<compile_context>
chip_gen: v5e
topology: v5e:2x2
jax: 0.10.0
libtpu: 0.0.40
codegen_flags: <defaults>
</compile_context>

<pallas_src>
import jax
import jax.numpy as jnp
from jax import lax
from jax.experimental import pallas as pl
from jax.experimental.pallas import tpu as pltpu


def fire_kernel(x_ref, wsq_ref, bsq_ref, wexp_ref, bexp_ref, out_ref,
                sp_ref, col_ref):
    # x_ref: (B, H, W, Cin) f32 tile; sp_ref: (B, H+2, W+2, Csq) bf16 scratch;
    # col_ref: (B, H, W, 9*Csq) bf16 im2col scratch.
    B, H, W, Cin = x_ref.shape
    Csq = wsq_ref.shape[-1]
    Cout = wexp_ref.shape[-1]
    M = B * H * W

    # ---- squeeze: 1x1 conv == (M, Cin) @ (Cin, Csq); bf16 MXU, f32 acc ----
    xm = x_ref[...].reshape(M, Cin).astype(jnp.bfloat16)
    s = jnp.dot(xm, wsq_ref[...], preferred_element_type=jnp.float32)
    s = jnp.maximum(s + bsq_ref[...], 0.0)          # bias + ReLU in f32 (VPU)

    # ---- zero only the 1-pixel halo (cheap, megacore-safe every step) ----
    zrow = jnp.zeros((B, 1, W + 2, Csq), jnp.bfloat16)
    zcol = jnp.zeros((B, H + 2, 1, Csq), jnp.bfloat16)
    sp_ref[:, 0:1, :, :] = zrow
    sp_ref[:, H + 1:H + 2, :, :] = zrow
    sp_ref[:, :, 0:1, :] = zcol
    sp_ref[:, :, W + 1:W + 2, :] = zcol

    # stash ReLU'd squeeze output (bf16) inside the zero halo
    sp_ref[:, 1:H + 1, 1:W + 1, :] = s.reshape(B, H, W, Csq).astype(jnp.bfloat16)

    # ---- im2col: 9 shifted windows laid out along the K (lane) axis ----
    for dy in range(3):
        for dx in range(3):
            tap = dy * 3 + dx
            col_ref[:, :, :, tap * Csq:(tap + 1) * Csq] = (
                sp_ref[:, dy:dy + H, dx:dx + W, :])

    # ---- fused expand1x1 + expand3x3: ONE MXU matmul, K = 9*Csq ----
    col = col_ref[...].reshape(M, 9 * Csq)
    e = jnp.dot(col, wexp_ref[...], preferred_element_type=jnp.float32)
    e = jnp.maximum(e + bexp_ref[...], 0.0)         # bias + ReLU in f32

    # single lane-dense store of the concatenated [e1 | e3] slab
    out_ref[...] = e.reshape(B, H, W, Cout).astype(out_ref.dtype)


def _pack_expand_weights(we1, we3):
    """Pack expand1x1 (center tap only) and expand3x3 into one (9*Csq, E1+E3)."""
    Csq, E1 = we1.shape
    E3 = we3.shape[-1]
    w3 = we3.reshape(9 * Csq, E3)                      # rows: (dy*3+dx)*Csq + c
    w1 = jnp.zeros((9 * Csq, E1), we1.dtype)
    w1 = w1.at[4 * Csq:5 * Csq, :].set(we1)            # tap 4 == (dy=1, dx=1)
    return jnp.concatenate([w1, w3], axis=-1)          # (9*Csq, E1+E3)


def fire_pallas(x_nchw, params, *, batch_tile=None):
    """x_nchw: (N, Cin, H, W) f32.  Returns (N, E1+E3, H, W) f32."""
    wsq, bsq, we1, be1, we3, be3 = params
    N, Cin, H, W = x_nchw.shape
    Csq = wsq.shape[-1]
    E1 = we1.shape[-1]
    E3 = we3.shape[-1]
    Cout = E1 + E3

    if batch_tile is None:
        batch_tile = N
    assert N % batch_tile == 0, (N, batch_tile)
    B = batch_tile

    # bf16 weights for the MXU; biases stay f32 (added on the f32 accumulator,
    # which also keeps the elementwise tail f32-native on v5e).
    wsq_bf = wsq.astype(jnp.bfloat16)
    wexp_bf = _pack_expand_weights(we1, we3).astype(jnp.bfloat16)
    bexp = jnp.concatenate([be1, be3], axis=-1)        # (1, Cout) f32

    # NCHW -> NHWC only to honor the PyTorch interface; keep the surrounding
    # model NHWC end-to-end to drop these two HBM passes.
    x_nhwc = jnp.transpose(x_nchw, (0, 2, 3, 1))

    full = lambda a: pl.BlockSpec(a.shape, lambda n: (0,) * a.ndim)

    out_nhwc = pl.pallas_call(
        fire_kernel,
        out_shape=jax.ShapeDtypeStruct((N, H, W, Cout), jnp.float32),
        grid_spec=pltpu.PrefetchScalarGridSpec(
            num_scalar_prefetch=0,
            grid=(N // B,),
            in_specs=[
                pl.BlockSpec((B, H, W, Cin), lambda n: (n, 0, 0, 0)),
                full(wsq_bf),   # weights resident across all grid steps
                full(bsq),
                full(wexp_bf),
                full(bexp),
            ],
            out_specs=pl.BlockSpec((B, H, W, Cout), lambda n: (n, 0, 0, 0)),
            scratch_shapes=[
                pltpu.VMEM((B, H + 2, W + 2, Csq), jnp.bfloat16),   # padded s
                pltpu.VMEM((B, H, W, 9 * Csq), jnp.bfloat16),       # im2col
            ]),
        compiler_params=pltpu.CompilerParams(
            dimension_semantics=("parallel",),
            # above v5e's 16 MiB scoped default, within v7x's 64 MiB budget;
            # size batch_tile so 2x(x block)+2x(out block)+scratch fits this.
            vmem_limit_bytes=32 * 1024 * 1024),
    )(x_nhwc, wsq_bf, bsq, wexp_bf, bexp)

    # NHWC -> NCHW to match the PyTorch module.
    return jnp.transpose(out_nhwc, (0, 3, 1, 2))


def make_params(key, inplanes, squeeze_planes, e1_planes, e3_planes):
    """Deterministic synthetic parameters (kernel-friendly layouts, f32)."""
    k = jax.random.split(key, 6)
    scale = 0.1
    wsq = scale * jax.random.normal(k[0], (inplanes, squeeze_planes), jnp.float32)
    bsq = scale * jax.random.normal(k[1], (1, squeeze_planes), jnp.float32)
    we1 = scale * jax.random.normal(k[2], (squeeze_planes, e1_planes), jnp.float32)
    be1 = scale * jax.random.normal(k[3], (1, e1_planes), jnp.float32)
    we3 = scale * jax.random.normal(k[4], (3, 3, squeeze_planes, e3_planes), jnp.float32)
    be3 = scale * jax.random.normal(k[5], (1, e3_planes), jnp.float32)
    return wsq, bsq, we1, be1, we3, be3


def fire_reference(x_nchw, params):
    """Pure-JAX reference with the same numerics (bf16 MXU inputs, f32 acc)."""
    wsq, bsq, we1, be1, we3, be3 = params

    def conv(x, w_oihw, b, pad):
        y = lax.conv_general_dilated(
            x.astype(jnp.bfloat16), w_oihw.astype(jnp.bfloat16),
            window_strides=(1, 1), padding=pad,
            dimension_numbers=("NCHW", "OIHW", "NCHW"),
            preferred_element_type=jnp.float32)
        return y + b.reshape(1, -1, 1, 1)

    wsq_o = jnp.transpose(wsq, (1, 0))[:, :, None, None]
    we1_o = jnp.transpose(we1, (1, 0))[:, :, None, None]
    we3_o = jnp.transpose(we3, (3, 2, 0, 1))

    s = jax.nn.relu(conv(x_nchw, wsq_o, bsq[0], "VALID"))
    e1 = jax.nn.relu(conv(s, we1_o, be1[0], "VALID"))
    e3 = jax.nn.relu(conv(s, we3_o, be3[0], ((1, 1), (1, 1))))
    return jnp.concatenate([e1, e3], axis=1)


if __name__ == "__main__":
    # Fire(inplanes=32, squeeze=16, expand1x1=64, expand3x3=64) at 16x16,
    # batch 4, two images per grid step (Cout = 128 -> lane-dense output).
    N, Cin, H, W = 4, 32, 16, 16
    Csq, E1, E3 = 16, 64, 64

    key = jax.random.PRNGKey(0)
    kx, kp = jax.random.split(key)
    x = jax.random.normal(kx, (N, Cin, H, W), jnp.float32)
    params = make_params(kp, Cin, Csq, E1, E3)

    out = fire_pallas(x, params, batch_tile=2)
    out = jax.block_until_ready(out)

    ref = fire_reference(x, params)
    assert out.shape == (N, E1 + E3, H, W), out.shape
    max_err = float(jnp.max(jnp.abs(out - ref)))
    assert jnp.allclose(out, ref, atol=1e-2, rtol=1e-2), max_err

    print("KERNEL_OK")
</pallas_src>

<mosaic_0001>
module attributes {stable_mosaic.version = 11 : i64} {
  func.func @fire_kernel(%arg0: i32, %arg1: memref<2x16x16x32xf32, #tpu.memory_space<vmem>>, %arg2: memref<32x16xbf16, #tpu.memory_space<vmem>>, %arg3: memref<1x16xf32, #tpu.memory_space<vmem>>, %arg4: memref<144x128xbf16, #tpu.memory_space<vmem>>, %arg5: memref<1x128xf32, #tpu.memory_space<vmem>>, %arg6: memref<2x16x16x128xf32, #tpu.memory_space<vmem>>, %arg7: memref<2x18x18x16xbf16, #tpu.memory_space<vmem>>, %arg8: memref<2x16x16x144xbf16, #tpu.memory_space<vmem>>) attributes {dimension_semantics = [#tpu.dimension_semantics<parallel>], iteration_bounds = array<i64: 2>, scalar_prefetch = 0 : i64, scratch_operands = 2 : i64, tpu.core_type = #tpu.core_type<tc>, window_params = [{transform_indices = @transform_0, window_bounds = array<i64: 2, 16, 16, 32>}, {pipeline_mode = #tpu.pipeline_mode<synchronous>, transform_indices = @transform_1, window_bounds = array<i64: 32, 16>}, {pipeline_mode = #tpu.pipeline_mode<synchronous>, transform_indices = @transform_2, window_bounds = array<i64: 1, 16>}, {pipeline_mode = #tpu.pipeline_mode<synchronous>, transform_indices = @transform_3, window_bounds = array<i64: 144, 128>}, {pipeline_mode = #tpu.pipeline_mode<synchronous>, transform_indices = @transform_4, window_bounds = array<i64: 1, 128>}, {transform_indices = @transform_5, window_bounds = array<i64: 2, 16, 16, 128>}]} {
    %c0 = arith.constant 0 : index
    %c0_0 = arith.constant 0 : index
    %c0_1 = arith.constant 0 : index
    %c0_2 = arith.constant 0 : index
    %0 = vector.load %arg1[%c0, %c0_0, %c0_1, %c0_2] : memref<2x16x16x32xf32, #tpu.memory_space<vmem>>, vector<2x16x16x32xf32>
    %1 = vector.shape_cast %0 : vector<2x16x16x32xf32> to vector<512x32xf32>
    %2 = arith.truncf %1 : vector<512x32xf32> to vector<512x32xbf16>
    %c0_3 = arith.constant 0 : index
    %c0_4 = arith.constant 0 : index
    %3 = vector.load %arg2[%c0_3, %c0_4] : memref<32x16xbf16, #tpu.memory_space<vmem>>, vector<32x16xbf16>
    %cst = arith.constant dense<0.000000e+00> : vector<512x16xf32>
    %4 = tpu.matmul %2, %3, %cst {dimension_numbers = #tpu.dot_dimension_numbers<[1], [0], [0], [1], [0, 0, 1, 1], [], []>} : vector<512x32xbf16>, vector<32x16xbf16>, vector<512x16xf32> -> vector<512x16xf32>
    %c0_5 = arith.constant 0 : index
    %c0_6 = arith.constant 0 : index
    %5 = vector.load %arg3[%c0_5, %c0_6] : memref<1x16xf32, #tpu.memory_space<vmem>>, vector<1x16xf32>
    %6 = vector.broadcast %5 : vector<1x16xf32> to vector<512x16xf32>
    %7 = arith.addf %4, %6 : vector<512x16xf32>
    %cst_7 = arith.constant 0.000000e+00 : f32
    %8 = vector.broadcast %cst_7 : f32 to vector<512x16xf32>
    %9 = arith.maximumf %7, %8 : vector<512x16xf32>
    %cst_8 = arith.constant 0.000000e+00 : bf16
    %10 = vector.broadcast %cst_8 : bf16 to vector<2x1x18x16xbf16>
    %cst_9 = arith.constant 0.000000e+00 : bf16
    %11 = vector.broadcast %cst_9 : bf16 to vector<2x18x1x16xbf16>
    %c0_10 = arith.constant 0 : index
    %c0_11 = arith.constant 0 : index
    %c0_12 = arith.constant 0 : index
    %c0_13 = arith.constant 0 : index
    %12 = vector.load %arg7[%c0_10, %c0_11, %c0_12, %c0_13] : memref<2x18x18x16xbf16, #tpu.memory_space<vmem>>, vector<2x1x18x16xbf16>
    tpu.vector_store %arg7[%c0_10, %c0_11, %c0_12, %c0_13], %10 {strides = array<i32>} : memref<2x18x18x16xbf16, #tpu.memory_space<vmem>>, vector<2x1x18x16xbf16>,
    %c0_14 = arith.constant 0 : index
    %c17 = arith.constant 17 : index
    %c0_15 = arith.constant 0 : index
    %c0_16 = arith.constant 0 : index
    %13 = vector.load %arg7[%c0_14, %c17, %c0_15, %c0_16] : memref<2x18x18x16xbf16, #tpu.memory_space<vmem>>, vector<2x1x18x16xbf16>
    tpu.vector_store %arg7[%c0_14, %c17, %c0_15, %c0_16], %10 {strides = array<i32>} : memref<2x18x18x16xbf16, #tpu.memory_space<vmem>>, vector<2x1x18x16xbf16>,
    %c0_17 = arith.constant 0 : index
    %c0_18 = arith.constant 0 : index
    %c0_19 = arith.constant 0 : index
    %c0_20 = arith.constant 0 : index
    %14 = vector.load %arg7[%c0_17, %c0_18, %c0_19, %c0_20] : memref<2x18x18x16xbf16, #tpu.memory_space<vmem>>, vector<2x18x1x16xbf16>
    tpu.vector_store %arg7[%c0_17, %c0_18, %c0_19, %c0_20], %11 {strides = array<i32>} : memref<2x18x18x16xbf16, #tpu.memory_space<vmem>>, vector<2x18x1x16xbf16>,
    %c0_21 = arith.constant 0 : index
    %c0_22 = arith.constant 0 : index
    %c17_23 = arith.constant 17 : index
    %c0_24 = arith.constant 0 : index
    %15 = vector.load %arg7[%c0_21, %c0_22, %c17_23, %c0_24] : memref<2x18x18x16xbf16, #tpu.memory_space<vmem>>, vector<2x18x1x16xbf16>
    tpu.vector_store %arg7[%c0_21, %c0_22, %c17_23, %c0_24], %11 {strides = array<i32>} : memref<2x18x18x16xbf16, #tpu.memory_space<vmem>>, vector<2x18x1x16xbf16>,
    %16 = vector.shape_cast %9 : vector<512x16xf32> to vector<2x16x16x16xf32>
    %17 = arith.truncf %16 : vector<2x16x16x16xf32> to vector<2x16x16x16xbf16>
    %c0_25 = arith.constant 0 : index
    %c1 = arith.constant 1 : index
    %c1_26 = arith.constant 1 : index
    %c0_27 = arith.constant 0 : index
    %18 = vector.load %arg7[%c0_25, %c1, %c1_26, %c0_27] : memref<2x18x18x16xbf16, #tpu.memory_space<vmem>>, vector<2x16x16x16xbf16>
    tpu.vector_store %arg7[%c0_25, %c1, %c1_26, %c0_27], %17 {strides = array<i32>} : memref<2x18x18x16xbf16, #tpu.memory_space<vmem>>, vector<2x16x16x16xbf16>,
    %c0_28 = arith.constant 0 : index
    %c0_29 = arith.constant 0 : index
    %c0_30 = arith.constant 0 : index
    %c0_31 = arith.constant 0 : index
    %19 = vector.load %arg7[%c0_28, %c0_29, %c0_30, %c0_31] : memref<2x18x18x16xbf16, #tpu.memory_space<vmem>>, vector<2x16x16x16xbf16>
    %c0_32 = arith.constant 0 : index
    %c0_33 = arith.constant 0 : index
    %c0_34 = arith.constant 0 : index
    %c0_35 = arith.constant 0 : index
    %20 = vector.load %arg8[%c0_32, %c0_33, %c0_34, %c0_35] : memref<2x16x16x144xbf16, #tpu.memory_space<vmem>>, vector<2x16x16x16xbf16>
    tpu.vector_store %arg8[%c0_32, %c0_33, %c0_34, %c0_35], %19 {strides = array<i32>} : memref<2x16x16x144xbf16, #tpu.memory_space<vmem>>, vector<2x16x16x16xbf16>,
    %c0_36 = arith.constant 0 : index
    %c0_37 = arith.constant 0 : index
    %c1_38 = arith.constant 1 : index
    %c0_39 = arith.constant 0 : index
    %21 = vector.load %arg7[%c0_36, %c0_37, %c1_38, %c0_39] : memref<2x18x18x16xbf16, #tpu.memory_space<vmem>>, vector<2x16x16x16xbf16>
    %c0_40 = arith.constant 0 : index
    %c0_41 = arith.constant 0 : index
    %c0_42 = arith.constant 0 : index
    %c16 = arith.constant 16 : index
    %22 = vector.load %arg8[%c0_40, %c0_41, %c0_42, %c16] : memref<2x16x16x144xbf16, #tpu.memory_space<vmem>>, vector<2x16x16x16xbf16>
    tpu.vector_store %arg8[%c0_40, %c0_41, %c0_42, %c16], %21 {strides = array<i32>} : memref<2x16x16x144xbf16, #tpu.memory_space<vmem>>, vector<2x16x16x16xbf16>,
    %c0_43 = arith.constant 0 : index
    %c0_44 = arith.constant 0 : index
    %c2 = arith.constant 2 : index
    %c0_45 = arith.constant 0 : index
    %23 = vector.load %arg7[%c0_43, %c0_44, %c2, %c0_45] : memref<2x18x18x16xbf16, #tpu.memory_space<vmem>>, vector<2x16x16x16xbf16>
    %c0_46 = arith.constant 0 : index
    %c0_47 = arith.constant 0 : index
    %c0_48 = arith.constant 0 : index
    %c32 = arith.constant 32 : index
    %24 = vector.load %arg8[%c0_46, %c0_47, %c0_48, %c32] : memref<2x16x16x144xbf16, #tpu.memory_space<vmem>>, vector<2x16x16x16xbf16>
    tpu.vector_store %arg8[%c0_46, %c0_47, %c0_48, %c32], %23 {strides = array<i32>} : memref<2x16x16x144xbf16, #tpu.memory_space<vmem>>, vector<2x16x16x16xbf16>,
    %c0_49 = arith.constant 0 : index
    %c1_50 = arith.constant 1 : index
    %c0_51 = arith.constant 0 : index
    %c0_52 = arith.constant 0 : index
    %25 = vector.load %arg7[%c0_49, %c1_50, %c0_51, %c0_52] : memref<2x18x18x16xbf16, #tpu.memory_space<vmem>>, vector<2x16x16x16xbf16>
    %c0_53 = arith.constant 0 : index
    %c0_54 = arith.constant 0 : index
    %c0_55 = arith.constant 0 : index
    %c48 = arith.constant 48 : index
    %26 = vector.load %arg8[%c0_53, %c0_54, %c0_55, %c48] : memref<2x16x16x144xbf16, #tpu.memory_space<vmem>>, vector<2x16x16x16xbf16>
    tpu.vector_store %arg8[%c0_53, %c0_54, %c0_55, %c48], %25 {strides = array<i32>} : memref<2x16x16x144xbf16, #tpu.memory_space<vmem>>, vector<2x16x16x16xbf16>,
    %c0_56 = arith.constant 0 : index
    %c1_57 = arith.constant 1 : index
    %c1_58 = arith.constant 1 : index
    %c0_59 = arith.constant 0 : index
    %27 = vector.load %arg7[%c0_56, %c1_57, %c1_58, %c0_59] : memref<2x18x18x16xbf16, #tpu.memory_space<vmem>>, vector<2x16x16x16xbf16>
    %c0_60 = arith.constant 0 : index
    %c0_61 = arith.constant 0 : index
    %c0_62 = arith.constant 0 : index
    %c64 = arith.constant 64 : index
    %28 = vector.load %arg8[%c0_60, %c0_61, %c0_62, %c64] : memref<2x16x16x144xbf16, #tpu.memory_space<vmem>>, vector<2x16x16x16xbf16>
    tpu.vector_store %arg8[%c0_60, %c0_61, %c0_62, %c64], %27 {strides = array<i32>} : memref<2x16x16x144xbf16, #tpu.memory_space<vmem>>, vector<2x16x16x16xbf16>,
    %c0_63 = arith.constant 0 : index
    %c1_64 = arith.constant 1 : index
    %c2_65 = arith.constant 2 : index
    %c0_66 = arith.constant 0 : index
    %29 = vector.load %arg7[%c0_63, %c1_64, %c2_65, %c0_66] : memref<2x18x18x16xbf16, #tpu.memory_space<vmem>>, vector<2x16x16x16xbf16>
    %c0_67 = arith.constant 0 : index
    %c0_68 = arith.constant 0 : index
    %c0_69 = arith.constant 0 : index
    %c80 = arith.constant 80 : index
    %30 = vector.load %arg8[%c0_67, %c0_68, %c0_69, %c80] : memref<2x16x16x144xbf16, #tpu.memory_space<vmem>>, vector<2x16x16x16xbf16>
    tpu.vector_store %arg8[%c0_67, %c0_68, %c0_69, %c80], %29 {strides = array<i32>} : memref<2x16x16x144xbf16, #tpu.memory_space<vmem>>, vector<2x16x16x16xbf16>,
    %c0_70 = arith.constant 0 : index
    %c2_71 = arith.constant 2 : index
    %c0_72 = arith.constant 0 : index
    %c0_73 = arith.constant 0 : index
    %31 = vector.load %arg7[%c0_70, %c2_71, %c0_72, %c0_73] : memref<2x18x18x16xbf16, #tpu.memory_space<vmem>>, vector<2x16x16x16xbf16>
    %c0_74 = arith.constant 0 : index
    %c0_75 = arith.constant 0 : index
    %c0_76 = arith.constant 0 : index
    %c96 = arith.constant 96 : index
    %32 = vector.load %arg8[%c0_74, %c0_75, %c0_76, %c96] : memref<2x16x16x144xbf16, #tpu.memory_space<vmem>>, vector<2x16x16x16xbf16>
    tpu.vector_store %arg8[%c0_74, %c0_75, %c0_76, %c96], %31 {strides = array<i32>} : memref<2x16x16x144xbf16, #tpu.memory_space<vmem>>, vector<2x16x16x16xbf16>,
    %c0_77 = arith.constant 0 : index
    %c2_78 = arith.constant 2 : index
    %c1_79 = arith.constant 1 : index
    %c0_80 = arith.constant 0 : index
    %33 = vector.load %arg7[%c0_77, %c2_78, %c1_79, %c0_80] : memref<2x18x18x16xbf16, #tpu.memory_space<vmem>>, vector<2x16x16x16xbf16>
    %c0_81 = arith.constant 0 : index
    %c0_82 = arith.constant 0 : index
    %c0_83 = arith.constant 0 : index
    %c112 = arith.constant 112 : index
    %34 = vector.load %arg8[%c0_81, %c0_82, %c0_83, %c112] : memref<2x16x16x144xbf16, #tpu.memory_space<vmem>>, vector<2x16x16x16xbf16>
    tpu.vector_store %arg8[%c0_81, %c0_82, %c0_83, %c112], %33 {strides = array<i32>} : memref<2x16x16x144xbf16, #tpu.memory_space<vmem>>, vector<2x16x16x16xbf16>,
    %c0_84 = arith.constant 0 : index
    %c2_85 = arith.constant 2 : index
    %c2_86 = arith.constant 2 : index
    %c0_87 = arith.constant 0 : index
    %35 = vector.load %arg7[%c0_84, %c2_85, %c2_86, %c0_87] : memref<2x18x18x16xbf16, #tpu.memory_space<vmem>>, vector<2x16x16x16xbf16>
    %c0_88 = arith.constant 0 : index
    %c0_89 = arith.constant 0 : index
    %c0_90 = arith.constant 0 : index
    %c128 = arith.constant 128 : index
    %36 = vector.load %arg8[%c0_88, %c0_89, %c0_90, %c128] : memref<2x16x16x144xbf16, #tpu.memory_space<vmem>>, vector<2x16x16x16xbf16>
    tpu.vector_store %arg8[%c0_88, %c0_89, %c0_90, %c128], %35 {strides = array<i32>} : memref<2x16x16x144xbf16, #tpu.memory_space<vmem>>, vector<2x16x16x16xbf16>,
    %c0_91 = arith.constant 0 : index
    %c0_92 = arith.constant 0 : index
    %c0_93 = arith.constant 0 : index
    %c0_94 = arith.constant 0 : index
    %37 = vector.load %arg8[%c0_91, %c0_92, %c0_93, %c0_94] : memref<2x16x16x144xbf16, #tpu.memory_space<vmem>>, vector<2x16x16x144xbf16>
    %38 = vector.shape_cast %37 : vector<2x16x16x144xbf16> to vector<512x144xbf16>
    %c0_95 = arith.constant 0 : index
    %c0_96 = arith.constant 0 : index
    %39 = vector.load %arg4[%c0_95, %c0_96] : memref<144x128xbf16, #tpu.memory_space<vmem>>, vector<144x128xbf16>
    %cst_97 = arith.constant dense<0.000000e+00> : vector<512x128xf32>
    %40 = tpu.matmul %38, %39, %cst_97 {dimension_numbers = #tpu.dot_dimension_numbers<[1], [0], [0], [1], [0, 0, 1, 1], [], []>} : vector<512x144xbf16>, vector<144x128xbf16>, vector<512x128xf32> -> vector<512x128xf32>
    %c0_98 = arith.constant 0 : index
    %c0_99 = arith.constant 0 : index
    %41 = vector.load %arg5[%c0_98, %c0_99] : memref<1x128xf32, #tpu.memory_space<vmem>>, vector<1x128xf32>
    %42 = vector.broadcast %41 : vector<1x128xf32> to vector<512x128xf32>
    %43 = arith.addf %40, %42 : vector<512x128xf32>
    %cst_100 = arith.constant 0.000000e+00 : f32
    %44 = vector.broadcast %cst_100 : f32 to vector<512x128xf32>
    %45 = arith.maximumf %43, %44 : vector<512x128xf32>
    %46 = vector.shape_cast %45 : vector<512x128xf32> to vector<2x16x16x128xf32>
    %c0_101 = arith.constant 0 : index
    %c0_102 = arith.constant 0 : index
    %c0_103 = arith.constant 0 : index
    %c0_104 = arith.constant 0 : index
    %47 = vector.load %arg6[%c0_101, %c0_102, %c0_103, %c0_104] : memref<2x16x16x128xf32, #tpu.memory_space<vmem>>, vector<2x16x16x128xf32>
    tpu.vector_store %arg6[%c0_101, %c0_102, %c0_103, %c0_104], %46 {strides = array<i32>} : memref<2x16x16x128xf32, #tpu.memory_space<vmem>>, vector<2x16x16x128xf32>,
    return
  }
  func.func @transform_0(%arg0: i32) -> (i32, i32, i32, i32) {
    %c0_i32 = arith.constant 0 : i32
    %c0_i32_0 = arith.constant 0 : i32
    %c0_i32_1 = arith.constant 0 : i32
    %c0_i32_2 = arith.constant 0 : i32
    return %arg0, %c0_i32, %c0_i32_0, %c0_i32_1 : i32, i32, i32, i32
  }
  func.func @transform_1(%arg0: i32) -> (i32, i32) {
    %c0_i32 = arith.constant 0 : i32
    %c0_i32_0 = arith.constant 0 : i32
    %c0_i32_1 = arith.constant 0 : i32
    return %c0_i32, %c0_i32_0 : i32, i32
  }
  func.func @transform_2(%arg0: i32) -> (i32, i32) {
    %c0_i32 = arith.constant 0 : i32
    %c0_i32_0 = arith.constant 0 : i32
    %c0_i32_1 = arith.constant 0 : i32
    return %c0_i32, %c0_i32_0 : i32, i32
  }
  func.func @transform_3(%arg0: i32) -> (i32, i32) {
    %c0_i32 = arith.constant 0 : i32
    %c0_i32_0 = arith.constant 0 : i32
    %c0_i32_1 = arith.constant 0 : i32
    return %c0_i32, %c0_i32_0 : i32, i32
  }
  func.func @transform_4(%arg0: i32) -> (i32, i32) {
    %c0_i32 = arith.constant 0 : i32
    %c0_i32_0 = arith.constant 0 : i32
    %c0_i32_1 = arith.constant 0 : i32
    return %c0_i32, %c0_i32_0 : i32, i32
  }
  func.func @transform_5(%arg0: i32) -> (i32, i32, i32, i32) {
    %c0_i32 = arith.constant 0 : i32
    %c0_i32_0 = arith.constant 0 : i32
    %c0_i32_1 = arith.constant 0 : i32
    %c0_i32_2 = arith.constant 0 : i32
    return %arg0, %c0_i32, %c0_i32_0, %c0_i32_1 : i32, i32, i32, i32
  }
}

</mosaic_0001>

<bundles_post_ra>
// kernel: tpu_custom_call.1
= control target key start
LH: loop header
LB: loop body
LE: loop exit
PB: predicated region body
PF: predicated region fallthrough
CT: control target
= control target key end

     0   :  { %10 = vsyncpa [#allocation5], 0  ;;  %s13883_s0 = inlined_call_operand.hbm [shape: f32[4,16,16,32], index: 0, kind: input, shape index: {}]   ;;  %s13884_s1 = inlined_call_operand.vmem [shape: bf16[32,16], index: 1, kind: input, shape index: {}]   ;;  %s13885_s2 = inlined_call_operand.vmem [shape: f32[1,16], index: 2, kind: input, shape index: {}]   ;;  %s13886_s3 = inlined_call_operand.hbm [shape: bf16[144,128], index: 3, kind: input, shape index: {}]   ;;  %s13887_s4 = inlined_call_operand.vmem [shape: f32[1,128], index: 4, kind: input, shape index: {}]   ;;  %s13888_s5 = inlined_call_operand.hbm [shape: f32[4,16,16,128], index: 5, kind: output, shape index: {}]  }
   0x1   :  { %12 = vsyncpa [#allocation5 + $0x1], 0 }
   0x2   :  { %13 = vsyncpa [#allocation8], 0 }
   0x3   :  { %14 = vsyncpa [#allocation6], 0 }
   0x4   :  { %16 = vsyncpa [#allocation6 + $0x1], 0  ;;  %s9955_s18 = smov 0   ;;  %s9957_s19 = smov 0  }
   0x5   :  { %s9959_s20 = smov 0   ;;  %s9961_s21 = smov 0  }
   0x6 LB: > { %s9976_s22 = sadd.s32 4294967295, %s9908_s21   ;;  %s9130_s23 = sadd.s32 4294967294, %s9908_s21   ;;  %s9908_s21 = sphi %s9961_s21, %s13916_s21   ;;  %s9904_s20 = sphi %s9959_s20, %s13915_s20   ;;  %s9900_s19 = sphi %s9957_s19, %s13914_s19   ;;  %s9896_s18 = sphi %s9955_s18, %s13913_s18  }
   0x7   : > { %p42_p0 = scmp.ne.s32.totalorder %s9900_s19, %s9896_s18  ;;  %p43_p1 = scmp.eq.s32.totalorder %s9976_s22, 0 }
   0x8   : > { %p150_p2 = scmp.eq.s32.totalorder %s9976_s22, 1  ;;  %p156_p3 = scmp.eq.s32.totalorder %s9130_s23, 1 }
   0x9   : > { %p9985_p4 = por %p43_p1, %p42_p0  ;;  %p9131_p5 = scmp.ge.s32.totalorder %s9908_s21, 1 }
   0xa   : > { %p9990_p6 = por %p156_p3, %p42_p0  ;;  %p163_p7 = scmp.lt.s32.totalorder %s9908_s21, 3 }
   0xb   : > { %s180_s28 = sshll.u32 %s13886_s3, 4  ;;  %s9910_s30 = smov [#allocation7]   ;;  %s181_s28 = int_to_ptr.hbm [resolvable:$true] %s180_s28 }
   0xc   : > { %p9998_p8 = pnand %p9131_p5, %p163_p7  ;;  %s182_s6 = sshll.u32 %s9910_s30, 4  ;;  %s183_s6 = int_to_ptr.vmem [resolvable:$true] %s182_s6 }
   0xd   : > { %s10008_s7 = sadd.s32 1, %s9908_s21   ;;  %s9911_s8 = smov 64  }
   0xe   : > { %p9706_p9 = pneg %p9998_p8  ;;  %s9912_s9 = smov 4  }
   0xf   : > { %s26_s10 = ssub.s32 %s9908_s21, %s10008_s7  ;;  %s29_s11 = sadd.s32 1, %s9904_s20 }
  0x10   : > { %p9707_p10 = pnand %p9706_p9, %p43_p1  ;;  %p27_p12 = scmp.eq.s32.totalorder %s26_s10, 0 }
  0x11   : > { %p36_p13 = scmp.ne.s32.totalorder %s9904_s20, %s9900_s19  ;;  %p37_p0 = scmp.eq.s32.totalorder %s9908_s21, 0 }
  0x12   : > { %9709 = dma.hbm_to_vmem [thread:$0]  (!%p9707_p10), %s181_s28, 1152, %s183_s6, [#allocation8], %s9911_s8, %s9911_s8, %s9912_s9  }
  0x13   : > { %p9719_p3 = scmp.lt.s32.totalorder %s9908_s21, 2  ;;  %p38_p5 = por %p37_p0, %p36_p13 }
  0x14   : > { %s10018_s12 = scalar_select %p27_p12, %s9904_s20, %s29_s11  }
  0x15   : > { %p10022_p7 = por %p150_p2, %p36_p13  ;;  %s199_s14 = sand.u32 1, %s9904_s20  }
  0x16   : > { %s9609_s15 = sshll.u32 %s9908_s21, 9  ;;  %s9134_s16 = sshll.u32 %s199_s14, 9 }
  0x17   : > { %s209_s26 = scalar_lea.hbm %s13883_s0, %s9609_s15  ;;  %s203_s28 = scalar_lea.vmem [#allocation4], %s9134_s16 }
  0x18   : > { %s210_s27 = sshll.u32 %s209_s26, 4  ;;  %s212_s30 = sshll.u32 %s203_s28, 4  ;;  %s211_s27 = int_to_ptr.hbm [resolvable:$true] %s210_s27  ;;  %s213_s30 = int_to_ptr.vmem [resolvable:$true] %s212_s30 }
  0x19   : > { %p10033_p9 = pnand %p9719_p3, %p38_p5  ;;  %s200_s8 = scalar_lea.sflag [#allocation5], %s199_s14 }
  0x1a   : > { %s9808_s9 = sshra.s32 %s211_s27, 4  ;;  %s9815_s16 = scalar_lea.hbm %s13883_s0, 1024  ;;  %s9809_s9 = int_to_ptr.hbm [resolvable:$true] %s9808_s9 }
  0x1b   : > { %s9810_s10 = scalar_lea.hbm %s9809_s9, 512  ;;  %p9812_p10 = pneg %p10033_p9 }
  0x1c   : > { %p9811_p2 = scmp.ne.s32.totalorder %s9809_s9, %s9810_s10  ;;  %p9816_p0 = scmp.lt.s32.totalorder %s9809_s9, %s13883_s0 }
  0x1d   : > { %p9817_p3 = scmp.lt.s32.totalorder %s9815_s16, %s9810_s10 }
  0x1e   : > { %p9813_p12 = pnand %p9812_p10, %p9811_p2 }
  0x1f   : > { %p9818_p5 = por %p9817_p3, %p9816_p0 }
  0x20   : > { %p9814_p13 = pneg %p9813_p12 }
  0x22   : > { %p9819_p11 = pnand %p9818_p5, %p9814_p13 }
  0x24   : > { %9822 = shalt.err (!%p9819_p11)
}
  0x25   : > { %s9913_s14 = smov 128   ;;  %s9914_s26 = smov 8  }
  0x26   : > { %9713 = dma.hbm_to_vmem [thread:$0]  (!%p10033_p9), %s211_s27, 8192, %s213_s30, %s200_s8, %s9913_s14, %s9913_s14, %s9914_s26  }
  0x27   : > { %224 = sbr.rel (%p9998_p8) target bundleno = 1696 (0x6a0), region = 40 }
  0x2c   : > { %s10050_s28 = sand.u32 1, %s9900_s19  }
  0x2d   : > { %s9139_s9 = sshll.u32 %s10050_s28, 9  ;;  %s227_s10 = scalar_lea.sflag [#allocation5], %s10050_s28 }
  0x2e   : > { %s10056_s11 = scalar_lea.vmem [#allocation4], %s9139_s9 }
  0x2f   : > { %9883 = dma.done.wait (%p9985_p4), %s227_s10, 8192  }
  0x30   : > { %9885 = vsyncadd (%p9985_p4), %s227_s10, 4294959104 }
  0x31   : > { %9887 = dma.done.wait (%p43_p1), [#allocation8], 1152  }
  0x32   : > { %9889 = vsyncadd (%p43_p1), [#allocation8], 4294966144  ;;  %v9611_v0 = vld [vmem:[%s13884_s1 + $0x8] sm:$0xff]  ;;  %v9610_v1 = vld [vmem:[%s13884_s1] sm:$0xff]  ;;  %vm382_vm0 = vcmask 261120   ;;  %vm715_vm1 = vcmask 122880  }
  0x33   : > { %v266_v2 = vld [vmem:[%s10056_s11] sm:$0xff]  ;;  %485 = vmatpush.bf16.msra.mxu0 %v9611_v0  ;;  %9687 = vmatpush.bf16.msra.mxu3 %v9611_v0  ;;  %v267_v3 = vld [vmem:[%s10056_s11 + $0x8] sm:$0xff]  ;;  %v316_v4 = vld [vmem:[%s10056_s11 + $0x190] sm:$0xff]  ;;  %v9915_v22 = vmov 0   ;;  %vm712_vm2 = vcmask 125952   ;;  %s9916_s24 = smov 16  }
  0x34   : > { %v317_v5 = vld [vmem:[%s10056_s11 + $0x198] sm:$0xff]  ;;  %v330_v6 = vpack.c.bf16 %v267_v3, %v266_v2  ;;  %v268_v8 = vld [vmem:[%s10056_s11 + $0x10] sm:$0xff]  ;;  %v318_v10 = vld [vmem:[%s10056_s11 + $0x1a0] sm:$0xff]  ;;  %716 = vst.msk [vmem:[#allocation2 + $0x8] sm:$0x1] %vm715_vm1, %v9915_v22  ;;  %vm3325_vm10 = vcmask 1042432  }
  0x35   : > { %v355_v7 = vpack.c.bf16 %v317_v5, %v316_v4  ;;  %v269_v9 = vld [vmem:[%s10056_s11 + $0x18] sm:$0xff]  ;;  %v319_v11 = vld [vmem:[%s10056_s11 + $0x1a8] sm:$0xff]  ;;  %v270_v14 = vld [vmem:[%s10056_s11 + $0x20] sm:$0xff]  ;;  %723 = vst.msk [vmem:[#allocation2 + $0xd4] sm:$0x1] %vm715_vm1, %v9915_v22  ;;  %vm3326_vm11 = vcmask 1046532  }
  0x36   : > { %v331_v12 = vpack.c.bf16 %v269_v9, %v268_v8  ;;  %v356_v13 = vpack.c.bf16 %v319_v11, %v318_v10  ;;  %v271_v15 = vld [vmem:[%s10056_s11 + $0x28] sm:$0xff]  ;;  %v320_v17 = vld [vmem:[%s10056_s11 + $0x1b0] sm:$0xff]  ;;  %v321_v18 = vld [vmem:[%s10056_s11 + $0x1b8] sm:$0xff]  ;;  %719 = vst.msk [vmem:[#allocation2 + $0xe0] sm:$0x1] %vm715_vm1, %v9915_v22  ;;  %s9917_s8 = smov 32  }
  0x37   : > { %486 = vmatpush.bf16.msra.mxu0 %v9610_v1  ;;  %9688 = vmatpush.bf16.msra.mxu3 %v9610_v1  ;;  %v332_v16 = vpack.c.bf16 %v271_v15, %v270_v14  ;;  %v357_v19 = vpack.c.bf16 %v321_v18, %v320_v17  ;;  %v272_v20 = vld [vmem:[%s10056_s11 + $0x30] sm:$0xff]  ;;  %v273_v21 = vld [vmem:[%s10056_s11 + $0x38] sm:$0xff]  ;;  %726 = vst.msk [vmem:[#allocation2 + $0x1ac] sm:$0x1] %vm715_vm1, %v9915_v22  ;;  %vm838_vm3 = vsmask.f32 7938  ;;  %vm10152_vm12 = vmor %vm3325_vm10, %vm3326_vm11 }
  0x38   : > { %v333_v23 = vpack.c.bf16 %v273_v21, %v272_v20  ;;  %714 = vst.msk [vmem:[#allocation2 + $0x4] sm:$0xf] %vm712_vm2, %v9915_v22  ;;  %vm10101_vm4 = vmand %vm715_vm1, %vm838_vm3  ;;  %v274_v30 = vld [vmem:[%s10056_s11 + $0x40] sm:$0xff]  ;;  %v275_v31 = vld [vmem:[%s10056_s11 + $0x48] sm:$0xff]  ;;  %vm2105_vm5 = vsmask.f32 3328 }
  0x39   : > { %713 = vst.msk [vmem:[#allocation2] sm:$0xf] %vm712_vm2, %v9915_v22  ;;  %v334_v37 = vpack.c.bf16 %v275_v31, %v274_v30  ;;  %vm2106_vm6 = vsmask.f32 7440  ;;  %vm728_vm8 = vsmask.f32 256  ;;  %vm10215_vm13 = vmand %vm712_vm2, %vm838_vm3 }
  0x3a   : > { %9150 = vmatmul.msk.bf16.vlgmr.msra.gmra.mxu0 %vm382_vm0, %v330_v6  ;;  %9175 = vmatmul.msk.bf16.vlgmr.msra.gmra.mxu3 %vm382_vm0, %v355_v7  ;;  %717 = vst.msk [vmem:[#allocation2 + $0xd8] sm:$0xf] %vm712_vm2, %v9915_v22  ;;  %vm10120_vm7 = vmor %vm2105_vm5, %vm2106_vm6  ;;  %v322_v49 = vld [vmem:[%s10056_s11 + $0x1c0] sm:$0xff]  ;;  %v323_v50 = vld [vmem:[%s10056_s11 + $0x1c8] sm:$0xff]  ;;  %vm1012_vm14 = vsmask.f32 4368 }
  0x3b   : > { %v840_v25 = vld [vmem:[#allocation2 + $0x8] sm:$0x1]  ;;  %718 = vst.msk [vmem:[#allocation2 + $0xdc] sm:$0xf] %vm712_vm2, %v9915_v22  ;;  %v358_v53 = vpack.c.bf16 %v323_v50, %v322_v49  ;;  %vm10136_vm9 = vmand %vm715_vm1, %vm728_vm8  ;;  %v276_v63 = vld [vmem:[%s10056_s11 + $0x50] sm:$0xff]  ;;  %s9918_s17 = smov 48  }
  0x3c   : > { %v841_v26 = vsel %vm10101_vm4, 0, %v840_v25  ;;  %721 = vst.msk [vmem:[#allocation2 + $0xcc] sm:$0xf] %vm712_vm2, %v9915_v22  ;;  %v891_v44 = vld [vmem:[#allocation2 + $0xd4] sm:$0x1]  ;;  %v277_v0 = vld [vmem:[%s10056_s11 + $0x58] sm:$0xff]  ;;  %vm10230_vm15 = vmor %vm728_vm8, %vm1012_vm14 }
  0x3d   : > { %842 = vst [vmem:[#allocation2 + $0x8] sm:$0x1] %v841_v26  ;;  %v894_v34 = vld [vmem:[#allocation2 + $0xe0] sm:$0x1]  ;;  %v892_v48 = vsel %vm10101_vm4, 0, %v891_v44  ;;  %v335_v1 = vpack.c.bf16 %v277_v0, %v276_v63  ;;  %v278_v21 = vld [vmem:[%s10056_s11 + $0x60] sm:$0xff] }
  0x3e   : > { %722 = vst.msk [vmem:[#allocation2 + $0xd0] sm:$0xf] %vm712_vm2, %v9915_v22  ;;  %v895_v36 = vsel %vm10101_vm4, 0, %v894_v34  ;;  %v281_v44 = vld [vmem:[%s10056_s11 + $0x78] sm:$0xff]  ;;  %v846_v0 = vld [vmem:[#allocation2 + $0x20] sm:$0x1] }
  0x3f   : > { %v2010_v27 = vld [vmem:[#allocation2 + $0x4] sm:$0xf]  ;;  %724 = vst.msk [vmem:[#allocation2 + $0x1a4] sm:$0xf] %vm712_vm2, %v9915_v22  ;;  %v325_v49 = vld [vmem:[%s10056_s11 + $0x1d8] sm:$0xff]  ;;  %s9919_s23 = smov 64  }
  0x40   : > { %v2118_v28 = vshll.u32 %v2010_v27, 16  ;;  %v2122_v29 = vshrl.u32 %v2010_v27, 16  ;;  %725 = vst.msk [vmem:[#allocation2 + $0x1a8] sm:$0xf] %vm712_vm2, %v9915_v22  ;;  %v730_v60 = vld [vmem:[#allocation2] sm:$0x1] }
  0x41   : > { %896 = vst [vmem:[#allocation2 + $0xe0] sm:$0x1] %v895_v36  ;;  %v731_v61 = vsel %vm10136_vm9, 0, %v730_v60  ;;  %v3181_v2 = vld [vmem:[#allocation2 + $0xd8] sm:$0xe]  ;;  %vm8467_vm1 = vcmask 130048  }
  0x42   : > { %v10115_v32 = vrot.slane %v2118_v28, 5  ;;  %v2124_v33 = vrot.slane %v2122_v29, 4  ;;  %v2058_v43 = vld [vmem:[#allocation2 + $0xdc] sm:$0xf]  ;;  %893 = vst [vmem:[#allocation2 + $0xd4] sm:$0x1] %v892_v48 }
  0x43   : > { %v2502_v46 = vshll.u32 %v2058_v43, 16  ;;  %v2506_v47 = vshrl.u32 %v2058_v43, 16  ;;  %732 = vst [vmem:[#allocation2] sm:$0x1] %v731_v61  ;;  %v10149_v3 = vld [vmem:[#allocation2 + $0xdc] sm:$0xf] }
  0x44   : > { %v2011_v35 = vld [vmem:[#allocation2 + $0x8] sm:$0x1]  ;;  %v2125_v38 = vor.u32 %v2124_v33, %v10115_v32  ;;  %v9198_v4 = vrot.slane %v3181_v2, 9  ;;  %v3442_v5 = vrot.slane %v10149_v3, 5  ;;  %v3133_v11 = vld [vmem:[#allocation2] sm:$0xe] }
  0x45   : > { %v2128_v39 = vshll.u32 %v2011_v35, 16  ;;  %v10132_v51 = vrot.slane %v2502_v46, 5  ;;  %v2508_v52 = vrot.slane %v2506_v47, 4  ;;  %v279_v22 = vld [vmem:[%s10056_s11 + $0x68] sm:$0xff]  ;;  %v3135_v27 = vld [vmem:[#allocation2 + $0x8] sm:$0x1] }
  0x46   : > { %v2126_v40 = vrot.slane %v2125_v38, 4  ;;  %v3443_v8 = vsel %vm10152_vm12, %v9198_v4, %v3442_v5  ;;  %v336_v26 = vpack.c.bf16 %v279_v22, %v278_v21  ;;  %v733_v28 = vld [vmem:[#allocation2 + $0xc] sm:$0x1]  ;;  %v3333_v30 = vrot.slane %v3135_v27, 5  ;;  %v814_v38 = vld [vmem:[#allocation2 + $0x150] sm:$0x1] }
  0x47   : > { %v2130_v41 = vrot.slane %v2128_v39, 5  ;;  %v2509_v56 = vor.u32 %v2508_v52, %v10132_v51  ;;  %v734_v31 = vsel %vm10136_vm9, 0, %v733_v28  ;;  %v815_v39 = vsel %vm10136_vm9, 0, %v814_v38  ;;  %v280_v43 = vld [vmem:[%s10056_s11 + $0x70] sm:$0xff]  ;;  %v283_v60 = vld [vmem:[%s10056_s11 + $0x88] sm:$0xff]  ;;  %s9922_s15 = smov 112  }
  0x48   : > { %v2059_v54 = vld [vmem:[#allocation2 + $0xe0] sm:$0x1]  ;;  %735 = vst [vmem:[#allocation2 + $0xc] sm:$0x1] %v734_v31  ;;  %v337_v50 = vpack.c.bf16 %v281_v44, %v280_v43  ;;  %v736_v61 = vld [vmem:[#allocation2 + $0x18] sm:$0x1] }
  0x49   : > { %v2131_v45 = vsel %vm10120_vm7, %v2126_v40, %v2130_v41  ;;  %v2512_v57 = vshll.u32 %v2059_v54, 16  ;;  %v2510_v58 = vrot.slane %v2509_v56, 4  ;;  %816 = vst [vmem:[#allocation2 + $0x150] sm:$0x1] %v815_v39  ;;  %v843_v41 = vld [vmem:[#allocation2 + $0x14] sm:$0x1] }
  0x4a   : > { %9151 = vmatmul.msk.bf16.gmra.mxu0 %vm382_vm0, %v331_v12  ;;  %9176 = vmatmul.msk.bf16.gmra.mxu3 %vm382_vm0, %v356_v13  ;;  %v2009_v7 = vld [vmem:[#allocation2] sm:$0xf]  ;;  %v3134_v12 = vld [vmem:[#allocation2 + $0x4] sm:$0xf]  ;;  %v9182_v13 = vrot.slane %v3133_v11, 9  ;;  %v3444_v56 = vrot.slane %v3442_v5, 4 }
  0x4b   : > { %2878 = vrot.lane.b32.xlu0 %v2131_v45, %s9916_s24  ;;  %v2514_v59 = vrot.slane %v2512_v57, 5  ;;  %v2109_v9 = vshrl.u32 %v2009_v7, 16  ;;  %v2112_v10 = vshll.u32 %v2009_v7, 16  ;;  %v3330_v14 = vrot.slane %v3134_v12, 5  ;;  %v324_v48 = vld [vmem:[%s10056_s11 + $0x1d0] sm:$0xff]  ;;  %s9686_s29 = sshll.u32 %s9976_s22, 9 }
  0x4c   : > { %v844_v45 = vsel %vm10101_vm4, 0, %v843_v41  ;;  %v359_v52 = vpack.c.bf16 %v325_v49, %v324_v48  ;;  %v924_v54 = vld [vmem:[#allocation2 + $0x158] sm:$0x1]  ;;  %v737_v63 = vsel %vm10136_vm9, 0, %v736_v61  ;;  %v847_v2 = vsel %vm10101_vm4, 0, %v846_v0 }
  0x4d   : > { %v2515_v62 = vsel %vm10120_vm7, %v2510_v58, %v2514_v59  ;;  %v2111_v15 = vrot.slane %v2109_v9, 4  ;;  %v3331_v17 = vsel %vm10152_vm12, %v9182_v13, %v3330_v14  ;;  %v3332_v29 = vrot.slane %v3330_v14, 4  ;;  %845 = vst [vmem:[#allocation2 + $0x14] sm:$0x1] %v844_v45  ;;  %v282_v59 = vld [vmem:[%s10056_s11 + $0x80] sm:$0xff] }
  0x4e   : > { %3552 = vrot.lane.b32.xlu1 %v3331_v17, %s9917_s8  ;;  %v925_v58 = vsel %vm10101_vm4, 0, %v924_v54  ;;  %738 = vst [vmem:[#allocation2 + $0x18] sm:$0x1] %v737_v63  ;;  %v739_v12 = vld [vmem:[#allocation2 + $0x24] sm:$0x1]  ;;  %vm3068_vm3 = vcmask 257152  }
  0x4f   : > { %926 = vst [vmem:[#allocation2 + $0x158] sm:$0x1] %v925_v58  ;;  %v740_v14 = vsel %vm10136_vm9, 0, %v739_v12  ;;  %vm3744_vm5 = vcmask 388352   ;;  %vm4129_vm6 = vcmask 519552   ;;  %vm5250_vm8 = vcmask 650752  }
  0x50   : > { %848 = vst [vmem:[#allocation2 + $0x20] sm:$0x1] %v847_v2  ;;  %v1832_v38 = vld [vmem:[#allocation2 + $0x150] sm:$0xf]  ;;  %vm6309_vm10 = vcmask 913152   ;;  %vm7430_vm11 = vcmask 1044352  }
  0x51   : > { %741 = vst [vmem:[#allocation2 + $0x24] sm:$0x1] %v740_v14  ;;  %v6468_v55 = vld [vmem:[#allocation2 + $0x1a8] sm:$0xf] }
  0x53   : > { %2942 = vrot.lane.b32.xlu0 %v2515_v62, %s9916_s24  ;;  %v10201_v62 = vld [vmem:[%s13885_s2] ss:$0 sm:$0xff] }
  0x54   : > { %v1661_v48 = vld [vmem:[#allocation2 + $0x14] sm:$0x1] }
  0x56   : > { %v1836_v0 = vld [vmem:[#allocation2 + $0x158] sm:$0x1] }
  0x5a   : > { %9152 = vmatmul.msk.bf16.gmra.mxu0 %vm382_vm0, %v332_v16  ;;  %9177 = vmatmul.msk.bf16.gmra.mxu3 %vm382_vm0, %v357_v19  ;;  %v2114_v16 = vrot.slane %v2112_v10, 5 }
  0x5b   : > { %3616 = vrot.lane.b32.xlu0 %v3443_v8, %s9917_s8 }
  0x5c   : > { %v2115_v18 = vor.u32 %v2114_v16, %v2111_v15 }
  0x5e   : > { %v2116_v19 = vrot.slane %v2115_v18, 4 }
  0x60   : > { %v2121_v20 = vsel %vm10120_vm7, %v2116_v19, %v10115_v32  ;;  %v3334_v32 = vsel %vm10152_vm12, %v3332_v29, %v3333_v30  ;;  %v1657_v19 = vld [vmem:[#allocation2 + $0xc] sm:$0xf] }
  0x61   : > { %3554 = vrot.lane.b32.xlu2 %v3334_v32, %s9917_s8 }
  0x63   : > { %2876 = vrot.lane.b32.xlu0 %v2121_v20, %s9916_s24 }
  0x6a   : > { %9153 = vmatmul.msk.bf16.gmra.mxu0 %vm382_vm0, %v333_v23  ;;  %9178 = vmatmul.msk.bf16.gmra.mxu3 %vm382_vm0, %v358_v53  ;;  %v784_v23 = vld [vmem:[#allocation2 + $0xd8] sm:$0x1]  ;;  %v3183_v53 = vld [vmem:[#allocation2 + $0xe0] sm:$0x1] }
  0x6b   : > { %v785_v25 = vsel %vm10136_vm9, 0, %v784_v23  ;;  %v3445_v57 = vrot.slane %v3183_v53, 5  ;;  %v284_v23 = vld [vmem:[%s10056_s11 + $0x90] sm:$0xff] }
  0x6c   : > { %786 = vst [vmem:[#allocation2 + $0xd8] sm:$0x1] %v785_v25  ;;  %v285_v25 = vld [vmem:[%s10056_s11 + $0x98] sm:$0xff] }
  0x6d   : > { %v339_v31 = vpack.c.bf16 %v285_v25, %v284_v23  ;;  %v286_v23 = vld [vmem:[%s10056_s11 + $0xa0] sm:$0xff] }
  0x73   : > { %v2057_v33 = vld [vmem:[#allocation2 + $0xd8] sm:$0xf] }
  0x74   : > { %v2493_v34 = vshrl.u32 %v2057_v33, 16  ;;  %v2496_v35 = vshll.u32 %v2057_v33, 16  ;;  %v849_v33 = vld [vmem:[#allocation2 + $0x2c] sm:$0x1] }
  0x76   : > { %v2495_v36 = vrot.slane %v2493_v34, 4 }
  0x7a   : > { %9154 = vmatmul.msk.bf16.gmra.mxu0 %vm382_vm0, %v334_v37  ;;  %v2498_v37 = vrot.slane %v2496_v35, 5  ;;  %9179 = vmatmul.msk.bf16.gmra.mxu3 %vm382_vm0, %v359_v52 }
  0x7c   : > { %v2499_v40 = vor.u32 %v2498_v37, %v2495_v36 }
  0x7e   : > { %v2500_v46 = vrot.slane %v2499_v40, 4  ;;  %v850_v40 = vsel %vm10101_vm4, 0, %v849_v33 }
  0x7f   : > { %851 = vst [vmem:[#allocation2 + $0x2c] sm:$0x1] %v850_v40 }
  0x80   : > { %v2505_v47 = vsel %vm10120_vm7, %v2500_v46, %v10132_v51  ;;  %v3446_v51 = vsel %vm10152_vm12, %v3444_v56, %v3445_v57  ;;  %v927_v57 = vld [vmem:[#allocation2 + $0x164] sm:$0x1] }
  0x81   : > { %2940 = vrot.lane.b32.xlu2 %v2505_v47, %s9916_s24  ;;  %3618 = vrot.lane.b32.xlu1 %v3446_v51, %s9917_s8 }
  0x8a   : > { %9155 = vmatmul.msk.bf16.gmra.mxu0 %vm382_vm0, %v335_v1  ;;  %v338_v1 = vpack.c.bf16 %v283_v60, %v282_v59 }
  0x9a   : > { %9156 = vmatmul.msk.bf16.gmra.mxu0 %vm382_vm0, %v336_v26  ;;  %v817_v26 = vld [vmem:[#allocation2 + $0x15c] sm:$0x1] }
  0x9b   : > { %v818_v32 = vsel %vm10136_vm9, 0, %v817_v26 }
  0x9c   : > { %819 = vst [vmem:[#allocation2 + $0x15c] sm:$0x1] %v818_v32 }
  0xaa   : > { %9157 = vmatmul.msk.bf16.gmra.mxu0 %vm382_vm0, %v337_v50 }
  0xb7   : > { %v488_v3 = vpop.f32.mrf.mxu0 }
  0xb8   : > { %v489_v4 = vadd.f32 %v10201_v62, %v488_v3 }
  0xba   : > { %v648_v5 = vmax.f32 %v489_v4, 0.0  ;;  %9158 = vmatmul.msk.bf16.gmra.mxu0 %vm382_vm0, %v338_v1 }
  0xbc   : > { %v948_v7 = vpack.c.bf16 %v648_v5, %v648_v5 }
  0xbd   : > { %v613_v8 = vpop.f32.mrf.mxu3 }
  0xbe   : > { %v1015_v9 = vshrl.u32 %v948_v7, 16  ;;  %v1018_v10 = vshll.u32 %v948_v7, 16  ;;  %v614_v11 = vadd.f32 %v10201_v62, %v613_v8 }
  0xbf   : > { %v490_v13 = vpop.f32.mrf.mxu0 }
  0xc0   : > { %v1017_v15 = vrot.slane %v1015_v9, 7  ;;  %v698_v16 = vmax.f32 %v614_v11, 0.0  ;;  %v491_v17 = vadd.f32 %v10201_v62, %v490_v13  ;;  %v928_v9 = vsel %vm10101_vm4, 0, %v927_v57  ;;  %v1839_v57 = vld [vmem:[#allocation2 + $0x15c] sm:$0xf] }
  0xc1   : > { %929 = vst [vmem:[#allocation2 + $0x164] sm:$0x1] %v928_v9 }
  0xc2   : > { %v1020_v20 = vor.u32 %v1018_v10, %v1017_v15  ;;  %v998_v21 = vpack.c.bf16 %v698_v16, %v698_v16  ;;  %v649_v22 = vmax.f32 %v491_v17, 0.0  ;;  %v1021_v46 = vrot.slane %v1017_v15, 4 }
  0xc4   : > { %v1658_v27 = vsel %vm10215_vm13, %v1020_v20, %v1657_v19  ;;  %v1440_v28 = vshrl.u32 %v998_v21, 16  ;;  %v949_v29 = vpack.c.bf16 %v649_v22, %v649_v22  ;;  %v1443_v35 = vshll.u32 %v998_v21, 16 }
  0xc5   : > { %1659 = vst [vmem:[#allocation2 + $0xc] sm:$0xf] %v1658_v27  ;;  %v615_v30 = vpop.f32.mrf.mxu3  ;;  %v1664_v27 = vld [vmem:[#allocation2 + $0x18] sm:$0xf] }
  0xc6   : > { %v1442_v34 = vrot.slane %v1440_v28, 7  ;;  %v1023_v36 = vshrl.u32 %v949_v29, 16  ;;  %v616_v37 = vadd.f32 %v10201_v62, %v615_v30  ;;  %v1026_v44 = vshll.u32 %v949_v29, 16  ;;  %v287_v30 = vld [vmem:[%s10056_s11 + $0xa8] sm:$0xff] }
  0xc7   : > { %v493_v39 = vpop.f32.mrf.mxu0 }
  0xc8   : > { %v1445_v41 = vor.u32 %v1443_v35, %v1442_v34  ;;  %v1025_v43 = vrot.slane %v1023_v36, 7  ;;  %v699_v45 = vmax.f32 %v616_v37, 0.0  ;;  %v494_v49 = vadd.f32 %v10201_v62, %v493_v39 }
  0xc9   : > { %v1446_v63 = vrot.slane %v1442_v34, 4 }
  0xca   : > { %v1833_v50 = vsel %vm10215_vm13, %v1445_v41, %v1832_v38  ;;  %v1028_v52 = vor.u32 %v1026_v44, %v1025_v43  ;;  %v1030_v53 = vrot.slane %v1025_v43, 4  ;;  %v999_v54 = vpack.c.bf16 %v699_v45, %v699_v45  ;;  %9159 = vmatmul.msk.bf16.gmra.mxu0 %vm382_vm0, %v339_v31 }
  0xcb   : > { %1834 = vst [vmem:[#allocation2 + $0x150] sm:$0xf] %v1833_v50  ;;  %v650_v56 = vmax.f32 %v494_v49, 0.0  ;;  %v340_v43 = vpack.c.bf16 %v287_v30, %v286_v23 }
  0xcc   : > { %v1029_v58 = vsel %vm10230_vm15, %v1021_v46, %v1028_v52  ;;  %v1662_v51 = vsel %vm10136_vm9, %v1030_v53, %v1661_v48  ;;  %v1448_v59 = vshrl.u32 %v999_v54, 16  ;;  %v3809_v60 = vld [vmem:[#allocation2 + $0xc] sm:$0xf]  ;;  %v1451_v7 = vshll.u32 %v999_v54, 16 }
  0xcd   : > { %v2012_v61 = vld [vmem:[#allocation2 + $0xc] sm:$0xf]  ;;  %1660 = vst.msk [vmem:[#allocation2 + $0x10] sm:$0xf] %vm712_vm2, %v1029_v58  ;;  %v950_v1 = vpack.c.bf16 %v650_v56, %v650_v56  ;;  %3937 = vrot.lane.b32.xlu2 %v3809_v60, %s9918_s17  ;;  %v618_v2 = vpop.f32.mrf.mxu3 }
  0xce   : > { %v2133_v3 = vshrl.u32 %v2012_v61, 16  ;;  %v2136_v4 = vshll.u32 %v2012_v61, 16  ;;  %1663 = vst [vmem:[#allocation2 + $0x14] sm:$0x1] %v1662_v51  ;;  %v1450_v5 = vrot.slane %v1448_v59, 7  ;;  %v619_v8 = vadd.f32 %v10201_v62, %v618_v2 }
  0xcf   : > { %v1032_v10 = vshrl.u32 %v950_v1, 16  ;;  %v1035_v11 = vshll.u32 %v950_v1, 16  ;;  %v495_v12 = vpop.f32.mrf.mxu0  ;;  %v10247_v15 = vld [vmem:[#allocation2 + $0xc] sm:$0xe]  ;;  %v1668_v1 = vld [vmem:[#allocation2 + $0x20] sm:$0x1] }
  0xd0   : > { %v2135_v13 = vrot.slane %v2133_v3, 4  ;;  %v2138_v14 = vrot.slane %v2136_v4, 5  ;;  %v1453_v16 = vor.u32 %v1451_v7, %v1450_v5  ;;  %v1455_v17 = vrot.slane %v1450_v5, 4  ;;  %v10250_v21 = vld [vmem:[#allocation2 + $0xc] sm:$0xf] }
  0xd1   : > { %v496_v19 = vadd.f32 %v10201_v62, %v495_v12  ;;  %v700_v20 = vmax.f32 %v619_v8, 0.0  ;;  %v10252_v22 = vrot.slane %v1032_v10, 7  ;;  %v9183_v34 = vrot.slane %v10247_v15, 9 }
  0xd2   : > { %v1454_v25 = vsel %vm10230_vm15, %v1446_v63, %v1453_v16  ;;  %v1837_v26 = vsel %vm10136_vm9, %v1455_v17, %v1836_v0  ;;  %v3859_v29 = vld [vmem:[#allocation2 + $0x150] sm:$0xf]  ;;  %v2139_v33 = vor.u32 %v2138_v14, %v2135_v13  ;;  %v4291_v36 = vshrl.u32 %v10250_v21, 16 }
  0xd3   : > { %v651_v28 = vmax.f32 %v496_v19, 0.0  ;;  %v1000_v31 = vpack.c.bf16 %v700_v20, %v700_v20  ;;  %1835 = vst.msk [vmem:[#allocation2 + $0x154] sm:$0xf] %vm712_vm2, %v1454_v25  ;;  %v1037_v32 = vor.u32 %v1035_v11, %v10252_v22  ;;  %4037 = vrot.lane.b32.xlu1 %v3859_v29, %s9918_s17  ;;  %v10264_v35 = vld [vmem:[#allocation2 + $0x150] sm:$0xe]  ;;  %v1038_v54 = vrot.slane %v10252_v22, 4 }
  0xd4   : > { %1838 = vst [vmem:[#allocation2 + $0x158] sm:$0x1] %v1837_v26  ;;  %v3810_v38 = vld [vmem:[#allocation2 + $0x10] sm:$0xf]  ;;  %v2140_v58 = vrot.slane %v2139_v33, 4  ;;  %v9208_v0 = vrot.slane %v10264_v35, 9 }
  0xd5   : > { %v951_v37 = vpack.c.bf16 %v651_v28, %v651_v28  ;;  %v1457_v39 = vshrl.u32 %v1000_v31, 16  ;;  %v1460_v40 = vshll.u32 %v1000_v31, 16  ;;  %v1665_v41 = vsel %vm10215_vm13, %v1037_v32, %v1664_v27  ;;  %3939 = vrot.lane.b32.xlu0 %v3810_v38, %s9918_s17  ;;  %v10270_v44 = vld [vmem:[#allocation2 + $0x10] sm:$0xf]  ;;  %v620_v46 = vpop.f32.mrf.mxu3  ;;  %v3138_v48 = vld [vmem:[#allocation2 + $0x14] sm:$0x1] }
  0xd6   : > { %v3137_v45 = vld [vmem:[#allocation2 + $0x10] sm:$0xf]  ;;  %1666 = vst [vmem:[#allocation2 + $0x18] sm:$0xf] %v1665_v41  ;;  %v2142_v53 = vshll.u32 %v10270_v44, 16  ;;  %v621_v59 = vadd.f32 %v10201_v62, %v620_v46  ;;  %v2146_v3 = vshrl.u32 %v10270_v44, 16 }
  0xd7   : > { %v1040_v49 = vshrl.u32 %v951_v37, 16  ;;  %v1043_v50 = vshll.u32 %v951_v37, 16  ;;  %v10272_v52 = vrot.slane %v1457_v39, 7  ;;  %v498_v56 = vpop.f32.mrf.mxu0  ;;  %v3337_v51 = vrot.slane %v3137_v45, 5  ;;  %v10286_v12 = vld [vmem:[#allocation2 + $0x10] sm:$0xf] }
  0xd8   : > { %v499_v61 = vadd.f32 %v10201_v62, %v498_v56  ;;  %v10280_v2 = vrot.slane %v2142_v53, 5  ;;  %v701_v4 = vmax.f32 %v621_v59, 0.0  ;;  %v3340_v5 = vrot.slane %v3138_v48, 5  ;;  %v742_v25 = vld [vmem:[#allocation2 + $0x30] sm:$0x1] }
  0xd9   : > { %v1042_v60 = vrot.slane %v1040_v49, 7  ;;  %v1462_v63 = vor.u32 %v1460_v40, %v10272_v52  ;;  %v3338_v14 = vsel %vm10152_vm12, %v9183_v34, %v3337_v51  ;;  %v3339_v17 = vrot.slane %v3337_v51, 4  ;;  %v1671_v35 = vld [vmem:[#allocation2 + $0x24] sm:$0xf]  ;;  %v9684_v56 = vld [vmem:[#allocation7 + $0x40] sm:$0xff] }
  0xda   : > { %v652_v9 = vmax.f32 %v499_v61, 0.0  ;;  %9160 = vmatmul.msk.bf16.gmra.mxu0 %vm382_vm0, %v340_v43  ;;  %v3860_v11 = vld [vmem:[#allocation2 + $0x154] sm:$0xf]  ;;  %v2145_v13 = vsel %vm10120_vm7, %v2140_v58, %v10280_v2  ;;  %v1001_v15 = vpack.c.bf16 %v701_v4, %v701_v4  ;;  %v4293_v29 = vrot.slane %v4291_v36, 4  ;;  %v1843_v43 = vld [vmem:[#allocation2 + $0x164] sm:$0x1]  ;;  %8740 = vmatpush.bf16.msra.mxu2 %v9684_v56 }
  0xdb   : > { %v1045_v7 = vor.u32 %v1043_v50, %v1042_v60  ;;  %v1047_v8 = vrot.slane %v1042_v60, 4  ;;  %v1840_v10 = vsel %vm10215_vm13, %v1462_v63, %v1839_v57  ;;  %4039 = vrot.lane.b32.xlu2 %v3860_v11, %s9918_s17  ;;  %v10294_v16 = vld [vmem:[#allocation2 + $0x154] sm:$0xf]  ;;  %2880 = vrot.lane.b32.xlu1 %v2145_v13, %s9916_s24  ;;  %v4294_v30 = vshll.u32 %v10250_v21, 16  ;;  %v2089_v53 = vld [vmem:[#allocation2 + $0x158] sm:$0x1] }
  0xdc   : > { %1841 = vst [vmem:[#allocation2 + $0x15c] sm:$0xf] %v1840_v10  ;;  %v952_v22 = vpack.c.bf16 %v652_v9, %v652_v9  ;;  %v3512_v23 = vrot.slane %v10294_v16, 5  ;;  %v2088_v26 = vld [vmem:[#allocation2 + $0x154] sm:$0xf]  ;;  %v1465_v27 = vshrl.u32 %v1001_v15, 16  ;;  %v3341_v39 = vsel %vm10152_vm12, %v3339_v17, %v3340_v5 }
  0xdd   : > { %v1046_v19 = vsel %vm10230_vm15, %v1038_v54, %v1045_v7  ;;  %v1669_v20 = vsel %vm10136_vm9, %v1047_v8, %v1668_v1  ;;  %3556 = vrot.lane.b32.xlu0 %v3338_v14, %s9917_s8  ;;  %v1468_v28 = vshll.u32 %v1001_v15, 16  ;;  %v1463_v33 = vrot.slane %v10272_v52, 4  ;;  %v10321_v52 = vld [vmem:[%s10056_s11 + $0xb0] sm:$0xff]  ;;  %v289_v60 = vld [vmem:[%s10056_s11 + $0xb8] sm:$0xff]  ;;  %v852_v5 = vld [vmem:[#allocation2 + $0x38] sm:$0x1] }
  0xde   : > { %1667 = vst.msk [vmem:[#allocation2 + $0x1c] sm:$0xf] %vm712_vm2, %v1046_v19  ;;  %v1049_v31 = vshrl.u32 %v952_v22, 16  ;;  %v1052_v32 = vshll.u32 %v952_v22, 16  ;;  %v4300_v34 = vshll.u32 %v10286_v12, 16  ;;  %v1467_v38 = vrot.slane %v1465_v27, 7 }
  0xdf   : > { %1670 = vst [vmem:[#allocation2 + $0x20] sm:$0x1] %v1669_v20  ;;  %v500_v37 = vpop.f32.mrf.mxu0  ;;  %v4296_v40 = vrot.slane %v4294_v30, 5  ;;  %v743_v36 = vsel %vm10136_vm9, 0, %v742_v25  ;;  %v3513_v45 = vsel %vm10152_vm12, %v9208_v0, %v3512_v23  ;;  %v2742_v54 = vshll.u32 %v2088_v26, 16  ;;  %v326_v7 = vld [vmem:[%s10056_s11 + $0x1e0] sm:$0xff] }
  0xe0   : > { %v10311_v41 = vrot.slane %v1049_v31, 7  ;;  %v501_v21 = vadd.f32 %v10201_v62, %v500_v37  ;;  %v10318_v46 = vrot.slane %v4300_v34, 5  ;;  %744 = vst [vmem:[#allocation2 + $0x30] sm:$0x1] %v743_v36  ;;  %v1470_v48 = vor.u32 %v1468_v28, %v1467_v38  ;;  %v327_v8 = vld [vmem:[%s10056_s11 + $0x1e8] sm:$0xff] }
  0xe1   : > { %v1472_v49 = vrot.slane %v1467_v38, 4  ;;  %v4297_v50 = vor.u32 %v4296_v40, %v4293_v29  ;;  %v4304_v59 = vshrl.u32 %v10286_v12, 16  ;;  %v2746_v61 = vshrl.u32 %v2088_v26, 16  ;;  %v3213_v14 = vld [vmem:[#allocation2 + $0x158] sm:$0x1] }
  0xe2   : > { %v1054_v57 = vor.u32 %v1052_v32, %v10311_v41  ;;  %v653_v51 = vmax.f32 %v501_v21, 0.0  ;;  %v1055_v63 = vrot.slane %v10311_v41, 4  ;;  %v1471_v0 = vsel %vm10230_vm15, %v1463_v33, %v1470_v48  ;;  %v2014_v15 = vld [vmem:[#allocation2 + $0x14] sm:$0x1]  ;;  %v7495_v25 = vld [vmem:[#allocation2 + $0x18] sm:$0xe] }
  0xe3   : > { %v10324_v58 = vld [vmem:[#allocation2 + $0x15c] sm:$0xe]  ;;  %v1844_v1 = vsel %vm10136_vm9, %v1472_v49, %v1843_v43  ;;  %3656 = vrot.lane.b32.xlu2 %v3513_v45, %s9917_s8  ;;  %v4298_v4 = vrot.slane %v4297_v50, 4  ;;  %1842 = vst.msk [vmem:[#allocation2 + $0x160] sm:$0xf] %vm712_vm2, %v1471_v0  ;;  %3558 = vrot.lane.b32.xlu1 %v3341_v39, %s9917_s8  ;;  %v10340_v11 = vrot.slane %v2742_v54, 5  ;;  %v341_v20 = vpack.c.bf16 %v289_v60, %v10321_v52 }
  0xe4   : > { %v1672_v9 = vsel %vm10215_vm13, %v1054_v57, %v1671_v35  ;;  %v953_v10 = vpack.c.bf16 %v653_v51, %v653_v51  ;;  %v2748_v13 = vrot.slane %v2746_v61, 4  ;;  %v9271_v17 = vrot.slane %v10324_v58, 9  ;;  %1845 = vst [vmem:[#allocation2 + $0x164] sm:$0x1] %v1844_v1  ;;  %v1675_v30 = vld [vmem:[#allocation2 + $0x2c] sm:$0x1] }
  0xe5   : > { %1673 = vst [vmem:[#allocation2 + $0x24] sm:$0xf] %v1672_v9  ;;  %v4303_v19 = vsel %vm10120_vm7, %v4298_v4, %v10318_v46  ;;  %v2752_v22 = vshll.u32 %v2089_v53, 16  ;;  %v853_v29 = vsel %vm10101_vm4, 0, %v852_v5  ;;  %v3514_v33 = vrot.slane %v3512_v23, 4 }
  0xe6   : > { %v1057_v26 = vshrl.u32 %v953_v10, 16  ;;  %v1060_v27 = vshll.u32 %v953_v10, 16  ;;  %5058 = vrot.lane.b32.xlu0 %v4303_v19, %s9919_s23  ;;  %v2749_v28 = vor.u32 %v2748_v13, %v10340_v11  ;;  %854 = vst [vmem:[#allocation2 + $0x38] sm:$0x1] %v853_v29  ;;  %v360_v34 = vpack.c.bf16 %v327_v8, %v326_v7  ;;  %v7496_v36 = vld [vmem:[#allocation2 + $0x1c] sm:$0xf]  ;;  %v623_v13 = vpop.f32.mrf.mxu3 }
  0xe7   : > { %v503_v31 = vpop.f32.mrf.mxu0  ;;  %v2754_v32 = vrot.slane %v2752_v22, 5  ;;  %v2148_v35 = vrot.slane %v2146_v3, 4  ;;  %v2152_v40 = vshll.u32 %v2014_v15, 16  ;;  %v3811_v21 = vld [vmem:[#allocation2 + $0x18] sm:$0xf]  ;;  %v3515_v43 = vrot.slane %v3213_v14, 5 }
  0xe8   : > { %v1059_v37 = vrot.slane %v1057_v26, 7  ;;  %v504_v38 = vadd.f32 %v10201_v62, %v503_v31  ;;  %v2750_v39 = vrot.slane %v2749_v28, 4  ;;  %9180 = vmatmul.msk.bf16.gmra.mxu3 %vm382_vm0, %v360_v34  ;;  %v7497_v48 = vld [vmem:[#allocation2 + $0x20] sm:$0x1]  ;;  %v9246_v16 = vrot.slane %v7495_v25, 9  ;;  %v290_v29 = vld [vmem:[%s10056_s11 + $0xc0] sm:$0xff] }
  0xe9   : > { %v2149_v45 = vor.u32 %v2148_v35, %v10280_v2  ;;  %v7689_v23 = vrot.slane %v7496_v36, 5  ;;  %v745_v3 = vld [vmem:[#allocation2 + $0x3c] sm:$0x1]  ;;  %v10361_v53 = vld [vmem:[#allocation2 + $0x18] sm:$0xe]  ;;  %v2154_v57 = vrot.slane %v2152_v40, 5  ;;  %v3516_v41 = vsel %vm10152_vm12, %v3514_v33, %v3515_v43 }
  0xea   : > { %v1062_v49 = vor.u32 %v1060_v27, %v1059_v37  ;;  %v1064_v50 = vrot.slane %v1059_v37, 4  ;;  %v654_v52 = vmax.f32 %v504_v38, 0.0  ;;  %9161 = vmatmul.msk.bf16.gmra.mxu0 %vm382_vm0, %v341_v20  ;;  %v2755_v44 = vsel %vm10120_vm7, %v2750_v39, %v2754_v32  ;;  %v7571_v54 = vld [vmem:[#allocation2 + $0x160] sm:$0xf]  ;;  %v10374_v1 = vld [vmem:[#allocation2 + $0x1c] sm:$0xf] }
  0xeb   : > { %2982 = vrot.lane.b32.xlu2 %v2755_v44, %s9916_s24  ;;  %v2150_v56 = vrot.slane %v2149_v45, 4  ;;  %v7690_v2 = vsel %vm10152_vm12, %v9246_v16, %v7689_v23  ;;  %v7691_v58 = vrot.slane %v7689_v23, 4  ;;  %v7864_v61 = vrot.slane %v7571_v54, 5  ;;  %3941 = vrot.lane.b32.xlu1 %v3811_v21, %s9918_s17  ;;  %v7572_v4 = vld [vmem:[#allocation2 + $0x164] sm:$0x1] }
  0xec   : > { %v1063_v51 = vsel %vm10230_vm15, %v1055_v63, %v1062_v49  ;;  %v1676_v60 = vsel %vm10136_vm9, %v1064_v50, %v1675_v30  ;;  %v954_v0 = vpack.c.bf16 %v654_v52, %v654_v52  ;;  %7975 = vst.msk [vmem:[#allocation3 + $0x4] sm:$0xf] %vm712_vm2, %v7690_v2  ;;  %v7692_v5 = vrot.slane %v7497_v48, 5  ;;  %v1678_v15 = vld [vmem:[#allocation2 + $0x30] sm:$0xf]  ;;  %v291_v30 = vld [vmem:[%s10056_s11 + $0xc8] sm:$0xff] }
  0xed   : > { %1674 = vst.msk [vmem:[#allocation2 + $0x28] sm:$0xf] %vm712_vm2, %v1063_v51  ;;  %v746_v63 = vsel %vm10136_vm9, 0, %v745_v3  ;;  %v7865_v7 = vsel %vm10152_vm12, %v9271_v17, %v7864_v61  ;;  %v7866_v8 = vrot.slane %v7864_v61, 4  ;;  %v7867_v9 = vrot.slane %v7572_v4, 5 }
  0xee   : > { %1677 = vst [vmem:[#allocation2 + $0x2c] sm:$0x1] %v1676_v60  ;;  %v1066_v10 = vshrl.u32 %v954_v0, 16  ;;  %3658 = vrot.lane.b32.xlu0 %v3516_v41, %s9917_s8  ;;  %v1069_v14 = vshll.u32 %v954_v0, 16  ;;  %v7693_v20 = vsel %vm10152_vm12, %v7691_v58, %v7692_v5  ;;  %v9184_v22 = vrot.slane %v10361_v53, 9 }
  0xef   : > { %8025 = vst.msk [vmem:[#allocation3 + $0x194] sm:$0xf] %vm712_vm2, %v7865_v7  ;;  %v505_v19 = vpop.f32.mrf.mxu0  ;;  %v624_v17 = vadd.f32 %v10201_v62, %v623_v13  ;;  %v7868_v25 = vsel %vm10152_vm12, %v7866_v8, %v7867_v9  ;;  %v3812_v28 = vld [vmem:[#allocation2 + $0x1c] sm:$0xf]  ;;  %v3344_v31 = vrot.slane %v10374_v1, 5  ;;  %v4306_v34 = vrot.slane %v4304_v59, 4 }
  0xf0   : > { %v10391_v26 = vrot.slane %v1066_v10, 7  ;;  %v506_v27 = vadd.f32 %v10201_v62, %v505_v19  ;;  %7976 = vst.msk [vmem:[#allocation3 + $0xc] sm:$0xf] %vm712_vm2, %v7693_v20  ;;  %v4196_v32 = vld [vmem:[#allocation2 + $0x14] sm:$0x1]  ;;  %v2155_v36 = vsel %vm10120_vm7, %v2150_v56, %v2154_v57  ;;  %v342_v3 = vpack.c.bf16 %v291_v30, %v290_v29  ;;  %v10435_v30 = vld [vmem:[%s10056_s11 + $0xd0] sm:$0xff] }
  0xf1   : > { %8026 = vst.msk [vmem:[#allocation3 + $0x19c] sm:$0xf] %vm712_vm2, %v7868_v25  ;;  %v3861_v33 = vld [vmem:[#allocation2 + $0x15c] sm:$0xf]  ;;  %v4310_v35 = vshll.u32 %v4196_v32, 16  ;;  %v4307_v45 = vor.u32 %v4306_v34, %v10318_v46  ;;  %v3346_v59 = vrot.slane %v3344_v31, 4  ;;  %v3345_v61 = vsel %vm10152_vm12, %v9184_v22, %v3344_v31  ;;  %v625_v25 = vpop.f32.mrf.mxu3 }
  0xf2   : > { %v10401_v37 = vld [vmem:[#allocation2 + $0x20] sm:$0x1]  ;;  %v1071_v38 = vor.u32 %v1069_v14, %v10391_v26  ;;  %v1072_v39 = vrot.slane %v10391_v26, 4  ;;  %v655_v40 = vmax.f32 %v506_v27, 0.0  ;;  %747 = vst [vmem:[#allocation2 + $0x3c] sm:$0x1] %v746_v63 }
  0xf3   : > { %v855_v21 = vld [vmem:[#allocation2 + $0x44] sm:$0x1]  ;;  %3943 = vrot.lane.b32.xlu2 %v3812_v28, %s9918_s17  ;;  %v9612_v43 = vld [vmem:[#allocation3 + $0x4] sm:$0xf]  ;;  %v4312_v12 = vrot.slane %v4310_v35, 5  ;;  %v3347_v48 = vrot.slane %v10401_v37, 5  ;;  %2882 = vrot.lane.b32.xlu1 %v2155_v36, %s9916_s24 }
  0xf4   : > { %v1679_v16 = vsel %vm10215_vm13, %v1071_v38, %v1678_v15  ;;  %v955_v23 = vpack.c.bf16 %v655_v40, %v655_v40  ;;  %v856_v49 = vsel %vm10101_vm4, 0, %v855_v21  ;;  %v702_v50 = vmax.f32 %v624_v17, 0.0  ;;  %v820_v52 = vld [vmem:[#allocation2 + $0x168] sm:$0x1]  ;;  %v2015_v44 = vld [vmem:[#allocation2 + $0x18] sm:$0xf] }
  0xf5   : > { %1680 = vst [vmem:[#allocation2 + $0x30] sm:$0xf] %v1679_v16  ;;  %v4308_v53 = vrot.slane %v4307_v45, 4  ;;  %v821_v46 = vsel %vm10136_vm9, 0, %v820_v52  ;;  %v10417_v54 = vld [vmem:[#allocation2 + $0x1c] sm:$0xf]  ;;  %v3348_v36 = vsel %vm10152_vm12, %v3346_v59, %v3347_v48  ;;  %v626_v45 = vadd.f32 %v10201_v62, %v625_v25 }
  0xf6   : > { %v1074_v56 = vshrl.u32 %v955_v23, 16  ;;  %v1077_v57 = vshll.u32 %v955_v23, 16  ;;  %4041 = vrot.lane.b32.xlu0 %v3861_v33, %s9918_s17  ;;  %857 = vst [vmem:[#allocation2 + $0x44] sm:$0x1] %v856_v49  ;;  %v1002_v2 = vpack.c.bf16 %v702_v50, %v702_v50  ;;  %v2157_v58 = vshrl.u32 %v2015_v44, 16  ;;  %v10438_v31 = vld [vmem:[%s10056_s11 + $0xd8] sm:$0xff] }
  0xf7   : > { %v9282_v51 = vld [vmem:[#allocation3 + $0x8] sm:$0xf0]  ;;  %v508_v60 = vpop.f32.mrf.mxu0  ;;  %v4313_v0 = vsel %vm10120_vm7, %v4308_v53, %v4312_v12  ;;  %822 = vst [vmem:[#allocation2 + $0x168] sm:$0x1] %v821_v46  ;;  %v2160_v1 = vshll.u32 %v2015_v44, 16  ;;  %v2166_v4 = vshll.u32 %v10417_v54, 16  ;;  %v343_v49 = vpack.c.bf16 %v10438_v31, %v10435_v30 }
  0xf8   : > { %v1076_v41 = vrot.slane %v1074_v56, 7  ;;  %v9285_v5 = vor.u32 %v9612_v43, %v9282_v51  ;;  %v509_v63 = vadd.f32 %v10201_v62, %v508_v60  ;;  %v1474_v7 = vshrl.u32 %v1002_v2, 16  ;;  %v2087_v8 = vld [vmem:[#allocation2 + $0x150] sm:$0xf]  ;;  %v1682_v9 = vld [vmem:[#allocation2 + $0x38] sm:$0x1] }
  0xf9   : > { %v1477_v10 = vshll.u32 %v1002_v2, 16  ;;  %v2159_v13 = vrot.slane %v2157_v58, 4  ;;  %v2162_v14 = vrot.slane %v2160_v1, 5  ;;  %v10426_v15 = vrot.slane %v2166_v4, 5  ;;  %v7498_v37 = vld [vmem:[#allocation2 + $0x24] sm:$0xe] }
  0xfa   : > { %v1079_v19 = vor.u32 %v1077_v57, %v1076_v41  ;;  %v1081_v20 = vrot.slane %v1076_v41, 4  ;;  %9570 = vmatmul.msk.bf16.vlgmr.msra.gmra.mxu2 %vm8467_vm1, %v9285_v5  ;;  %v656_v22 = vmax.f32 %v509_v63, 0.0  ;;  %9162 = vmatmul.msk.bf16.gmra.mxu0 %vm382_vm0, %v342_v3  ;;  %v10430_v17 = vrot.slane %v1474_v7, 7  ;;  %v7499_v38 = vld [vmem:[#allocation2 + $0x28] sm:$0xf] }
  0xfb   : > { %3560 = vrot.lane.b32.xlu2 %v3345_v61, %s9917_s8  ;;  %v2163_v26 = vor.u32 %v2162_v14, %v2159_v13  ;;  %v2170_v27 = vshrl.u32 %v10417_v54, 16  ;;  %v2733_v28 = vshrl.u32 %v2087_v8, 16  ;;  %v2736_v29 = vshll.u32 %v2087_v8, 16  ;;  %5060 = vrot.lane.b32.xlu1 %v4313_v0, %s9919_s23  ;;  %v7500_v40 = vld [vmem:[#allocation2 + $0x2c] sm:$0x1] }
  0xfc   : > { %v1080_v32 = vsel %vm10230_vm15, %v1072_v39, %v1079_v19  ;;  %v1683_v33 = vsel %vm10136_vm9, %v1081_v20, %v1682_v9  ;;  %v956_v34 = vpack.c.bf16 %v656_v22, %v656_v22  ;;  %v1479_v35 = vor.u32 %v1477_v10, %v10430_v17  ;;  %v748_v39 = vld [vmem:[#allocation2 + $0x48] sm:$0x1]  ;;  %v1685_v50 = vld [vmem:[#allocation2 + $0x3c] sm:$0xf]  ;;  %v930_v53 = vld [vmem:[#allocation2 + $0x170] sm:$0x1] }
  0xfd   : > { %1681 = vst.msk [vmem:[#allocation2 + $0x34] sm:$0xf] %vm712_vm2, %v1080_v32  ;;  %v1480_v21 = vrot.slane %v10430_v17, 4  ;;  %v2164_v43 = vrot.slane %v2163_v26, 4  ;;  %v2735_v44 = vrot.slane %v2733_v28, 4  ;;  %v2738_v3 = vrot.slane %v2736_v29, 5 }
  0xfe   : > { %1684 = vst [vmem:[#allocation2 + $0x38] sm:$0x1] %v1683_v33  ;;  %v1083_v12 = vshrl.u32 %v956_v34, 16  ;;  %v1086_v16 = vshll.u32 %v956_v34, 16  ;;  %3562 = vrot.lane.b32.xlu0 %v3348_v36, %s9917_s8  ;;  %v1846_v23 = vld [vmem:[#allocation2 + $0x168] sm:$0xf] }
  0xff   : > { %v510_v52 = vpop.f32.mrf.mxu0  ;;  %v1847_v59 = vsel %vm10215_vm13, %v1479_v35, %v1846_v23  ;;  %v2169_v48 = vsel %vm10120_vm7, %v2164_v43, %v10426_v15  ;;  %v9247_v57 = vrot.slane %v7498_v37, 9  ;;  %v7696_v2 = vrot.slane %v7499_v38, 5  ;;  %v3813_v60 = vld [vmem:[#allocation2 + $0x24] sm:$0xf]  ;;  %v4197_v1 = vld [vmem:[#allocation2 + $0x18] sm:$0xf] }
 0x100   : > { %v10459_v46 = vrot.slane %v1083_v12, 7  ;;  %v511_v56 = vadd.f32 %v10201_v62, %v510_v52  ;;  %1848 = vst [vmem:[#allocation2 + $0x168] sm:$0xf] %v1847_v59  ;;  %v2739_v58 = vor.u32 %v2738_v3, %v2735_v44  ;;  %v7699_v51 = vrot.slane %v7500_v40, 5  ;;  %v4198_v7 = vld [vmem:[#allocation2 + $0x1c] sm:$0xf]  ;;  %v2879_v40 = vpop.permute.xlu0 %2878 }
 0x101   : > { %v749_v61 = vsel %vm10136_vm9, 0, %v748_v39  ;;  %v703_v0 = vmax.f32 %v626_v45, 0.0  ;;  %v7697_v63 = vsel %vm10152_vm12, %v9247_v57, %v7696_v2  ;;  %v7698_v9 = vrot.slane %v7696_v2, 4  ;;  %v1882_v25 = vld [vmem:[#allocation2 + $0x4] sm:$0xf] }
 0x102   : > { %v1088_v4 = vor.u32 %v1086_v16, %v10459_v46  ;;  %v1089_v41 = vrot.slane %v10459_v46, 4  ;;  %v657_v5 = vmax.f32 %v511_v56, 0.0  ;;  %750 = vst [vmem:[#allocation2 + $0x48] sm:$0x1] %v749_v61  ;;  %v2740_v8 = vrot.slane %v2739_v58, 4  ;;  %v328_v56 = vld [vmem:[%s10056_s11 + $0x1f0] sm:$0xff] }
 0x103   : > { %2884 = vrot.lane.b32.xlu2 %v2169_v48, %s9916_s24  ;;  %7977 = vst.msk [vmem:[#allocation3 + $0x14] sm:$0xf] %vm712_vm2, %v7697_v63  ;;  %v931_v10 = vsel %vm10101_vm4, 0, %v930_v53  ;;  %v1003_v13 = vpack.c.bf16 %v703_v0, %v703_v0  ;;  %v4315_v20 = vshrl.u32 %v4197_v1, 16  ;;  %v4318_v22 = vshll.u32 %v4197_v1, 16  ;;  %v329_v61 = vld [vmem:[%s10056_s11 + $0x1f8] sm:$0xff] }
 0x104   : > { %v1686_v14 = vsel %vm10215_vm13, %v1088_v4, %v1685_v50  ;;  %v957_v19 = vpack.c.bf16 %v657_v5, %v657_v5  ;;  %932 = vst [vmem:[#allocation2 + $0x170] sm:$0x1] %v931_v10  ;;  %v2745_v26 = vsel %vm10120_vm7, %v2740_v8, %v10340_v11  ;;  %v7700_v28 = vsel %vm10152_vm12, %v7698_v9, %v7699_v51  ;;  %v4199_v33 = vld [vmem:[#allocation2 + $0x20] sm:$0x1]  ;;  %v1689_v36 = vld [vmem:[#allocation2 + $0x44] sm:$0x1] }
 0x105   : > { %1687 = vst [vmem:[#allocation2 + $0x3c] sm:$0xf] %v1686_v14  ;;  %v1482_v29 = vshrl.u32 %v1003_v13, 16  ;;  %v1485_v32 = vshll.u32 %v1003_v13, 16  ;;  %2980 = vrot.lane.b32.xlu1 %v2745_v26, %s9916_s24  ;;  %v4317_v37 = vrot.slane %v4315_v20, 4  ;;  %v4320_v38 = vrot.slane %v4318_v22, 5 }
 0x106   : > { %v1091_v34 = vshrl.u32 %v957_v19, 16  ;;  %v1094_v35 = vshll.u32 %v957_v19, 16  ;;  %7978 = vst.msk [vmem:[#allocation3 + $0x1c] sm:$0xf] %vm712_vm2, %v7700_v28  ;;  %3945 = vrot.lane.b32.xlu0 %v3813_v60, %s9918_s17  ;;  %v4324_v39 = vshll.u32 %v4198_v7, 16  ;;  %v4328_v45 = vshrl.u32 %v4198_v7, 16 }
 0x107   : > { %v513_v43 = vpop.f32.mrf.mxu0  ;;  %v1484_v11 = vrot.slane %v1482_v29, 7  ;;  %1946 = vst.msk [vmem:[#allocation3 + $0x8] sm:$0xf] %vm712_vm2, %v1882_v25  ;;  %v4321_v23 = vor.u32 %v4320_v38, %v4317_v37  ;;  %v4334_v50 = vshll.u32 %v4199_v33, 16  ;;  %v858_v52 = vld [vmem:[#allocation2 + $0x50] sm:$0x1]  ;;  %v361_v14 = vpack.c.bf16 %v329_v61, %v328_v56  ;;  %v3555_v61 = vpop.permute.xlu2 %3554 }
 0x108   : > { %v1093_v12 = vrot.slane %v1091_v34, 7  ;;  %v514_v16 = vadd.f32 %v10201_v62, %v513_v43  ;;  %3070 = vst.msk [vmem:[#allocation3 + $0x8] sm:$0xf] %vm3068_vm3, %v2879_v40  ;;  %v4326_v44 = vrot.slane %v4324_v39, 5  ;;  %v4330_v3 = vrot.slane %v4328_v45, 4  ;;  %v10512_v19 = vld [vmem:[%s10056_s11 + $0xe0] sm:$0xff] }
 0x109   : > { %v1487_v59 = vor.u32 %v1485_v32, %v1484_v11  ;;  %v1489_v48 = vrot.slane %v1484_v11, 4  ;;  %v2017_v53 = vld [vmem:[#allocation2 + $0x20] sm:$0x1]  ;;  %v4322_v60 = vrot.slane %v4321_v23, 4  ;;  %v4336_v63 = vrot.slane %v4334_v50, 5  ;;  %v10517_v28 = vld [vmem:[%s10056_s11 + $0xe8] sm:$0xff]  ;;  %9181 = vmatmul.msk.bf16.gmra.mxu3 %vm382_vm0, %v361_v14 }
 0x10a   : > { %v1096_v57 = vor.u32 %v1094_v35, %v1093_v12  ;;  %v1098_v2 = vrot.slane %v1093_v12, 4  ;;  %v9614_v58 = vld [vmem:[#allocation3 + $0x14] sm:$0xf]  ;;  %v658_v51 = vmax.f32 %v514_v16, 0.0  ;;  %9163 = vmatmul.msk.bf16.gmra.mxu0 %vm382_vm0, %v343_v49  ;;  %v3862_v4 = vld [vmem:[#allocation2 + $0x160] sm:$0xf]  ;;  %v4331_v5 = vor.u32 %v4330_v3, %v4326_v44 }
 0x10b   : > { %v1488_v0 = vsel %vm10230_vm15, %v1480_v21, %v1487_v59  ;;  %v1850_v1 = vld [vmem:[#allocation2 + $0x170] sm:$0x1]  ;;  %v859_v7 = vsel %vm10101_vm4, 0, %v858_v52  ;;  %v3214_v8 = vld [vmem:[#allocation2 + $0x15c] sm:$0xe]  ;;  %v4327_v46 = vsel %vm10120_vm7, %v4322_v60, %v4326_v44  ;;  %v2176_v26 = vshll.u32 %v2017_v53, 16 }
 0x10c   : > { %v1097_v30 = vsel %vm10230_vm15, %v1089_v41, %v1096_v57  ;;  %v1690_v17 = vsel %vm10136_vm9, %v1098_v2, %v1689_v36  ;;  %v958_v31 = vpack.c.bf16 %v658_v51, %v658_v51  ;;  %1849 = vst.msk [vmem:[#allocation2 + $0x16c] sm:$0xf] %vm712_vm2, %v1488_v0  ;;  %v1851_v21 = vsel %vm10136_vm9, %v1489_v48, %v1850_v1  ;;  %v3215_v49 = vld [vmem:[#allocation2 + $0x160] sm:$0xf]  ;;  %v7501_v9 = vld [vmem:[#allocation2 + $0x30] sm:$0xe]  ;;  %v2943_v36 = vpop.permute.xlu0 %2942 }
 0x10d   : > { %1688 = vst.msk [vmem:[#allocation2 + $0x40] sm:$0xf] %vm712_vm2, %v1097_v30  ;;  %v9290_v10 = vld [vmem:[#allocation3 + $0x18] sm:$0xf0]  ;;  %v4332_v13 = vrot.slane %v4331_v5, 4  ;;  %v2172_v41 = vrot.slane %v2170_v27, 4  ;;  %5062 = vrot.lane.b32.xlu2 %v4327_v46, %s9919_s23  ;;  %4043 = vrot.lane.b32.xlu1 %v3862_v4, %s9918_s17  ;;  %v344_v50 = vpack.c.bf16 %v10517_v28, %v10512_v19 }
 0x10e   : > { %1691 = vst [vmem:[#allocation2 + $0x44] sm:$0x1] %v1690_v17  ;;  %v9293_v20 = vor.u32 %v9614_v58, %v9290_v10  ;;  %v1100_v22 = vshrl.u32 %v958_v31, 16  ;;  %v1103_v25 = vshll.u32 %v958_v31, 16  ;;  %v1692_v29 = vld [vmem:[#allocation2 + $0x48] sm:$0xf] }
 0x10f   : > { %1852 = vst [vmem:[#allocation2 + $0x170] sm:$0x1] %v1851_v21  ;;  %v4337_v54 = vsel %vm10120_vm7, %v4332_v13, %v4336_v63  ;;  %v515_v27 = vpop.f32.mrf.mxu0  ;;  %v2173_v32 = vor.u32 %v2172_v41, %v10426_v15  ;;  %v9209_v33 = vrot.slane %v3214_v8, 9  ;;  %v3519_v34 = vrot.slane %v3215_v49, 5  ;;  %v7502_v35 = vld [vmem:[#allocation2 + $0x34] sm:$0xf]  ;;  %v10548_v63 = vpop.f32.mrf.mxu3 }
 0x110   : > { %9571 = vmatmul.msk.bf16.gmra.mxu2 %vm8467_vm1, %v9293_v20  ;;  %v10524_v37 = vrot.slane %v1100_v22, 7  ;;  %5064 = vrot.lane.b32.xlu0 %v4337_v54, %s9919_s23  ;;  %v516_v38 = vadd.f32 %v10201_v62, %v515_v27  ;;  %860 = vst [vmem:[#allocation2 + $0x50] sm:$0x1] %v859_v7  ;;  %v7503_v40 = vld [vmem:[#allocation2 + $0x38] sm:$0x1]  ;;  %v2178_v11 = vrot.slane %v2176_v26, 5 }
 0x111   : > { %v2174_v43 = vrot.slane %v2173_v32, 4  ;;  %v9248_v39 = vrot.slane %v7501_v9, 9  ;;  %v7703_v15 = vrot.slane %v7502_v35, 5  ;;  %v1914_v45 = vld [vmem:[#allocation2 + $0xdc] sm:$0xf]  ;;  %v7706_v23 = vrot.slane %v7503_v40, 5 }
 0x112   : > { %v1105_v12 = vor.u32 %v1103_v25, %v10524_v37  ;;  %v659_v16 = vmax.f32 %v516_v38, 0.0  ;;  %1978 = vst.msk [vmem:[#allocation3 + $0x108] sm:$0xf] %vm712_vm2, %v1914_v45  ;;  %v1106_v52 = vrot.slane %v10524_v37, 4  ;;  %v3520_v62 = vsel %vm10152_vm12, %v9209_v33, %v3519_v34  ;;  %v2090_v53 = vld [vmem:[#allocation2 + $0x15c] sm:$0xf] }
 0x113   : > { %v7704_v59 = vsel %vm10152_vm12, %v9248_v39, %v7703_v15  ;;  %v7705_v48 = vrot.slane %v7703_v15, 4  ;;  %3102 = vst.msk [vmem:[#allocation3 + $0x108] sm:$0xf] %vm3068_vm3, %v2943_v36  ;;  %v3521_v56 = vrot.slane %v3519_v34, 4  ;;  %v2179_v57 = vsel %vm10120_vm7, %v2174_v43, %v2178_v11  ;;  %v2091_v58 = vld [vmem:[#allocation2 + $0x160] sm:$0xf] }
 0x114   : > { %v1693_v44 = vsel %vm10215_vm13, %v1105_v12, %v1692_v29  ;;  %v959_v3 = vpack.c.bf16 %v659_v16, %v659_v16  ;;  %7979 = vst.msk [vmem:[#allocation3 + $0x24] sm:$0xf] %vm712_vm2, %v7704_v59  ;;  %v2757_v51 = vshrl.u32 %v2090_v53, 16  ;;  %v2760_v60 = vshll.u32 %v2090_v53, 16  ;;  %v10554_v49 = vld [vmem:[%s13885_s2] ss:$0 sm:$0xff]  ;;  %v3617_v29 = vpop.permute.xlu0 %3616 }
 0x115   : > { %1694 = vst [vmem:[#allocation2 + $0x48] sm:$0xf] %v1693_v44  ;;  %v7707_v2 = vsel %vm10152_vm12, %v7705_v48, %v7706_v23  ;;  %2886 = vrot.lane.b32.xlu2 %v2179_v57, %s9916_s24  ;;  %3660 = vrot.lane.b32.xlu1 %v3520_v62, %s9917_s8  ;;  %v2766_v4 = vshll.u32 %v2091_v58, 16  ;;  %v2770_v5 = vshrl.u32 %v2091_v58, 16  ;;  %v751_v10 = vld [vmem:[#allocation2 + $0x54] sm:$0x1]  ;;  %v2941_v48 = vpop.permute.xlu2 %2940 }
 0x116   : > { %v1108_v0 = vshrl.u32 %v959_v3, 16  ;;  %v1111_v1 = vshll.u32 %v959_v3, 16  ;;  %7980 = vst.msk [vmem:[#allocation3 + $0x2c] sm:$0xf] %vm712_vm2, %v7707_v2  ;;  %v2759_v8 = vrot.slane %v2757_v51, 4  ;;  %v2762_v30 = vrot.slane %v2760_v60, 5 }
 0x117   : > { %v1696_v7 = vld [vmem:[#allocation2 + $0x50] sm:$0x1]  ;;  %3746 = vst.msk [vmem:[#allocation3 + $0x8] sm:$0xf] %vm3744_vm5, %v3555_v61  ;;  %v518_v17 = vpop.f32.mrf.mxu0  ;;  %v2768_v21 = vrot.slane %v2766_v4, 5  ;;  %v752_v41 = vsel %vm10136_vm9, 0, %v751_v10  ;;  %v630_v2 = vpop.f32.mrf.mxu3 }
 0x118   : > { %v1110_v31 = vrot.slane %v1108_v0, 7  ;;  %v519_v9 = vadd.f32 %v10554_v49, %v518_v17  ;;  %v3216_v46 = vld [vmem:[#allocation2 + $0x164] sm:$0x1]  ;;  %v2763_v13 = vor.u32 %v2762_v30, %v2759_v8  ;;  %v2772_v20 = vrot.slane %v2770_v5, 4  ;;  %753 = vst [vmem:[#allocation2 + $0x54] sm:$0x1] %v752_v41 }
 0x119   : > { %v3522_v14 = vrot.slane %v3216_v46, 5  ;;  %v2092_v19 = vld [vmem:[#allocation2 + $0x164] sm:$0x1]  ;;  %v10564_v40 = vld [vmem:[#allocation2 + $0x28] sm:$0xf] }
 0x11a   : > { %v1113_v22 = vor.u32 %v1111_v1, %v1110_v31  ;;  %v1115_v25 = vrot.slane %v1110_v31, 4  ;;  %v660_v26 = vmax.f32 %v519_v9, 0.0  ;;  %9164 = vmatmul.msk.bf16.gmra.mxu0 %vm382_vm0, %v344_v50  ;;  %v2776_v28 = vshll.u32 %v2092_v19, 16  ;;  %v2018_v33 = vld [vmem:[#allocation2 + $0x24] sm:$0xf] }
 0x11b   : > { %v9616_v54 = vld [vmem:[#allocation3 + $0x24] sm:$0xf]  ;;  %v2764_v27 = vrot.slane %v2763_v13, 4  ;;  %v2773_v32 = vor.u32 %v2772_v20, %v2768_v21  ;;  %v1913_v36 = vld [vmem:[#allocation2 + $0xd8] sm:$0xf]  ;;  %v3523_v39 = vsel %vm10152_vm12, %v3521_v56, %v3522_v14  ;;  %v2181_v45 = vshrl.u32 %v2018_v33, 16 }
 0x11c   : > { %v1114_v34 = vsel %vm10230_vm15, %v1106_v52, %v1113_v22  ;;  %v1697_v35 = vsel %vm10136_vm9, %v1115_v25, %v1696_v7  ;;  %v960_v37 = vpack.c.bf16 %v660_v26, %v660_v26  ;;  %v2778_v38 = vrot.slane %v2776_v28, 5  ;;  %1977 = vst.msk [vmem:[#allocation3 + $0x100] sm:$0xf] %vm712_vm2, %v1913_v36  ;;  %v861_v57 = vld [vmem:[#allocation2 + $0x5c] sm:$0x1]  ;;  %v296_v5 = vld [vmem:[%s10056_s11 + $0xf0] sm:$0xff]  ;;  %v2877_v14 = vpop.permute.xlu0 %2876 }
 0x11d   : > { %1695 = vst.msk [vmem:[#allocation2 + $0x4c] sm:$0xf] %vm712_vm2, %v1114_v34  ;;  %v9298_v43 = vld [vmem:[#allocation3 + $0x28] sm:$0xf0]  ;;  %v2769_v11 = vsel %vm10120_vm7, %v2764_v27, %v2768_v21  ;;  %v2774_v15 = vrot.slane %v2773_v32, 4  ;;  %3662 = vrot.lane.b32.xlu2 %v3523_v39, %s9917_s8  ;;  %v2184_v50 = vshll.u32 %v2018_v33, 16  ;;  %v629_v31 = vadd.f32 %v10554_v49, %v10548_v63 }
 0x11e   : > { %1698 = vst [vmem:[#allocation2 + $0x50] sm:$0x1] %v1697_v35  ;;  %v9301_v12 = vor.u32 %v9616_v54, %v9298_v43  ;;  %2984 = vrot.lane.b32.xlu0 %v2769_v11, %s9916_s24  ;;  %v1117_v16 = vshrl.u32 %v960_v37, 16  ;;  %v1120_v23 = vshll.u32 %v960_v37, 16  ;;  %v2183_v62 = vrot.slane %v2181_v45, 4  ;;  %v297_v7 = vld [vmem:[%s10056_s11 + $0xf8] sm:$0xff] }
 0x11f   : > { %v2779_v52 = vsel %vm10120_vm7, %v2774_v15, %v2778_v38  ;;  %v2190_v59 = vshll.u32 %v10564_v40, 16  ;;  %v520_v44 = vpop.f32.mrf.mxu0  ;;  %v2186_v53 = vrot.slane %v2184_v50, 5  ;;  %3101 = vst.msk [vmem:[#allocation3 + $0x100] sm:$0xf] %vm3068_vm3, %v2941_v48  ;;  %v1699_v58 = vld [vmem:[#allocation2 + $0x54] sm:$0xf]  ;;  %v631_v21 = vadd.f32 %v10554_v49, %v630_v2 }
 0x120   : > { %9572 = vmatmul.msk.bf16.gmra.mxu2 %vm8467_vm1, %v9301_v12  ;;  %v10578_v3 = vrot.slane %v1117_v16, 7  ;;  %2986 = vrot.lane.b32.xlu1 %v2779_v52, %s9916_s24  ;;  %v521_v56 = vadd.f32 %v10554_v49, %v520_v44  ;;  %3777 = vst.msk [vmem:[#allocation3 + $0x100] sm:$0xf] %vm3744_vm5, %v3617_v29  ;;  %v862_v60 = vsel %vm10101_vm4, 0, %v861_v57  ;;  %v3863_v8 = vld [vmem:[#allocation2 + $0x168] sm:$0xf]  ;;  %v3553_v29 = vpop.permute.xlu1 %3552  ;;  %v345_v27 = vpack.c.bf16 %v297_v7, %v296_v5 }
 0x121   : > { %v10583_v51 = vrot.slane %v2190_v59, 5  ;;  %v2187_v1 = vor.u32 %v2186_v53, %v2183_v62  ;;  %863 = vst [vmem:[#allocation2 + $0x5c] sm:$0x1] %v862_v60  ;;  %v7504_v30 = vld [vmem:[#allocation2 + $0x3c] sm:$0xe]  ;;  %v704_v37 = vmax.f32 %v629_v31, 0.0 }
 0x122   : > { %v1122_v61 = vor.u32 %v1120_v23, %v10578_v3  ;;  %v1123_v0 = vrot.slane %v10578_v3, 4  ;;  %v661_v4 = vmax.f32 %v521_v56, 0.0  ;;  %v7505_v17 = vld [vmem:[#allocation2 + $0x40] sm:$0xf]  ;;  %v7506_v13 = vld [vmem:[#allocation2 + $0x44] sm:$0x1] }
 0x123   : > { %v2188_v10 = vrot.slane %v2187_v1, 4  ;;  %v9249_v41 = vrot.slane %v7504_v30, 9  ;;  %v1881_v19 = vld [vmem:[#allocation2] sm:$0xf]  ;;  %v3814_v20 = vld [vmem:[#allocation2 + $0x28] sm:$0xf]  ;;  %v1004_v16 = vpack.c.bf16 %v704_v37, %v704_v37 }
 0x124   : > { %v1700_v9 = vsel %vm10215_vm13, %v1122_v61, %v1699_v58  ;;  %v961_v46 = vpack.c.bf16 %v661_v4, %v661_v4  ;;  %v7710_v22 = vrot.slane %v7505_v17, 5  ;;  %v7713_v25 = vrot.slane %v7506_v13, 5  ;;  %1945 = vst.msk [vmem:[#allocation3] sm:$0xf] %vm712_vm2, %v1881_v19  ;;  %v754_v54 = vld [vmem:[#allocation2 + $0x60] sm:$0x1] }
 0x125   : > { %1701 = vst [vmem:[#allocation2 + $0x54] sm:$0xf] %v1700_v9  ;;  %v2193_v26 = vsel %vm10120_vm7, %v2188_v10, %v10583_v51  ;;  %4045 = vrot.lane.b32.xlu2 %v3863_v8, %s9918_s17  ;;  %v755_v35 = vsel %vm10136_vm9, 0, %v754_v54  ;;  %v823_v43 = vld [vmem:[#allocation2 + $0x174] sm:$0x1]  ;;  %v705_v11 = vmax.f32 %v631_v21, 0.0 }
 0x126   : > { %v1125_v63 = vshrl.u32 %v961_v46, 16  ;;  %v1128_v28 = vshll.u32 %v961_v46, 16  ;;  %2888 = vrot.lane.b32.xlu0 %v2193_v26, %s9916_s24  ;;  %v7711_v32 = vsel %vm10152_vm12, %v9249_v41, %v7710_v22  ;;  %v7712_v33 = vrot.slane %v7710_v22, 4  ;;  %3069 = vst.msk [vmem:[#allocation3] sm:$0xf] %vm3068_vm3, %v2877_v14 }
 0x127   : > { %v523_v34 = vpop.f32.mrf.mxu0  ;;  %7981 = vst.msk [vmem:[#allocation3 + $0x34] sm:$0xf] %vm712_vm2, %v7711_v32  ;;  %v2194_v39 = vshrl.u32 %v10564_v40, 16  ;;  %v3938_v12 = vpop.permute.xlu2 %3937  ;;  %v3143_v62 = vld [vmem:[#allocation2 + $0x28] sm:$0xf]  ;;  %v1005_v59 = vpack.c.bf16 %v705_v11, %v705_v11  ;;  %v824_v40 = vsel %vm10136_vm9, 0, %v823_v43 }
 0x128   : > { %v1127_v38 = vrot.slane %v1125_v63, 7  ;;  %3947 = vrot.lane.b32.xlu1 %v3814_v20, %s9918_s17  ;;  %v524_v36 = vadd.f32 %v10554_v49, %v523_v34  ;;  %v1703_v15 = vld [vmem:[#allocation2 + $0x5c] sm:$0x1]  ;;  %v7714_v45 = vsel %vm10152_vm12, %v7712_v33, %v7713_v25  ;;  %3745 = vst.msk [vmem:[#allocation3] sm:$0xf] %vm3744_vm5, %v3553_v29  ;;  %v1491_v48 = vshrl.u32 %v1004_v16, 16 }
 0x129   : > { %7982 = vst.msk [vmem:[#allocation3 + $0x3c] sm:$0xf] %vm712_vm2, %v7714_v45  ;;  %v3144_v44 = vld [vmem:[#allocation2 + $0x2c] sm:$0x1]  ;;  %v3351_v2 = vrot.slane %v3143_v62, 5  ;;  %v1499_v4 = vshrl.u32 %v1005_v59, 16 }
 0x12a   : > { %v1130_v23 = vor.u32 %v1128_v28, %v1127_v38  ;;  %v1132_v50 = vrot.slane %v1127_v38, 4  ;;  %v662_v52 = vmax.f32 %v524_v36, 0.0  ;;  %9165 = vmatmul.msk.bf16.gmra.mxu0 %vm382_vm0, %v345_v27  ;;  %756 = vst [vmem:[#allocation2 + $0x60] sm:$0x1] %v755_v35  ;;  %v3864_v56 = vld [vmem:[#allocation2 + $0x16c] sm:$0xf] }
 0x12b   : > { %4130 = vst.msk [vmem:[#allocation3] sm:$0xf] %vm4129_vm6, %v3938_v12  ;;  %v3142_v58 = vld [vmem:[#allocation2 + $0x24] sm:$0xe]  ;;  %v1493_v60 = vrot.slane %v1491_v48, 7  ;;  %v3354_v61 = vrot.slane %v3144_v44, 5 }
 0x12c   : > { %v1131_v3 = vsel %vm10230_vm15, %v1123_v0, %v1130_v23  ;;  %v1704_v53 = vsel %vm10136_vm9, %v1132_v50, %v1703_v15  ;;  %v962_v57 = vpack.c.bf16 %v662_v52, %v662_v52  ;;  %v9185_v1 = vrot.slane %v3142_v58, 9  ;;  %825 = vst [vmem:[#allocation2 + $0x174] sm:$0x1] %v824_v40  ;;  %v3217_v41 = vld [vmem:[#allocation2 + $0x168] sm:$0xe]  ;;  %v298_v36 = vld [vmem:[%s10056_s11 + $0x100] sm:$0xff] }
 0x12d   : > { %1702 = vst.msk [vmem:[#allocation2 + $0x58] sm:$0xf] %vm712_vm2, %v1131_v3  ;;  %v3353_v8 = vrot.slane %v3351_v2, 4  ;;  %v1502_v0 = vshll.u32 %v1005_v59, 16  ;;  %v1494_v17 = vshll.u32 %v1004_v16, 16  ;;  %v10628_v9 = vrot.slane %v1499_v4, 7 }
 0x12e   : > { %1705 = vst [vmem:[#allocation2 + $0x5c] sm:$0x1] %v1704_v53  ;;  %v1134_v5 = vshrl.u32 %v962_v57, 16  ;;  %v1137_v7 = vshll.u32 %v962_v57, 16  ;;  %v9618_v30 = vld [vmem:[#allocation3 + $0x34] sm:$0xf]  ;;  %4047 = vrot.lane.b32.xlu0 %v3864_v56, %s9918_s17  ;;  %v3352_v31 = vsel %vm10152_vm12, %v9185_v1, %v3351_v2 }
 0x12f   : > { %v525_v21 = vpop.f32.mrf.mxu0  ;;  %v1497_v46 = vrot.slane %v1493_v60, 4  ;;  %v3355_v13 = vsel %vm10152_vm12, %v3353_v8, %v3354_v61  ;;  %v10635_v14 = vld [vmem:[#allocation2 + $0x16c] sm:$0xf]  ;;  %v9210_v22 = vrot.slane %v3217_v41, 9  ;;  %v864_v25 = vld [vmem:[#allocation2 + $0x68] sm:$0x1]  ;;  %v1504_v26 = vor.u32 %v1502_v0, %v10628_v9 }
 0x130   : > { %v10630_v10 = vrot.slane %v1134_v5, 7  ;;  %3564 = vrot.lane.b32.xlu1 %v3352_v31, %s9917_s8  ;;  %v526_v19 = vadd.f32 %v10554_v49, %v525_v21  ;;  %v9306_v20 = vld [vmem:[#allocation3 + $0x38] sm:$0xf0]  ;;  %3566 = vrot.lane.b32.xlu2 %v3355_v13, %s9917_s8  ;;  %v10640_v63 = vrot.slane %v2194_v39, 4  ;;  %v3526_v27 = vrot.slane %v10635_v14, 5  ;;  %v299_v43 = vld [vmem:[%s10056_s11 + $0x108] sm:$0xff] }
 0x131   : > { %v9309_v28 = vor.u32 %v9618_v30, %v9306_v20  ;;  %v1706_v54 = vld [vmem:[#allocation2 + $0x60] sm:$0xf]  ;;  %v933_v33 = vld [vmem:[#allocation2 + $0x17c] sm:$0x1]  ;;  %v1496_v34 = vor.u32 %v1494_v17, %v1493_v60  ;;  %v865_v35 = vsel %vm10101_vm4, 0, %v864_v25  ;;  %v1505_v15 = vsel %vm10230_vm15, %v1497_v46, %v1504_v26  ;;  %v3619_v25 = vpop.permute.xlu1 %3618 }
 0x132   : > { %v1139_v29 = vor.u32 %v1137_v7, %v10630_v10  ;;  %v663_v32 = vmax.f32 %v526_v19, 0.0  ;;  %v934_v37 = vsel %vm10101_vm4, 0, %v933_v33  ;;  %v4200_v38 = vld [vmem:[#allocation2 + $0x24] sm:$0xf]  ;;  %866 = vst [vmem:[#allocation2 + $0x68] sm:$0x1] %v865_v35  ;;  %v3527_v48 = vsel %vm10152_vm12, %v9210_v22, %v3526_v27 }
 0x133   : > { %9573 = vmatmul.msk.bf16.gmra.mxu2 %vm8467_vm1, %v9309_v28  ;;  %v3815_v45 = vld [vmem:[#allocation2 + $0x30] sm:$0xf]  ;;  %v4201_v12 = vld [vmem:[#allocation2 + $0x28] sm:$0xf]  ;;  %v4339_v16 = vshrl.u32 %v4200_v38, 16  ;;  %v1140_v23 = vrot.slane %v10630_v10, 4  ;;  %v346_v53 = vpack.c.bf16 %v299_v43, %v298_v36 }
 0x134   : > { %v1707_v11 = vsel %vm10215_vm13, %v1139_v29, %v1706_v54  ;;  %v963_v39 = vpack.c.bf16 %v663_v32, %v663_v32  ;;  %v4342_v50 = vshll.u32 %v4200_v38, 16  ;;  %v4348_v52 = vshll.u32 %v4201_v12, 16  ;;  %v1853_v40 = vld [vmem:[#allocation2 + $0x174] sm:$0xf]  ;;  %935 = vst [vmem:[#allocation2 + $0x17c] sm:$0x1] %v934_v37 }
 0x135   : > { %1708 = vst [vmem:[#allocation2 + $0x60] sm:$0xf] %v1707_v11  ;;  %v4352_v62 = vshrl.u32 %v4201_v12, 16  ;;  %v10656_v59 = vpop.permute.xlu2 %4039  ;;  %v1854_v56 = vsel %vm10215_vm13, %v1496_v34, %v1853_v40  ;;  %v4341_v57 = vrot.slane %v4339_v16, 4  ;;  %v7507_v1 = vld [vmem:[#allocation2 + $0x48] sm:$0xe] }
 0x136   : > { %v1142_v44 = vshrl.u32 %v963_v39, 16  ;;  %v1145_v3 = vshll.u32 %v963_v39, 16  ;;  %3664 = vrot.lane.b32.xlu0 %v3527_v48, %s9917_s8  ;;  %1856 = vst.msk [vmem:[#allocation2 + $0x178] sm:$0xf] %vm712_vm2, %v1505_v15  ;;  %v4344_v2 = vrot.slane %v4342_v50, 5  ;;  %v4350_v58 = vrot.slane %v4348_v52, 5  ;;  %v633_v15 = vpop.f32.mrf.mxu3 }
 0x137   : > { %v528_v60 = vpop.f32.mrf.mxu0  ;;  %1855 = vst [vmem:[#allocation2 + $0x174] sm:$0xf] %v1854_v56  ;;  %v4354_v4 = vrot.slane %v4352_v62, 4  ;;  %v1506_v5 = vrot.slane %v10628_v9, 4  ;;  %v7508_v8 = vld [vmem:[#allocation2 + $0x4c] sm:$0xf]  ;;  %v2197_v9 = vor.u32 %v10640_v63, %v10583_v51 }
 0x138   : > { %v1144_v61 = vrot.slane %v1142_v44, 7  ;;  %3949 = vrot.lane.b32.xlu2 %v3815_v45, %s9918_s17  ;;  %v4345_v7 = vor.u32 %v4344_v2, %v4341_v57  ;;  %v7509_v0 = vld [vmem:[#allocation2 + $0x50] sm:$0x1]  ;;  %v9250_v30 = vrot.slane %v7507_v1, 9  ;;  %v529_v17 = vadd.f32 %v10554_v49, %v528_v60  ;;  %v2094_v13 = vld [vmem:[#allocation2 + $0x16c] sm:$0xf] }
 0x139   : > { %v7717_v10 = vrot.slane %v7508_v8, 5  ;;  %v7720_v46 = vrot.slane %v7509_v0, 5  ;;  %v1710_v41 = vld [vmem:[#allocation2 + $0x68] sm:$0x1]  ;;  %v2095_v20 = vld [vmem:[#allocation2 + $0x170] sm:$0x1]  ;;  %v4355_v33 = vor.u32 %v4354_v4, %v4350_v58 }
 0x13a   : > { %v1147_v31 = vor.u32 %v1145_v3, %v1144_v61  ;;  %v1149_v21 = vrot.slane %v1144_v61, 4  ;;  %9166 = vmatmul.msk.bf16.gmra.mxu0 %vm382_vm0, %v346_v53  ;;  %v4346_v19 = vrot.slane %v4345_v7, 4  ;;  %v2790_v22 = vshll.u32 %v2094_v13, 16  ;;  %v757_v54 = vld [vmem:[#allocation2 + $0x6c] sm:$0x1]  ;;  %v10693_v50 = vld [vmem:[%s10056_s11 + $0x110] sm:$0xff] }
 0x13b   : > { %v7719_v29 = vrot.slane %v7717_v10, 4  ;;  %v4202_v32 = vld [vmem:[#allocation2 + $0x2c] sm:$0x1]  ;;  %v1857_v34 = vld [vmem:[#allocation2 + $0x17c] sm:$0x1]  ;;  %v7718_v51 = vsel %vm10152_vm12, %v9250_v30, %v7717_v10  ;;  %v2794_v37 = vshrl.u32 %v2094_v13, 16 }
 0x13c   : > { %v1148_v26 = vsel %vm10230_vm15, %v1140_v23, %v1147_v31  ;;  %v1711_v28 = vsel %vm10136_vm9, %v1149_v21, %v1710_v41  ;;  %v4351_v35 = vsel %vm10120_vm7, %v4346_v19, %v4350_v58  ;;  %v10681_v63 = vrot.slane %v2790_v22, 5  ;;  %7983 = vst.msk [vmem:[#allocation3 + $0x44] sm:$0xf] %vm712_vm2, %v7718_v51  ;;  %v2020_v48 = vld [vmem:[#allocation2 + $0x2c] sm:$0x1] }
 0x13d   : > { %1709 = vst.msk [vmem:[#allocation2 + $0x64] sm:$0xf] %vm712_vm2, %v1148_v26  ;;  %v10683_v38 = vpop.permute.xlu2 %3656  ;;  %v1858_v36 = vsel %vm10136_vm9, %v1506_v5, %v1857_v34  ;;  %5066 = vrot.lane.b32.xlu1 %v4351_v35, %s9919_s23  ;;  %v7721_v43 = vsel %vm10152_vm12, %v7719_v29, %v7720_v46  ;;  %v2800_v11 = vshll.u32 %v2095_v20, 16  ;;  %v664_v39 = vmax.f32 %v529_v17, 0.0  ;;  %v301_v2 = vld [vmem:[%s10056_s11 + $0x118] sm:$0xff] }
 0x13e   : > { %1712 = vst [vmem:[#allocation2 + $0x68] sm:$0x1] %v1711_v28  ;;  %v2796_v45 = vrot.slane %v2794_v37, 4  ;;  %v758_v12 = vsel %vm10136_vm9, 0, %v757_v54  ;;  %v2198_v16 = vrot.slane %v2197_v9, 4  ;;  %v4356_v62 = vrot.slane %v4355_v33, 4 }
 0x13f   : > { %1859 = vst [vmem:[#allocation2 + $0x17c] sm:$0x1] %v1858_v36  ;;  %v530_v23 = vpop.f32.mrf.mxu0  ;;  %v964_v52 = vpack.c.bf16 %v664_v39, %v664_v39  ;;  %v4358_v40 = vshll.u32 %v4202_v32, 16  ;;  %v2802_v53 = vrot.slane %v2800_v11, 5  ;;  %v2200_v56 = vshll.u32 %v2020_v48, 16 }
 0x140   : > { %v531_v44 = vadd.f32 %v10554_v49, %v530_v23  ;;  %7984 = vst.msk [vmem:[#allocation3 + $0x4c] sm:$0xf] %vm712_vm2, %v7721_v43  ;;  %v2797_v3 = vor.u32 %v2796_v45, %v10681_v63  ;;  %v10701_v57 = vrot.slane %v3526_v27, 4  ;;  %v867_v7 = vld [vmem:[#allocation2 + $0x74] sm:$0x1]  ;;  %v347_v8 = vpack.c.bf16 %v301_v2, %v10693_v50  ;;  %v635_v45 = vpop.f32.mrf.mxu3 }
 0x141   : > { %759 = vst [vmem:[#allocation2 + $0x6c] sm:$0x1] %v758_v12  ;;  %v1151_v58 = vshrl.u32 %v964_v52, 16  ;;  %v1154_v60 = vshll.u32 %v964_v52, 16  ;;  %v4360_v61 = vrot.slane %v4358_v40, 5  ;;  %v2202_v5 = vrot.slane %v2200_v56, 5 }
 0x142   : > { %v665_v1 = vmax.f32 %v531_v44, 0.0  ;;  %v2798_v4 = vrot.slane %v2797_v3, 4  ;;  %3778 = vst.msk [vmem:[#allocation3 + $0x108] sm:$0xf] %vm3744_vm5, %v3619_v25  ;;  %v868_v14 = vsel %vm10101_vm4, 0, %v867_v7  ;;  %v634_v39 = vadd.f32 %v10554_v49, %v633_v15 }
 0x143   : > { %v1153_v0 = vrot.slane %v1151_v58, 7  ;;  %v4361_v30 = vsel %vm10120_vm7, %v4356_v62, %v4360_v61  ;;  %v2093_v17 = vld [vmem:[#allocation2 + $0x168] sm:$0xf]  ;;  %v10710_v31 = vld [vmem:[#allocation2 + $0x170] sm:$0x1]  ;;  %v2203_v10 = vsel %vm10120_vm7, %v2198_v16, %v2202_v5  ;;  %v636_v2 = vadd.f32 %v10554_v49, %v635_v45 }
 0x144   : > { %v965_v27 = vpack.c.bf16 %v665_v1, %v665_v1  ;;  %v2803_v21 = vsel %vm10120_vm7, %v2798_v4, %v2802_v53  ;;  %5068 = vrot.lane.b32.xlu2 %v4361_v30, %s9919_s23  ;;  %869 = vst [vmem:[#allocation2 + $0x74] sm:$0x1] %v868_v14  ;;  %v2781_v46 = vshrl.u32 %v2093_v17, 16  ;;  %v2784_v13 = vshll.u32 %v2093_v17, 16  ;;  %v7510_v41 = vld [vmem:[#allocation2 + $0x54] sm:$0xe] }
 0x145   : > { %v10717_v19 = vpop.permute.xlu1 %4037  ;;  %v10719_v20 = vpop.permute.xlu2 %2982  ;;  %2990 = vrot.lane.b32.xlu0 %v2803_v21, %s9916_s24  ;;  %v1156_v22 = vor.u32 %v1154_v60, %v1153_v0  ;;  %v1157_v9 = vrot.slane %v1153_v0, 4  ;;  %2890 = vrot.lane.b32.xlu1 %v2203_v10, %s9916_s24  ;;  %v7511_v28 = vld [vmem:[#allocation2 + $0x58] sm:$0xf]  ;;  %v9620_v29 = vld [vmem:[#allocation3 + $0x44] sm:$0xf]  ;;  %v3529_v33 = vrot.slane %v10710_v31, 5 }
 0x146   : > { %v1159_v25 = vshrl.u32 %v965_v27, 16  ;;  %v1162_v26 = vshll.u32 %v965_v27, 16  ;;  %v2783_v54 = vrot.slane %v2781_v46, 4  ;;  %v2786_v32 = vrot.slane %v2784_v13, 5  ;;  %v7512_v43 = vld [vmem:[#allocation2 + $0x5c] sm:$0x1] }
 0x147   : > { %v9251_v34 = vrot.slane %v7510_v41, 9  ;;  %v533_v35 = vpop.f32.mrf.mxu0  ;;  %v10724_v51 = vpop.permute.xlu0 %3939  ;;  %v9314_v37 = vld [vmem:[#allocation3 + $0x48] sm:$0xf0]  ;;  %v7724_v11 = vrot.slane %v7511_v28, 5  ;;  %v7727_v50 = vrot.slane %v7512_v43, 5  ;;  %v3530_v14 = vsel %vm10152_vm12, %v10701_v57, %v3529_v33 }
 0x148   : > { %v1161_v36 = vrot.slane %v1159_v25, 7  ;;  %v9317_v12 = vor.u32 %v9620_v29, %v9314_v37  ;;  %v1713_v16 = vld [vmem:[#allocation2 + $0x6c] sm:$0xf]  ;;  %v2787_v23 = vor.u32 %v2786_v32, %v2783_v54  ;;  %v1934_v52 = vld [vmem:[#allocation2 + $0x154] sm:$0xf]  ;;  %v534_v62 = vadd.f32 %v10554_v49, %v533_v35 }
 0x149   : > { %v1714_v40 = vsel %vm10215_vm13, %v1156_v22, %v1713_v16  ;;  %v7725_v3 = vsel %vm10152_vm12, %v9251_v34, %v7724_v11  ;;  %1998 = vst.msk [vmem:[#allocation3 + $0x1a8] sm:$0xf] %vm712_vm2, %v1934_v52  ;;  %v3816_v15 = vld [vmem:[#allocation2 + $0x34] sm:$0xf]  ;;  %v7726_v56 = vrot.slane %v7724_v11, 4  ;;  %v707_v57 = vmax.f32 %v636_v2, 0.0 }
 0x14a   : > { %v1164_v48 = vor.u32 %v1162_v26, %v1161_v36  ;;  %v1166_v44 = vrot.slane %v1161_v36, 4  ;;  %9167 = vmatmul.msk.bf16.gmra.mxu0 %vm382_vm0, %v347_v8  ;;  %9574 = vmatmul.msk.bf16.gmra.mxu2 %vm8467_vm1, %v9317_v12  ;;  %1715 = vst [vmem:[#allocation2 + $0x6c] sm:$0xf] %v1714_v40  ;;  %v2788_v53 = vrot.slane %v2787_v23, 4  ;;  %v3145_v61 = vld [vmem:[#allocation2 + $0x30] sm:$0xe] }
 0x14b   : > { %v1717_v60 = vld [vmem:[#allocation2 + $0x74] sm:$0x1]  ;;  %7985 = vst.msk [vmem:[#allocation3 + $0x54] sm:$0xf] %vm712_vm2, %v7725_v3  ;;  %v7728_v7 = vsel %vm10152_vm12, %v7726_v56, %v7727_v50  ;;  %v666_v8 = vmax.f32 %v534_v62, 0.0  ;;  %v9186_v29 = vrot.slane %v3145_v61, 9  ;;  %v10780_v50 = vpack.c.bf16 %v707_v57, %v707_v57 }
 0x14c   : > { %v1165_v58 = vsel %vm10230_vm15, %v1157_v9, %v1164_v48  ;;  %v10739_v1 = vld [vmem:[#allocation2 + $0x34] sm:$0xf]  ;;  %v1718_v4 = vsel %vm10136_vm9, %v1166_v44, %v1717_v60  ;;  %v2793_v5 = vsel %vm10120_vm7, %v2788_v53, %v10681_v63  ;;  %v760_v0 = vld [vmem:[#allocation2 + $0x78] sm:$0x1]  ;;  %v706_v63 = vmax.f32 %v634_v39, 0.0 }
 0x14d   : > { %1716 = vst.msk [vmem:[#allocation2 + $0x70] sm:$0xf] %vm712_vm2, %v1165_v58  ;;  %v10749_v30 = vpop.permute.xlu2 %3943  ;;  %3951 = vrot.lane.b32.xlu0 %v3816_v15, %s9918_s17  ;;  %2988 = vrot.lane.b32.xlu2 %v2793_v5, %s9916_s24  ;;  %v761_v27 = vsel %vm10136_vm9, 0, %v760_v0  ;;  %v826_v17 = vld [vmem:[#allocation2 + $0x180] sm:$0x1]  ;;  %v10758_v31 = vpop.permute.xlu1 %2880  ;;  %v966_v21 = vpack.c.bf16 %v666_v8, %v666_v8  ;;  %v3358_v54 = vrot.slane %v10739_v1, 5 }
 0x14e   : > { %1719 = vst [vmem:[#allocation2 + $0x74] sm:$0x1] %v1718_v4  ;;  %3666 = vrot.lane.b32.xlu1 %v3530_v14, %s9917_s8  ;;  %v827_v10 = vsel %vm10136_vm9, 0, %v826_v17  ;;  %v2021_v46 = vld [vmem:[#allocation2 + $0x30] sm:$0xf]  ;;  %v1006_v22 = vpack.c.bf16 %v706_v63, %v706_v63 }
 0x14f   : > { %7986 = vst.msk [vmem:[#allocation3 + $0x5c] sm:$0xf] %vm712_vm2, %v7728_v7  ;;  %v535_v13 = vpop.f32.mrf.mxu0  ;;  %v10764_v41 = vpop.permute.xlu0 %3556  ;;  %v10768_v9 = vld [vmem:[#allocation2 + $0x34] sm:$0xf]  ;;  %v2205_v25 = vshrl.u32 %v2021_v46, 16  ;;  %v2208_v26 = vshll.u32 %v2021_v46, 16 }
 0x150   : > { %3122 = vst.msk [vmem:[#allocation3 + $0x1a8] sm:$0xf] %vm3068_vm3, %v10719_v20  ;;  %v536_v28 = vadd.f32 %v10554_v49, %v535_v13  ;;  %v1168_v32 = vshrl.u32 %v966_v21, 16  ;;  %v1171_v33 = vshll.u32 %v966_v21, 16  ;;  %v1508_v34 = vshrl.u32 %v1006_v22, 16  ;;  %v302_v14 = vld [vmem:[%s10056_s11 + $0x120] sm:$0xff] }
 0x151   : > { %762 = vst [vmem:[#allocation2 + $0x78] sm:$0x1] %v761_v27  ;;  %v2207_v35 = vrot.slane %v2205_v25, 4  ;;  %v2210_v37 = vrot.slane %v2208_v26, 5  ;;  %v2214_v20 = vshll.u32 %v10768_v9, 16  ;;  %v1511_v43 = vshll.u32 %v1006_v22, 16 }
 0x152   : > { %4131 = vst.msk [vmem:[#allocation3 + $0x8] sm:$0xf] %vm4129_vm6, %v10724_v51  ;;  %v10775_v36 = vrot.slane %v1168_v32, 7  ;;  %v2218_v11 = vshrl.u32 %v10768_v9, 16  ;;  %v9622_v39 = vld [vmem:[#allocation3 + $0x54] sm:$0xf]  ;;  %v3359_v51 = vsel %vm10152_vm12, %v9186_v29, %v3358_v54 }
 0x153   : > { %828 = vst [vmem:[#allocation2 + $0x180] sm:$0x1] %v827_v10  ;;  %v10778_v45 = vrot.slane %v1508_v34, 7  ;;  %v2211_v12 = vor.u32 %v2210_v37, %v2207_v35  ;;  %v4203_v16 = vld [vmem:[#allocation2 + $0x30] sm:$0xf]  ;;  %v667_v23 = vmax.f32 %v536_v28, 0.0 }
 0x154   : > { %v1173_v52 = vor.u32 %v1171_v33, %v10775_v36  ;;  %v3865_v62 = vld [vmem:[#allocation2 + $0x174] sm:$0xf]  ;;  %v4363_v48 = vshrl.u32 %v4203_v16, 16  ;;  %v4366_v44 = vshll.u32 %v4203_v16, 16  ;;  %v1174_v53 = vrot.slane %v10775_v36, 4  ;;  %v303_v27 = vld [vmem:[%s10056_s11 + $0x128] sm:$0xff] }
 0x155   : > { %v10787_v40 = vld [vmem:[#allocation2 + $0x34] sm:$0xf]  ;;  %v10789_v3 = vpop.permute.xlu2 %3560  ;;  %3568 = vrot.lane.b32.xlu0 %v3359_v51, %s9917_s8  ;;  %v2212_v56 = vrot.slane %v2211_v12, 4  ;;  %v10793_v2 = vrot.slane %v2214_v20, 5  ;;  %v10796_v60 = vpop.permute.xlu1 %3558  ;;  %v1513_v4 = vor.u32 %v1511_v43, %v10778_v45  ;;  %v1883_v8 = vld [vmem:[#allocation2 + $0xc] sm:$0xf]  ;;  %v967_v10 = vpack.c.bf16 %v667_v23, %v667_v23 }
 0x156   : > { %v9322_v15 = vld [vmem:[#allocation3 + $0x58] sm:$0xf0]  ;;  %v4372_v58 = vshll.u32 %v10787_v40, 16  ;;  %4049 = vrot.lane.b32.xlu1 %v3865_v62, %s9918_s17  ;;  %v4365_v5 = vrot.slane %v4363_v48, 4  ;;  %v4368_v7 = vrot.slane %v4366_v44, 5  ;;  %v1516_v46 = vshrl.u32 %v10780_v50, 16 }
 0x157   : > { %v9325_v61 = vor.u32 %v9622_v39, %v9322_v15  ;;  %v538_v0 = vpop.f32.mrf.mxu0  ;;  %v2217_v17 = vsel %vm10120_vm7, %v2212_v56, %v10793_v2  ;;  %1947 = vst.msk [vmem:[#allocation3 + $0x10] sm:$0xf] %vm712_vm2, %v1883_v8  ;;  %v870_v25 = vld [vmem:[#allocation2 + $0x80] sm:$0x1]  ;;  %v936_v26 = vld [vmem:[#allocation2 + $0x188] sm:$0x1]  ;;  %v348_v33 = vpack.c.bf16 %v303_v27, %v302_v14 }
 0x158   : > { %v1720_v63 = vld [vmem:[#allocation2 + $0x78] sm:$0xf]  ;;  %v10805_v21 = vrot.slane %v4372_v58, 5  ;;  %v10809_v13 = vpop.permute.xlu0 %5058  ;;  %2892 = vrot.lane.b32.xlu2 %v2217_v17, %s9916_s24  ;;  %v4369_v22 = vor.u32 %v4368_v7, %v4365_v5  ;;  %3071 = vst.msk [vmem:[#allocation3 + $0x10] sm:$0xf] %vm3068_vm3, %v10758_v31  ;;  %v871_v29 = vsel %vm10101_vm4, 0, %v870_v25 }
 0x159   : > { %v1721_v57 = vsel %vm10215_vm13, %v1173_v52, %v1720_v63  ;;  %v1176_v32 = vshrl.u32 %v967_v10, 16  ;;  %872 = vst [vmem:[#allocation2 + $0x80] sm:$0x1] %v871_v29  ;;  %v1179_v37 = vshll.u32 %v967_v10, 16  ;;  %v937_v31 = vsel %vm10101_vm4, 0, %v936_v26 }
 0x15a   : > { %1722 = vst [vmem:[#allocation2 + $0x78] sm:$0xf] %v1721_v57  ;;  %v1860_v28 = vld [vmem:[#allocation2 + $0x180] sm:$0xf]  ;;  %9575 = vmatmul.msk.bf16.gmra.mxu2 %vm8467_vm1, %v9325_v61  ;;  %v4370_v35 = vrot.slane %v4369_v22, 4  ;;  %v1514_v20 = vrot.slane %v10778_v45, 4  ;;  %9168 = vmatmul.msk.bf16.gmra.mxu0 %vm382_vm0, %v348_v33  ;;  %v539_v52 = vadd.f32 %v10554_v49, %v538_v0 }
 0x15b   : > { %v1861_v34 = vsel %vm10215_vm13, %v1513_v4, %v1860_v28  ;;  %v1178_v43 = vrot.slane %v1176_v32, 7  ;;  %v1518_v39 = vrot.slane %v1516_v46, 7  ;;  %v1519_v12 = vshll.u32 %v10780_v50, 16  ;;  %3747 = vst.msk [vmem:[#allocation3 + $0x10] sm:$0xf] %vm3744_vm5, %v10764_v41 }
 0x15c   : > { %1862 = vst [vmem:[#allocation2 + $0x180] sm:$0xf] %v1861_v34  ;;  %v4375_v16 = vsel %vm10120_vm7, %v4370_v35, %v10805_v21  ;;  %v4376_v23 = vshrl.u32 %v10787_v40, 16  ;;  %v3147_v51 = vld [vmem:[#allocation2 + $0x38] sm:$0x1]  ;;  %v3360_v45 = vrot.slane %v3358_v54, 4 }
 0x15d   : > { %5070 = vrot.lane.b32.xlu0 %v4375_v16, %s9919_s23  ;;  %v1181_v50 = vor.u32 %v1179_v37, %v1178_v43  ;;  %v1183_v62 = vrot.slane %v1178_v43, 4  ;;  %938 = vst [vmem:[#allocation2 + $0x188] sm:$0x1] %v937_v31  ;;  %v1521_v48 = vor.u32 %v1519_v12, %v1518_v39  ;;  %v1523_v44 = vrot.slane %v1518_v39, 4  ;;  %v3866_v15 = vld [vmem:[#allocation2 + $0x178] sm:$0xf]  ;;  %v10836_v58 = vpop.permute.xlu2 %2884  ;;  %v10838_v61 = vpop.permute.xlu1 %3941 }
 0x15e   : > { %v7513_v56 = vld [vmem:[#allocation2 + $0x60] sm:$0xe]  ;;  %v3361_v41 = vrot.slane %v3147_v51, 5  ;;  %v7514_v4 = vld [vmem:[#allocation2 + $0x64] sm:$0xf]  ;;  %v2220_v36 = vrot.slane %v2218_v11, 4 }
 0x15f   : > { %v7515_v5 = vld [vmem:[#allocation2 + $0x68] sm:$0x1]  ;;  %v9252_v1 = vrot.slane %v7513_v56, 9  ;;  %v540_v54 = vpop.f32.mrf.mxu0  ;;  %v1182_v7 = vsel %vm10230_vm15, %v1174_v53, %v1181_v50  ;;  %v1522_v8 = vsel %vm10230_vm15, %v1514_v20, %v1521_v48  ;;  %v7731_v0 = vrot.slane %v7514_v4, 5  ;;  %v2023_v27 = vld [vmem:[#allocation2 + $0x38] sm:$0x1] }
 0x160   : > { %v7734_v14 = vrot.slane %v7515_v5, 5  ;;  %v763_v63 = vld [vmem:[#allocation2 + $0x84] sm:$0x1]  ;;  %v10846_v17 = vpop.permute.xlu0 %3658  ;;  %1723 = vst.msk [vmem:[#allocation2 + $0x7c] sm:$0xf] %vm712_vm2, %v1182_v7  ;;  %4051 = vrot.lane.b32.xlu2 %v3866_v15, %s9918_s17  ;;  %v3362_v10 = vsel %vm10152_vm12, %v3360_v45, %v3361_v41  ;;  %v2224_v53 = vshll.u32 %v2023_v27, 16  ;;  %v541_v28 = vadd.f32 %v10554_v49, %v540_v54 }
 0x161   : > { %v668_v46 = vmax.f32 %v539_v52, 0.0  ;;  %v1724_v57 = vld [vmem:[#allocation2 + $0x80] sm:$0x1]  ;;  %1863 = vst.msk [vmem:[#allocation2 + $0x184] sm:$0xf] %vm712_vm2, %v1522_v8  ;;  %3570 = vrot.lane.b32.xlu1 %v3362_v10, %s9917_s8  ;;  %v7732_v22 = vsel %vm10152_vm12, %v9252_v1, %v7731_v0  ;;  %v7733_v25 = vrot.slane %v7731_v0, 4  ;;  %v2221_v11 = vor.u32 %v2220_v36, %v10793_v2 }
 0x162   : > { %v764_v26 = vsel %vm10136_vm9, 0, %v763_v63  ;;  %v1725_v9 = vsel %vm10136_vm9, %v1183_v62, %v1724_v57  ;;  %7987 = vst.msk [vmem:[#allocation3 + $0x64] sm:$0xf] %vm712_vm2, %v7732_v22  ;;  %v2226_v29 = vrot.slane %v2224_v53, 5  ;;  %v3220_v33 = vld [vmem:[#allocation2 + $0x174] sm:$0xe] }
 0x163   : > { %v968_v32 = vpack.c.bf16 %v668_v46, %v668_v46  ;;  %1726 = vst [vmem:[#allocation2 + $0x80] sm:$0x1] %v1725_v9  ;;  %v7735_v34 = vsel %vm10152_vm12, %v7733_v25, %v7734_v14  ;;  %v3221_v35 = vld [vmem:[#allocation2 + $0x178] sm:$0xf]  ;;  %v9211_v37 = vrot.slane %v3220_v33, 9  ;;  %v2222_v20 = vrot.slane %v2221_v11, 4 }
 0x164   : > { %v1864_v31 = vld [vmem:[#allocation2 + $0x188] sm:$0x1]  ;;  %7988 = vst.msk [vmem:[#allocation3 + $0x6c] sm:$0xf] %vm712_vm2, %v7735_v34  ;;  %v3533_v12 = vrot.slane %v3221_v35, 5  ;;  %v669_v50 = vmax.f32 %v541_v28, 0.0 }
 0x165   : > { %v1185_v43 = vshrl.u32 %v968_v32, 16  ;;  %v1865_v39 = vsel %vm10136_vm9, %v1523_v44, %v1864_v31  ;;  %765 = vst [vmem:[#allocation2 + $0x84] sm:$0x1] %v764_v26  ;;  %v1188_v2 = vshll.u32 %v968_v32, 16  ;;  %v10870_v16 = vpop.permute.xlu1 %2882  ;;  %v2227_v51 = vsel %vm10120_vm7, %v2222_v20, %v2226_v29  ;;  %v1885_v52 = vld [vmem:[#allocation2 + $0x18] sm:$0xf] }
 0x166   : > { %1866 = vst [vmem:[#allocation2 + $0x188] sm:$0x1] %v1865_v39  ;;  %2894 = vrot.lane.b32.xlu0 %v2227_v51, %s9916_s24  ;;  %v3534_v48 = vsel %vm10152_vm12, %v9211_v37, %v3533_v12  ;;  %v3222_v44 = vld [vmem:[#allocation2 + $0x17c] sm:$0x1]  ;;  %v4378_v15 = vrot.slane %v4376_v23, 4  ;;  %v3535_v1 = vrot.slane %v3533_v12, 4  ;;  %v969_v54 = vpack.c.bf16 %v669_v50, %v669_v50 }
 0x167   : > { %v1187_v45 = vrot.slane %v1185_v43, 7  ;;  %v543_v62 = vpop.f32.mrf.mxu0  ;;  %5251 = vst.msk [vmem:[#allocation3] sm:$0xf] %vm5250_vm8, %v10809_v13  ;;  %v10881_v56 = vpop.permute.xlu2 %5062  ;;  %v3817_v5 = vld [vmem:[#allocation2 + $0x3c] sm:$0xf]  ;;  %v3536_v40 = vrot.slane %v3222_v44, 5 }
 0x168   : > { %v544_v41 = vadd.f32 %v10554_v49, %v543_v62  ;;  %3668 = vrot.lane.b32.xlu2 %v3534_v48, %s9917_s8  ;;  %1949 = vst.msk [vmem:[#allocation3 + $0x20] sm:$0xf] %vm712_vm2, %v1885_v52  ;;  %v4379_v23 = vor.u32 %v4378_v15, %v10805_v21  ;;  %v10890_v8 = vpop.permute.xlu0 %4041  ;;  %v873_v0 = vld [vmem:[#allocation2 + $0x8c] sm:$0x1]  ;;  %v1193_v14 = vshrl.u32 %v969_v54, 16  ;;  %v1196_v27 = vshll.u32 %v969_v54, 16 }
 0x169   : > { %v1191_v4 = vrot.slane %v1187_v45, 4  ;;  %v9624_v13 = vld [vmem:[#allocation3 + $0x64] sm:$0xf]  ;;  %v1190_v7 = vor.u32 %v1188_v2, %v1187_v45  ;;  %3953 = vrot.lane.b32.xlu1 %v3817_v5, %s9918_s17  ;;  %3073 = vst.msk [vmem:[#allocation3 + $0x20] sm:$0xf] %vm3068_vm3, %v10836_v58  ;;  %v874_v58 = vsel %vm10101_vm4, 0, %v873_v0  ;;  %v3537_v22 = vsel %vm10152_vm12, %v3535_v1, %v3536_v40 }
 0x16a   : > { %v670_v49 = vmax.f32 %v544_v41, 0.0  ;;  %3749 = vst.msk [vmem:[#allocation3 + $0x20] sm:$0xf] %vm3744_vm5, %v10789_v3  ;;  %v4380_v10 = vrot.slane %v4379_v23, 4  ;;  %v1195_v46 = vrot.slane %v1193_v14, 7  ;;  %v304_v57 = vld [vmem:[%s10056_s11 + $0x130] sm:$0xff] }
 0x16b   : > { %v9330_v63 = vld [vmem:[#allocation3 + $0x68] sm:$0xf0]  ;;  %4132 = vst.msk [vmem:[#allocation3 + $0x10] sm:$0xf] %vm4129_vm6, %v10838_v61  ;;  %v2097_v61 = vld [vmem:[#allocation2 + $0x178] sm:$0xf] }
 0x16c   : > { %v10898_v36 = vpack.c.bf16 %v670_v49, %v670_v49  ;;  %v9333_v21 = vor.u32 %v9624_v13, %v9330_v63  ;;  %v1727_v53 = vld [vmem:[#allocation2 + $0x84] sm:$0xf]  ;;  %875 = vst [vmem:[#allocation2 + $0x8c] sm:$0x1] %v874_v58  ;;  %v2098_v25 = vld [vmem:[#allocation2 + $0x17c] sm:$0x1]  ;;  %v1198_v28 = vor.u32 %v1196_v27, %v1195_v46 }
 0x16d   : > { %v1728_v3 = vsel %vm10215_vm13, %v1190_v7, %v1727_v53  ;;  %3798 = vst.msk [vmem:[#allocation3 + $0x1a8] sm:$0xf] %vm3744_vm5, %v10846_v17  ;;  %v10907_v26 = vpop.permute.xlu1 %5060  ;;  %v1200_v9 = vrot.slane %v1195_v46, 4  ;;  %v2814_v11 = vshll.u32 %v2097_v61, 16  ;;  %v2818_v29 = vshrl.u32 %v2097_v61, 16  ;;  %v305_v32 = vld [vmem:[%s10056_s11 + $0x138] sm:$0xff] }
 0x16e   : > { %9576 = vmatmul.msk.bf16.gmra.mxu2 %vm8467_vm1, %v9333_v21  ;;  %1729 = vst [vmem:[#allocation2 + $0x84] sm:$0xf] %v1728_v3  ;;  %3670 = vrot.lane.b32.xlu0 %v3537_v22, %s9917_s8  ;;  %v2824_v34 = vshll.u32 %v2098_v25, 16  ;;  %v4205_v35 = vld [vmem:[#allocation2 + $0x38] sm:$0x1]  ;;  %v1202_v17 = vshrl.u32 %v10898_v36, 16  ;;  %v349_v31 = vpack.c.bf16 %v305_v32, %v304_v57  ;;  %v1199_v43 = vsel %vm10230_vm15, %v1191_v4, %v1198_v28  ;;  %v638_v21 = vpop.f32.mrf.mxu3 }
 0x16f   : > { %v545_v33 = vpop.f32.mrf.mxu0  ;;  %v7516_v37 = vld [vmem:[#allocation2 + $0x6c] sm:$0xe]  ;;  %v10913_v20 = vpop.permute.xlu2 %2886  ;;  %v10917_v39 = vrot.slane %v2814_v11, 5  ;;  %v2820_v2 = vrot.slane %v2818_v29, 4  ;;  %v4382_v12 = vshll.u32 %v4205_v35, 16  ;;  %v1205_v58 = vshll.u32 %v10898_v36, 16 }
 0x170   : > { %v7517_v51 = vld [vmem:[#allocation2 + $0x70] sm:$0xf]  ;;  %1730 = vst.msk [vmem:[#allocation2 + $0x88] sm:$0xf] %vm712_vm2, %v1199_v43  ;;  %v2826_v45 = vrot.slane %v2824_v34, 5  ;;  %v9253_v50 = vrot.slane %v7516_v37, 9  ;;  %9169 = vmatmul.msk.bf16.gmra.mxu0 %vm382_vm0, %v349_v31  ;;  %v10930_v13 = vpop.permute.xlu0 %3562 }
 0x171   : > { %v7518_v52 = vld [vmem:[#allocation2 + $0x74] sm:$0x1]  ;;  %v2821_v62 = vor.u32 %v2820_v2, %v10917_v39  ;;  %v4384_v48 = vrot.slane %v4382_v12, 5  ;;  %v7738_v44 = vrot.slane %v7517_v51, 5  ;;  %5253 = vst.msk [vmem:[#allocation3 + $0x10] sm:$0xf] %vm5250_vm8, %v10881_v56 }
 0x172   : > { %v7741_v15 = vrot.slane %v7518_v52, 5  ;;  %v3867_v4 = vld [vmem:[#allocation2 + $0x180] sm:$0xf]  ;;  %v1884_v5 = vld [vmem:[#allocation2 + $0x10] sm:$0xf]  ;;  %v10940_v14 = vrot.slane %v1202_v17, 7 }
 0x173   : > { %v1731_v41 = vld [vmem:[#allocation2 + $0x8c] sm:$0x1]  ;;  %v10927_v1 = vld [vmem:[%s13885_s2] ss:$0 sm:$0xff]  ;;  %v2822_v40 = vrot.slane %v2821_v62, 4  ;;  %v4385_v23 = vsel %vm10120_vm7, %v4380_v10, %v4384_v48  ;;  %v7739_v56 = vsel %vm10152_vm12, %v9253_v50, %v7738_v44  ;;  %v7740_v0 = vrot.slane %v7738_v44, 4 }
 0x174   : > { %v546_v54 = vadd.f32 %v10927_v1, %v545_v33  ;;  %v1732_v7 = vsel %vm10136_vm9, %v1200_v9, %v1731_v41  ;;  %1948 = vst.msk [vmem:[#allocation3 + $0x18] sm:$0xf] %vm712_vm2, %v1884_v5  ;;  %v766_v49 = vld [vmem:[#allocation2 + $0x90] sm:$0x1]  ;;  %5072 = vrot.lane.b32.xlu1 %v4385_v23, %s9919_s23  ;;  %v2096_v10 = vld [vmem:[#allocation2 + $0x174] sm:$0xf]  ;;  %v639_v61 = vadd.f32 %v10927_v1, %v638_v21 }
 0x175   : > { %1733 = vst [vmem:[#allocation2 + $0x8c] sm:$0x1] %v1732_v7  ;;  %v2827_v27 = vsel %vm10120_vm7, %v2822_v40, %v2826_v45  ;;  %v767_v63 = vsel %vm10136_vm9, 0, %v766_v49  ;;  %v7742_v46 = vsel %vm10152_vm12, %v7740_v0, %v7741_v15  ;;  %v1208_v57 = vrot.slane %v10940_v14, 4  ;;  %v1886_v22 = vld [vmem:[#allocation2 + $0x1c] sm:$0xf] }
 0x176   : > { %7989 = vst.msk [vmem:[#allocation3 + $0x74] sm:$0xf] %vm712_vm2, %v7739_v56  ;;  %2994 = vrot.lane.b32.xlu2 %v2827_v27, %s9916_s24  ;;  %4053 = vrot.lane.b32.xlu0 %v3867_v4, %s9918_s17  ;;  %v2805_v3 = vshrl.u32 %v2096_v10, 16  ;;  %v2808_v28 = vshll.u32 %v2096_v10, 16  ;;  %v10961_v9 = vld [vmem:[#allocation2 + $0x40] sm:$0xf] }
 0x177   : > { %v548_v53 = vpop.f32.mrf.mxu0  ;;  %3072 = vst.msk [vmem:[#allocation3 + $0x18] sm:$0xf] %vm3068_vm3, %v10870_v16  ;;  %v10956_v36 = vpop.permute.xlu2 %3662  ;;  %v671_v11 = vmax.f32 %v546_v54, 0.0  ;;  %v3150_v32 = vld [vmem:[#allocation2 + $0x44] sm:$0x1]  ;;  %v3365_v33 = vrot.slane %v10961_v9, 5 }
 0x178   : > { %v10958_v25 = vpop.permute.xlu1 %2980  ;;  %7990 = vst.msk [vmem:[#allocation3 + $0x7c] sm:$0xf] %vm712_vm2, %v7742_v46  ;;  %v549_v29 = vadd.f32 %v10927_v1, %v548_v53  ;;  %v2807_v16 = vrot.slane %v2805_v3, 4  ;;  %v2810_v34 = vrot.slane %v2808_v28, 5  ;;  %v3368_v35 = vrot.slane %v3150_v32, 5  ;;  %v10978_v44 = vpop.permute.xlu0 %3945  ;;  %v306_v15 = vld [vmem:[%s10056_s11 + $0x140] sm:$0xff] }
 0x179   : > { %3748 = vst.msk [vmem:[#allocation3 + $0x18] sm:$0xf] %vm3744_vm5, %v10796_v60  ;;  %v876_v37 = vld [vmem:[#allocation2 + $0x98] sm:$0x1]  ;;  %v971_v17 = vpack.c.bf16 %v671_v11, %v671_v11  ;;  %v3367_v31 = vrot.slane %v3365_v33, 4  ;;  %v708_v60 = vmax.f32 %v639_v61, 0.0  ;;  %v640_v11 = vpop.f32.mrf.mxu3 }
 0x17a   : > { %4133 = vst.msk [vmem:[#allocation3 + $0x18] sm:$0xf] %vm4129_vm6, %v10749_v30  ;;  %v877_v43 = vsel %vm10101_vm4, 0, %v876_v37  ;;  %v672_v2 = vmax.f32 %v549_v29, 0.0  ;;  %v3818_v12 = vld [vmem:[#allocation2 + $0x40] sm:$0xf]  ;;  %v2811_v51 = vor.u32 %v2810_v34, %v2807_v16 }
 0x17b   : > { %768 = vst [vmem:[#allocation2 + $0x90] sm:$0x1] %v767_v63  ;;  %v1210_v45 = vshrl.u32 %v971_v17, 16  ;;  %v1213_v30 = vshll.u32 %v971_v17, 16  ;;  %v829_v52 = vld [vmem:[#allocation2 + $0x18c] sm:$0x1]  ;;  %v1008_v48 = vpack.c.bf16 %v708_v60, %v708_v60  ;;  %v3369_v4 = vsel %vm10152_vm12, %v3367_v31, %v3368_v35 }
 0x17c   : > { %1950 = vst.msk [vmem:[#allocation3 + $0x28] sm:$0xf] %vm712_vm2, %v1886_v22  ;;  %v830_v62 = vsel %vm10136_vm9, 0, %v829_v52  ;;  %v2812_v41 = vrot.slane %v2811_v51, 4  ;;  %v3148_v54 = vld [vmem:[#allocation2 + $0x3c] sm:$0xe]  ;;  %v10999_v21 = vpack.c.bf16 %v672_v2, %v672_v2 }
 0x17d   : > { %v9626_v50 = vld [vmem:[#allocation3 + $0x74] sm:$0xf]  ;;  %3074 = vst.msk [vmem:[#allocation3 + $0x28] sm:$0xf] %vm3068_vm3, %v10913_v20  ;;  %v1212_v5 = vrot.slane %v1210_v45, 7  ;;  %v1207_v20 = vor.u32 %v1205_v58, %v10940_v14  ;;  %v1525_v40 = vshrl.u32 %v1008_v48, 16 }
 0x17e   : > { %5252 = vst.msk [vmem:[#allocation3 + $0x8] sm:$0xf] %vm5250_vm8, %v10907_v26  ;;  %3955 = vrot.lane.b32.xlu2 %v3818_v12, %s9918_s17  ;;  %3574 = vrot.lane.b32.xlu0 %v3369_v4, %s9917_s8  ;;  %v2817_v56 = vsel %vm10120_vm7, %v2812_v41, %v10917_v39  ;;  %v1528_v26 = vshll.u32 %v1008_v48, 16  ;;  %v2024_v0 = vld [vmem:[#allocation2 + $0x3c] sm:$0xf]  ;;  %v9187_v58 = vrot.slane %v3148_v54, 9  ;;  %v641_v12 = vadd.f32 %v10927_v1, %v640_v11 }
 0x17f   : > { %v9338_v7 = vld [vmem:[#allocation3 + $0x78] sm:$0xf0]  ;;  %878 = vst [vmem:[#allocation2 + $0x98] sm:$0x1] %v877_v43  ;;  %v1215_v49 = vor.u32 %v1213_v30, %v1212_v5  ;;  %v307_v27 = vld [vmem:[%s10056_s11 + $0x148] sm:$0xff]  ;;  %2992 = vrot.lane.b32.xlu1 %v2817_v56, %s9916_s24  ;;  %v10995_v63 = vrot.slane %v1525_v40, 7  ;;  %v11001_v46 = vpop.permute.xlu2 %4045  ;;  %v550_v29 = vpop.f32.mrf.mxu0 }
 0x180   : > { %v9341_v23 = vor.u32 %v9626_v50, %v9338_v7  ;;  %3750 = vst.msk [vmem:[#allocation3 + $0x28] sm:$0xf] %vm3744_vm5, %v10930_v13  ;;  %v10997_v10 = vld [vmem:[#allocation2 + $0x40] sm:$0xf]  ;;  %v350_v53 = vpack.c.bf16 %v307_v27, %v306_v15  ;;  %v11003_v39 = vpop.permute.xlu1 %4043  ;;  %v2229_v22 = vshrl.u32 %v2024_v0, 16  ;;  %v2232_v61 = vshll.u32 %v2024_v0, 16 }
 0x181   : > { %831 = vst [vmem:[#allocation2 + $0x18c] sm:$0x1] %v830_v62  ;;  %v1216_v3 = vsel %vm10230_vm15, %v1208_v57, %v1215_v49  ;;  %v2238_v28 = vshll.u32 %v10997_v10, 16  ;;  %v1217_v32 = vrot.slane %v1212_v5, 4  ;;  %v7519_v34 = vld [vmem:[#allocation2 + $0x78] sm:$0xe]  ;;  %v1530_v17 = vor.u32 %v1528_v26, %v10995_v63 }
 0x182   : > { %9577 = vmatmul.msk.bf16.gmra.mxu2 %vm8467_vm1, %v9341_v23  ;;  %v1734_v13 = vld [vmem:[#allocation2 + $0x90] sm:$0xf]  ;;  %1737 = vst.msk [vmem:[#allocation2 + $0x94] sm:$0xf] %vm712_vm2, %v1216_v3  ;;  %9170 = vmatmul.msk.bf16.gmra.mxu0 %vm382_vm0, %v350_v53  ;;  %v1531_v14 = vrot.slane %v10995_v63, 4  ;;  %v2231_v35 = vrot.slane %v2229_v22, 4  ;;  %v3366_v45 = vsel %vm10152_vm12, %v9187_v58, %v3365_v33  ;;  %v11032_v9 = vpop.permute.xlu0 %5064  ;;  %v551_v22 = vadd.f32 %v10927_v1, %v550_v29 }
 0x183   : > { %v1735_v16 = vsel %vm10215_vm13, %v1207_v20, %v1734_v13  ;;  %v2234_v57 = vrot.slane %v2232_v61, 5  ;;  %v11016_v37 = vrot.slane %v2238_v28, 5  ;;  %v7520_v31 = vld [vmem:[#allocation2 + $0x7c] sm:$0xf]  ;;  %v7521_v43 = vld [vmem:[#allocation2 + $0x80] sm:$0x1] }
 0x184   : > { %1736 = vst [vmem:[#allocation2 + $0x90] sm:$0xf] %v1735_v16  ;;  %v9254_v60 = vrot.slane %v7519_v34, 9  ;;  %v1219_v2 = vshrl.u32 %v10999_v21, 16  ;;  %v7745_v52 = vrot.slane %v7520_v31, 5  ;;  %v7748_v50 = vrot.slane %v7521_v43, 5 }
 0x185   : > { %v2235_v30 = vor.u32 %v2234_v57, %v2231_v35  ;;  %v3819_v62 = vld [vmem:[#allocation2 + $0x48] sm:$0xf]  ;;  %v2242_v15 = vshrl.u32 %v10997_v10, 16  ;;  %v1933_v41 = vld [vmem:[#allocation2 + $0x150] sm:$0xf]  ;;  %v1222_v56 = vshll.u32 %v10999_v21, 16 }
 0x186   : > { %v1738_v51 = vld [vmem:[#allocation2 + $0x98] sm:$0x1]  ;;  %3572 = vrot.lane.b32.xlu2 %v3366_v45, %s9917_s8  ;;  %3957 = vrot.lane.b32.xlu0 %v3819_v62, %s9918_s17  ;;  %v769_v4 = vld [vmem:[#allocation2 + $0x9c] sm:$0x1]  ;;  %v11030_v5 = vrot.slane %v1219_v2, 7  ;;  %v7746_v7 = vsel %vm10152_vm12, %v9254_v60, %v7745_v52  ;;  %v7747_v20 = vrot.slane %v7745_v52, 4 }
 0x187   : > { %v1739_v48 = vsel %vm10136_vm9, %v1217_v32, %v1738_v51  ;;  %v2236_v54 = vrot.slane %v2235_v30, 4  ;;  %7991 = vst.msk [vmem:[#allocation3 + $0x84] sm:$0xf] %vm712_vm2, %v7746_v7  ;;  %v770_v23 = vsel %vm10136_vm9, 0, %v769_v4  ;;  %v939_v49 = vld [vmem:[#allocation2 + $0x194] sm:$0x1]  ;;  %v553_v35 = vpop.f32.mrf.mxu0 }
 0x188   : > { %1740 = vst [vmem:[#allocation2 + $0x98] sm:$0x1] %v1739_v48  ;;  %v1867_v33 = vld [vmem:[#allocation2 + $0x18c] sm:$0xf]  ;;  %v7749_v0 = vsel %vm10152_vm12, %v7747_v20, %v7748_v50  ;;  %v1225_v27 = vrot.slane %v11030_v5, 4  ;;  %v709_v58 = vmax.f32 %v641_v12, 0.0  ;;  %v11053_v28 = vpop.permute.xlu1 %3660  ;;  %v1224_v20 = vor.u32 %v1222_v56, %v11030_v5 }
 0x189   : > { %v1868_v40 = vsel %vm10215_vm13, %v1530_v17, %v1867_v33  ;;  %v2241_v26 = vsel %vm10120_vm7, %v2236_v54, %v11016_v37  ;;  %v4206_v53 = vld [vmem:[#allocation2 + $0x3c] sm:$0xf]  ;;  %7992 = vst.msk [vmem:[#allocation3 + $0x8c] sm:$0xf] %vm712_vm2, %v7749_v0  ;;  %v4207_v13 = vld [vmem:[#allocation2 + $0x40] sm:$0xf]  ;;  %v554_v33 = vadd.f32 %v10927_v1, %v553_v35 }
 0x18a   : > { %1869 = vst [vmem:[#allocation2 + $0x18c] sm:$0xf] %v1868_v40  ;;  %2896 = vrot.lane.b32.xlu1 %v2241_v26, %s9916_s24  ;;  %v4387_v3 = vshrl.u32 %v4206_v53, 16  ;;  %v4390_v21 = vshll.u32 %v4206_v53, 16  ;;  %v11051_v61 = vpop.permute.xlu2 %3566  ;;  %v940_v11 = vsel %vm10101_vm4, 0, %v939_v49  ;;  %v1009_v16 = vpack.c.bf16 %v709_v58, %v709_v58  ;;  %v308_v35 = vld [vmem:[%s10056_s11 + $0x150] sm:$0xff] }
 0x18b   : > { %1997 = vst.msk [vmem:[#allocation3 + $0x1a0] sm:$0xf] %vm712_vm2, %v1933_v41  ;;  %v4396_v32 = vshll.u32 %v4207_v13, 16  ;;  %v4400_v34 = vshrl.u32 %v4207_v13, 16  ;;  %v4208_v31 = vld [vmem:[#allocation2 + $0x44] sm:$0x1] }
 0x18c   : > { %3121 = vst.msk [vmem:[#allocation3 + $0x1a0] sm:$0xf] %vm3068_vm3, %v10958_v25  ;;  %v4389_v57 = vrot.slane %v4387_v3, 4  ;;  %v4392_v17 = vrot.slane %v4390_v21, 5  ;;  %v1533_v29 = vshrl.u32 %v1009_v16, 16  ;;  %v1536_v43 = vshll.u32 %v1009_v16, 16 }
 0x18d   : > { %3797 = vst.msk [vmem:[#allocation3 + $0x1a0] sm:$0xf] %vm3744_vm5, %v10683_v38  ;;  %v4398_v60 = vrot.slane %v4396_v32, 5  ;;  %v4402_v2 = vrot.slane %v4400_v34, 4  ;;  %v4406_v51 = vshll.u32 %v4208_v31, 16  ;;  %v673_v45 = vmax.f32 %v551_v22, 0.0 }
 0x18e   : > { %4182 = vst.msk [vmem:[#allocation3 + $0x1a0] sm:$0xf] %vm4129_vm6, %v10890_v8  ;;  %v4393_v12 = vor.u32 %v4392_v17, %v4389_v57  ;;  %v879_v30 = vld [vmem:[#allocation2 + $0xa4] sm:$0x1]  ;;  %v9628_v52 = vld [vmem:[#allocation3 + $0x84] sm:$0xf] }
 0x18f   : > { %771 = vst [vmem:[#allocation2 + $0x9c] sm:$0x1] %v770_v23  ;;  %v11064_v25 = vrot.slane %v1533_v29, 7  ;;  %v3868_v50 = vld [vmem:[#allocation2 + $0x184] sm:$0xf]  ;;  %v4403_v62 = vor.u32 %v4402_v2, %v4398_v60  ;;  %v880_v38 = vsel %vm10101_vm4, 0, %v879_v30  ;;  %v973_v4 = vpack.c.bf16 %v673_v45, %v673_v45  ;;  %v555_v57 = vpop.f32.mrf.mxu0 }
 0x190   : > { %4134 = vst.msk [vmem:[#allocation3 + $0x20] sm:$0xf] %vm4129_vm6, %v10978_v44  ;;  %v4394_v48 = vrot.slane %v4393_v12, 4  ;;  %v4408_v41 = vrot.slane %v4406_v51, 5  ;;  %v2026_v8 = vld [vmem:[#allocation2 + $0x44] sm:$0x1]  ;;  %v11071_v54 = vpop.permute.xlu0 %2984 }
 0x191   : > { %v9346_v7 = vld [vmem:[#allocation3 + $0x88] sm:$0xf0]  ;;  %941 = vst [vmem:[#allocation2 + $0x194] sm:$0x1] %v940_v11  ;;  %v1538_v40 = vor.u32 %v1536_v43, %v11064_v25  ;;  %v1540_v23 = vrot.slane %v11064_v25, 4  ;;  %v4404_v49 = vrot.slane %v4403_v62, 4 }
 0x192   : > { %v9349_v26 = vor.u32 %v9628_v52, %v9346_v7  ;;  %v4399_v44 = vsel %vm10120_vm7, %v4394_v48, %v4398_v60  ;;  %4055 = vrot.lane.b32.xlu1 %v3868_v50, %s9918_s17  ;;  %4183 = vst.msk [vmem:[#allocation3 + $0x1a8] sm:$0xf] %vm4129_vm6, %v11003_v39  ;;  %v1227_v0 = vshrl.u32 %v973_v4, 16  ;;  %v1230_v58 = vshll.u32 %v973_v4, 16  ;;  %v3223_v53 = vld [vmem:[#allocation2 + $0x180] sm:$0xe]  ;;  %v11096_v16 = vpop.permute.xlu2 %3949  ;;  %v11098_v32 = vpop.permute.xlu1 %2986 }
 0x193   : > { %v1539_v56 = vsel %vm10230_vm15, %v1531_v14, %v1538_v40  ;;  %5074 = vrot.lane.b32.xlu2 %v4399_v44, %s9919_s23  ;;  %v4409_v13 = vsel %vm10120_vm7, %v4404_v49, %v4408_v41  ;;  %881 = vst [vmem:[#allocation2 + $0xa4] sm:$0x1] %v880_v38  ;;  %v2244_v3 = vrot.slane %v2242_v15, 4  ;;  %v2248_v21 = vshll.u32 %v2026_v8, 16  ;;  %v11090_v39 = vld [vmem:[#allocation2 + $0x184] sm:$0xf] }
 0x194   : > { %9578 = vmatmul.msk.bf16.gmra.mxu2 %vm8467_vm1, %v9349_v26  ;;  %1870 = vst.msk [vmem:[#allocation2 + $0x190] sm:$0xf] %vm712_vm2, %v1539_v56  ;;  %5076 = vrot.lane.b32.xlu0 %v4409_v13, %s9919_s23  ;;  %v1229_v63 = vrot.slane %v1227_v0, 7  ;;  %v9212_v14 = vrot.slane %v3223_v53, 9  ;;  %v3540_v22 = vrot.slane %v11090_v39, 5  ;;  %v674_v11 = vmax.f32 %v554_v33, 0.0 }
 0x195   : > { %5254 = vst.msk [vmem:[#allocation3 + $0x18] sm:$0xf] %vm5250_vm8, %v11032_v9  ;;  %v2245_v10 = vor.u32 %v2244_v3, %v11016_v37  ;;  %v2250_v15 = vrot.slane %v2248_v21, 5  ;;  %v7522_v34 = vld [vmem:[#allocation2 + $0x84] sm:$0xe]  ;;  %v309_v4 = vld [vmem:[%s10056_s11 + $0x158] sm:$0xff]  ;;  %v556_v53 = vadd.f32 %v10927_v1, %v555_v57 }
 0x196   : > { %v1741_v17 = vld [vmem:[#allocation2 + $0x9c] sm:$0xf]  ;;  %v1232_v31 = vor.u32 %v1230_v58, %v1229_v63  ;;  %v1234_v29 = vrot.slane %v1229_v63, 4  ;;  %v7523_v43 = vld [vmem:[#allocation2 + $0x88] sm:$0xf]  ;;  %v9255_v60 = vrot.slane %v7522_v34, 9  ;;  %v3541_v52 = vsel %vm10152_vm12, %v9212_v14, %v3540_v22 }
 0x197   : > { %v1742_v2 = vsel %vm10215_vm13, %v1224_v20, %v1741_v17  ;;  %v2246_v12 = vrot.slane %v2245_v10, 4  ;;  %v7524_v51 = vld [vmem:[#allocation2 + $0x8c] sm:$0x1]  ;;  %v7752_v45 = vrot.slane %v7523_v43, 5  ;;  %v2099_v30 = vld [vmem:[#allocation2 + $0x180] sm:$0xf]  ;;  %v974_v41 = vpack.c.bf16 %v674_v11, %v674_v11 }
 0x198   : > { %1743 = vst [vmem:[#allocation2 + $0x9c] sm:$0xf] %v1742_v2  ;;  %v1871_v9 = vld [vmem:[#allocation2 + $0x194] sm:$0x1]  ;;  %v1233_v37 = vsel %vm10230_vm15, %v1225_v27, %v1232_v31  ;;  %v7755_v25 = vrot.slane %v7524_v51, 5  ;;  %v2829_v50 = vshrl.u32 %v2099_v30, 16  ;;  %v351_v20 = vpack.c.bf16 %v309_v4, %v308_v35  ;;  %v11123_v40 = vpop.permute.xlu0 %2888  ;;  %v558_v31 = vpop.f32.mrf.mxu0 }
 0x199   : > { %v1872_v62 = vsel %vm10136_vm9, %v1540_v23, %v1871_v9  ;;  %1744 = vst.msk [vmem:[#allocation2 + $0xa0] sm:$0xf] %vm712_vm2, %v1233_v37  ;;  %v7753_v38 = vsel %vm10152_vm12, %v9255_v60, %v7752_v45  ;;  %v7754_v48 = vrot.slane %v7752_v45, 4  ;;  %v2100_v5 = vld [vmem:[#allocation2 + $0x184] sm:$0xf]  ;;  %v2251_v8 = vsel %vm10120_vm7, %v2246_v12, %v2250_v15 }
 0x19a   : > { %1873 = vst [vmem:[#allocation2 + $0x194] sm:$0x1] %v1872_v62  ;;  %v1745_v27 = vld [vmem:[#allocation2 + $0xa4] sm:$0x1]  ;;  %3672 = vrot.lane.b32.xlu1 %v3541_v52, %s9917_s8  ;;  %v2831_v33 = vrot.slane %v2829_v50, 4  ;;  %v2832_v7 = vshll.u32 %v2099_v30, 16  ;;  %9171 = vmatmul.msk.bf16.gmra.mxu0 %vm382_vm0, %v351_v20  ;;  %v11138_v15 = vpop.permute.xlu1 %3947 }
 0x19b   : > { %v1746_v23 = vsel %vm10136_vm9, %v1234_v29, %v1745_v27  ;;  %2898 = vrot.lane.b32.xlu2 %v2251_v8, %s9916_s24  ;;  %v7756_v49 = vsel %vm10152_vm12, %v7754_v48, %v7755_v25  ;;  %7993 = vst.msk [vmem:[#allocation3 + $0x94] sm:$0xf] %vm712_vm2, %v7753_v38  ;;  %v2838_v26 = vshll.u32 %v2100_v5, 16  ;;  %v2842_v44 = vshrl.u32 %v2100_v5, 16  ;;  %v772_v58 = vld [vmem:[#allocation2 + $0xa8] sm:$0x1]  ;;  %v643_v8 = vpop.f32.mrf.mxu3 }
 0x19c   : > { %1747 = vst [vmem:[#allocation2 + $0xa4] sm:$0x1] %v1746_v23  ;;  %v2834_v0 = vrot.slane %v2832_v7, 5  ;;  %v773_v13 = vsel %vm10136_vm9, 0, %v772_v58  ;;  %v1236_v3 = vshrl.u32 %v974_v41, 16  ;;  %v1239_v21 = vshll.u32 %v974_v41, 16 }
 0x19d   : > { %7994 = vst.msk [vmem:[#allocation3 + $0x9c] sm:$0xf] %vm712_vm2, %v7756_v49  ;;  %v2840_v56 = vrot.slane %v2838_v26, 5  ;;  %v1935_v14 = vld [vmem:[#allocation2 + $0x15c] sm:$0xf]  ;;  %v3542_v35 = vrot.slane %v3540_v22, 4 }
 0x19e   : > { %v2835_v63 = vor.u32 %v2834_v0, %v2831_v33  ;;  %774 = vst [vmem:[#allocation2 + $0xa8] sm:$0x1] %v773_v13  ;;  %v3225_v11 = vld [vmem:[#allocation2 + $0x188] sm:$0x1]  ;;  %v11136_v10 = vpop.permute.xlu2 %5068  ;;  %v11140_v34 = vrot.slane %v1236_v3, 7  ;;  %v2844_v17 = vrot.slane %v2842_v44, 4 }
 0x19f   : > { %1999 = vst.msk [vmem:[#allocation3 + $0x1b0] sm:$0xf] %vm712_vm2, %v1935_v14  ;;  %v3543_v57 = vrot.slane %v3225_v11, 5  ;;  %v2101_v43 = vld [vmem:[#allocation2 + $0x188] sm:$0x1]  ;;  %v675_v60 = vmax.f32 %v556_v53, 0.0 }
 0x1a0   : > { %v2836_v29 = vrot.slane %v2835_v63, 4  ;;  %3123 = vst.msk [vmem:[#allocation3 + $0x1b0] sm:$0xf] %vm3068_vm3, %v11071_v54  ;;  %v1241_v2 = vor.u32 %v1239_v21, %v11140_v34  ;;  %v2845_v51 = vor.u32 %v2844_v17, %v2840_v56  ;;  %v2027_v39 = vld [vmem:[#allocation2 + $0x48] sm:$0xf]  ;;  %v2848_v54 = vshll.u32 %v2101_v43, 16  ;;  %v11161_v5 = vpop.permute.xlu0 %4047 }
 0x1a1   : > { %3799 = vst.msk [vmem:[#allocation3 + $0x1b0] sm:$0xf] %vm3744_vm5, %v11053_v28  ;;  %v3544_v12 = vsel %vm10152_vm12, %v3542_v35, %v3543_v57  ;;  %v2253_v30 = vshrl.u32 %v2027_v39, 16  ;;  %v975_v9 = vpack.c.bf16 %v675_v60, %v675_v60  ;;  %v11158_v37 = vld [vmem:[#allocation2 + $0x4c] sm:$0xf]  ;;  %v2256_v52 = vshll.u32 %v2027_v39, 16  ;;  %v560_v35 = vpop.f32.mrf.mxu0 }
 0x1a2   : > { %v9630_v22 = vld [vmem:[#allocation3 + $0x94] sm:$0xf]  ;;  %v2841_v45 = vsel %vm10120_vm7, %v2836_v29, %v2840_v56  ;;  %4184 = vst.msk [vmem:[#allocation3 + $0x1b0] sm:$0xf] %vm4129_vm6, %v11001_v46  ;;  %v2846_v28 = vrot.slane %v2845_v51, 4  ;;  %v2850_v62 = vrot.slane %v2848_v54, 5  ;;  %v11182_v3 = vpop.permute.xlu1 %3564 }
 0x1a3   : > { %2996 = vrot.lane.b32.xlu0 %v2841_v45, %s9916_s24  ;;  %3674 = vrot.lane.b32.xlu2 %v3544_v12, %s9917_s8  ;;  %v1936_v25 = vld [vmem:[#allocation2 + $0x160] sm:$0xf]  ;;  %v2255_v38 = vrot.slane %v2253_v30, 4  ;;  %v2262_v48 = vshll.u32 %v11158_v37, 16  ;;  %v2258_v4 = vrot.slane %v2256_v52, 5  ;;  %v1244_v27 = vshrl.u32 %v975_v9, 16 }
 0x1a4   : > { %v9354_v50 = vld [vmem:[#allocation3 + $0x98] sm:$0xf0]  ;;  %2000 = vst.msk [vmem:[#allocation3 + $0x1b8] sm:$0xf] %vm712_vm2, %v1936_v25  ;;  %v1242_v33 = vrot.slane %v11140_v34, 4  ;;  %v2851_v20 = vsel %vm10120_vm7, %v2846_v28, %v2850_v62  ;;  %v1247_v49 = vshll.u32 %v975_v9, 16  ;;  %v644_v34 = vadd.f32 %v10927_v1, %v643_v8 }
 0x1a5   : > { %v9357_v46 = vor.u32 %v9630_v22, %v9354_v50  ;;  %v1748_v41 = vld [vmem:[#allocation2 + $0xa8] sm:$0xf]  ;;  %3124 = vst.msk [vmem:[#allocation3 + $0x1b8] sm:$0xf] %vm3068_vm3, %v11098_v32  ;;  %v882_v23 = vld [vmem:[#allocation2 + $0xb0] sm:$0x1]  ;;  %2998 = vrot.lane.b32.xlu1 %v2851_v20, %s9916_s24  ;;  %v2259_v26 = vor.u32 %v2258_v4, %v2255_v38  ;;  %v559_v32 = vadd.f32 %v10927_v1, %v558_v31 }
 0x1a6   : > { %v1749_v7 = vsel %vm10215_vm13, %v1241_v2, %v1748_v41  ;;  %v883_v44 = vsel %vm10101_vm4, 0, %v882_v23  ;;  %v1246_v0 = vrot.slane %v1244_v27, 7  ;;  %v1887_v58 = vld [vmem:[#allocation2 + $0x24] sm:$0xf]  ;;  %v11175_v53 = vrot.slane %v2262_v48, 5  ;;  %v310_v60 = vld [vmem:[%s10056_s11 + $0x160] sm:$0xff]  ;;  %v645_v41 = vpop.f32.mrf.mxu3 }
 0x1a7   : > { %9579 = vmatmul.msk.bf16.gmra.mxu2 %vm8467_vm1, %v9357_v46  ;;  %1750 = vst [vmem:[#allocation2 + $0xa8] sm:$0xf] %v1749_v7  ;;  %v3869_v56 = vld [vmem:[#allocation2 + $0x18c] sm:$0xf]  ;;  %v11180_v13 = vpop.permute.xlu2 %2988  ;;  %v2260_v21 = vrot.slane %v2259_v26, 4  ;;  %v676_v51 = vmax.f32 %v559_v32, 0.0  ;;  %v11217_v7 = vpop.f32.mrf.mxu2 }
 0x1a8   : > { %3800 = vst.msk [vmem:[#allocation3 + $0x1b8] sm:$0xf] %vm3744_vm5, %v10956_v36  ;;  %v1249_v63 = vor.u32 %v1247_v49, %v1246_v0  ;;  %v1251_v14 = vrot.slane %v1246_v0, 4  ;;  %v7525_v11 = vld [vmem:[#allocation2 + $0x90] sm:$0xe]  ;;  %v710_v54 = vmax.f32 %v644_v34, 0.0  ;;  %v11205_v50 = vpop.permute.xlu0 %3664 }
 0x1a9   : > { %884 = vst [vmem:[#allocation2 + $0xb0] sm:$0x1] %v883_v44  ;;  %v7526_v57 = vld [vmem:[#allocation2 + $0x94] sm:$0xf]  ;;  %v7527_v36 = vld [vmem:[#allocation2 + $0x98] sm:$0x1]  ;;  %v2265_v17 = vsel %vm10120_vm7, %v2260_v21, %v11175_v53  ;;  %v976_v9 = vpack.c.bf16 %v676_v51, %v676_v51  ;;  %v563_v34 = vpop.f32.mrf.mxu0 }
 0x1aa   : > { %1951 = vst.msk [vmem:[#allocation3 + $0x30] sm:$0xf] %vm712_vm2, %v1887_v58  ;;  %v1250_v31 = vsel %vm10230_vm15, %v1242_v33, %v1249_v63  ;;  %v9256_v29 = vrot.slane %v7525_v11, 9  ;;  %v7759_v43 = vrot.slane %v7526_v57, 5  ;;  %v3820_v2 = vld [vmem:[#allocation2 + $0x4c] sm:$0xf]  ;;  %v1010_v38 = vpack.c.bf16 %v710_v54, %v710_v54 }
 0x1ab   : > { %3075 = vst.msk [vmem:[#allocation3 + $0x30] sm:$0xf] %vm3068_vm3, %v11123_v40  ;;  %4057 = vrot.lane.b32.xlu2 %v3869_v56, %s9918_s17  ;;  %2900 = vrot.lane.b32.xlu0 %v2265_v17, %s9916_s24  ;;  %v7762_v12 = vrot.slane %v7527_v36, 5  ;;  %v775_v39 = vld [vmem:[#allocation2 + $0xb4] sm:$0x1]  ;;  %v311_v30 = vld [vmem:[%s10056_s11 + $0x168] sm:$0xff]  ;;  %v561_v33 = vadd.f32 %v10927_v1, %v560_v35  ;;  %v646_v56 = vadd.f32 %v10927_v1, %v645_v41 }
 0x1ac   : > { %1751 = vst.msk [vmem:[#allocation2 + $0xac] sm:$0xf] %vm712_vm2, %v1250_v31  ;;  %v7760_v22 = vsel %vm10152_vm12, %v9256_v29, %v7759_v43  ;;  %v7761_v45 = vrot.slane %v7759_v43, 4  ;;  %v776_v40 = vsel %vm10136_vm9, 0, %v775_v39  ;;  %v832_v28 = vld [vmem:[#allocation2 + $0x198] sm:$0x1]  ;;  %v352_v52 = vpack.c.bf16 %v311_v30, %v310_v60 }
 0x1ad   : > { %4135 = vst.msk [vmem:[#allocation3 + $0x28] sm:$0xf] %vm4129_vm6, %v11138_v15  ;;  %v3152_v25 = vld [vmem:[#allocation2 + $0x4c] sm:$0xf]  ;;  %3959 = vrot.lane.b32.xlu1 %v3820_v2, %s9918_s17  ;;  %v833_v15 = vsel %vm10136_vm9, 0, %v832_v28  ;;  %v1253_v27 = vshrl.u32 %v976_v9, 16 }
 0x1ae   : > { %7995 = vst.msk [vmem:[#allocation3 + $0xa4] sm:$0xf] %vm712_vm2, %v7760_v22  ;;  %v7763_v62 = vsel %vm10152_vm12, %v7761_v45, %v7762_v12  ;;  %v3153_v48 = vld [vmem:[#allocation2 + $0x50] sm:$0x1]  ;;  %v3372_v46 = vrot.slane %v3152_v25, 5  ;;  %v1256_v8 = vshll.u32 %v976_v9, 16  ;;  %9172 = vmatmul.msk.bf16.gmra.mxu0 %vm382_vm0, %v352_v52  ;;  %v564_v12 = vadd.f32 %v10927_v1, %v563_v34 }
 0x1af   : > { %5256 = vst.msk [vmem:[#allocation3 + $0x28] sm:$0xf] %vm5250_vm8, %v11136_v10  ;;  %v3870_v20 = vld [vmem:[#allocation2 + $0x190] sm:$0xf]  ;;  %v1542_v23 = vshrl.u32 %v1010_v38, 16  ;;  %v1545_v49 = vshll.u32 %v1010_v38, 16  ;;  %v11226_v21 = vpop.permute.xlu1 %5066 }
 0x1b0   : > { %v1752_v4 = vld [vmem:[#allocation2 + $0xb0] sm:$0x1]  ;;  %7996 = vst.msk [vmem:[#allocation3 + $0xac] sm:$0xf] %vm712_vm2, %v7763_v62  ;;  %v3374_v26 = vrot.slane %v3372_v46, 4  ;;  %v11221_v44 = vrot.slane %v1253_v27, 7 }
 0x1b1   : > { %v1753_v10 = vsel %vm10136_vm9, %v1251_v14, %v1752_v4  ;;  %777 = vst [vmem:[#allocation2 + $0xb4] sm:$0x1] %v776_v40  ;;  %v3375_v0 = vrot.slane %v3153_v48, 5  ;;  %v3151_v58 = vld [vmem:[#allocation2 + $0x48] sm:$0xe]  ;;  %v11232_v14 = vrot.slane %v1542_v23, 7  ;;  %v11277_v23 = vpop.f32.mrf.mxu2 }
 0x1b2   : > { %1754 = vst [vmem:[#allocation2 + $0xb0] sm:$0x1] %v1753_v10  ;;  %v11224_v32 = vpop.permute.xlu2 %2892  ;;  %v9188_v11 = vrot.slane %v3151_v58, 9  ;;  %v1937_v57 = vld [vmem:[#allocation2 + $0x168] sm:$0xf]  ;;  %v1258_v31 = vor.u32 %v1256_v8, %v11221_v44  ;;  %v1259_v29 = vrot.slane %v11221_v44, 4 }
 0x1b3   : > { %v11228_v63 = vld [vmem:[#allocation2 + $0xac] sm:$0xf]  ;;  %4185 = vst.msk [vmem:[#allocation3 + $0x1b8] sm:$0xf] %vm4129_vm6, %v11161_v5  ;;  %4059 = vrot.lane.b32.xlu0 %v3870_v20, %s9918_s17  ;;  %v3376_v35 = vsel %vm10152_vm12, %v3374_v26, %v3375_v0  ;;  %v677_v5 = vmax.f32 %v561_v33, 0.0  ;;  %v711_v2 = vmax.f32 %v646_v56, 0.0  ;;  %v1547_v39 = vor.u32 %v1545_v49, %v11232_v14  ;;  %v11275_v20 = vpop.f32.mrf.mxu0 }
 0x1b4   : > { %834 = vst [vmem:[#allocation2 + $0x198] sm:$0x1] %v833_v15  ;;  %v7773_v36 = vrot.slane %v11228_v63, 5  ;;  %3578 = vrot.lane.b32.xlu2 %v3376_v35, %s9917_s8  ;;  %v3373_v43 = vsel %vm10152_vm12, %v9188_v11, %v3372_v46  ;;  %v3226_v60 = vld [vmem:[#allocation2 + $0x18c] sm:$0xe]  ;;  %v1548_v22 = vrot.slane %v11232_v14, 4 }
 0x1b5   : > { %v9632_v17 = vld [vmem:[#allocation3 + $0xa4] sm:$0xf]  ;;  %2001 = vst.msk [vmem:[#allocation3 + $0x1c0] sm:$0xf] %vm712_vm2, %v1937_v57  ;;  %3576 = vrot.lane.b32.xlu1 %v3373_v43, %s9917_s8  ;;  %v11250_v45 = vld [vmem:[#allocation2 + $0x190] sm:$0xf]  ;;  %v977_v54 = vpack.c.bf16 %v677_v5, %v677_v5 }
 0x1b6   : > { %3125 = vst.msk [vmem:[#allocation3 + $0x1c0] sm:$0xf] %vm3068_vm3, %v11180_v13  ;;  %v9213_v40 = vrot.slane %v3226_v60, 9  ;;  %v3547_v28 = vrot.slane %v11250_v45, 5  ;;  %v1011_v13 = vpack.c.bf16 %v711_v2, %v711_v2  ;;  %v678_v1 = vmax.f32 %v564_v12, 0.0  ;;  %v312_v10 = vld [vmem:[%s10056_s11 + $0x170] sm:$0xff] }
 0x1b7   : > { %v9362_v51 = vld [vmem:[#allocation3 + $0xa8] sm:$0xf0]  ;;  %3751 = vst.msk [vmem:[#allocation3 + $0x30] sm:$0xf] %vm3744_vm5, %v11182_v3  ;;  %v11255_v52 = vpop.permute.xlu0 %2990  ;;  %v1261_v15 = vshrl.u32 %v977_v54, 16  ;;  %v1264_v38 = vshll.u32 %v977_v54, 16  ;;  %v11266_v4 = vpop.permute.xlu1 %2890 }
 0x1b8   : > { %v9365_v30 = vor.u32 %v9632_v17, %v9362_v51  ;;  %v1755_v9 = vld [vmem:[#allocation2 + $0xb4] sm:$0xf]  ;;  %4136 = vst.msk [vmem:[#allocation3 + $0x30] sm:$0xf] %vm4129_vm6, %v11096_v16  ;;  %v885_v62 = vld [vmem:[#allocation2 + $0xbc] sm:$0x1]  ;;  %v11264_v41 = vpack.c.bf16 %v678_v1, %v678_v1  ;;  %v3548_v16 = vsel %vm10152_vm12, %v9213_v40, %v3547_v28 }
 0x1b9   : > { %v1756_v25 = vsel %vm10215_vm13, %v1258_v31, %v1755_v9  ;;  %v886_v3 = vsel %vm10101_vm4, 0, %v885_v62  ;;  %v942_v48 = vld [vmem:[#allocation2 + $0x1a0] sm:$0x1]  ;;  %v1550_v46 = vshrl.u32 %v1011_v13, 16  ;;  %v1263_v8 = vrot.slane %v1261_v15, 7  ;;  %v313_v12 = vld [vmem:[%s10056_s11 + $0x178] sm:$0xff] }
 0x1ba   : > { %9580 = vmatmul.msk.bf16.gmra.mxu2 %vm8467_vm1, %v9365_v30  ;;  %1757 = vst [vmem:[#allocation2 + $0xb4] sm:$0xf] %v1756_v25  ;;  %v943_v33 = vsel %vm10101_vm4, 0, %v942_v48  ;;  %v1553_v44 = vshll.u32 %v1011_v13, 16  ;;  %v3821_v0 = vld [vmem:[#allocation2 + $0x54] sm:$0xf]  ;;  %v11284_v58 = vpop.permute.xlu2 %4051  ;;  %v353_v30 = vpack.c.bf16 %v313_v12, %v312_v10 }
 0x1bb   : > { %v1874_v27 = vld [vmem:[#allocation2 + $0x198] sm:$0xf]  ;;  %887 = vst [vmem:[#allocation2 + $0xbc] sm:$0x1] %v886_v3  ;;  %3676 = vrot.lane.b32.xlu0 %v3548_v16, %s9917_s8  ;;  %v1552_v26 = vrot.slane %v1550_v46, 7  ;;  %v1266_v56 = vor.u32 %v1264_v38, %v1263_v8  ;;  %v1268_v14 = vrot.slane %v1263_v8, 4 }
 0x1bc   : > { %v1875_v49 = vsel %vm10215_vm13, %v1547_v39, %v1874_v27  ;;  %3801 = vst.msk [vmem:[#allocation3 + $0x1c0] sm:$0xf] %vm3744_vm5, %v11205_v50  ;;  %3961 = vrot.lane.b32.xlu2 %v3821_v0, %s9918_s17  ;;  %v4209_v11 = vld [vmem:[#allocation2 + $0x48] sm:$0xf]  ;;  %v1270_v34 = vshrl.u32 %v11264_v41, 16  ;;  %v11337_v12 = vrot.slane %v7773_v36, 4 }
 0x1bd   : > { %1876 = vst [vmem:[#allocation2 + $0x198] sm:$0xf] %v1875_v49  ;;  %v1555_v35 = vor.u32 %v1553_v44, %v1552_v26  ;;  %v1557_v57 = vrot.slane %v1552_v26, 4  ;;  %v11288_v17 = vld [vmem:[#allocation2 + $0x4c] sm:$0xf]  ;;  %v4411_v50 = vshrl.u32 %v4209_v11, 16  ;;  %v1267_v31 = vsel %vm10230_vm15, %v1259_v29, %v1266_v56  ;;  %v11311_v49 = vpop.f32.mrf.mxu0  ;;  %v11314_v56 = vpop.f32.mrf.mxu2 }
 0x1be   : > { %944 = vst [vmem:[#allocation2 + $0x1a0] sm:$0x1] %v943_v33  ;;  %v4414_v5 = vshll.u32 %v4209_v11, 16  ;;  %v4420_v43 = vshll.u32 %v11288_v17, 16  ;;  %v4424_v60 = vshrl.u32 %v11288_v17, 16  ;;  %9173 = vmatmul.msk.bf16.gmra.mxu0 %vm382_vm0, %v353_v30  ;;  %v1273_v30 = vshll.u32 %v11264_v41, 16 }
 0x1bf   : > { %v7528_v2 = vld [vmem:[#allocation2 + $0x9c] sm:$0xe]  ;;  %1758 = vst.msk [vmem:[#allocation2 + $0xb8] sm:$0xf] %vm712_vm2, %v1267_v31  ;;  %v1556_v51 = vsel %vm10230_vm15, %v1548_v22, %v1555_v35  ;;  %v4413_v39 = vrot.slane %v4411_v50, 4  ;;  %v11302_v38 = vpop.permute.xlu0 %3951 }
 0x1c0   : > { %v7529_v40 = vld [vmem:[#allocation2 + $0xa0] sm:$0xf]  ;;  %v9257_v54 = vrot.slane %v7528_v2, 9  ;;  %1877 = vst.msk [vmem:[#allocation2 + $0x19c] sm:$0xf] %vm712_vm2, %v1556_v51  ;;  %v4416_v9 = vrot.slane %v4414_v5, 5  ;;  %v11307_v27 = vpop.permute.xlu1 %3666 }
 0x1c1   : > { %v11299_v29 = vrot.slane %v4420_v43, 5  ;;  %v7530_v13 = vld [vmem:[#allocation2 + $0xa4] sm:$0x1]  ;;  %v7766_v25 = vrot.slane %v7529_v40, 5  ;;  %v1889_v15 = vld [vmem:[#allocation2 + $0x30] sm:$0xf] }
 0x1c2   : > { %v1759_v1 = vld [vmem:[#allocation2 + $0xbc] sm:$0x1]  ;;  %v7769_v62 = vrot.slane %v7530_v13, 5  ;;  %v4417_v3 = vor.u32 %v4416_v9, %v4413_v39  ;;  %1953 = vst.msk [vmem:[#allocation3 + $0x40] sm:$0xf] %vm712_vm2, %v1889_v15  ;;  %v11324_v31 = vpop.permute.xlu2 %3668  ;;  %v2266_v43 = vshrl.u32 %v11158_v37, 16 }
 0x1c3   : > { %v1760_v22 = vsel %vm10136_vm9, %v1268_v14, %v1759_v1  ;;  %v2103_v48 = vld [vmem:[#allocation2 + $0x190] sm:$0xf]  ;;  %v2104_v46 = vld [vmem:[#allocation2 + $0x194] sm:$0x1]  ;;  %v7767_v16 = vsel %vm10152_vm12, %v9257_v54, %v7766_v25  ;;  %v7768_v8 = vrot.slane %v7766_v25, 4  ;;  %v11350_v54 = vrot.slane %v1270_v34, 7 }
 0x1c4   : > { %1761 = vst [vmem:[#allocation2 + $0xbc] sm:$0x1] %v1760_v22  ;;  %v2862_v33 = vshll.u32 %v2103_v48, 16  ;;  %v2866_v10 = vshrl.u32 %v2103_v48, 16  ;;  %v4418_v44 = vrot.slane %v4417_v3, 4  ;;  %v2872_v0 = vshll.u32 %v2104_v46, 16 }
 0x1c5   : > { %v1878_v26 = vld [vmem:[#allocation2 + $0x1a0] sm:$0x1]  ;;  %7997 = vst.msk [vmem:[#allocation3 + $0xb4] sm:$0xf] %vm712_vm2, %v7767_v16  ;;  %v7770_v11 = vsel %vm10152_vm12, %v7768_v8, %v7769_v62  ;;  %v1938_v51 = vld [vmem:[#allocation2 + $0x16c] sm:$0xf]  ;;  %v570_v15 = vpop.f32.mrf.mxu0  ;;  %v1275_v46 = vor.u32 %v1273_v30, %v11350_v54 }
 0x1c6   : > { %v1879_v14 = vsel %vm10136_vm9, %v1557_v57, %v1878_v26  ;;  %3077 = vst.msk [vmem:[#allocation3 + $0x40] sm:$0xf] %vm3068_vm3, %v11224_v32  ;;  %v11322_v35 = vrot.slane %v2862_v33, 5  ;;  %v2868_v17 = vrot.slane %v2866_v10, 4  ;;  %v778_v50 = vld [vmem:[#allocation2 + $0xc0] sm:$0x1]  ;;  %v4423_v5 = vsel %vm10120_vm7, %v4418_v44, %v11299_v29 }
 0x1c7   : > { %1880 = vst [vmem:[#allocation2 + $0x1a0] sm:$0x1] %v1879_v14  ;;  %v779_v57 = vsel %vm10136_vm9, 0, %v778_v50  ;;  %5078 = vrot.lane.b32.xlu1 %v4423_v5, %s9919_s23  ;;  %v2874_v2 = vrot.slane %v2872_v0, 5  ;;  %v11344_v39 = vld [vmem:[%s13885_s2] ss:$0 sm:$0xff]  ;;  %v11353_v13 = vpop.permute.xlu0 %3568  ;;  %v11371_v0 = vpop.f32.mrf.mxu2 }
 0x1c8   : > { %7998 = vst.msk [vmem:[#allocation3 + $0xbc] sm:$0xf] %vm712_vm2, %v7770_v11  ;;  %v2869_v32 = vor.u32 %v2868_v17, %v11322_v35  ;;  %v566_v37 = vadd.f32 %v11344_v39, %v11275_v20  ;;  %v4426_v9 = vrot.slane %v4424_v60, 4  ;;  %v2029_v1 = vld [vmem:[#allocation2 + $0x50] sm:$0x1]  ;;  %v2268_v34 = vrot.slane %v2266_v43, 4  ;;  %v11362_v48 = vpop.permute.xlu1 %4049 }
 0x1c9   : > { %5255 = vst.msk [vmem:[#allocation3 + $0x20] sm:$0xf] %vm5250_vm8, %v11226_v21  ;;  %v4211_v21 = vld [vmem:[#allocation2 + $0x50] sm:$0x1]  ;;  %v2272_v41 = vshll.u32 %v2029_v1, 16  ;;  %v569_v50 = vadd.f32 %v11344_v39, %v11311_v49  ;;  %v1276_v30 = vrot.slane %v11350_v54, 4  ;;  %v571_v54 = vadd.f32 %v11344_v39, %v570_v15 }
 0x1ca   : > { %v2870_v40 = vrot.slane %v2869_v32, 4  ;;  %780 = vst [vmem:[#allocation2 + $0xc0] sm:$0x1] %v779_v57  ;;  %v4427_v20 = vor.u32 %v4426_v9, %v11299_v29  ;;  %v4430_v62 = vshll.u32 %v4211_v21, 16  ;;  %v1888_v60 = vld [vmem:[#allocation2 + $0x28] sm:$0xf]  ;;  %v2269_v33 = vor.u32 %v2268_v34, %v11175_v53 }
 0x1cb   : > { %2002 = vst.msk [vmem:[#allocation3 + $0x1c8] sm:$0xf] %vm712_vm2, %v1938_v51  ;;  %v679_v3 = vmax.f32 %v566_v37, 0.0  ;;  %v2274_v10 = vrot.slane %v2272_v41, 5  ;;  %v2102_v53 = vld [vmem:[#allocation2 + $0x18c] sm:$0xf] }
 0x1cc   : > { %v2875_v25 = vsel %vm10120_vm7, %v2870_v40, %v2874_v2  ;;  %3126 = vst.msk [vmem:[#allocation3 + $0x1c8] sm:$0xf] %vm3068_vm3, %v11255_v52  ;;  %v9634_v22 = vld [vmem:[#allocation3 + $0xb4] sm:$0xf]  ;;  %v4428_v16 = vrot.slane %v4427_v20, 4  ;;  %v4432_v8 = vrot.slane %v4430_v62, 5 }
 0x1cd   : > { %3002 = vrot.lane.b32.xlu0 %v2875_v25, %s9916_s24  ;;  %1952 = vst.msk [vmem:[#allocation3 + $0x38] sm:$0xf] %vm712_vm2, %v1888_v60  ;;  %v888_v52 = vld [vmem:[#allocation2 + $0xc8] sm:$0x1]  ;;  %v979_v44 = vpack.c.bf16 %v679_v3, %v679_v3  ;;  %v2270_v17 = vrot.slane %v2269_v33, 4  ;;  %v2853_v49 = vshrl.u32 %v2102_v53, 16 }
 0x1ce   : > { %3076 = vst.msk [vmem:[#allocation3 + $0x38] sm:$0xf] %vm3068_vm3, %v11266_v4  ;;  %v889_v26 = vsel %vm10101_vm4, 0, %v888_v52  ;;  %v4433_v11 = vsel %vm10120_vm7, %v4428_v16, %v4432_v8  ;;  %v3822_v2 = vld [vmem:[#allocation2 + $0x58] sm:$0xf]  ;;  %v2856_v51 = vshll.u32 %v2102_v53, 16 }
 0x1cf   : > { %v9370_v29 = vld [vmem:[#allocation3 + $0xb8] sm:$0xf0]  ;;  %3752 = vst.msk [vmem:[#allocation3 + $0x38] sm:$0xf] %vm3744_vm5, %v11051_v61  ;;  %5080 = vrot.lane.b32.xlu2 %v4433_v11, %s9919_s23  ;;  %v1278_v57 = vshrl.u32 %v979_v44, 16  ;;  %v1281_v43 = vshll.u32 %v979_v44, 16  ;;  %v2275_v61 = vsel %vm10120_vm7, %v2270_v17, %v2274_v10  ;;  %v11389_v40 = vpop.permute.xlu0 %5070 }
 0x1d0   : > { %v9373_v14 = vor.u32 %v9634_v22, %v9370_v29  ;;  %v11379_v5 = vpop.permute.xlu2 %2994  ;;  %890 = vst [vmem:[#allocation2 + $0xc8] sm:$0x1] %v889_v26  ;;  %v3228_v37 = vld [vmem:[#allocation2 + $0x194] sm:$0x1]  ;;  %2902 = vrot.lane.b32.xlu1 %v2275_v61, %s9916_s24  ;;  %v7531_v21 = vld [vmem:[#allocation2 + $0xa8] sm:$0xe] }
 0x1d1   : > { %v1762_v4 = vld [vmem:[#allocation2 + $0xc0] sm:$0xf]  ;;  %4137 = vst.msk [vmem:[#allocation3 + $0x38] sm:$0xf] %vm4129_vm6, %v11302_v38  ;;  %v1280_v9 = vrot.slane %v1278_v57, 7  ;;  %v2855_v1 = vrot.slane %v2853_v49, 4  ;;  %v11426_v57 = vpop.f32.mrf.mxu2 }
 0x1d2   : > { %9581 = vmatmul.msk.bf16.gmra.mxu2 %vm8467_vm1, %v9373_v14  ;;  %v1763_v32 = vsel %vm10215_vm13, %v1275_v46, %v1762_v4  ;;  %v2858_v25 = vrot.slane %v2856_v51, 5  ;;  %v7533_v20 = vld [vmem:[#allocation2 + $0xb0] sm:$0x1]  ;;  %v9258_v62 = vrot.slane %v7531_v21, 9  ;;  %v680_v34 = vmax.f32 %v569_v50, 0.0  ;;  %v11397_v46 = vpop.f32.mrf.mxu0  ;;  %v315_v63 = vld [vmem:[%s10056_s11 + $0x188] sm:$0xff] }
 0x1d3   : > { %1764 = vst [vmem:[#allocation2 + $0xc0] sm:$0xf] %v1763_v32  ;;  %v1283_v38 = vor.u32 %v1281_v43, %v1280_v9  ;;  %v1285_v22 = vrot.slane %v1280_v9, 4  ;;  %v7776_v41 = vrot.slane %v7533_v20, 5  ;;  %v3154_v60 = vld [vmem:[#allocation2 + $0x54] sm:$0xe]  ;;  %v11417_v14 = vpop.permute.xlu1 %3570 }
 0x1d4   : > { %v11394_v3 = vld [vmem:[#allocation2 + $0x58] sm:$0xf]  ;;  %v2859_v8 = vor.u32 %v2858_v25, %v2855_v1  ;;  %v3549_v33 = vrot.slane %v3547_v28, 4  ;;  %v3550_v52 = vrot.slane %v3228_v37, 5  ;;  %v7774_v29 = vsel %vm10152_vm12, %v9258_v62, %v7773_v36  ;;  %3802 = vst.msk [vmem:[#allocation3 + $0x1c8] sm:$0xf] %vm3744_vm5, %v11307_v27 }
 0x1d5   : > { %3963 = vrot.lane.b32.xlu0 %v3822_v2, %s9918_s17  ;;  %v11399_v16 = vld [vmem:[#allocation2 + $0xb8] sm:$0xf]  ;;  %v787_v10 = vld [vmem:[#allocation2 + $0xe4] sm:$0x1]  ;;  %v1284_v15 = vsel %vm10230_vm15, %v1276_v30, %v1283_v38  ;;  %v7777_v26 = vsel %vm10152_vm12, %v11337_v12, %v7776_v41  ;;  %7999 = vst.msk [vmem:[#allocation3 + $0xc4] sm:$0xf] %vm712_vm2, %v7774_v29  ;;  %v980_v28 = vpack.c.bf16 %v680_v34, %v680_v34 }
 0x1d6   : > { %v9189_v45 = vrot.slane %v3154_v60, 9  ;;  %v314_v44 = vld [vmem:[%s10056_s11 + $0x180] sm:$0xff]  ;;  %1765 = vst.msk [vmem:[#allocation2 + $0xc4] sm:$0xf] %vm712_vm2, %v1284_v15  ;;  %v2860_v27 = vrot.slane %v2859_v8, 4  ;;  %v3379_v11 = vrot.slane %v11394_v3, 5  ;;  %v3551_v32 = vsel %vm10152_vm12, %v3549_v33, %v3550_v52  ;;  %s9043_s11 = scalar_lea.hbm %s13888_s5, %s9686_s29 }
 0x1d7   : > { %v1766_v36 = vld [vmem:[#allocation2 + $0xc8] sm:$0x1]  ;;  %v354_v17 = vpack.c.bf16 %v315_v63, %v314_v44  ;;  %8000 = vst.msk [vmem:[#allocation3 + $0xcc] sm:$0xf] %vm712_vm2, %v7777_v26  ;;  %v788_v12 = vsel %vm10136_vm9, 0, %v787_v10  ;;  %v1287_v50 = vshrl.u32 %v980_v28, 16 }
 0x1d8   : > { %v1767_v53 = vsel %vm10136_vm9, %v1285_v22, %v1766_v36  ;;  %v2030_v4 = vld [vmem:[#allocation2 + $0x54] sm:$0xf]  ;;  %v2865_v43 = vsel %vm10120_vm7, %v2860_v27, %v11322_v35  ;;  %v11434_v61 = vld [vmem:[#allocation2 + $0x58] sm:$0xf]  ;;  %v11436_v51 = vpop.permute.xlu2 %3955  ;;  %v7780_v37 = vrot.slane %v11399_v16, 5  ;;  %3678 = vrot.lane.b32.xlu1 %v3551_v32, %s9917_s8  ;;  %v1290_v30 = vshll.u32 %v980_v28, 16  ;;  %v11445_v21 = vpop.permute.xlu0 %2894 }
 0x1d9   : > { %1768 = vst [vmem:[#allocation2 + $0xc8] sm:$0x1] %v1767_v53  ;;  %9174 = vmatmul.msk.bf16.gmra.mxu0 %vm382_vm0, %v354_v17  ;;  %v2277_v2 = vshrl.u32 %v2030_v4, 16  ;;  %v2280_v49 = vshll.u32 %v2030_v4, 16  ;;  %3000 = vrot.lane.b32.xlu2 %v2865_v43, %s9916_s24  ;;  %v11443_v35 = vrot.slane %v1287_v50, 7  ;;  %v681_v9 = vmax.f32 %v571_v54, 0.0  ;;  %v11484_v43 = vpop.f32.mrf.mxu2 }
 0x1da   : > { %4187 = vst.msk [vmem:[#allocation3 + $0x1c8] sm:$0xf] %vm4129_vm6, %v11284_v58  ;;  %v3380_v1 = vsel %vm10152_vm12, %v9189_v45, %v3379_v11  ;;  %v2286_v62 = vshll.u32 %v11434_v61, 16  ;;  %v1940_v58 = vld [vmem:[#allocation2 + $0x178] sm:$0xf]  ;;  %v575_v34 = vpop.f32.mrf.mxu0  ;;  %v11458_v60 = vrot.slane %v7780_v37, 4 }
 0x1db   : > { %789 = vst [vmem:[#allocation2 + $0xe4] sm:$0x1] %v788_v12  ;;  %v2279_v25 = vrot.slane %v2277_v2, 4  ;;  %v2282_v20 = vrot.slane %v2280_v49, 5  ;;  %v4212_v41 = vld [vmem:[#allocation2 + $0x54] sm:$0xf]  ;;  %v1292_v54 = vor.u32 %v1290_v30, %v11443_v35  ;;  %v981_v33 = vpack.c.bf16 %v681_v9, %v681_v9  ;;  %v11471_v63 = vpop.permute.xlu1 %3953 }
 0x1dc   : > { %3753 = vst.msk [vmem:[#allocation3 + $0x40] sm:$0xf] %vm3744_vm5, %v11353_v13  ;;  %v9636_v38 = vld [vmem:[#allocation3 + $0xc4] sm:$0xf]  ;;  %v11463_v8 = vld [vmem:[#allocation2 + $0x58] sm:$0xf] }
 0x1dd   : > { %3580 = vrot.lane.b32.xlu0 %v3380_v1, %s9917_s8  ;;  %v2283_v22 = vor.u32 %v2282_v20, %v2279_v25  ;;  %2004 = vst.msk [vmem:[#allocation3 + $0x1d8] sm:$0xf] %vm712_vm2, %v1940_v58  ;;  %v11465_v29 = vrot.slane %v2286_v62, 5  ;;  %v4435_v10 = vshrl.u32 %v4212_v41, 16  ;;  %v4438_v15 = vshll.u32 %v4212_v41, 16 }
 0x1de   : > { %3128 = vst.msk [vmem:[#allocation3 + $0x1d8] sm:$0xf] %vm3068_vm3, %v11379_v5  ;;  %v9378_v13 = vld [vmem:[#allocation3 + $0xc8] sm:$0xf0]  ;;  %v2290_v45 = vshrl.u32 %v11434_v61, 16  ;;  %v4444_v28 = vshll.u32 %v11463_v8, 16  ;;  %v576_v41 = vadd.f32 %v11344_v39, %v575_v34 }
 0x1df   : > { %v2284_v52 = vrot.slane %v2283_v22, 4  ;;  %v9381_v26 = vor.u32 %v9636_v38, %v9378_v13  ;;  %4186 = vst.msk [vmem:[#allocation3 + $0x1c0] sm:$0xf] %vm4129_vm6, %v11362_v48  ;;  %v897_v44 = vld [vmem:[#allocation2 + $0xec] sm:$0x1]  ;;  %v4437_v27 = vrot.slane %v4435_v10, 4 }
 0x1e0   : > { %v3871_v36 = vld [vmem:[#allocation2 + $0x198] sm:$0xf]  ;;  %v4440_v17 = vrot.slane %v4438_v15, 5  ;;  %5257 = vst.msk [vmem:[#allocation3 + $0x30] sm:$0xf] %vm5250_vm8, %v11389_v40  ;;  %v898_v48 = vsel %vm10101_vm4, 0, %v897_v44  ;;  %v11492_v30 = vpop.permute.xlu2 %3572  ;;  %v11498_v25 = vpop.permute.xlu0 %3670 }
 0x1e1   : > { %v2289_v5 = vsel %vm10120_vm7, %v2284_v52, %v11465_v29  ;;  %v1295_v12 = vshrl.u32 %v981_v33, 16  ;;  %v1298_v50 = vshll.u32 %v981_v33, 16  ;;  %v3381_v4 = vrot.slane %v3379_v11, 4  ;;  %4061 = vrot.lane.b32.xlu1 %v3871_v36, %s9918_s17  ;;  %899 = vst [vmem:[#allocation2 + $0xec] sm:$0x1] %v898_v48 }
 0x1e2   : > { %9582 = vmatmul.msk.bf16.gmra.mxu2 %vm8467_vm1, %v9381_v26  ;;  %v1769_v53 = vld [vmem:[#allocation2 + $0xe4] sm:$0xf]  ;;  %2904 = vrot.lane.b32.xlu2 %v2289_v5, %s9916_s24  ;;  %v1293_v32 = vrot.slane %v11443_v35, 4  ;;  %v4441_v61 = vor.u32 %v4440_v17, %v4437_v27  ;;  %v11490_v2 = vrot.slane %v4444_v28, 5  ;;  %v3156_v49 = vld [vmem:[#allocation2 + $0x5c] sm:$0x1]  ;;  %v574_v35 = vadd.f32 %v11344_v39, %v11397_v46  ;;  %v11500_v20 = vpop.f32.mrf.mxu0 }
 0x1e3   : > { %v1770_v40 = vsel %vm10215_vm13, %v1292_v54, %v1769_v53  ;;  %v11494_v9 = vld [vmem:[#allocation2 + $0xc4] sm:$0xf]  ;;  %v1297_v3 = vrot.slane %v1295_v12, 7  ;;  %v3382_v11 = vrot.slane %v3156_v49, 5  ;;  %v7534_v1 = vld [vmem:[#allocation2 + $0xb4] sm:$0xe] }
 0x1e4   : > { %1771 = vst [vmem:[#allocation2 + $0xe4] sm:$0xf] %v1770_v40  ;;  %v4442_v62 = vrot.slane %v4441_v61, 4  ;;  %v7536_v58 = vld [vmem:[#allocation2 + $0xbc] sm:$0x1]  ;;  %v9259_v38 = vrot.slane %v7534_v1, 9 }
 0x1e5   : > { %v2032_v22 = vld [vmem:[#allocation2 + $0x5c] sm:$0x1]  ;;  %v1300_v54 = vor.u32 %v1298_v50, %v1297_v3  ;;  %v1302_v33 = vrot.slane %v1297_v3, 4  ;;  %v7783_v13 = vrot.slane %v7536_v58, 5  ;;  %v790_v52 = vld [vmem:[#allocation2 + $0xf0] sm:$0x1] }
 0x1e6   : > { %v1890_v10 = vld [vmem:[#allocation2 + $0x34] sm:$0xf]  ;;  %v4447_v15 = vsel %vm10120_vm7, %v4442_v62, %v11490_v2  ;;  %v7781_v46 = vsel %vm10152_vm12, %v9259_v38, %v7780_v37  ;;  %v2292_v26 = vrot.slane %v2290_v45, 4  ;;  %v2296_v28 = vshll.u32 %v2032_v22, 16  ;;  %v3872_v44 = vld [vmem:[#allocation2 + $0x19c] sm:$0xf]  ;;  %v11531_v50 = vpop.permute.xlu1 %5072 }
 0x1e7   : > { %1954 = vst.msk [vmem:[#allocation3 + $0x48] sm:$0xf] %vm712_vm2, %v1890_v10  ;;  %5082 = vrot.lane.b32.xlu0 %v4447_v15, %s9919_s23  ;;  %v1301_v34 = vsel %vm10230_vm15, %v1293_v32, %v1300_v54  ;;  %v7784_v5 = vsel %vm10152_vm12, %v11458_v60, %v7783_v13  ;;  %v682_v16 = vmax.f32 %v574_v35, 0.0  ;;  %v791_v37 = vsel %vm10136_vm9, 0, %v790_v52  ;;  %v11523_v27 = vld [vmem:[#allocation2 + $0x64] sm:$0xf] }
 0x1e8   : > { %8001 = vst.msk [vmem:[#allocation3 + $0xd4] sm:$0xf] %vm712_vm2, %v7781_v46  ;;  %v7787_v45 = vrot.slane %v11494_v9, 5  ;;  %v2293_v36 = vor.u32 %v2292_v26, %v11465_v29  ;;  %v683_v17 = vmax.f32 %v576_v41, 0.0  ;;  %v1773_v53 = vld [vmem:[#allocation2 + $0xec] sm:$0x1]  ;;  %v3383_v60 = vsel %vm10152_vm12, %v3381_v4, %v3382_v11  ;;  %v11536_v11 = vpop.f32.mrf.mxu2  ;;  %v11549_v52 = vpop.permute.xlu0 %4053 }
 0x1e9   : > { %1772 = vst.msk [vmem:[#allocation2 + $0xe8] sm:$0xf] %vm712_vm2, %v1301_v34  ;;  %v982_v48 = vpack.c.bf16 %v682_v16, %v682_v16  ;;  %v11529_v12 = vld [vmem:[#allocation2 + $0x68] sm:$0x1]  ;;  %v1774_v32 = vsel %vm10136_vm9, %v1302_v33, %v1773_v53  ;;  %3582 = vrot.lane.b32.xlu1 %v3383_v60, %s9917_s8  ;;  %v2298_v40 = vrot.slane %v2296_v28, 5  ;;  %v4448_v35 = vshrl.u32 %v11463_v8, 16 }
 0x1ea   : > { %4063 = vrot.lane.b32.xlu2 %v3872_v44, %s9918_s17  ;;  %8002 = vst.msk [vmem:[#allocation3 + $0xdc] sm:$0xf] %vm712_vm2, %v7784_v5  ;;  %v2294_v29 = vrot.slane %v2293_v36, 4  ;;  %v900_v3 = vld [vmem:[#allocation2 + $0xf8] sm:$0x1]  ;;  %v983_v4 = vpack.c.bf16 %v683_v17, %v683_v17  ;;  %v7789_v1 = vrot.slane %v7787_v45, 4  ;;  %v580_v38 = vpop.f32.mrf.mxu0 }
 0x1eb   : > { %792 = vst [vmem:[#allocation2 + $0xf0] sm:$0x1] %v791_v37  ;;  %v1304_v61 = vshrl.u32 %v982_v48, 16  ;;  %v1307_v49 = vshll.u32 %v982_v48, 16  ;;  %v3386_v62 = vrot.slane %v11523_v27, 5  ;;  %v3389_v58 = vrot.slane %v11529_v12, 5 }
 0x1ec   : > { %1775 = vst [vmem:[#allocation2 + $0xec] sm:$0x1] %v1774_v32  ;;  %v901_v41 = vsel %vm10101_vm4, 0, %v900_v3  ;;  %v1312_v54 = vshrl.u32 %v983_v4, 16  ;;  %v1315_v33 = vshll.u32 %v983_v4, 16  ;;  %v4450_v37 = vrot.slane %v4448_v35, 4 }
 0x1ed   : > { %3078 = vst.msk [vmem:[#allocation3 + $0x48] sm:$0xf] %vm3068_vm3, %v11445_v21  ;;  %v1306_v22 = vrot.slane %v1304_v61, 7  ;;  %v5075_v13 = vpop.permute.xlu2 %5074  ;;  %v2299_v21 = vsel %vm10120_vm7, %v2294_v29, %v2298_v40  ;;  %v3824_v10 = vld [vmem:[#allocation2 + $0x64] sm:$0xf]  ;;  %v581_v29 = vadd.f32 %v11344_v39, %v580_v38  ;;  %vm5923_vm0 = vcmask 781952  }
 0x1ee   : > { %3754 = vst.msk [vmem:[#allocation3 + $0x48] sm:$0xf] %vm3744_vm5, %v11417_v14  ;;  %v3157_v15 = vld [vmem:[#allocation2 + $0x60] sm:$0xe]  ;;  %v4214_v46 = vld [vmem:[#allocation2 + $0x5c] sm:$0x1]  ;;  %v579_v14 = vadd.f32 %v11344_v39, %v11500_v20  ;;  %v4451_v48 = vor.u32 %v4450_v37, %v11490_v2 }
 0x1ef   : > { %v9638_v8 = vld [vmem:[#allocation3 + $0xd4] sm:$0xf]  ;;  %4139 = vst.msk [vmem:[#allocation3 + $0x48] sm:$0xf] %vm4129_vm6, %v11436_v51  ;;  %2906 = vrot.lane.b32.xlu0 %v2299_v21, %s9916_s24  ;;  %v1309_v26 = vor.u32 %v1307_v49, %v1306_v22  ;;  %v1310_v28 = vrot.slane %v1306_v22, 4  ;;  %v1314_v44 = vrot.slane %v1312_v54, 7 }
 0x1f0   : > { %v3823_v34 = vld [vmem:[#allocation2 + $0x60] sm:$0xf]  ;;  %4138 = vst.msk [vmem:[#allocation3 + $0x40] sm:$0xf] %vm4129_vm6, %v11471_v63  ;;  %v4454_v51 = vshll.u32 %v4214_v46, 16  ;;  %v3388_v20 = vrot.slane %v3386_v62, 4 }
 0x1f1   : > { %v7537_v5 = vld [vmem:[#allocation2 + $0xc0] sm:$0xe]  ;;  %v9386_v16 = vld [vmem:[#allocation3 + $0xd8] sm:$0xf0]  ;;  %902 = vst [vmem:[#allocation2 + $0xf8] sm:$0x1] %v901_v41  ;;  %v1317_v53 = vor.u32 %v1315_v33, %v1314_v44  ;;  %3965 = vrot.lane.b32.xlu1 %v3823_v34, %s9918_s17  ;;  %v11578_v2 = vpop.permute.xlu1 %2992 }
 0x1f2   : > { %v9389_v36 = vor.u32 %v9638_v8, %v9386_v16  ;;  %v1776_v17 = vld [vmem:[#allocation2 + $0xf0] sm:$0xf]  ;;  %3967 = vrot.lane.b32.xlu2 %v3824_v10, %s9918_s17  ;;  %3804 = vst.msk [vmem:[#allocation3 + $0x1d8] sm:$0xf] %vm3744_vm5, %v11498_v25  ;;  %v9260_v60 = vrot.slane %v7537_v5, 9  ;;  %v684_v32 = vmax.f32 %v579_v14, 0.0  ;;  %v3390_v33 = vsel %vm10152_vm12, %v3388_v20, %v3389_v58  ;;  %v11591_v10 = vpop.f32.mrf.mxu0 }
 0x1f3   : > { %v1777_v63 = vsel %vm10215_vm13, %v1309_v26, %v1776_v17  ;;  %v7539_v12 = vld [vmem:[#allocation2 + $0xc8] sm:$0x1]  ;;  %5259 = vst.msk [vmem:[#allocation3 + $0x40] sm:$0xf] %vm5250_vm8, %v5075_v13  ;;  %v1318_v25 = vsel %vm10230_vm15, %v1310_v28, %v1317_v53  ;;  %v9190_v40 = vrot.slane %v3157_v15, 9  ;;  %v1319_v3 = vrot.slane %v1314_v44, 4  ;;  %v11600_v26 = vpop.permute.xlu0 %3574 }
 0x1f4   : > { %9583 = vmatmul.msk.bf16.gmra.mxu2 %vm8467_vm1, %v9389_v36  ;;  %1778 = vst [vmem:[#allocation2 + $0xf0] sm:$0xf] %v1777_v63  ;;  %v7788_v61 = vsel %vm10152_vm12, %v9260_v60, %v7787_v45  ;;  %v7790_v49 = vrot.slane %v7539_v12, 5  ;;  %v4456_v4 = vrot.slane %v4454_v51, 5  ;;  %v793_v35 = vld [vmem:[#allocation2 + $0xfc] sm:$0x1]  ;;  %v984_v38 = vpack.c.bf16 %v684_v32, %v684_v32  ;;  %v11586_v45 = vpop.f32.mrf.mxu2 }
 0x1f5   : > { %1779 = vst.msk [vmem:[#allocation2 + $0xf4] sm:$0xf] %vm712_vm2, %v1318_v25  ;;  %v4452_v22 = vrot.slane %v4451_v48, 4  ;;  %v794_v9 = vsel %vm10136_vm9, 0, %v793_v35  ;;  %v4215_v54 = vld [vmem:[#allocation2 + $0x60] sm:$0xf]  ;;  %v3387_v15 = vsel %vm10152_vm12, %v9190_v40, %v3386_v62  ;;  %v2899_v14 = vpop.permute.xlu2 %2898 }
 0x1f6   : > { %v7791_v41 = vsel %vm10152_vm12, %v7789_v1, %v7790_v49  ;;  %8003 = vst.msk [vmem:[#allocation3 + $0xe4] sm:$0xf] %vm712_vm2, %v7788_v61  ;;  %v1321_v13 = vshrl.u32 %v984_v38, 16  ;;  %v4216_v8 = vld [vmem:[#allocation2 + $0x64] sm:$0xf]  ;;  %v685_v21 = vmax.f32 %v581_v29, 0.0 }
 0x1f7   : > { %8004 = vst.msk [vmem:[#allocation3 + $0xec] sm:$0xf] %vm712_vm2, %v7791_v41  ;;  %3586 = vrot.lane.b32.xlu0 %v3390_v33, %s9917_s8  ;;  %v4459_v46 = vshrl.u32 %v4215_v54, 16  ;;  %v4462_v58 = vshll.u32 %v4215_v54, 16  ;;  %v1324_v34 = vshll.u32 %v984_v38, 16  ;;  %v4468_v44 = vshll.u32 %v4216_v8, 16 }
 0x1f8   : > { %v1780_v1 = vld [vmem:[#allocation2 + $0xf8] sm:$0x1]  ;;  %5258 = vst.msk [vmem:[#allocation3 + $0x38] sm:$0xf] %vm5250_vm8, %v11531_v50  ;;  %v4472_v5 = vshrl.u32 %v4216_v8, 16  ;;  %v4457_v27 = vsel %vm10120_vm7, %v4452_v22, %v4456_v4  ;;  %v11608_v37 = vrot.slane %v1321_v13, 7  ;;  %v985_v20 = vpack.c.bf16 %v685_v21, %v685_v21 }
 0x1f9   : > { %v1781_v28 = vsel %vm10136_vm9, %v1319_v3, %v1780_v1  ;;  %795 = vst [vmem:[#allocation2 + $0xfc] sm:$0x1] %v794_v9  ;;  %v4461_v62 = vrot.slane %v4459_v46, 4  ;;  %v4464_v50 = vrot.slane %v4462_v58, 5  ;;  %v2033_v16 = vld [vmem:[#allocation2 + $0x60] sm:$0xf]  ;;  %5084 = vrot.lane.b32.xlu1 %v4457_v27, %s9919_s23 }
 0x1fa   : > { %1782 = vst [vmem:[#allocation2 + $0xf8] sm:$0x1] %v1781_v28  ;;  %3584 = vrot.lane.b32.xlu2 %v3387_v15, %s9917_s8  ;;  %v11610_v51 = vrot.slane %v4468_v44, 5  ;;  %v11612_v36 = vrot.slane %v4472_v5, 4  ;;  %v2034_v17 = vld [vmem:[#allocation2 + $0x64] sm:$0xf]  ;;  %v1326_v29 = vor.u32 %v1324_v34, %v11608_v37  ;;  %v585_v54 = vpop.f32.mrf.mxu0 }
 0x1fb   : > { %v4465_v53 = vor.u32 %v4464_v50, %v4461_v62  ;;  %v2301_v60 = vshrl.u32 %v2033_v16, 16  ;;  %v2304_v63 = vshll.u32 %v2033_v16, 16  ;;  %v2310_v48 = vshll.u32 %v2034_v17, 16  ;;  %v3825_v32 = vld [vmem:[#allocation2 + $0x6c] sm:$0xf]  ;;  %v11639_v50 = vpop.permute.xlu0 %3957 }
 0x1fc   : > { %v4475_v25 = vor.u32 %v11612_v36, %v11610_v51  ;;  %v1892_v40 = vld [vmem:[#allocation2 + $0x40] sm:$0xf]  ;;  %v2314_v35 = vshrl.u32 %v2034_v17, 16  ;;  %v11617_v38 = vpop.permute.xlu1 %2896  ;;  %v2036_v41 = vld [vmem:[#allocation2 + $0x6c] sm:$0xf]  ;;  %v1329_v9 = vshrl.u32 %v985_v20, 16  ;;  %v11626_v1 = vpop.f32.mrf.mxu2  ;;  %v584_v62 = vadd.f32 %v11344_v39, %v11591_v10 }
 0x1fd   : > { %v9640_v12 = vld [vmem:[#allocation3 + $0xe4] sm:$0xf]  ;;  %v4466_v49 = vrot.slane %v4465_v53, 4  ;;  %v2303_v3 = vrot.slane %v2301_v60, 4  ;;  %v2306_v4 = vrot.slane %v2304_v63, 5  ;;  %v11619_v22 = vrot.slane %v2310_v48, 5  ;;  %v11635_v27 = vpop.permute.xlu2 %3674 }
 0x1fe   : > { %v9394_v61 = vld [vmem:[#allocation3 + $0xe8] sm:$0xf0]  ;;  %1956 = vst.msk [vmem:[#allocation3 + $0x58] sm:$0xf] %vm712_vm2, %v1892_v40  ;;  %v11624_v21 = vld [vmem:[#allocation2 + $0x70] sm:$0xf] }
 0x1ff   : > { %v9397_v33 = vor.u32 %v9640_v12, %v9394_v61  ;;  %3969 = vrot.lane.b32.xlu0 %v3825_v32, %s9918_s17  ;;  %v2307_v8 = vor.u32 %v2306_v4, %v2303_v3  ;;  %3080 = vst.msk [vmem:[#allocation3 + $0x58] sm:$0xf] %vm3068_vm3, %v2899_v14  ;;  %v4471_v46 = vsel %vm10120_vm7, %v4466_v49, %v11610_v51  ;;  %v2325_v58 = vshrl.u32 %v2036_v41, 16  ;;  %v1939_v34 = vld [vmem:[#allocation2 + $0x174] sm:$0xf] }
 0x200   : > { %v1783_v13 = vld [vmem:[#allocation2 + $0xfc] sm:$0xf]  ;;  %v2328_v28 = vshll.u32 %v2036_v41, 16  ;;  %v2334_v14 = vshll.u32 %v11624_v21, 16  ;;  %v903_v5 = vld [vmem:[#allocation2 + $0x104] sm:$0x1] }
 0x201   : > { %v1784_v15 = vsel %vm10215_vm13, %v1326_v29, %v1783_v13  ;;  %v2308_v44 = vrot.slane %v2307_v8, 4  ;;  %v1327_v16 = vrot.slane %v11608_v37, 4  ;;  %v2327_v17 = vrot.slane %v2325_v58, 4  ;;  %2003 = vst.msk [vmem:[#allocation3 + $0x1d0] sm:$0xf] %vm712_vm2, %v1939_v34 }
 0x202   : > { %1785 = vst [vmem:[#allocation2 + $0xfc] sm:$0xf] %v1784_v15  ;;  %5086 = vrot.lane.b32.xlu2 %v4471_v46, %s9919_s23  ;;  %v2330_v53 = vrot.slane %v2328_v28, 5  ;;  %v904_v60 = vsel %vm10101_vm4, 0, %v903_v5  ;;  %v11651_v10 = vrot.slane %v1329_v9, 7  ;;  %v1332_v48 = vshll.u32 %v985_v20, 16  ;;  %v588_v46 = vpop.f32.mrf.mxu0 }
 0x203   : > { %v2313_v63 = vsel %vm10120_vm7, %v2308_v44, %v11619_v22  ;;  %3127 = vst.msk [vmem:[#allocation3 + $0x1d0] sm:$0xf] %vm3068_vm3, %v11578_v2  ;;  %v2035_v37 = vld [vmem:[#allocation2 + $0x68] sm:$0x1]  ;;  %v2316_v32 = vrot.slane %v2314_v35, 4  ;;  %v11656_v40 = vrot.slane %v2334_v14, 5 }
 0x204   : > { %9584 = vmatmul.msk.bf16.gmra.mxu2 %vm8467_vm1, %v9397_v33  ;;  %2908 = vrot.lane.b32.xlu1 %v2313_v63, %s9916_s24  ;;  %v2331_v12 = vor.u32 %v2330_v53, %v2327_v17  ;;  %3803 = vst.msk [vmem:[#allocation3 + $0x1d0] sm:$0xf] %vm3744_vm5, %v11324_v31  ;;  %v2320_v29 = vshll.u32 %v2035_v37, 16  ;;  %v1334_v61 = vor.u32 %v1332_v48, %v11651_v10  ;;  %v7540_v2 = vld [vmem:[#allocation2 + $0xcc] sm:$0xe]  ;;  %v686_v49 = vmax.f32 %v584_v62, 0.0  ;;  %v4056_v15 = vpop.permute.xlu1 %4055 }
 0x205   : > { %4188 = vst.msk [vmem:[#allocation3 + $0x1d0] sm:$0xf] %vm4129_vm6, %v11549_v52  ;;  %v11661_v3 = vld [vmem:[#allocation2 + $0xf4] sm:$0xf]  ;;  %v2317_v4 = vor.u32 %v2316_v32, %v11619_v22  ;;  %v7541_v9 = vld [vmem:[#allocation2 + $0xd0] sm:$0xf]  ;;  %v586_v31 = vadd.f32 %v11344_v39, %v585_v54  ;;  %v11691_v37 = vpop.permute.xlu2 %4057 }
 0x206   : > { %v2332_v20 = vrot.slane %v2331_v12, 4  ;;  %905 = vst [vmem:[#allocation2 + $0x104] sm:$0x1] %v904_v60  ;;  %v2322_v41 = vrot.slane %v2320_v29, 5  ;;  %v1335_v35 = vsel %vm10230_vm15, %v1327_v16, %v1334_v61  ;;  %v7542_v52 = vld [vmem:[#allocation2 + $0xd4] sm:$0x1]  ;;  %v11669_v8 = vpack.c.bf16 %v686_v49, %v686_v49  ;;  %v11681_v16 = vpop.f32.mrf.mxu2  ;;  %v5077_v12 = vpop.permute.xlu0 %5076 }
 0x207   : > { %3756 = vst.msk [vmem:[#allocation3 + $0x58] sm:$0xf] %vm3744_vm5, %v11600_v26  ;;  %v9261_v33 = vrot.slane %v7540_v2, 9  ;;  %v7794_v13 = vrot.slane %v7541_v9, 5  ;;  %v2338_v58 = vshrl.u32 %v11624_v21, 16  ;;  %v2318_v54 = vrot.slane %v2317_v4, 4 }
 0x208   : > { %v2337_v22 = vsel %vm10120_vm7, %v2332_v20, %v11656_v40  ;;  %1786 = vst.msk [vmem:[#allocation2 + $0x100] sm:$0xf] %vm712_vm2, %v1335_v35  ;;  %v7797_v28 = vrot.slane %v7542_v52, 5  ;;  %v1336_v26 = vrot.slane %v11651_v10, 4  ;;  %v3826_v34 = vld [vmem:[#allocation2 + $0x70] sm:$0xf] }
 0x209   : > { %2912 = vrot.lane.b32.xlu0 %v2337_v22, %s9916_s24  ;;  %v7795_v44 = vsel %vm10152_vm12, %v9261_v33, %v7794_v13  ;;  %v7796_v14 = vrot.slane %v7794_v13, 4  ;;  %v1891_v5 = vld [vmem:[#allocation2 + $0x3c] sm:$0xf]  ;;  %v1338_v62 = vshrl.u32 %v11669_v8, 16  ;;  %v2323_v21 = vsel %vm10120_vm7, %v2318_v54, %v2322_v41  ;;  %v796_v17 = vld [vmem:[#allocation2 + $0x108] sm:$0x1] }
 0x20a   : > { %8005 = vst.msk [vmem:[#allocation3 + $0xf4] sm:$0xf] %vm712_vm2, %v7795_v44  ;;  %v3161_v53 = vld [vmem:[#allocation2 + $0x70] sm:$0xf]  ;;  %v7801_v60 = vrot.slane %v11661_v3, 5  ;;  %2910 = vrot.lane.b32.xlu2 %v2323_v21, %s9916_s24  ;;  %v687_v61 = vmax.f32 %v586_v31, 0.0 }
 0x20b   : > { %v7798_v63 = vsel %vm10152_vm12, %v7796_v14, %v7797_v28  ;;  %1955 = vst.msk [vmem:[#allocation3 + $0x50] sm:$0xf] %vm712_vm2, %v1891_v5  ;;  %v3162_v10 = vld [vmem:[#allocation2 + $0x74] sm:$0x1]  ;;  %v3393_v48 = vrot.slane %v3161_v53, 5  ;;  %v11695_v32 = vrot.slane %v1338_v62, 7 }
 0x20c   : > { %3971 = vrot.lane.b32.xlu1 %v3826_v34, %s9918_s17  ;;  %8006 = vst.msk [vmem:[#allocation3 + $0xfc] sm:$0xf] %vm712_vm2, %v7798_v63  ;;  %v3160_v29 = vld [vmem:[#allocation2 + $0x6c] sm:$0xe]  ;;  %v797_v49 = vsel %vm10136_vm9, 0, %v796_v17  ;;  %v3396_v20 = vrot.slane %v3162_v10, 5  ;;  %v987_v35 = vpack.c.bf16 %v687_v61, %v687_v61  ;;  %v11720_v34 = vpop.permute.xlu1 %3672 }
 0x20d   : > { %v1787_v2 = vld [vmem:[#allocation2 + $0x104] sm:$0x1]  ;;  %3079 = vst.msk [vmem:[#allocation3 + $0x50] sm:$0xf] %vm3068_vm3, %v11617_v38  ;;  %v3828_v41 = vld [vmem:[#allocation2 + $0x7c] sm:$0xf]  ;;  %v11706_v38 = vpop.f32.mrf.mxu0 }
 0x20e   : > { %v1788_v4 = vsel %vm10136_vm9, %v1336_v26, %v1787_v2  ;;  %3755 = vst.msk [vmem:[#allocation3 + $0x50] sm:$0xf] %vm3744_vm5, %v11492_v30  ;;  %v3395_v9 = vrot.slane %v3393_v48, 4  ;;  %v2340_v52 = vrot.slane %v2338_v58, 4  ;;  %v1341_v31 = vshll.u32 %v11669_v8, 16  ;;  %v11732_v17 = vpop.f32.mrf.mxu2 }
 0x20f   : > { %1789 = vst [vmem:[#allocation2 + $0x104] sm:$0x1] %v1788_v4  ;;  %v9191_v33 = vrot.slane %v3160_v29, 9  ;;  %v3163_v13 = vld [vmem:[#allocation2 + $0x78] sm:$0xe]  ;;  %v11710_v22 = vrot.slane %v7801_v60, 4  ;;  %v589_v30 = vadd.f32 %v11344_v39, %v588_v46 }
 0x210   : > { %798 = vst [vmem:[#allocation2 + $0x108] sm:$0x1] %v797_v49  ;;  %v1344_v54 = vrot.slane %v11695_v32, 4  ;;  %v11713_v28 = vld [vmem:[#allocation2 + $0x7c] sm:$0xf]  ;;  %v2341_v58 = vor.u32 %v2340_v52, %v11656_v40  ;;  %v3397_v44 = vsel %vm10152_vm12, %v3395_v9, %v3396_v20  ;;  %v9192_v14 = vrot.slane %v3163_v13, 9 }
 0x211   : > { %v9642_v26 = vld [vmem:[#allocation3 + $0xf4] sm:$0xf]  ;;  %3975 = vrot.lane.b32.xlu0 %v3828_v41, %s9918_s17  ;;  %4140 = vst.msk [vmem:[#allocation3 + $0x50] sm:$0xf] %vm4129_vm6, %v11639_v50  ;;  %v906_v8 = vld [vmem:[#allocation2 + $0x110] sm:$0x1]  ;;  %v1343_v62 = vor.u32 %v1341_v31, %v11695_v32  ;;  %v3394_v50 = vsel %vm10152_vm12, %v9191_v33, %v3393_v48  ;;  %v11738_v48 = vpop.permute.xlu2 %3578 }
 0x212   : > { %4189 = vst.msk [vmem:[#allocation3 + $0x1d8] sm:$0xf] %vm4129_vm6, %v4056_v15  ;;  %v907_v39 = vsel %vm10101_vm4, 0, %v906_v8  ;;  %v1346_v46 = vshrl.u32 %v987_v35, 16  ;;  %3590 = vrot.lane.b32.xlu2 %v3397_v44, %s9917_s8  ;;  %v3400_v40 = vrot.slane %v11713_v28, 5  ;;  %v1349_v21 = vshll.u32 %v987_v35, 16 }
 0x213   : > { %v9402_v5 = vld [vmem:[#allocation3 + $0xf8] sm:$0xf0]  ;;  %908 = vst [vmem:[#allocation2 + $0x110] sm:$0x1] %v907_v39  ;;  %v11734_v53 = vld [vmem:[#allocation2 + $0x100] sm:$0xf] }
 0x214   : > { %v9405_v15 = vor.u32 %v9642_v26, %v9402_v5  ;;  %3588 = vrot.lane.b32.xlu1 %v3394_v50, %s9917_s8  ;;  %v1348_v63 = vrot.slane %v1346_v46, 7  ;;  %5260 = vst.msk [vmem:[#allocation3 + $0x48] sm:$0xf] %vm5250_vm8, %v5077_v12  ;;  %v2342_v10 = vrot.slane %v2341_v58, 4  ;;  %v688_v32 = vmax.f32 %v589_v30, 0.0 }
 0x215   : > { %v2038_v29 = vld [vmem:[#allocation2 + $0x74] sm:$0x1]  ;;  %v7543_v61 = vld [vmem:[#allocation2 + $0xf0] sm:$0xe]  ;;  %v7545_v2 = vld [vmem:[#allocation2 + $0xf8] sm:$0x1]  ;;  %v11740_v49 = vpop.permute.xlu0 %2996  ;;  %v3401_v12 = vsel %vm10152_vm12, %v9192_v14, %v3400_v40 }
 0x216   : > { %9585 = vmatmul.msk.bf16.gmra.mxu2 %vm8467_vm1, %v9405_v15  ;;  %v1351_v20 = vor.u32 %v1349_v21, %v1348_v63  ;;  %v1353_v4 = vrot.slane %v1348_v63, 4  ;;  %v2344_v41 = vshll.u32 %v2038_v29, 16  ;;  %v9262_v9 = vrot.slane %v7543_v61, 9  ;;  %v2040_v35 = vld [vmem:[#allocation2 + $0x7c] sm:$0xf] }
 0x217   : > { %v1790_v52 = vld [vmem:[#allocation2 + $0x108] sm:$0xf]  ;;  %v7804_v31 = vrot.slane %v7545_v2, 5  ;;  %v2041_v33 = vld [vmem:[#allocation2 + $0x80] sm:$0x1]  ;;  %v2358_v13 = vshll.u32 %v2040_v35, 16  ;;  %v11747_v30 = vpack.c.bf16 %v688_v32, %v688_v32  ;;  %v593_v26 = vpop.f32.mrf.mxu0  ;;  %v2999_v2 = vpop.permute.xlu1 %2998 }
 0x218   : > { %v1791_v8 = vsel %vm10215_vm13, %v1343_v62, %v1790_v52  ;;  %v1352_v58 = vsel %vm10230_vm15, %v1344_v54, %v1351_v20  ;;  %v3827_v44 = vld [vmem:[#allocation2 + $0x78] sm:$0xf]  ;;  %v2346_v39 = vrot.slane %v2344_v41, 5  ;;  %v7802_v46 = vsel %vm10152_vm12, %v9262_v9, %v7801_v60  ;;  %v799_v14 = vld [vmem:[#allocation2 + $0x114] sm:$0x1]  ;;  %v11778_v52 = vpop.f32.mrf.mxu2 }
 0x219   : > { %v7808_v5 = vrot.slane %v11734_v53, 5  ;;  %1792 = vst [vmem:[#allocation2 + $0x108] sm:$0xf] %v1791_v8  ;;  %3592 = vrot.lane.b32.xlu0 %v3401_v12, %s9917_s8  ;;  %v11759_v50 = vrot.slane %v2358_v13, 5  ;;  %v2362_v21 = vshrl.u32 %v2040_v35, 16  ;;  %v2368_v62 = vshll.u32 %v2041_v33, 16  ;;  %v11793_v28 = vpop.permute.xlu2 %3961 }
 0x21a   : > { %1793 = vst.msk [vmem:[#allocation2 + $0x10c] sm:$0xf] %vm712_vm2, %v1352_v58  ;;  %v1794_v54 = vld [vmem:[#allocation2 + $0x110] sm:$0x1]  ;;  %v2347_v15 = vsel %vm10120_vm7, %v2342_v10, %v2346_v39  ;;  %v7805_v3 = vsel %vm10152_vm12, %v11710_v22, %v7804_v31  ;;  %v1941_v60 = vld [vmem:[#allocation2 + $0x180] sm:$0xf]  ;;  %3973 = vrot.lane.b32.xlu2 %v3827_v44, %s9918_s17 }
 0x21b   : > { %v1795_v63 = vsel %vm10136_vm9, %v1353_v4, %v1794_v54  ;;  %8007 = vst.msk [vmem:[#allocation3 + $0x104] sm:$0xf] %vm712_vm2, %v7802_v46  ;;  %v2364_v32 = vrot.slane %v2362_v21, 4  ;;  %v800_v29 = vsel %vm10136_vm9, 0, %v799_v14  ;;  %v1355_v61 = vshrl.u32 %v11747_v30, 16 }
 0x21c   : > { %1796 = vst [vmem:[#allocation2 + $0x110] sm:$0x1] %v1795_v63  ;;  %2914 = vrot.lane.b32.xlu1 %v2347_v15, %s9916_s24  ;;  %v2370_v10 = vrot.slane %v2368_v62, 5  ;;  %v1358_v22 = vshll.u32 %v11747_v30, 16  ;;  %v2039_v20 = vld [vmem:[#allocation2 + $0x78] sm:$0xf] }
 0x21d   : > { %8008 = vst.msk [vmem:[#allocation3 + $0x10c] sm:$0xf] %vm712_vm2, %v7805_v3  ;;  %v2365_v4 = vor.u32 %v2364_v32, %v11759_v50  ;;  %v2349_v41 = vshrl.u32 %v2039_v20, 16  ;;  %v2352_v9 = vshll.u32 %v2039_v20, 16  ;;  %v3165_v35 = vld [vmem:[#allocation2 + $0x80] sm:$0x1]  ;;  %v2901_v46 = vpop.permute.xlu0 %2900 }
 0x21e   : > { %801 = vst [vmem:[#allocation2 + $0x114] sm:$0x1] %v800_v29  ;;  %v3402_v12 = vrot.slane %v3400_v40, 4  ;;  %v3403_v31 = vrot.slane %v3165_v35, 5  ;;  %v11782_v33 = vld [vmem:[#allocation2 + $0x88] sm:$0xf] }
 0x21f   : > { %v11787_v13 = vld [vmem:[%s13885_s2] ss:$0 sm:$0xff]  ;;  %v2366_v58 = vrot.slane %v2365_v4, 4  ;;  %2005 = vst.msk [vmem:[#allocation3 + $0x1e0] sm:$0xf] %vm712_vm2, %v1941_v60  ;;  %v2351_v44 = vrot.slane %v2349_v41, 4  ;;  %v595_v15 = vpop.f32.mrf.mxu0 }
 0x220   : > { %v591_v30 = vadd.f32 %v11787_v13, %v11706_v38  ;;  %v594_v8 = vadd.f32 %v11787_v13, %v593_v26  ;;  %v2354_v39 = vrot.slane %v2352_v9, 5  ;;  %v3407_v40 = vrot.slane %v11782_v33, 5  ;;  %3129 = vst.msk [vmem:[#allocation3 + $0x1e0] sm:$0xf] %vm3068_vm3, %v11740_v49  ;;  %v1942_v21 = vld [vmem:[#allocation2 + $0x184] sm:$0xf] }
 0x221   : > { %v11796_v14 = vrot.slane %v1355_v61, 7  ;;  %v7810_v38 = vrot.slane %v7808_v5, 4  ;;  %v2371_v26 = vsel %vm10120_vm7, %v2366_v58, %v2370_v10  ;;  %3805 = vst.msk [vmem:[#allocation3 + $0x1e0] sm:$0xf] %vm3744_vm5, %v11720_v34  ;;  %v3168_v54 = vld [vmem:[#allocation2 + $0x8c] sm:$0x1]  ;;  %v3404_v29 = vsel %vm10152_vm12, %v3402_v12, %v3403_v31  ;;  %v3960_v12 = vpop.permute.xlu1 %3959 }
 0x222   : > { %v2355_v62 = vor.u32 %v2354_v39, %v2351_v44  ;;  %v9644_v3 = vld [vmem:[#allocation3 + $0x104] sm:$0xf]  ;;  %2918 = vrot.lane.b32.xlu0 %v2371_v26, %s9916_s24  ;;  %4190 = vst.msk [vmem:[#allocation3 + $0x1e0] sm:$0xf] %vm4129_vm6, %v11691_v37  ;;  %v3409_v49 = vrot.slane %v3407_v40, 4  ;;  %v689_v63 = vmax.f32 %v591_v30, 0.0  ;;  %v596_v26 = vadd.f32 %v11787_v13, %v595_v15 }
 0x223   : > { %v1360_v60 = vor.u32 %v1358_v22, %v11796_v14  ;;  %2006 = vst.msk [vmem:[#allocation3 + $0x1e8] sm:$0xf] %vm712_vm2, %v1942_v21  ;;  %v909_v34 = vld [vmem:[#allocation2 + $0x11c] sm:$0x1]  ;;  %v690_v61 = vmax.f32 %v594_v8, 0.0  ;;  %v3410_v20 = vrot.slane %v3168_v54, 5 }
 0x224   : > { %v2356_v32 = vrot.slane %v2355_v62, 4  ;;  %v9410_v10 = vld [vmem:[#allocation3 + $0x108] sm:$0xf0]  ;;  %3594 = vrot.lane.b32.xlu1 %v3404_v29, %s9917_s8  ;;  %3130 = vst.msk [vmem:[#allocation3 + $0x1e8] sm:$0xf] %vm3068_vm3, %v2999_v2  ;;  %v910_v37 = vsel %vm10101_vm4, 0, %v909_v34  ;;  %v989_v22 = vpack.c.bf16 %v689_v63, %v689_v63 }
 0x225   : > { %v9413_v4 = vor.u32 %v9644_v3, %v9410_v10  ;;  %v1797_v41 = vld [vmem:[#allocation2 + $0x114] sm:$0xf]  ;;  %3806 = vst.msk [vmem:[#allocation3 + $0x1e8] sm:$0xf] %vm3744_vm5, %v11635_v27  ;;  %v1893_v35 = vld [vmem:[#allocation2 + $0x48] sm:$0xf]  ;;  %v11824_v31 = vpack.c.bf16 %v690_v61, %v690_v61  ;;  %v3411_v62 = vsel %vm10152_vm12, %v3409_v49, %v3410_v20 }
 0x226   : > { %v2361_v9 = vsel %vm10120_vm7, %v2356_v32, %v11759_v50  ;;  %v1361_v30 = vrot.slane %v11796_v14, 4  ;;  %v1798_v2 = vsel %vm10215_vm13, %v1360_v60, %v1797_v41  ;;  %911 = vst [vmem:[#allocation2 + $0x11c] sm:$0x1] %v910_v37  ;;  %v1363_v8 = vshrl.u32 %v989_v22, 16  ;;  %v11830_v44 = vld [vmem:[#allocation2 + $0x10c] sm:$0xf]  ;;  %v11833_v50 = vpop.f32.mrf.mxu2  ;;  %v4060_v32 = vpop.permute.xlu0 %4059 }
 0x227   : > { %2916 = vrot.lane.b32.xlu2 %v2361_v9, %s9916_s24  ;;  %v1366_v58 = vshll.u32 %v989_v22, 16  ;;  %9586 = vmatmul.msk.bf16.gmra.mxu2 %vm8467_vm1, %v9413_v4  ;;  %1799 = vst [vmem:[#allocation2 + $0x114] sm:$0xf] %v1798_v2  ;;  %v7546_v27 = vld [vmem:[#allocation2 + $0xfc] sm:$0xe]  ;;  %v1372_v63 = vshrl.u32 %v11824_v31, 16 }
 0x228   : > { %v1365_v39 = vrot.slane %v1363_v8, 7  ;;  %1957 = vst.msk [vmem:[#allocation3 + $0x60] sm:$0xf] %vm712_vm2, %v1893_v35  ;;  %v7548_v14 = vld [vmem:[#allocation2 + $0x104] sm:$0x1]  ;;  %v9263_v21 = vrot.slane %v7546_v27, 9 }
 0x229   : > { %3081 = vst.msk [vmem:[#allocation3 + $0x60] sm:$0xf] %vm3068_vm3, %v2901_v46  ;;  %v3829_v54 = vld [vmem:[#allocation2 + $0x84] sm:$0xf]  ;;  %v7811_v3 = vrot.slane %v7548_v14, 5  ;;  %v5081_v60 = vpop.permute.xlu2 %5080  ;;  %v7815_v46 = vrot.slane %v11830_v44, 5 }
 0x22a   : > { %3598 = vrot.lane.b32.xlu0 %v3411_v62, %s9917_s8  ;;  %v1368_v29 = vor.u32 %v1366_v58, %v1365_v39  ;;  %v1370_v34 = vrot.slane %v1365_v39, 4  ;;  %v7809_v15 = vsel %vm10152_vm12, %v9263_v21, %v7808_v5  ;;  %4141 = vst.msk [vmem:[#allocation3 + $0x58] sm:$0xf] %vm4129_vm6, %v3960_v12  ;;  %v802_v49 = vld [vmem:[#allocation2 + $0x120] sm:$0x1]  ;;  %v11851_v20 = vrot.slane %v1372_v63, 7  ;;  %v3577_v21 = vpop.permute.xlu1 %3576 }
 0x22b   : > { %v3830_v61 = vld [vmem:[#allocation2 + $0x88] sm:$0xf]  ;;  %v7812_v10 = vsel %vm10152_vm12, %v7810_v38, %v7811_v3  ;;  %8009 = vst.msk [vmem:[#allocation3 + $0x114] sm:$0xf] %vm712_vm2, %v7809_v15  ;;  %v3166_v37 = vld [vmem:[#allocation2 + $0x84] sm:$0xe]  ;;  %v598_v22 = vpop.f32.mrf.mxu0 }
 0x22c   : > { %v1369_v53 = vsel %vm10230_vm15, %v1361_v30, %v1368_v29  ;;  %3977 = vrot.lane.b32.xlu1 %v3829_v54, %s9918_s17  ;;  %8010 = vst.msk [vmem:[#allocation3 + $0x11c] sm:$0xf] %vm712_vm2, %v7812_v10  ;;  %v1375_v5 = vshll.u32 %v11824_v31, 16  ;;  %v2042_v4 = vld [vmem:[#allocation2 + $0x84] sm:$0xf]  ;;  %v691_v41 = vmax.f32 %v596_v26, 0.0  ;;  %v599_v26 = vadd.f32 %v11787_v13, %v598_v22 }
 0x22d   : > { %1800 = vst.msk [vmem:[#allocation2 + $0x118] sm:$0xf] %vm712_vm2, %v1369_v53  ;;  %v1801_v38 = vld [vmem:[#allocation2 + $0x11c] sm:$0x1]  ;;  %v803_v9 = vsel %vm10136_vm9, 0, %v802_v49  ;;  %v2373_v35 = vshrl.u32 %v2042_v4, 16 }
 0x22e   : > { %v1802_v12 = vsel %vm10136_vm9, %v1370_v34, %v1801_v38  ;;  %5262 = vst.msk [vmem:[#allocation3 + $0x58] sm:$0xf] %vm5250_vm8, %v5081_v60  ;;  %v9193_v30 = vrot.slane %v3166_v37, 9  ;;  %v2043_v2 = vld [vmem:[#allocation2 + $0x88] sm:$0xf]  ;;  %v2376_v8 = vshll.u32 %v2042_v4, 16  ;;  %v991_v31 = vpack.c.bf16 %v691_v41, %v691_v41  ;;  %v11868_v34 = vpop.f32.mrf.mxu2  ;;  %v3677_v41 = vpop.permute.xlu0 %3676 }
 0x22f   : > { %3979 = vrot.lane.b32.xlu2 %v3830_v61, %s9918_s17  ;;  %1803 = vst [vmem:[#allocation2 + $0x11c] sm:$0x1] %v1802_v12  ;;  %v3831_v58 = vld [vmem:[#allocation2 + $0x90] sm:$0xf]  ;;  %v1378_v27 = vrot.slane %v11851_v20, 4  ;;  %v2375_v39 = vrot.slane %v2373_v35, 4  ;;  %v1377_v49 = vor.u32 %v1375_v5, %v11851_v20 }
 0x230   : > { %v2382_v14 = vshll.u32 %v2043_v2, 16  ;;  %804 = vst [vmem:[#allocation2 + $0x120] sm:$0x1] %v803_v9  ;;  %v2378_v62 = vrot.slane %v2376_v8, 5  ;;  %v1943_v54 = vld [vmem:[#allocation2 + $0x18c] sm:$0xf]  ;;  %v3408_v5 = vsel %vm10152_vm12, %v9193_v30, %v3407_v40 }
 0x231   : > { %v1380_v3 = vshrl.u32 %v991_v31, 16  ;;  %4191 = vst.msk [vmem:[#allocation3 + $0x1e8] sm:$0xf] %vm4129_vm6, %v4060_v32  ;;  %v2386_v60 = vshrl.u32 %v2043_v2, 16  ;;  %v2045_v63 = vld [vmem:[#allocation2 + $0x90] sm:$0xf] }
 0x232   : > { %v1383_v29 = vshll.u32 %v991_v31, 16  ;;  %v9646_v15 = vld [vmem:[#allocation3 + $0x114] sm:$0xf]  ;;  %3981 = vrot.lane.b32.xlu0 %v3831_v58, %s9918_s17  ;;  %v2379_v61 = vor.u32 %v2378_v62, %v2375_v39  ;;  %2007 = vst.msk [vmem:[#allocation3 + $0x1f0] sm:$0xf] %vm712_vm2, %v1943_v54  ;;  %v2384_v22 = vrot.slane %v2382_v14, 5 }
 0x233   : > { %v11873_v10 = vld [vmem:[#allocation2 + $0x94] sm:$0xf]  ;;  %v9418_v37 = vld [vmem:[#allocation3 + $0x118] sm:$0xf0]  ;;  %v3001_v53 = vpop.permute.xlu2 %3000  ;;  %v2397_v4 = vshrl.u32 %v2045_v63, 16  ;;  %v2400_v32 = vshll.u32 %v2045_v63, 16  ;;  %v600_v20 = vpop.f32.mrf.mxu0 }
 0x234   : > { %v692_v38 = vmax.f32 %v599_v26, 0.0  ;;  %v9421_v9 = vor.u32 %v9646_v15, %v9418_v37  ;;  %v2380_v35 = vrot.slane %v2379_v61, 4  ;;  %3131 = vst.msk [vmem:[#allocation3 + $0x1f0] sm:$0xf] %vm3068_vm3, %v3001_v53  ;;  %v2406_v12 = vshll.u32 %v11873_v10, 16 }
 0x235   : > { %v11877_v2 = vrot.slane %v1380_v3, 7  ;;  %v2399_v8 = vrot.slane %v2397_v4, 4  ;;  %v2402_v31 = vrot.slane %v2400_v32, 5  ;;  %3757 = vst.msk [vmem:[#allocation3 + $0x60] sm:$0xf] %vm3744_vm5, %v3577_v21  ;;  %v2388_v26 = vrot.slane %v2386_v60, 4 }
 0x236   : > { %v2385_v58 = vsel %vm10120_vm7, %v2380_v35, %v2384_v22  ;;  %4142 = vst.msk [vmem:[#allocation3 + $0x60] sm:$0xf] %vm4129_vm6, %v11793_v28  ;;  %v912_v39 = vld [vmem:[#allocation2 + $0x128] sm:$0x1]  ;;  %v7817_v33 = vrot.slane %v7815_v46, 4  ;;  %v11897_v62 = vpack.c.bf16 %v692_v38, %v692_v38  ;;  %v11903_v3 = vrot.slane %v2406_v12, 5 }
 0x237   : > { %3596 = vrot.lane.b32.xlu2 %v3408_v5, %s9917_s8  ;;  %v1385_v14 = vor.u32 %v1383_v29, %v11877_v2  ;;  %9587 = vmatmul.msk.bf16.gmra.mxu2 %vm8467_vm1, %v9421_v9  ;;  %v1804_v40 = vld [vmem:[#allocation2 + $0x120] sm:$0xf]  ;;  %v2403_v30 = vor.u32 %v2402_v31, %v2399_v8  ;;  %v913_v21 = vsel %vm10101_vm4, 0, %v912_v39  ;;  %3807 = vst.msk [vmem:[#allocation3 + $0x1f0] sm:$0xf] %vm3744_vm5, %v3677_v41  ;;  %v11913_v5 = vpop.f32.mrf.mxu2 }
 0x238   : > { %2920 = vrot.lane.b32.xlu1 %v2385_v58, %s9916_s24  ;;  %v11899_v28 = vld [vmem:[#allocation2 + $0x118] sm:$0xf]  ;;  %v1805_v54 = vsel %vm10215_vm13, %v1377_v49, %v1804_v40  ;;  %914 = vst [vmem:[#allocation2 + $0x128] sm:$0x1] %v913_v21  ;;  %v2044_v63 = vld [vmem:[#allocation2 + $0x8c] sm:$0x1]  ;;  %v2389_v29 = vor.u32 %v2388_v26, %v2384_v22  ;;  %v601_v4 = vadd.f32 %v11787_v13, %v600_v20 }
 0x239   : > { %v1386_v60 = vsel %vm10230_vm15, %v1378_v27, %v1385_v14  ;;  %1806 = vst [vmem:[#allocation2 + $0x120] sm:$0xf] %v1805_v54  ;;  %v2404_v15 = vrot.slane %v2403_v30, 4  ;;  %v2392_v61 = vshll.u32 %v2044_v63, 16  ;;  %v7549_v37 = vld [vmem:[#allocation2 + $0x108] sm:$0xe]  ;;  %v5079_v53 = vpop.permute.xlu1 %5078 }
 0x23a   : > { %1807 = vst.msk [vmem:[#allocation2 + $0x124] sm:$0xf] %vm712_vm2, %v1386_v60  ;;  %v2390_v32 = vrot.slane %v2389_v29, 4  ;;  %v7551_v41 = vld [vmem:[#allocation2 + $0x110] sm:$0x1]  ;;  %v9264_v49 = vrot.slane %v7549_v37, 9 }
 0x23b   : > { %v2409_v38 = vsel %vm10120_vm7, %v2404_v15, %v11903_v3  ;;  %v2410_v27 = vshrl.u32 %v11873_v10, 16  ;;  %v2394_v9 = vrot.slane %v2392_v61, 5  ;;  %v7818_v22 = vrot.slane %v7551_v41, 5  ;;  %v1895_v35 = vld [vmem:[#allocation2 + $0x54] sm:$0xf]  ;;  %v603_v54 = vpop.f32.mrf.mxu0 }
 0x23c   : > { %v2905_v12 = vpop.permute.xlu2 %2904  ;;  %2924 = vrot.lane.b32.xlu0 %v2409_v38, %s9916_s24  ;;  %v1387_v20 = vrot.slane %v11877_v2, 4  ;;  %v7816_v8 = vsel %vm10152_vm12, %v9264_v49, %v7815_v46  ;;  %1959 = vst.msk [vmem:[#allocation3 + $0x70] sm:$0xf] %vm712_vm2, %v1895_v35  ;;  %v805_v31 = vld [vmem:[#allocation2 + $0x12c] sm:$0x1]  ;;  %v1389_v10 = vshrl.u32 %v11897_v62, 16 }
 0x23d   : > { %v7822_v58 = vrot.slane %v11899_v28, 5  ;;  %v2395_v39 = vsel %vm10120_vm7, %v2390_v32, %v2394_v9  ;;  %v3832_v14 = vld [vmem:[#allocation2 + $0x94] sm:$0xf]  ;;  %v7819_v26 = vsel %vm10152_vm12, %v7817_v33, %v7818_v22  ;;  %8011 = vst.msk [vmem:[#allocation3 + $0x124] sm:$0xf] %vm712_vm2, %v7816_v8  ;;  %v693_v2 = vmax.f32 %v601_v4, 0.0 }
 0x23e   : > { %8012 = vst.msk [vmem:[#allocation3 + $0x12c] sm:$0xf] %vm712_vm2, %v7819_v26  ;;  %v806_v46 = vsel %vm10136_vm9, 0, %v805_v31  ;;  %v11933_v40 = vrot.slane %v1389_v10, 7  ;;  %v1944_v30 = vld [vmem:[#allocation2 + $0x190] sm:$0xf] }
 0x23f   : > { %v3003_v44 = vpop.permute.xlu0 %3002  ;;  %2922 = vrot.lane.b32.xlu2 %v2395_v39, %s9916_s24  ;;  %v3170_v21 = vld [vmem:[#allocation2 + $0x94] sm:$0xf]  ;;  %v1808_v60 = vld [vmem:[#allocation2 + $0x128] sm:$0x1]  ;;  %3083 = vst.msk [vmem:[#allocation3 + $0x70] sm:$0xf] %vm3068_vm3, %v2905_v12  ;;  %v993_v63 = vpack.c.bf16 %v693_v2, %v693_v2 }
 0x240   : > { %3983 = vrot.lane.b32.xlu1 %v3832_v14, %s9918_s17  ;;  %v3171_v33 = vld [vmem:[#allocation2 + $0x98] sm:$0x1]  ;;  %v1809_v29 = vsel %vm10136_vm9, %v1387_v20, %v1808_v60  ;;  %5261 = vst.msk [vmem:[#allocation3 + $0x50] sm:$0xf] %vm5250_vm8, %v5079_v53  ;;  %v3414_v15 = vrot.slane %v3170_v21, 5  ;;  %v2412_v37 = vrot.slane %v2410_v27, 4 }
 0x241   : > { %v3169_v61 = vld [vmem:[#allocation2 + $0x90] sm:$0xe]  ;;  %1810 = vst [vmem:[#allocation2 + $0x128] sm:$0x1] %v1809_v29  ;;  %v1392_v4 = vshll.u32 %v11897_v62, 16  ;;  %v3417_v32 = vrot.slane %v3171_v33, 5 }
 0x242   : > { %v9194_v41 = vrot.slane %v3169_v61, 9  ;;  %v11943_v49 = vrot.slane %v7822_v58, 4  ;;  %v3834_v38 = vld [vmem:[#allocation2 + $0xa0] sm:$0xf]  ;;  %807 = vst [vmem:[#allocation2 + $0x12c] sm:$0x1] %v806_v46  ;;  %v2903_v27 = vpop.permute.xlu1 %2902  ;;  %v2413_v8 = vor.u32 %v2412_v37, %v11903_v3 }
 0x243   : > { %v3416_v9 = vrot.slane %v3414_v15, 4  ;;  %v1395_v22 = vrot.slane %v11933_v40, 4  ;;  %2008 = vst.msk [vmem:[#allocation3 + $0x1f8] sm:$0xf] %vm712_vm2, %v1944_v30  ;;  %v3172_v35 = vld [vmem:[#allocation2 + $0x9c] sm:$0xe]  ;;  %v1394_v10 = vor.u32 %v1392_v4, %v11933_v40  ;;  %v11959_v30 = vpop.f32.mrf.mxu2  ;;  %v605_v4 = vpop.f32.mrf.mxu0 }
 0x244   : > { %v11947_v53 = vpop.permute.xlu2 %4063  ;;  %v1397_v12 = vshrl.u32 %v993_v63, 16  ;;  %v9648_v20 = vld [vmem:[#allocation3 + $0x124] sm:$0xf]  ;;  %3987 = vrot.lane.b32.xlu0 %v3834_v38, %s9918_s17  ;;  %3132 = vst.msk [vmem:[#allocation3 + $0x1f8] sm:$0xf] %vm3068_vm3, %v3003_v44  ;;  %v3415_v14 = vsel %vm10152_vm12, %v9194_v41, %v3414_v15  ;;  %v9195_v44 = vrot.slane %v3172_v35, 9 }
 0x245   : > { %v11951_v62 = vld [vmem:[#allocation2 + $0xa0] sm:$0xf]  ;;  %v9426_v31 = vld [vmem:[#allocation3 + $0x128] sm:$0xf0]  ;;  %v3418_v39 = vsel %vm10152_vm12, %v3416_v9, %v3417_v32  ;;  %v1894_v26 = vld [vmem:[#allocation2 + $0x4c] sm:$0xf]  ;;  %v604_v9 = vadd.f32 %v11787_v13, %v603_v54 }
 0x246   : > { %v915_v2 = vld [vmem:[#allocation2 + $0x134] sm:$0x1]  ;;  %v9429_v21 = vor.u32 %v9648_v20, %v9426_v31  ;;  %1958 = vst.msk [vmem:[#allocation3 + $0x68] sm:$0xf] %vm712_vm2, %v1894_v26  ;;  %v11965_v40 = vrot.slane %v1397_v12, 7  ;;  %v3421_v60 = vrot.slane %v11951_v62, 5 }
 0x247   : > { %v3964_v46 = vpop.permute.xlu0 %3963  ;;  %3602 = vrot.lane.b32.xlu2 %v3418_v39, %s9917_s8  ;;  %v916_v3 = vsel %vm10101_vm4, 0, %v915_v2  ;;  %3082 = vst.msk [vmem:[#allocation3 + $0x68] sm:$0xf] %vm3068_vm3, %v2903_v27  ;;  %v1400_v33 = vshll.u32 %v993_v63, 16  ;;  %v2047_v29 = vld [vmem:[#allocation2 + $0x98] sm:$0x1] }
 0x248   : > { %3600 = vrot.lane.b32.xlu1 %v3415_v14, %s9917_s8  ;;  %9588 = vmatmul.msk.bf16.gmra.mxu2 %vm8467_vm1, %v9429_v21  ;;  %3758 = vst.msk [vmem:[#allocation3 + $0x68] sm:$0xf] %vm3744_vm5, %v11738_v48  ;;  %v2414_v15 = vrot.slane %v2413_v8, 4  ;;  %v2416_v61 = vshll.u32 %v2047_v29, 16  ;;  %v7552_v37 = vld [vmem:[#allocation2 + $0x114] sm:$0xe]  ;;  %v3422_v48 = vsel %vm10152_vm12, %v9195_v44, %v3421_v60 }
 0x249   : > { %v1811_v32 = vld [vmem:[#allocation2 + $0x12c] sm:$0xf]  ;;  %917 = vst [vmem:[#allocation2 + $0x134] sm:$0x1] %v916_v3  ;;  %v1402_v41 = vor.u32 %v1400_v33, %v11965_v40  ;;  %v7554_v38 = vld [vmem:[#allocation2 + $0x11c] sm:$0x1] }
 0x24a   : > { %v1812_v63 = vsel %vm10215_vm13, %v1394_v10, %v1811_v32  ;;  %4143 = vst.msk [vmem:[#allocation3 + $0x68] sm:$0xf] %vm4129_vm6, %v3964_v46  ;;  %v2418_v35 = vrot.slane %v2416_v61, 5  ;;  %v9265_v27 = vrot.slane %v7552_v37, 9  ;;  %v7825_v12 = vrot.slane %v7554_v38, 5  ;;  %v3679_v39 = vpop.permute.xlu1 %3678 }
 0x24b   : > { %1813 = vst [vmem:[#allocation2 + $0x12c] sm:$0xf] %v1812_v63  ;;  %v1403_v20 = vsel %vm10230_vm15, %v1395_v22, %v1402_v41  ;;  %v3833_v62 = vld [vmem:[#allocation2 + $0x9c] sm:$0xf]  ;;  %v2049_v31 = vld [vmem:[#allocation2 + $0xa0] sm:$0xf]  ;;  %v606_v10 = vadd.f32 %v11787_v13, %v605_v4  ;;  %v12006_v41 = vpop.f32.mrf.mxu2 }
 0x24c   : > { %v11982_v8 = vpop.permute.xlu2 %3967  ;;  %v2050_v54 = vld [vmem:[#allocation2 + $0xa4] sm:$0x1]  ;;  %3604 = vrot.lane.b32.xlu0 %v3422_v48, %s9917_s8  ;;  %v1404_v14 = vrot.slane %v11965_v40, 4  ;;  %1814 = vst.msk [vmem:[#allocation2 + $0x130] sm:$0xf] %vm712_vm2, %v1403_v20  ;;  %v7823_v26 = vsel %vm10152_vm12, %v9265_v27, %v7822_v58  ;;  %v7826_v22 = vsel %vm10152_vm12, %v11943_v49, %v7825_v12  ;;  %v2430_v2 = vshll.u32 %v2049_v31, 16 }
 0x24d   : > { %v808_v46 = vld [vmem:[#allocation2 + $0x138] sm:$0x1]  ;;  %8013 = vst.msk [vmem:[#allocation3 + $0x134] sm:$0xf] %vm712_vm2, %v7823_v26  ;;  %v2434_v21 = vshrl.u32 %v2049_v31, 16  ;;  %v2440_v44 = vshll.u32 %v2050_v54, 16  ;;  %v2419_v28 = vsel %vm10120_vm7, %v2414_v15, %v2418_v35 }
 0x24e   : > { %v694_v3 = vmax.f32 %v604_v9, 0.0  ;;  %v809_v40 = vsel %vm10136_vm9, 0, %v808_v46  ;;  %8014 = vst.msk [vmem:[#allocation3 + $0x13c] sm:$0xf] %vm712_vm2, %v7826_v22  ;;  %v12002_v58 = vrot.slane %v2430_v2, 5  ;;  %v3423_v33 = vrot.slane %v3421_v60, 4 }
 0x24f   : > { %3985 = vrot.lane.b32.xlu2 %v3833_v62, %s9918_s17  ;;  %v2048_v49 = vld [vmem:[#allocation2 + $0x9c] sm:$0xf]  ;;  %v2436_v29 = vrot.slane %v2434_v21, 4  ;;  %v2442_v61 = vrot.slane %v2440_v44, 5  ;;  %3808 = vst.msk [vmem:[#allocation3 + $0x1f8] sm:$0xf] %vm3744_vm5, %v3679_v39  ;;  %v3581_v4 = vpop.permute.xlu0 %3580 }
 0x250   : > { %2926 = vrot.lane.b32.xlu1 %v2419_v28, %s9916_s24  ;;  %v994_v37 = vpack.c.bf16 %v694_v3, %v694_v3  ;;  %v2421_v32 = vshrl.u32 %v2048_v49, 16  ;;  %v12008_v38 = vld [vmem:[#allocation2 + $0x124] sm:$0xf]  ;;  %v1815_v15 = vld [vmem:[#allocation2 + $0x134] sm:$0x1]  ;;  %v2424_v9 = vshll.u32 %v2048_v49, 16 }
 0x251   : > { %4193 = vst.msk [vmem:[#allocation3 + $0x1f8] sm:$0xf] %vm4129_vm6, %v11947_v53  ;;  %v695_v63 = vmax.f32 %v606_v10, 0.0  ;;  %v1816_v60 = vsel %vm10136_vm9, %v1404_v14, %v1815_v15  ;;  %v2437_v35 = vor.u32 %v2436_v29, %v12002_v58  ;;  %v3174_v48 = vld [vmem:[#allocation2 + $0xa4] sm:$0x1]  ;;  %v7829_v21 = vrot.slane %v12008_v38, 5 }
 0x252   : > { %810 = vst [vmem:[#allocation2 + $0x138] sm:$0x1] %v809_v40  ;;  %v1406_v27 = vshrl.u32 %v994_v37, 16  ;;  %v1409_v12 = vshll.u32 %v994_v37, 16  ;;  %v2423_v20 = vrot.slane %v2421_v32, 4  ;;  %v2426_v62 = vrot.slane %v2424_v9, 5 }
 0x253   : > { %1817 = vst [vmem:[#allocation2 + $0x134] sm:$0x1] %v1816_v60  ;;  %v3424_v31 = vrot.slane %v3174_v48, 5  ;;  %v995_v54 = vpack.c.bf16 %v695_v63, %v695_v63  ;;  %v2438_v39 = vrot.slane %v2437_v35, 4  ;;  %v12018_v14 = vld [vmem:[#allocation2 + $0xac] sm:$0xf]  ;;  %v4062_v2 = vpop.permute.xlu1 %4061 }
 0x254   : > { %v1408_v26 = vrot.slane %v1406_v27, 7  ;;  %3759 = vst.msk [vmem:[#allocation3 + $0x70] sm:$0xf] %vm3744_vm5, %v3581_v4  ;;  %v12016_v53 = vpop.permute.xlu2 %3584  ;;  %v9650_v10 = vld [vmem:[#allocation3 + $0x134] sm:$0xf]  ;;  %v2427_v22 = vor.u32 %v2426_v62, %v2423_v20  ;;  %v3428_v49 = vrot.slane %v12018_v14, 5 }
 0x255   : > { %v1414_v46 = vshrl.u32 %v995_v54, 16  ;;  %v9434_v44 = vld [vmem:[#allocation3 + $0x138] sm:$0xf0]  ;;  %v2443_v3 = vsel %vm10120_vm7, %v2438_v39, %v2442_v61  ;;  %v3177_v28 = vld [vmem:[#allocation2 + $0xb0] sm:$0x1]  ;;  %v3425_v32 = vsel %vm10152_vm12, %v3423_v33, %v3424_v31  ;;  %v1417_v63 = vshll.u32 %v995_v54, 16  ;;  %v12041_v54 = vpop.f32.mrf.mxu2 }
 0x256   : > { %v1411_v40 = vor.u32 %v1409_v12, %v1408_v26  ;;  %v608_v29 = vpop.f32.mrf.mxu0  ;;  %v9437_v37 = vor.u32 %v9650_v10, %v9434_v44  ;;  %2930 = vrot.lane.b32.xlu0 %v2443_v3, %s9916_s24  ;;  %v2428_v4 = vrot.slane %v2427_v22, 4  ;;  %4192 = vst.msk [vmem:[#allocation3 + $0x1f0] sm:$0xf] %vm4129_vm6, %v4062_v2  ;;  %v1412_v15 = vrot.slane %v1408_v26, 4  ;;  %v918_v9 = vld [vmem:[#allocation2 + $0x140] sm:$0x1] }
 0x257   : > { %v3431_v38 = vrot.slane %v3177_v28, 5  ;;  %v1416_v61 = vrot.slane %v1414_v46, 7  ;;  %v3430_v27 = vrot.slane %v3428_v49, 4  ;;  %v919_v33 = vsel %vm10101_vm4, 0, %v918_v9  ;;  %v7557_v39 = vld [vmem:[#allocation2 + $0x128] sm:$0x1] }
 0x258   : > { %3606 = vrot.lane.b32.xlu1 %v3425_v32, %s9917_s8  ;;  %9589 = vmatmul.msk.bf16.gmra.mxu2 %vm8467_vm1, %v9437_v37  ;;  %v2433_v35 = vsel %vm10120_vm7, %v2428_v4, %v12002_v58  ;;  %v609_v12 = vadd.f32 %v11787_v13, %v608_v29  ;;  %v7831_v48 = vrot.slane %v7829_v21, 4  ;;  %920 = vst [vmem:[#allocation2 + $0x140] sm:$0x1] %v919_v33  ;;  %v7555_v58 = vld [vmem:[#allocation2 + $0x120] sm:$0xe]  ;;  %v7832_v22 = vrot.slane %v7557_v39, 5 }
 0x259   : > { %v1818_v60 = vld [vmem:[#allocation2 + $0x138] sm:$0xf]  ;;  %2928 = vrot.lane.b32.xlu2 %v2433_v35, %s9916_s24  ;;  %v1419_v62 = vor.u32 %v1417_v63, %v1416_v61  ;;  %v5083_v31 = vpop.permute.xlu0 %5082  ;;  %v9266_v10 = vrot.slane %v7555_v58, 9  ;;  %v3432_v46 = vsel %vm10152_vm12, %v3430_v27, %v3431_v38  ;;  %v1421_v28 = vrot.slane %v1416_v61, 4  ;;  %v3835_v29 = vld [vmem:[#allocation2 + $0xa8] sm:$0xf] }
 0x25a   : > { %v1819_v20 = vsel %vm10215_vm13, %v1411_v40, %v1818_v60  ;;  %5263 = vst.msk [vmem:[#allocation3 + $0x60] sm:$0xf] %vm5250_vm8, %v5083_v31  ;;  %v696_v3 = vmax.f32 %v609_v12, 0.0  ;;  %v811_v40 = vld [vmem:[#allocation2 + $0x144] sm:$0x1]  ;;  %v7833_v4 = vsel %vm10152_vm12, %v7831_v48, %v7832_v22 }
 0x25b   : > { %1820 = vst [vmem:[#allocation2 + $0x138] sm:$0xf] %v1819_v20  ;;  %v1420_v26 = vsel %vm10230_vm15, %v1412_v15, %v1419_v62  ;;  %v3583_v44 = vpop.permute.xlu1 %3582  ;;  %v7830_v37 = vsel %vm10152_vm12, %v9266_v10, %v7829_v21  ;;  %v812_v32 = vsel %vm10136_vm9, 0, %v811_v40  ;;  %v1896_v15 = vld [vmem:[#allocation2 + $0x58] sm:$0xf] }
 0x25c   : > { %v12046_v2 = vpop.permute.xlu2 %5086  ;;  %1821 = vst.msk [vmem:[#allocation2 + $0x13c] sm:$0xf] %vm712_vm2, %v1420_v26  ;;  %v3836_v38 = vld [vmem:[#allocation2 + $0xac] sm:$0xf]  ;;  %v996_v63 = vpack.c.bf16 %v696_v3, %v696_v3  ;;  %v3175_v60 = vld [vmem:[#allocation2 + $0xa8] sm:$0xe] }
 0x25d   : > { %8015 = vst.msk [vmem:[#allocation3 + $0x144] sm:$0xf] %vm712_vm2, %v7830_v37  ;;  %v2051_v61 = vld [vmem:[#allocation2 + $0xa8] sm:$0xf]  ;;  %v12059_v35 = vld [vmem:[#allocation2 + $0x130] sm:$0xf] }
 0x25e   : > { %v610_v9 = vpop.f32.mrf.mxu0  ;;  %3610 = vrot.lane.b32.xlu0 %v3432_v46, %s9917_s8  ;;  %8016 = vst.msk [vmem:[#allocation3 + $0x14c] sm:$0xf] %vm712_vm2, %v7833_v4  ;;  %v2052_v21 = vld [vmem:[#allocation2 + $0xac] sm:$0xf]  ;;  %v2445_v27 = vshrl.u32 %v2051_v61, 16  ;;  %v2448_v33 = vshll.u32 %v2051_v61, 16 }
 0x25f   : > { %v611_v12 = vadd.f32 %v11787_v13, %v610_v9  ;;  %v1822_v48 = vld [vmem:[#allocation2 + $0x140] sm:$0x1]  ;;  %813 = vst [vmem:[#allocation2 + $0x144] sm:$0x1] %v812_v32  ;;  %v1423_v20 = vshrl.u32 %v996_v63, 16  ;;  %v1426_v62 = vshll.u32 %v996_v63, 16 }
 0x260   : > { %3989 = vrot.lane.b32.xlu1 %v3835_v29, %s9918_s17  ;;  %v1823_v31 = vsel %vm10136_vm9, %v1421_v28, %v1822_v48  ;;  %1960 = vst.msk [vmem:[#allocation3 + $0x78] sm:$0xf] %vm712_vm2, %v1896_v15  ;;  %v2447_v39 = vrot.slane %v2445_v27, 4  ;;  %v2450_v26 = vrot.slane %v2448_v33, 5  ;;  %v2454_v10 = vshll.u32 %v2052_v21, 16  ;;  %v12071_v28 = vpop.f32.mrf.mxu2 }
 0x261   : > { %3991 = vrot.lane.b32.xlu2 %v3836_v38, %s9918_s17  ;;  %v2907_v58 = vpop.permute.xlu0 %2906  ;;  %1824 = vst [vmem:[#allocation2 + $0x140] sm:$0x1] %v1823_v31  ;;  %v12068_v22 = vrot.slane %v1423_v20, 7  ;;  %v9196_v46 = vrot.slane %v3175_v60, 9  ;;  %v2458_v13 = vshrl.u32 %v2052_v21, 16  ;;  %v697_v37 = vmax.f32 %v611_v12, 0.0 }
 0x262   : > { %v3837_v3 = vld [vmem:[#allocation2 + $0xb4] sm:$0xf]  ;;  %3084 = vst.msk [vmem:[#allocation3 + $0x78] sm:$0xf] %vm3068_vm3, %v2907_v58  ;;  %v2451_v40 = vor.u32 %v2450_v26, %v2447_v39  ;;  %v1898_v29 = vld [vmem:[#allocation2 + $0x64] sm:$0xf] }
 0x263   : > { %v7836_v4 = vrot.slane %v12059_v35, 5  ;;  %v1428_v32 = vor.u32 %v1426_v62, %v12068_v22  ;;  %3760 = vst.msk [vmem:[#allocation3 + $0x78] sm:$0xf] %vm3744_vm5, %v3583_v44  ;;  %v2456_v15 = vrot.slane %v2454_v10, 5  ;;  %v4217_v9 = vld [vmem:[#allocation2 + $0x68] sm:$0x1]  ;;  %v3966_v38 = vpop.permute.xlu1 %3965  ;;  %v997_v27 = vpack.c.bf16 %v697_v37, %v697_v37 }
 0x264   : > { %v9652_v63 = vld [vmem:[#allocation3 + $0x144] sm:$0xf]  ;;  %4145 = vst.msk [vmem:[#allocation3 + $0x78] sm:$0xf] %vm4129_vm6, %v11982_v8  ;;  %v2452_v60 = vrot.slane %v2451_v40, 4  ;;  %v2911_v61 = vpop.permute.xlu2 %2910  ;;  %v4478_v21 = vshll.u32 %v4217_v9, 16  ;;  %v3429_v12 = vsel %vm10152_vm12, %v9196_v46, %v3428_v49 }
 0x265   : > { %v9442_v33 = vld [vmem:[#allocation3 + $0x148] sm:$0xf0]  ;;  %1962 = vst.msk [vmem:[#allocation3 + $0x88] sm:$0xf] %vm712_vm2, %v1898_v29  ;;  %v4476_v44 = vrot.slane %v4475_v25, 4  ;;  %v2460_v48 = vrot.slane %v2458_v13, 4 }
 0x266   : > { %3993 = vrot.lane.b32.xlu0 %v3837_v3, %s9918_s17  ;;  %v9445_v8 = vor.u32 %v9652_v63, %v9442_v33  ;;  %v1429_v20 = vrot.slane %v12068_v22, 4  ;;  %v1825_v62 = vld [vmem:[#allocation2 + $0x144] sm:$0xf]  ;;  %v2457_v31 = vsel %vm10120_vm7, %v2452_v60, %v2456_v15  ;;  %3086 = vst.msk [vmem:[#allocation3 + $0x88] sm:$0xf] %vm3068_vm3, %v2911_v61  ;;  %v1431_v14 = vshrl.u32 %v997_v27, 16 }
 0x267   : > { %v1826_v49 = vsel %vm10215_vm13, %v1428_v32, %v1825_v62  ;;  %v4480_v58 = vrot.slane %v4478_v21, 5  ;;  %4144 = vst.msk [vmem:[#allocation3 + $0x70] sm:$0xf] %vm4129_vm6, %v3966_v38  ;;  %v921_v51 = vld [vmem:[#allocation2 + $0x14c] sm:$0x1]  ;;  %v1434_v36 = vshll.u32 %v997_v27, 16  ;;  %v2461_v25 = vor.u32 %v2460_v48, %v2456_v15 }
 0x268   : > { %2932 = vrot.lane.b32.xlu1 %v2457_v31, %s9916_s24  ;;  %9590 = vmatmul.msk.bf16.gmra.mxu2 %vm8467_vm1, %v9445_v8  ;;  %1827 = vst [vmem:[#allocation2 + $0x144] sm:$0xf] %v1826_v49  ;;  %v922_v39 = vsel %vm10101_vm4, 0, %v921_v51  ;;  %v1433_v26 = vrot.slane %v1431_v14, 7  ;;  %v2053_v18 = vld [vmem:[#allocation2 + $0xb0] sm:$0x1] }
 0x269   : > { %3608 = vrot.lane.b32.xlu2 %v3429_v12, %s9917_s8  ;;  %v3587_v10 = vpop.permute.xlu0 %3586  ;;  %5265 = vst.msk [vmem:[#allocation3 + $0x70] sm:$0xf] %vm5250_vm8, %v12046_v2  ;;  %v2464_v22 = vshll.u32 %v2053_v18, 16  ;;  %v7838_v46 = vrot.slane %v7836_v4, 4  ;;  %v2462_v3 = vrot.slane %v2461_v25, 4  ;;  %v4481_v38 = vsel %vm10120_vm7, %v4476_v44, %v4480_v58  ;;  %v12112_v12 = vpop.f32.mrf.mxu2 }
 0x26a   : > { %923 = vst [vmem:[#allocation2 + $0x14c] sm:$0x1] %v922_v39  ;;  %v1436_v13 = vor.u32 %v1434_v36, %v1433_v26  ;;  %v7558_v40 = vld [vmem:[#allocation2 + $0x12c] sm:$0xe]  ;;  %v7560_v37 = vld [vmem:[#allocation2 + $0x134] sm:$0x1] }
 0x26b   : > { %3762 = vst.msk [vmem:[#allocation3 + $0x88] sm:$0xf] %vm3744_vm5, %v3587_v10  ;;  %v2466_v29 = vrot.slane %v2464_v22, 5  ;;  %v9267_v32 = vrot.slane %v7558_v40, 9  ;;  %v5085_v15 = vpop.permute.xlu1 %5084  ;;  %v12104_v9 = vld [vmem:[#allocation2 + $0x13c] sm:$0xf] }
 0x26c   : > { %v1437_v2 = vsel %vm10230_vm15, %v1429_v20, %v1436_v13  ;;  %v1438_v63 = vrot.slane %v1433_v26, 4  ;;  %v3838_v60 = vld [vmem:[#allocation2 + $0xb8] sm:$0xf]  ;;  %v7839_v61 = vrot.slane %v7560_v37, 5  ;;  %v12110_v21 = vpop.permute.xlu2 %3590  ;;  %v2054_v27 = vld [vmem:[#allocation2 + $0xb4] sm:$0xf] }
 0x26d   : > { %v2055_v33 = vld [vmem:[#allocation2 + $0xb8] sm:$0xf]  ;;  %1828 = vst.msk [vmem:[#allocation2 + $0x148] sm:$0xf] %vm712_vm2, %v1437_v2  ;;  %v7837_v44 = vsel %vm10152_vm12, %v9267_v32, %v7836_v4  ;;  %v2469_v47 = vshrl.u32 %v2054_v27, 16  ;;  %v2472_v48 = vshll.u32 %v2054_v27, 16  ;;  %v2467_v49 = vsel %vm10120_vm7, %v2462_v3, %v2466_v29 }
 0x26e   : > { %5088 = vrot.lane.b32.xlu0 %v4481_v38, %s9919_s23  ;;  %v3179_v8 = vld [vmem:[#allocation2 + $0xb8] sm:$0xf]  ;;  %v7840_v20 = vsel %vm10152_vm12, %v7838_v46, %v7839_v61  ;;  %8017 = vst.msk [vmem:[#allocation3 + $0x154] sm:$0xf] %vm712_vm2, %v7837_v44  ;;  %v2478_v62 = vshll.u32 %v2055_v33, 16  ;;  %v2482_v31 = vshrl.u32 %v2055_v33, 16 }
 0x26f   : > { %v3180_v14 = vld [vmem:[#allocation2 + $0xbc] sm:$0x1]  ;;  %8018 = vst.msk [vmem:[#allocation3 + $0x15c] sm:$0xf] %vm712_vm2, %v7840_v20  ;;  %v2471_v35 = vrot.slane %v2469_v47, 4  ;;  %v2474_v4 = vrot.slane %v2472_v48, 5 }
 0x270   : > { %3995 = vrot.lane.b32.xlu1 %v3838_v60, %s9918_s17  ;;  %v3435_v58 = vrot.slane %v3179_v8, 5  ;;  %5264 = vst.msk [vmem:[#allocation3 + $0x68] sm:$0xf] %vm5250_vm8, %v5085_v15  ;;  %v3178_v36 = vld [vmem:[#allocation2 + $0xb4] sm:$0xe]  ;;  %v7843_v25 = vrot.slane %v12104_v9, 5 }
 0x271   : > { %2934 = vrot.lane.b32.xlu2 %v2467_v49, %s9916_s24  ;;  %v3970_v51 = vpop.permute.xlu0 %3969  ;;  %v1829_v39 = vld [vmem:[#allocation2 + $0x14c] sm:$0x1]  ;;  %v2475_v26 = vor.u32 %v2474_v4, %v2471_v35  ;;  %v2480_v10 = vrot.slane %v2478_v62, 5  ;;  %v2484_v18 = vrot.slane %v2482_v31, 4  ;;  %v3438_v46 = vrot.slane %v3180_v14, 5  ;;  %v12142_v33 = vpop.f32.mrf.mxu2 }
 0x272   : > { %v1830_v22 = vsel %vm10136_vm9, %v1438_v63, %v1829_v39  ;;  %v9197_v13 = vrot.slane %v3178_v36, 9  ;;  %v1897_v3 = vld [vmem:[#allocation2 + $0x60] sm:$0xf]  ;;  %v1899_v40 = vld [vmem:[#allocation2 + $0x6c] sm:$0xf]  ;;  %v3437_v37 = vrot.slane %v3435_v58, 4 }
 0x273   : > { %1831 = vst [vmem:[#allocation2 + $0x14c] sm:$0x1] %v1830_v22  ;;  %v2476_v29 = vrot.slane %v2475_v26, 4  ;;  %v2056_v32 = vld [vmem:[#allocation2 + $0xbc] sm:$0x1]  ;;  %v2485_v63 = vor.u32 %v2484_v18, %v2480_v10  ;;  %v7845_v44 = vrot.slane %v7843_v25, 4 }
 0x274   : > { %1961 = vst.msk [vmem:[#allocation3 + $0x80] sm:$0xf] %vm712_vm2, %v1897_v3  ;;  %v12135_v38 = vpop.permute.xlu2 %3973  ;;  %v3436_v61 = vsel %vm10152_vm12, %v9197_v13, %v3435_v58  ;;  %v2488_v27 = vshll.u32 %v2056_v32, 16  ;;  %v3439_v48 = vsel %vm10152_vm12, %v3437_v37, %v3438_v46  ;;  %v7561_v8 = vld [vmem:[#allocation2 + $0x138] sm:$0xe] }
 0x275   : > { %v9654_v15 = vld [vmem:[#allocation3 + $0x154] sm:$0xf]  ;;  %v2481_v9 = vsel %vm10120_vm7, %v2476_v29, %v2480_v10  ;;  %1963 = vst.msk [vmem:[#allocation3 + $0x90] sm:$0xf] %vm712_vm2, %v1899_v40  ;;  %v12149_v20 = vld [vmem:[#allocation2 + $0x148] sm:$0xf] }
 0x276   : > { %v2909_v2 = vpop.permute.xlu1 %2908  ;;  %v9450_v60 = vld [vmem:[#allocation3 + $0x158] sm:$0xf0]  ;;  %2936 = vrot.lane.b32.xlu0 %v2481_v9, %s9916_s24  ;;  %v7563_v62 = vld [vmem:[#allocation2 + $0x140] sm:$0x1]  ;;  %v9268_v31 = vrot.slane %v7561_v8, 9  ;;  %v2486_v14 = vrot.slane %v2485_v63, 4 }
 0x277   : > { %3085 = vst.msk [vmem:[#allocation3 + $0x80] sm:$0xf] %vm3068_vm3, %v2909_v2  ;;  %v9453_v47 = vor.u32 %v9654_v15, %v9450_v60  ;;  %v7846_v49 = vrot.slane %v7563_v62, 5  ;;  %v1901_v35 = vld [vmem:[#allocation2 + $0x78] sm:$0xf]  ;;  %v2490_v36 = vrot.slane %v2488_v27, 5 }
 0x278   : > { %3612 = vrot.lane.b32.xlu1 %v3436_v61, %s9917_s8  ;;  %3761 = vst.msk [vmem:[#allocation3 + $0x80] sm:$0xf] %vm3744_vm5, %v12016_v53  ;;  %v4221_v4 = vld [vmem:[#allocation2 + $0x78] sm:$0xf]  ;;  %v7844_v53 = vsel %vm10152_vm12, %v9268_v31, %v7843_v25  ;;  %v3840_v10 = vld [vmem:[#allocation2 + $0xc4] sm:$0xf] }
 0x279   : > { %3614 = vrot.lane.b32.xlu2 %v3439_v48, %s9917_s8  ;;  %4146 = vst.msk [vmem:[#allocation3 + $0x80] sm:$0xf] %vm4129_vm6, %v3970_v51  ;;  %9591 = vmatmul.msk.bf16.gmra.mxu2 %vm8467_vm1, %v9453_v47  ;;  %v4507_v39 = vshrl.u32 %v4221_v4, 16  ;;  %v4510_v26 = vshll.u32 %v4221_v4, 16  ;;  %v7847_v51 = vsel %vm10152_vm12, %v7845_v44, %v7846_v49  ;;  %v12160_v18 = vld [vmem:[#allocation2 + $0x7c] sm:$0xf]  ;;  %v2491_v32 = vsel %vm10120_vm7, %v2486_v14, %v2490_v36  ;;  %v12173_v8 = vpop.f32.mrf.mxu2 }
 0x27a   : > { %1965 = vst.msk [vmem:[#allocation3 + $0xa0] sm:$0xf] %vm712_vm2, %v1901_v35  ;;  %v4219_v22 = vld [vmem:[#allocation2 + $0x70] sm:$0xf]  ;;  %v4220_v3 = vld [vmem:[#allocation2 + $0x74] sm:$0x1] }
 0x27b   : > { %v2913_v58 = vpop.permute.xlu0 %2912  ;;  %8019 = vst.msk [vmem:[#allocation3 + $0x164] sm:$0xf] %vm712_vm2, %v7844_v53  ;;  %v4509_v46 = vrot.slane %v4507_v39, 4  ;;  %v4512_v13 = vrot.slane %v4510_v26, 5  ;;  %v7850_v25 = vrot.slane %v12149_v20, 5  ;;  %v4492_v29 = vshll.u32 %v4219_v22, 16 }
 0x27c   : > { %3087 = vst.msk [vmem:[#allocation3 + $0x90] sm:$0xf] %vm3068_vm3, %v2913_v58  ;;  %v4496_v37 = vshrl.u32 %v4219_v22, 16  ;;  %v4516_v9 = vshll.u32 %v12160_v18, 16  ;;  %v4218_v2 = vld [vmem:[#allocation2 + $0x6c] sm:$0xf] }
 0x27d   : > { %8020 = vst.msk [vmem:[#allocation3 + $0x16c] sm:$0xf] %vm712_vm2, %v7847_v51  ;;  %v4513_v15 = vor.u32 %v4512_v13, %v4509_v46  ;;  %v3839_v63 = vld [vmem:[#allocation2 + $0xc0] sm:$0xf]  ;;  %v4494_v61 = vrot.slane %v4492_v29, 5  ;;  %v4502_v44 = vshll.u32 %v4220_v3, 16 }
 0x27e   : > { %v3972_v40 = vpop.permute.xlu1 %3971  ;;  %3999 = vrot.lane.b32.xlu0 %v3840_v10, %s9918_s17  ;;  %v4498_v27 = vrot.slane %v4496_v37, 4  ;;  %v4483_v47 = vshrl.u32 %v4218_v2, 16  ;;  %v4486_v48 = vshll.u32 %v4218_v2, 16  ;;  %v7852_v20 = vrot.slane %v7850_v25, 4  ;;  %v12175_v49 = vld [vmem:[#allocation2 + $0xe8] sm:$0xf] }
 0x27f   : > { %4147 = vst.msk [vmem:[#allocation3 + $0x88] sm:$0xf] %vm4129_vm6, %v3972_v40  ;;  %v4514_v62 = vrot.slane %v4513_v15, 4  ;;  %v12177_v35 = vrot.slane %v4516_v9, 5  ;;  %v7564_v36 = vld [vmem:[#allocation2 + $0x144] sm:$0xe] }
 0x280   : > { %2938 = vrot.lane.b32.xlu1 %v2491_v32, %s9916_s24  ;;  %v4499_v31 = vor.u32 %v4498_v27, %v4494_v61  ;;  %v4485_v14 = vrot.slane %v4483_v47, 4  ;;  %v4488_v58 = vrot.slane %v4486_v48, 5  ;;  %v7566_v53 = vld [vmem:[#allocation2 + $0x14c] sm:$0x1]  ;;  %v4504_v10 = vrot.slane %v4502_v44, 5 }
 0x281   : > { %v2917_v60 = vpop.permute.xlu2 %2916  ;;  %3997 = vrot.lane.b32.xlu2 %v3839_v63, %s9918_s17  ;;  %v9269_v51 = vrot.slane %v7564_v36, 9  ;;  %v7853_v22 = vrot.slane %v7566_v53, 5  ;;  %v12181_v46 = vld [vmem:[#allocation2 + $0x154] sm:$0xf]  ;;  %v1900_v40 = vld [vmem:[#allocation2 + $0x70] sm:$0xf]  ;;  %v4519_v37 = vsel %vm10120_vm7, %v4514_v62, %v12177_v35 }
 0x282   : > { %3089 = vst.msk [vmem:[#allocation3 + $0xa0] sm:$0xf] %vm3068_vm3, %v2917_v60  ;;  %v9656_v39 = vld [vmem:[#allocation3 + $0x164] sm:$0xf]  ;;  %v4500_v26 = vrot.slane %v4499_v31, 4  ;;  %v4489_v3 = vor.u32 %v4488_v58, %v4485_v14  ;;  %v3449_v15 = vrot.slane %v12175_v49, 5 }
 0x283   : > { %v12179_v4 = vpop.permute.xlu0 %3975  ;;  %v3186_v32 = vld [vmem:[#allocation2 + $0xec] sm:$0x1]  ;;  %v7851_v2 = vsel %vm10152_vm12, %v9269_v51, %v7850_v25  ;;  %1964 = vst.msk [vmem:[#allocation3 + $0x98] sm:$0xf] %vm712_vm2, %v1900_v40  ;;  %v7854_v60 = vsel %vm10152_vm12, %v7852_v20, %v7853_v22  ;;  %v2060_v27 = vld [vmem:[#allocation2 + $0xe4] sm:$0xf] }
 0x284   : > { %v9458_v13 = vld [vmem:[#allocation3 + $0x168] sm:$0xf0]  ;;  %v4490_v63 = vrot.slane %v4489_v3, 4  ;;  %v7857_v44 = vrot.slane %v12181_v46, 5  ;;  %v4505_v47 = vsel %vm10120_vm7, %v4500_v26, %v4504_v10  ;;  %8021 = vst.msk [vmem:[#allocation3 + $0x174] sm:$0xf] %vm712_vm2, %v7851_v2 }
 0x285   : > { %v9461_v29 = vor.u32 %v9656_v39, %v9458_v13  ;;  %v1902_v25 = vld [vmem:[#allocation2 + $0x7c] sm:$0xf]  ;;  %v2517_v20 = vshrl.u32 %v2060_v27, 16  ;;  %v2520_v31 = vshll.u32 %v2060_v27, 16  ;;  %v3451_v14 = vrot.slane %v3449_v15, 4 }
 0x286   : > { %v3589_v9 = vpop.permute.xlu1 %3588  ;;  %5094 = vrot.lane.b32.xlu0 %v4519_v37, %s9919_s23  ;;  %v4495_v62 = vsel %vm10120_vm7, %v4490_v63, %v4494_v61  ;;  %v3452_v58 = vrot.slane %v3186_v32, 5  ;;  %8022 = vst.msk [vmem:[#allocation3 + $0x17c] sm:$0xf] %vm712_vm2, %v7854_v60  ;;  %v2063_v53 = vld [vmem:[#allocation2 + $0xf0] sm:$0xf]  ;;  %v12211_v61 = vpop.f32.mrf.mxu2  ;;  %v7859_v39 = vrot.slane %v7857_v44, 4 }
 0x287   : > { %3763 = vst.msk [vmem:[#allocation3 + $0x90] sm:$0xf] %vm3744_vm5, %v3589_v9  ;;  %v2061_v26 = vld [vmem:[#allocation2 + $0xe8] sm:$0xf]  ;;  %v2519_v10 = vrot.slane %v2517_v20, 4  ;;  %v2522_v51 = vrot.slane %v2520_v31, 5 }
 0x288   : > { %4148 = vst.msk [vmem:[#allocation3 + $0x90] sm:$0xf] %vm4129_vm6, %v12135_v38  ;;  %5090 = vrot.lane.b32.xlu1 %v4495_v62, %s9919_s23  ;;  %v1904_v38 = vld [vmem:[#allocation2 + $0x88] sm:$0xf]  ;;  %v3453_v22 = vsel %vm10152_vm12, %v3451_v14, %v3452_v58  ;;  %v3184_v3 = vld [vmem:[#allocation2 + $0xe4] sm:$0xe] }
 0x289   : > { %v12197_v48 = vpop.permute.xlu2 %3979  ;;  %5092 = vrot.lane.b32.xlu2 %v4505_v47, %s9919_s23  ;;  %9592 = vmatmul.msk.bf16.gmra.mxu2 %vm8467_vm1, %v9461_v29  ;;  %1966 = vst.msk [vmem:[#allocation3 + $0xa8] sm:$0xf] %vm712_vm2, %v1902_v25  ;;  %v3842_v46 = vld [vmem:[#allocation2 + $0xe8] sm:$0xf]  ;;  %v2541_v40 = vshrl.u32 %v2063_v53, 16  ;;  %v2544_v29 = vshll.u32 %v2063_v53, 16  ;;  %v2523_v47 = vor.u32 %v2522_v51, %v2519_v10 }
 0x28a   : > { %1968 = vst.msk [vmem:[#allocation3 + $0xb8] sm:$0xf] %vm712_vm2, %v1904_v38  ;;  %v7567_v37 = vld [vmem:[#allocation2 + $0x150] sm:$0xe]  ;;  %v7569_v32 = vld [vmem:[#allocation2 + $0x158] sm:$0x1] }
 0x28b   : > { %v3593_v36 = vpop.permute.xlu0 %3592  ;;  %v2526_v2 = vshll.u32 %v2061_v26, 16  ;;  %v2530_v63 = vshrl.u32 %v2061_v26, 16  ;;  %v9270_v60 = vrot.slane %v7567_v37, 9  ;;  %v3841_v27 = vld [vmem:[#allocation2 + $0xe4] sm:$0xf]  ;;  %v7860_v25 = vrot.slane %v7569_v32, 5 }
 0x28c   : > { %3765 = vst.msk [vmem:[#allocation3 + $0xa0] sm:$0xf] %vm3744_vm5, %v3593_v36  ;;  %v9199_v62 = vrot.slane %v3184_v3, 9  ;;  %v2543_v20 = vrot.slane %v2541_v40, 4  ;;  %v2546_v31 = vrot.slane %v2544_v29, 5  ;;  %v2524_v10 = vrot.slane %v2523_v47, 4 }
 0x28d   : > { %v7858_v14 = vsel %vm10152_vm12, %v9270_v60, %v7857_v44  ;;  %v9466_v58 = vld [vmem:[#allocation3 + $0x178] sm:$0xf0]  ;;  %v7861_v38 = vsel %vm10152_vm12, %v7859_v39, %v7860_v25  ;;  %v2528_v53 = vrot.slane %v2526_v2, 5  ;;  %v2532_v26 = vrot.slane %v2530_v63, 4  ;;  %v1903_v39 = vld [vmem:[#allocation2 + $0x84] sm:$0xf] }
 0x28e   : > { %v2915_v13 = vpop.permute.xlu1 %2914  ;;  %3622 = vrot.lane.b32.xlu0 %v3453_v22, %s9917_s8  ;;  %8023 = vst.msk [vmem:[#allocation3 + $0x184] sm:$0xf] %vm712_vm2, %v7858_v14  ;;  %v2062_v51 = vld [vmem:[#allocation2 + $0xec] sm:$0x1]  ;;  %v12234_v22 = vpop.f32.mrf.mxu2  ;;  %v3450_v40 = vsel %vm10152_vm12, %v9199_v62, %v3449_v15  ;;  %v1905_v63 = vld [vmem:[#allocation2 + $0x90] sm:$0xf] }
 0x28f   : > { %3088 = vst.msk [vmem:[#allocation3 + $0x98] sm:$0xf] %vm3068_vm3, %v2915_v13  ;;  %v2547_v13 = vor.u32 %v2546_v31, %v2543_v20  ;;  %v2533_v32 = vor.u32 %v2532_v26, %v2528_v53  ;;  %v2536_v2 = vshll.u32 %v2062_v51, 16  ;;  %v2529_v60 = vsel %vm10120_vm7, %v2524_v10, %v2528_v53  ;;  %v3188_v62 = vld [vmem:[#allocation2 + $0xf4] sm:$0xf] }
 0x290   : > { %3764 = vst.msk [vmem:[#allocation3 + $0x98] sm:$0xf] %vm3744_vm5, %v12110_v21  ;;  %4001 = vrot.lane.b32.xlu1 %v3841_v27, %s9918_s17  ;;  %v9658_v21 = vld [vmem:[#allocation3 + $0x174] sm:$0xf]  ;;  %v1907_v27 = vld [vmem:[#allocation2 + $0x9c] sm:$0xf] }
 0x291   : > { %v12219_v9 = vpop.permute.xlu2 %3596  ;;  %4003 = vrot.lane.b32.xlu2 %v3842_v46, %s9918_s17  ;;  %4149 = vst.msk [vmem:[#allocation3 + $0x98] sm:$0xf] %vm4129_vm6, %v12179_v4  ;;  %v2064_v4 = vld [vmem:[#allocation2 + $0xf4] sm:$0xf]  ;;  %v9469_v44 = vor.u32 %v9658_v21, %v9466_v58  ;;  %v3843_v46 = vld [vmem:[#allocation2 + $0xf0] sm:$0xf] }
 0x292   : > { %8024 = vst.msk [vmem:[#allocation3 + $0x18c] sm:$0xf] %vm712_vm2, %v7861_v38  ;;  %v2550_v37 = vshll.u32 %v2064_v4, 16  ;;  %v2548_v49 = vrot.slane %v2547_v13, 4  ;;  %v2534_v47 = vrot.slane %v2533_v32, 4  ;;  %v2538_v25 = vrot.slane %v2536_v2, 5 }
 0x293   : > { %1967 = vst.msk [vmem:[#allocation3 + $0xb0] sm:$0xf] %vm712_vm2, %v1903_v39  ;;  %v3456_v38 = vrot.slane %v3188_v62, 5  ;;  %v3844_v53 = vld [vmem:[#allocation2 + $0xf4] sm:$0xf] }
 0x294   : > { %v2919_v36 = vpop.permute.xlu0 %2918  ;;  %1969 = vst.msk [vmem:[#allocation3 + $0xc0] sm:$0xf] %vm712_vm2, %v1905_v63  ;;  %v12252_v15 = vrot.slane %v2550_v37, 5  ;;  %v2539_v21 = vsel %vm10120_vm7, %v2534_v47, %v2538_v25  ;;  %v3189_v26 = vld [vmem:[#allocation2 + $0xf8] sm:$0x1] }
 0x295   : > { %3090 = vst.msk [vmem:[#allocation3 + $0xa8] sm:$0xf] %vm3068_vm3, %v2919_v36  ;;  %v2554_v36 = vshrl.u32 %v2064_v4, 16  ;;  %v3187_v10 = vld [vmem:[#allocation2 + $0xf0] sm:$0xe]  ;;  %v3458_v13 = vrot.slane %v3456_v38, 4 }
 0x296   : > { %v3595_v3 = vpop.permute.xlu1 %3594  ;;  %4005 = vrot.lane.b32.xlu0 %v3843_v46, %s9918_s17  ;;  %1971 = vst.msk [vmem:[#allocation3 + $0xd0] sm:$0xf] %vm712_vm2, %v1907_v27  ;;  %v2553_v20 = vsel %vm10120_vm7, %v2548_v49, %v12252_v15  ;;  %v12261_v14 = vpop.f32.mrf.mxu2  ;;  %v2067_v51 = vld [vmem:[#allocation2 + $0x100] sm:$0xf]  ;;  %v2066_v37 = vld [vmem:[#allocation2 + $0xfc] sm:$0xf] }
 0x297   : > { %3766 = vst.msk [vmem:[#allocation3 + $0xa8] sm:$0xf] %vm3744_vm5, %v3595_v3  ;;  %v3459_v3 = vrot.slane %v3189_v26, 5  ;;  %v3190_v32 = vld [vmem:[#allocation2 + $0xfc] sm:$0xe]  ;;  %v2574_v63 = vshll.u32 %v2067_v51, 16 }
 0x298   : > { %4151 = vst.msk [vmem:[#allocation3 + $0xa8] sm:$0xf] %vm4129_vm6, %v12197_v48  ;;  %2944 = vrot.lane.b32.xlu1 %v2529_v60, %s9916_s24  ;;  %v2065_v2 = vld [vmem:[#allocation2 + $0xf8] sm:$0x1]  ;;  %v2578_v4 = vshrl.u32 %v2067_v51, 16  ;;  %v2565_v25 = vshrl.u32 %v2066_v37, 16 }
 0x299   : > { %v2923_v29 = vpop.permute.xlu2 %2922  ;;  %3620 = vrot.lane.b32.xlu2 %v3450_v40, %s9917_s8  ;;  %9593 = vmatmul.msk.bf16.gmra.mxu2 %vm8467_vm1, %v9469_v44  ;;  %v3846_v44 = vld [vmem:[#allocation2 + $0x100] sm:$0xf]  ;;  %v9474_v39 = vld [vmem:[#allocation3 + $0x188] sm:$0xf0]  ;;  %v9200_v40 = vrot.slane %v3187_v10, 9  ;;  %v3460_v47 = vsel %vm10152_vm12, %v3458_v13, %v3459_v3  ;;  %v2568_v62 = vshll.u32 %v2066_v37, 16 }
 0x29a   : > { %3092 = vst.msk [vmem:[#allocation3 + $0xb8] sm:$0xf] %vm3068_vm3, %v2923_v29  ;;  %v2556_v29 = vrot.slane %v2554_v36, 4  ;;  %v9660_v60 = vld [vmem:[#allocation3 + $0x184] sm:$0xf]  ;;  %v9201_v10 = vrot.slane %v3190_v32, 9 }
 0x29b   : > { %v3191_v27 = vld [vmem:[#allocation2 + $0x100] sm:$0xf]  ;;  %v1906_v49 = vld [vmem:[#allocation2 + $0x94] sm:$0xf]  ;;  %v2580_v13 = vrot.slane %v2578_v4, 4 }
 0x29c   : > { %v3599_v48 = vpop.permute.xlu0 %3598  ;;  %1970 = vst.msk [vmem:[#allocation3 + $0xc8] sm:$0xf] %vm712_vm2, %v1906_v49  ;;  %v2557_v36 = vor.u32 %v2556_v29, %v12252_v15  ;;  %v3463_v51 = vrot.slane %v3191_v27, 5  ;;  %v1908_v3 = vld [vmem:[#allocation2 + $0xa0] sm:$0xf]  ;;  %v2567_v15 = vrot.slane %v2565_v25, 4 }
 0x29d   : > { %3768 = vst.msk [vmem:[#allocation3 + $0xb8] sm:$0xf] %vm3744_vm5, %v3599_v48  ;;  %v9477_v48 = vor.u32 %v9660_v60, %v9474_v39  ;;  %v2570_v39 = vrot.slane %v2568_v62, 5  ;;  %v1910_v4 = vld [vmem:[#allocation2 + $0xac] sm:$0xf] }
 0x29e   : > { %v3978_v31 = vpop.permute.xlu1 %3977  ;;  %2948 = vrot.lane.b32.xlu0 %v2553_v20, %s9916_s24  ;;  %v3457_v20 = vsel %vm10152_vm12, %v9200_v40, %v3456_v38  ;;  %v12277_v26 = vpop.f32.mrf.mxu2  ;;  %v2068_v38 = vld [vmem:[#allocation2 + $0x104] sm:$0x1]  ;;  %v2558_v40 = vrot.slane %v2557_v36, 4  ;;  %1972 = vst.msk [vmem:[#allocation3 + $0xd8] sm:$0xf] %vm712_vm2, %v1908_v3  ;;  %v3464_v37 = vsel %vm10152_vm12, %v9201_v10, %v3463_v51 }
 0x29f   : > { %4150 = vst.msk [vmem:[#allocation3 + $0xa0] sm:$0xf] %vm4129_vm6, %v3978_v31  ;;  %v2571_v60 = vor.u32 %v2570_v39, %v2567_v15  ;;  %v12296_v62 = vld [vmem:[#allocation2 + $0x10c] sm:$0xf]  ;;  %v3195_v3 = vld [vmem:[#allocation2 + $0x110] sm:$0x1] }
 0x2a0   : > { %4007 = vrot.lane.b32.xlu1 %v3844_v53, %s9918_s17  ;;  %v2560_v53 = vshll.u32 %v2065_v2, 16  ;;  %13907 = vst [vmem:[#allocation13_spill] sm:$0xff] %v12277_v26  ;;  %v4233_v26 = vld [vmem:[#allocation2 + $0xa8] sm:$0xf] }
 0x2a1   : > { %v12265_v58 = vpop.permute.xlu2 %3602  ;;  %2946 = vrot.lane.b32.xlu2 %v2539_v21, %s9916_s24  ;;  %1974 = vst.msk [vmem:[#allocation3 + $0xe8] sm:$0xf] %vm712_vm2, %v1910_v4  ;;  %v2070_v4 = vld [vmem:[#allocation2 + $0x10c] sm:$0xf] }
 0x2a2   : > { %v2562_v29 = vrot.slane %v2560_v53, 5 }
 0x2a4   : > { %v3982_v46 = vpop.permute.xlu0 %3981 }
 0x2a6   : > { %4011 = vrot.lane.b32.xlu0 %v3846_v44, %s9918_s17  ;;  %v2576_v44 = vrot.slane %v2574_v63, 5  ;;  %v2584_v63 = vshll.u32 %v2068_v38, 16  ;;  %v2069_v38 = vld [vmem:[#allocation2 + $0x108] sm:$0xf] }
 0x2a8   : > { %3624 = vrot.lane.b32.xlu1 %v3457_v20, %s9917_s8  ;;  %v2581_v2 = vor.u32 %v2580_v13, %v2576_v44  ;;  %v2572_v20 = vrot.slane %v2571_v60, 4  ;;  %v3470_v13 = vrot.slane %v12296_v62, 5  ;;  %v2598_v62 = vshll.u32 %v2070_v4, 16 }
 0x2a9   : > { %3626 = vrot.lane.b32.xlu2 %v3460_v47, %s9917_s8  ;;  %v3986_v31 = vpop.permute.xlu2 %3985  ;;  %9594 = vmatmul.msk.bf16.gmra.mxu2 %vm8467_vm1, %v9477_v48  ;;  %v2586_v48 = vrot.slane %v2584_v63, 5  ;;  %v3192_v47 = vld [vmem:[#allocation2 + $0x104] sm:$0x1]  ;;  %v2072_v63 = vld [vmem:[#allocation2 + $0x114] sm:$0xf] }
 0x2aa   : > { %v2921_v21 = vpop.permute.xlu1 %2920  ;;  %v2582_v49 = vrot.slane %v2581_v2, 4  ;;  %v3466_v36 = vrot.slane %v3192_v47, 5  ;;  %v2577_v15 = vsel %vm10120_vm7, %v2572_v20, %v2576_v44  ;;  %v1909_v47 = vld [vmem:[#allocation2 + $0xa8] sm:$0xf]  ;;  %v2602_v20 = vshrl.u32 %v2070_v4, 16 }
 0x2ab   : > { %3091 = vst.msk [vmem:[#allocation3 + $0xb0] sm:$0xf] %vm3068_vm3, %v2921_v21  ;;  %v3465_v21 = vrot.slane %v3463_v51, 4 }
 0x2ac   : > { %3767 = vst.msk [vmem:[#allocation3 + $0xb0] sm:$0xf] %vm3744_vm5, %v12219_v9  ;;  %v3845_v9 = vld [vmem:[#allocation2 + $0xfc] sm:$0xf]  ;;  %v2587_v53 = vsel %vm10120_vm7, %v2582_v49, %v2586_v48  ;;  %v2616_v49 = vshll.u32 %v2072_v63, 16 }
 0x2ad   : > { %4152 = vst.msk [vmem:[#allocation3 + $0xb0] sm:$0xf] %vm4129_vm6, %v3982_v46  ;;  %v2563_v46 = vsel %vm10120_vm7, %v2558_v40, %v2562_v29  ;;  %v3467_v39 = vsel %vm10152_vm12, %v3465_v21, %v3466_v36  ;;  %v2589_v40 = vshrl.u32 %v2069_v38, 16  ;;  %v2592_v29 = vshll.u32 %v2069_v38, 16  ;;  %v3848_v48 = vld [vmem:[#allocation2 + $0x10c] sm:$0xf] }
 0x2ae   : > { %v2925_v32 = vpop.permute.xlu0 %2924  ;;  %3628 = vrot.lane.b32.xlu0 %v3464_v37, %s9917_s8  ;;  %v3472_v37 = vrot.slane %v3470_v13, 4  ;;  %1973 = vst.msk [vmem:[#allocation3 + $0xe0] sm:$0xf] %vm712_vm2, %v1909_v47  ;;  %v2618_v38 = vrot.slane %v2616_v49, 5 }
 0x2af   : > { %3093 = vst.msk [vmem:[#allocation3 + $0xc0] sm:$0xf] %vm3068_vm3, %v2925_v32  ;;  %v3473_v32 = vrot.slane %v3195_v3, 5  ;;  %v2591_v44 = vrot.slane %v2589_v40, 4  ;;  %v2604_v40 = vrot.slane %v2602_v20, 4 }
 0x2b0   : > { %2950 = vrot.lane.b32.xlu1 %v2563_v46, %s9916_s24 }
 0x2b1   : > { %4009 = vrot.lane.b32.xlu2 %v3845_v9, %s9918_s17  ;;  %v2594_v9 = vrot.slane %v2592_v29, 5  ;;  %v3474_v60 = vsel %vm10152_vm12, %v3472_v37, %v3473_v32  ;;  %v2071_v37 = vld [vmem:[#allocation2 + $0x110] sm:$0x1]  ;;  %v3849_v32 = vld [vmem:[#allocation2 + $0x114] sm:$0xf] }
 0x2b2   : > { %v3984_v27 = vpop.permute.xlu1 %3983 }
 0x2b3   : > { %4153 = vst.msk [vmem:[#allocation3 + $0xb8] sm:$0xf] %vm4129_vm6, %v3984_v27  ;;  %v2929_v25 = vpop.permute.xlu2 %2928  ;;  %v2613_v27 = vshrl.u32 %v2072_v63, 16  ;;  %v2595_v36 = vor.u32 %v2594_v9, %v2591_v44 }
 0x2b4   : > { %3095 = vst.msk [vmem:[#allocation3 + $0xd0] sm:$0xf] %vm3068_vm3, %v2929_v25  ;;  %v3193_v25 = vld [vmem:[#allocation2 + $0x108] sm:$0xe] }
 0x2b5   : > { %v2596_v29 = vrot.slane %v2595_v36, 4 }
 0x2b6   : > { %v3988_v10 = vpop.permute.xlu0 %3987  ;;  %2954 = vrot.lane.b32.xlu0 %v2587_v53, %s9916_s24  ;;  %v2615_v53 = vrot.slane %v2613_v27, 4 }
 0x2b8   : > { %3630 = vrot.lane.b32.xlu1 %v3467_v39, %s9917_s8  ;;  %v2600_v39 = vrot.slane %v2598_v62, 5  ;;  %v2619_v63 = vor.u32 %v2618_v38, %v2615_v53  ;;  %v3197_v62 = vld [vmem:[#allocation2 + $0x118] sm:$0xf] }
 0x2b9   : > { %2952 = vrot.lane.b32.xlu2 %v2577_v15, %s9916_s24  ;;  %v9202_v15 = vrot.slane %v3193_v25, 9  ;;  %v1911_v25 = vld [vmem:[#allocation2 + $0xb4] sm:$0xf]  ;;  %v3477_v53 = vrot.slane %v3197_v62, 5 }
 0x2ba   : > { %v3601_v51 = vpop.permute.xlu1 %3600  ;;  %v2620_v27 = vrot.slane %v2619_v63, 4  ;;  %1975 = vst.msk [vmem:[#allocation3 + $0xf0] sm:$0xf] %vm712_vm2, %v1911_v25 }
 0x2bb   : > { %3769 = vst.msk [vmem:[#allocation3 + $0xc0] sm:$0xf] %vm3744_vm5, %v3601_v51  ;;  %v3992_v2 = vpop.permute.xlu2 %3991  ;;  %v2073_v51 = vld [vmem:[#allocation2 + $0x118] sm:$0xf]  ;;  %v3471_v9 = vsel %vm10152_vm12, %v9202_v15, %v3470_v13  ;;  %v3198_v15 = vld [vmem:[#allocation2 + $0x11c] sm:$0x1] }
 0x2bc   : > { %4154 = vst.msk [vmem:[#allocation3 + $0xc0] sm:$0xf] %vm4129_vm6, %v3986_v31  ;;  %v3847_v31 = vld [vmem:[#allocation2 + $0x108] sm:$0xf]  ;;  %v2622_v4 = vshll.u32 %v2073_v51, 16 }
 0x2be   : > { %v3605_v46 = vpop.permute.xlu0 %3604  ;;  %3634 = vrot.lane.b32.xlu0 %v3474_v60, %s9917_s8  ;;  %v2605_v60 = vor.u32 %v2604_v40, %v2600_v39 }
 0x2bf   : > { %3771 = vst.msk [vmem:[#allocation3 + $0xd0] sm:$0xf] %vm3744_vm5, %v3605_v46  ;;  %v2608_v46 = vshll.u32 %v2071_v37, 16  ;;  %v3480_v37 = vrot.slane %v3198_v15, 5 }
 0x2c0   : > { %4013 = vrot.lane.b32.xlu1 %v3847_v31, %s9918_s17  ;;  %v2606_v13 = vrot.slane %v2605_v60, 4  ;;  %v2626_v31 = vshrl.u32 %v2073_v51, 16  ;;  %v2076_v51 = vld [vmem:[#allocation2 + $0x124] sm:$0xf] }
 0x2c1   : > { %4015 = vrot.lane.b32.xlu2 %v3848_v48, %s9918_s17  ;;  %v2624_v48 = vrot.slane %v2622_v4, 5  ;;  %v2610_v47 = vrot.slane %v2608_v46, 5  ;;  %v2075_v4 = vld [vmem:[#allocation2 + $0x120] sm:$0xf]  ;;  %v2646_v60 = vshll.u32 %v2076_v51, 16  ;;  %v2650_v46 = vshrl.u32 %v2076_v51, 16 }
 0x2c2   : > { %v2927_v21 = vpop.permute.xlu1 %2926  ;;  %v2628_v63 = vrot.slane %v2626_v31, 4  ;;  %v2640_v25 = vshll.u32 %v2075_v4, 16  ;;  %v2077_v51 = vld [vmem:[#allocation2 + $0x128] sm:$0x1] }
 0x2c3   : > { %3094 = vst.msk [vmem:[#allocation3 + $0xc8] sm:$0xf] %vm3068_vm3, %v2927_v21  ;;  %v12319_v3 = vpop.permute.xlu2 %3608  ;;  %v2625_v20 = vsel %vm10120_vm7, %v2620_v27, %v2624_v48  ;;  %v2611_v36 = vsel %vm10120_vm7, %v2606_v13, %v2610_v47  ;;  %v1912_v27 = vld [vmem:[#allocation2 + $0xb8] sm:$0xf]  ;;  %v2637_v47 = vshrl.u32 %v2075_v4, 16  ;;  %v2652_v15 = vrot.slane %v2650_v46, 4 }
 0x2c4   : > { %3770 = vst.msk [vmem:[#allocation3 + $0xc8] sm:$0xf] %vm3744_vm5, %v12265_v58  ;;  %v2601_v58 = vsel %vm10120_vm7, %v2596_v29, %v2600_v39  ;;  %v3196_v39 = vld [vmem:[#allocation2 + $0x114] sm:$0xe]  ;;  %v3479_v29 = vrot.slane %v3477_v53, 4  ;;  %v2656_v4 = vshll.u32 %v2077_v51, 16 }
 0x2c5   : > { %4155 = vst.msk [vmem:[#allocation3 + $0xc8] sm:$0xf] %vm4129_vm6, %v3988_v10 }
 0x2c6   : > { %4017 = vrot.lane.b32.xlu0 %v3849_v32, %s9918_s17  ;;  %v9203_v32 = vrot.slane %v3196_v39, 9  ;;  %v3481_v13 = vsel %vm10152_vm12, %v3479_v29, %v3480_v37  ;;  %1976 = vst.msk [vmem:[#allocation3 + $0xf8] sm:$0xf] %vm712_vm2, %v1912_v27  ;;  %v2639_v29 = vrot.slane %v2637_v47, 4  ;;  %v2642_v37 = vrot.slane %v2640_v25, 5 }
 0x2c7   : > { %v12369_v47 = vld [vmem:[#allocation2 + $0x130] sm:$0xf] }
 0x2c8   : > { %v2931_v44 = vpop.permute.xlu0 %2930  ;;  %2956 = vrot.lane.b32.xlu1 %v2601_v58, %s9916_s24  ;;  %v3199_v58 = vld [vmem:[#allocation2 + $0x120] sm:$0xe]  ;;  %v3478_v62 = vsel %vm10152_vm12, %v9203_v32, %v3477_v53  ;;  %v2643_v46 = vor.u32 %v2642_v37, %v2639_v29 }
 0x2c9   : > { %3096 = vst.msk [vmem:[#allocation3 + $0xd8] sm:$0xf] %vm3068_vm3, %v2931_v44  ;;  %3632 = vrot.lane.b32.xlu2 %v3471_v9, %s9917_s8  ;;  %v3852_v44 = vld [vmem:[#allocation2 + $0x124] sm:$0xf]  ;;  %v2074_v9 = vld [vmem:[#allocation2 + $0x11c] sm:$0x1] }
 0x2ca   : > { %v3607_v10 = vpop.permute.xlu1 %3606  ;;  %v2632_v31 = vshll.u32 %v2074_v9, 16  ;;  %v2644_v25 = vrot.slane %v2643_v46, 4 }
 0x2cb   : > { %3772 = vst.msk [vmem:[#allocation3 + $0xd8] sm:$0xf] %vm3744_vm5, %v3607_v10  ;;  %v2935_v49 = vpop.permute.xlu2 %2934  ;;  %v3200_v10 = vld [vmem:[#allocation2 + $0x124] sm:$0xf] }
 0x2cc   : > { %4157 = vst.msk [vmem:[#allocation3 + $0xd8] sm:$0xf] %vm4129_vm6, %v3992_v2  ;;  %v3850_v2 = vld [vmem:[#allocation2 + $0x118] sm:$0xf]  ;;  %v2634_v53 = vrot.slane %v2632_v31, 5 }
 0x2cd   : > { %3098 = vst.msk [vmem:[#allocation3 + $0xe8] sm:$0xf] %vm3068_vm3, %v2935_v49  ;;  %v2078_v31 = vld [vmem:[#allocation2 + $0x12c] sm:$0xf] }
 0x2ce   : > { %2960 = vrot.lane.b32.xlu0 %v2625_v20, %s9916_s24  ;;  %v2629_v20 = vor.u32 %v2628_v63, %v2624_v48  ;;  %v2661_v29 = vshrl.u32 %v2078_v31, 16  ;;  %v2664_v37 = vshll.u32 %v2078_v31, 16 }
 0x2d0   : > { %v3611_v21 = vpop.permute.xlu0 %3610  ;;  %4019 = vrot.lane.b32.xlu1 %v3850_v2, %s9918_s17  ;;  %v2630_v48 = vrot.slane %v2629_v20, 4 }
 0x2d1   : > { %3774 = vst.msk [vmem:[#allocation3 + $0xe8] sm:$0xf] %vm3744_vm5, %v3611_v21  ;;  %2958 = vrot.lane.b32.xlu2 %v2611_v36, %s9916_s24  ;;  %v9204_v21 = vrot.slane %v3199_v58, 9  ;;  %v3484_v36 = vrot.slane %v3200_v10, 5  ;;  %v2658_v10 = vrot.slane %v2656_v4, 5 }
 0x2d2   : > { %v3990_v38 = vpop.permute.xlu1 %3989 }
 0x2d3   : > { %4156 = vst.msk [vmem:[#allocation3 + $0xd0] sm:$0xf] %vm4129_vm6, %v3990_v38  ;;  %v12345_v40 = vpop.permute.xlu2 %3614  ;;  %v2648_v38 = vrot.slane %v2646_v60, 5  ;;  %v3485_v32 = vsel %vm10152_vm12, %v9204_v21, %v3484_v36  ;;  %v3851_v60 = vld [vmem:[#allocation2 + $0x120] sm:$0xf] }
 0x2d5   : > { %v2653_v63 = vor.u32 %v2652_v15, %v2648_v38  ;;  %v3204_v15 = vld [vmem:[#allocation2 + $0x134] sm:$0x1]  ;;  %v2649_v51 = vsel %vm10120_vm7, %v2644_v25, %v2648_v38  ;;  %v2663_v38 = vrot.slane %v2661_v29, 4 }
 0x2d6   : > { %4023 = vrot.lane.b32.xlu0 %v3852_v44, %s9918_s17  ;;  %v1916_v44 = vld [vmem:[#allocation2 + $0xe8] sm:$0xf] }
 0x2d7   : > { %1980 = vst.msk [vmem:[#allocation3 + $0x118] sm:$0xf] %vm712_vm2, %v1916_v44  ;;  %v2654_v58 = vrot.slane %v2653_v63, 4  ;;  %v2081_v44 = vld [vmem:[#allocation2 + $0x138] sm:$0xf] }
 0x2d8   : > { %v3994_v49 = vpop.permute.xlu0 %3993  ;;  %3636 = vrot.lane.b32.xlu1 %v3478_v62, %s9917_s8  ;;  %v3486_v62 = vrot.slane %v3484_v36, 4 }
 0x2d9   : > { %3638 = vrot.lane.b32.xlu2 %v3481_v13, %s9917_s8  ;;  %v2659_v21 = vsel %vm10120_vm7, %v2654_v58, %v2658_v10  ;;  %v2688_v58 = vshll.u32 %v2081_v44, 16  ;;  %v1915_v10 = vld [vmem:[#allocation2 + $0xe4] sm:$0xf] }
 0x2da   : > { %v2933_v2 = vpop.permute.xlu1 %2932  ;;  %1979 = vst.msk [vmem:[#allocation3 + $0x110] sm:$0xf] %vm712_vm2, %v1915_v10 }
 0x2db   : > { %v3998_v39 = vpop.permute.xlu2 %3997  ;;  %3097 = vst.msk [vmem:[#allocation3 + $0xe0] sm:$0xf] %vm3068_vm3, %v2933_v2  ;;  %v3491_v2 = vrot.slane %v12369_v47, 5 }
 0x2dc   : > { %3773 = vst.msk [vmem:[#allocation3 + $0xe0] sm:$0xf] %vm3744_vm5, %v12319_v3  ;;  %v2635_v3 = vsel %vm10120_vm7, %v2630_v48, %v2634_v53 }
 0x2dd   : > { %4158 = vst.msk [vmem:[#allocation3 + $0xe0] sm:$0xf] %vm4129_vm6, %v3994_v49  ;;  %v3201_v49 = vld [vmem:[#allocation2 + $0x128] sm:$0x1]  ;;  %v3493_v53 = vrot.slane %v3491_v2, 4 }
 0x2de   : > { %3640 = vrot.lane.b32.xlu0 %v3485_v32, %s9917_s8  ;;  %v3487_v20 = vrot.slane %v3201_v49, 5  ;;  %v3494_v32 = vrot.slane %v3204_v15, 5 }
 0x2e0   : > { %v5089_v9 = vpop.permute.xlu0 %5088  ;;  %2962 = vrot.lane.b32.xlu1 %v2635_v3, %s9916_s24  ;;  %v3488_v36 = vsel %vm10152_vm12, %v3486_v62, %v3487_v20  ;;  %v3495_v46 = vsel %vm10152_vm12, %v3493_v53, %v3494_v32  ;;  %v2685_v3 = vshrl.u32 %v2081_v44, 16  ;;  %v3853_v62 = vld [vmem:[#allocation2 + $0x12c] sm:$0xf]  ;;  %v2080_v53 = vld [vmem:[#allocation2 + $0x134] sm:$0x1] }
 0x2e1   : > { %5266 = vst.msk [vmem:[#allocation3 + $0x78] sm:$0xf] %vm5250_vm8, %v5089_v9  ;;  %4021 = vrot.lane.b32.xlu2 %v3851_v60, %s9918_s17  ;;  %v2666_v9 = vrot.slane %v2664_v37, 5  ;;  %v2079_v60 = vld [vmem:[#allocation2 + $0x130] sm:$0xf] }
 0x2e2   : > { %v3996_v27 = vpop.permute.xlu1 %3995  ;;  %v2674_v47 = vshrl.u32 %v2079_v60, 16  ;;  %v2687_v31 = vrot.slane %v2685_v3, 4  ;;  %v1917_v32 = vld [vmem:[#allocation2 + $0xf0] sm:$0xf]  ;;  %v1919_v44 = vld [vmem:[#allocation2 + $0xfc] sm:$0xf] }
 0x2e3   : > { %v5093_v13 = vpop.permute.xlu2 %5092  ;;  %4159 = vst.msk [vmem:[#allocation3 + $0xe8] sm:$0xf] %vm4129_vm6, %v3996_v27  ;;  %v3854_v27 = vld [vmem:[#allocation2 + $0x130] sm:$0xf]  ;;  %v2667_v49 = vor.u32 %v2666_v9, %v2663_v38 }
 0x2e4   : > { %5268 = vst.msk [vmem:[#allocation3 + $0x88] sm:$0xf] %vm5250_vm8, %v5093_v13  ;;  %v2670_v13 = vshll.u32 %v2079_v60, 16  ;;  %v2680_v60 = vshll.u32 %v2080_v53, 16  ;;  %v4224_v53 = vld [vmem:[#allocation2 + $0x84] sm:$0xf] }
 0x2e5   : > { %v2668_v37 = vrot.slane %v2667_v49, 4  ;;  %1981 = vst.msk [vmem:[#allocation3 + $0x120] sm:$0xf] %vm712_vm2, %v1917_v32  ;;  %v3858_v32 = vld [vmem:[#allocation2 + $0x148] sm:$0xf] }
 0x2e6   : > { %2966 = vrot.lane.b32.xlu0 %v2659_v21, %s9916_s24  ;;  %v2690_v21 = vrot.slane %v2688_v58, 5  ;;  %1983 = vst.msk [vmem:[#allocation3 + $0x130] sm:$0xf] %vm712_vm2, %v1919_v44  ;;  %v2083_v44 = vld [vmem:[#allocation2 + $0x140] sm:$0x1] }
 0x2e8   : > { %v2937_v48 = vpop.permute.xlu0 %2936  ;;  %3642 = vrot.lane.b32.xlu1 %v3488_v36, %s9917_s8  ;;  %v2676_v36 = vrot.slane %v2674_v47, 4  ;;  %v3206_v47 = vld [vmem:[#allocation2 + $0x13c] sm:$0xf] }
 0x2e9   : > { %2964 = vrot.lane.b32.xlu2 %v2649_v51, %s9916_s24  ;;  %3099 = vst.msk [vmem:[#allocation3 + $0xf0] sm:$0xf] %vm3068_vm3, %v2937_v48  ;;  %v2082_v51 = vld [vmem:[#allocation2 + $0x13c] sm:$0xf]  ;;  %v2672_v48 = vrot.slane %v2670_v13, 5  ;;  %v2682_v13 = vrot.slane %v2680_v60, 5 }
 0x2ea   : > { %v3613_v63 = vpop.permute.xlu1 %3612  ;;  %v2694_v9 = vshll.u32 %v2082_v51, 16  ;;  %v12421_v60 = vld [vmem:[#allocation2 + $0x148] sm:$0xf] }
 0x2eb   : > { %v4004_v4 = vpop.permute.xlu2 %4003  ;;  %3775 = vst.msk [vmem:[#allocation3 + $0xf0] sm:$0xf] %vm3744_vm5, %v3613_v63  ;;  %v3855_v63 = vld [vmem:[#allocation2 + $0x138] sm:$0xf]  ;;  %v2673_v3 = vsel %vm10120_vm7, %v2668_v37, %v2672_v48 }
 0x2ec   : > { %4163 = vst.msk [vmem:[#allocation3 + $0x108] sm:$0xf] %vm4129_vm6, %v4004_v4  ;;  %v2691_v4 = vor.u32 %v2690_v21, %v2687_v31  ;;  %v3856_v21 = vld [vmem:[#allocation2 + $0x13c] sm:$0xf]  ;;  %v3205_v37 = vld [vmem:[#allocation2 + $0x138] sm:$0xe] }
 0x2ed   : > { %4160 = vst.msk [vmem:[#allocation3 + $0xf0] sm:$0xf] %vm4129_vm6, %v3998_v39  ;;  %v3202_v39 = vld [vmem:[#allocation2 + $0x12c] sm:$0xe] }
 0x2ee   : > { %3646 = vrot.lane.b32.xlu0 %v3495_v46, %s9917_s8  ;;  %v9205_v29 = vrot.slane %v3202_v39, 9  ;;  %v2692_v58 = vrot.slane %v2691_v4, 4 }
 0x2f0   : > { %v4000_v25 = vpop.permute.xlu0 %3999  ;;  %4025 = vrot.lane.b32.xlu1 %v3853_v62, %s9918_s17  ;;  %v3492_v38 = vsel %vm10152_vm12, %v9205_v29, %v3491_v2  ;;  %v2696_v2 = vrot.slane %v2694_v9, 5  ;;  %v2698_v62 = vshrl.u32 %v2082_v51, 16  ;;  %v3207_v29 = vld [vmem:[#allocation2 + $0x140] sm:$0x1]  ;;  %v9206_v9 = vrot.slane %v3205_v37, 9 }
 0x2f1   : > { %4027 = vrot.lane.b32.xlu2 %v3854_v27, %s9918_s17  ;;  %v3501_v4 = vrot.slane %v3207_v29, 5  ;;  %v4225_v37 = vld [vmem:[#allocation2 + $0x88] sm:$0xf] }
 0x2f2   : > { %v2939_v20 = vpop.permute.xlu1 %2938 }
 0x2f3   : > { %v12392_v15 = vpop.permute.xlu2 %3620  ;;  %3100 = vst.msk [vmem:[#allocation3 + $0xf8] sm:$0xf] %vm3068_vm3, %v2939_v20  ;;  %v3498_v20 = vrot.slane %v3206_v47, 5 }
 0x2f4   : > { %3776 = vst.msk [vmem:[#allocation3 + $0xf8] sm:$0xf] %vm3744_vm5, %v12345_v40  ;;  %v2677_v40 = vor.u32 %v2676_v36, %v2672_v48  ;;  %v2085_v36 = vld [vmem:[#allocation2 + $0x148] sm:$0xf] }
 0x2f5   : > { %4161 = vst.msk [vmem:[#allocation3 + $0xf8] sm:$0xf] %vm4129_vm6, %v4000_v25  ;;  %v2697_v25 = vsel %vm10120_vm7, %v2692_v58, %v2696_v2  ;;  %v4531_v58 = vshrl.u32 %v4224_v53, 16 }
 0x2f6   : > { %4029 = vrot.lane.b32.xlu0 %v3855_v63, %s9918_s17  ;;  %v2678_v49 = vrot.slane %v2677_v40, 4  ;;  %v3500_v63 = vrot.slane %v3498_v20, 4  ;;  %v3208_v40 = vld [vmem:[#allocation2 + $0x144] sm:$0xe] }
 0x2f8   : > { %v5095_v46 = vpop.permute.xlu0 %5094  ;;  %2968 = vrot.lane.b32.xlu1 %v2673_v3, %s9916_s24  ;;  %v2683_v39 = vsel %vm10120_vm7, %v2678_v49, %v2682_v13  ;;  %v2722_v3 = vshrl.u32 %v2085_v36, 16  ;;  %v4520_v49 = vshrl.u32 %v12160_v18, 16  ;;  %v3502_v13 = vsel %vm10152_vm12, %v3500_v63, %v3501_v4 }
 0x2f9   : > { %3644 = vrot.lane.b32.xlu2 %v3492_v38, %s9917_s8  ;;  %5269 = vst.msk [vmem:[#allocation3 + $0x90] sm:$0xf] %vm5250_vm8, %v5095_v46  ;;  %v2700_v38 = vrot.slane %v2698_v62, 4  ;;  %v2718_v46 = vshll.u32 %v2085_v36, 16  ;;  %v4533_v36 = vrot.slane %v4531_v58, 4 }
 0x2fa   : > { %v5091_v27 = vpop.permute.xlu1 %5090  ;;  %v2724_v18 = vrot.slane %v2722_v3, 4  ;;  %v3857_v3 = vld [vmem:[#allocation2 + $0x144] sm:$0xf] }
 0x2fb   : > { %v2947_v10 = vpop.permute.xlu2 %2946  ;;  %5267 = vst.msk [vmem:[#allocation3 + $0x80] sm:$0xf] %vm5250_vm8, %v5091_v27  ;;  %v2704_v27 = vshll.u32 %v2083_v44, 16  ;;  %v2701_v47 = vor.u32 %v2700_v38, %v2696_v2  ;;  %v12433_v29 = vrot.slane %v2718_v46, 5  ;;  %v4522_v44 = vrot.slane %v4520_v49, 4 }
 0x2fc   : > { %3104 = vst.msk [vmem:[#allocation3 + $0x118] sm:$0xf] %vm3068_vm3, %v2947_v10  ;;  %v4534_v10 = vshll.u32 %v4224_v53, 16  ;;  %v2084_v38 = vld [vmem:[#allocation2 + $0x144] sm:$0xf] }
 0x2fd   : > { %v2702_v4 = vrot.slane %v2701_v47, 4  ;;  %v2725_v58 = vor.u32 %v2724_v18, %v12433_v29  ;;  %v2709_v47 = vshrl.u32 %v2084_v38, 16 }
 0x2fe   : > { %2972 = vrot.lane.b32.xlu0 %v2697_v25, %s9916_s24  ;;  %v1918_v25 = vld [vmem:[#allocation2 + $0xf4] sm:$0xf]  ;;  %v4536_v2 = vrot.slane %v4534_v10, 5 }
 0x2ff   : > { %1982 = vst.msk [vmem:[#allocation3 + $0x128] sm:$0xf] %vm712_vm2, %v1918_v25  ;;  %v2712_v25 = vshll.u32 %v2084_v38, 16 }
 0x300   : > { %v3623_v31 = vpop.permute.xlu0 %3622  ;;  %4031 = vrot.lane.b32.xlu1 %v3856_v21, %s9918_s17  ;;  %v13889_v21 = vrot.slane %v12421_v60, 5 }
 0x301   : > { %2970 = vrot.lane.b32.xlu2 %v2683_v39, %s9916_s24  ;;  %3780 = vst.msk [vmem:[#allocation3 + $0x118] sm:$0xf] %vm3744_vm5, %v3623_v31  ;;  %v3499_v39 = vsel %vm10152_vm12, %v9206_v9, %v3498_v20  ;;  %v9207_v31 = vrot.slane %v3208_v40, 9  ;;  %v4223_v20 = vld [vmem:[#allocation2 + $0x80] sm:$0x1]  ;;  %v4540_v9 = vshll.u32 %v4225_v37, 16 }
 0x302   : > { %v4002_v51 = vpop.permute.xlu1 %4001  ;;  %v4544_v40 = vshrl.u32 %v4225_v37, 16  ;;  %v4526_v49 = vshll.u32 %v4223_v20, 16  ;;  %v4230_v37 = vld [vmem:[#allocation2 + $0x9c] sm:$0xf]  ;;  %v2714_v38 = vrot.slane %v2712_v25, 5 }
 0x303   : > { %v12418_v48 = vpop.permute.xlu2 %3626  ;;  %4162 = vst.msk [vmem:[#allocation3 + $0x100] sm:$0xf] %vm4129_vm6, %v4002_v51  ;;  %v2086_v51 = vld [vmem:[#allocation2 + $0x14c] sm:$0x1]  ;;  %v3506_v46 = vsel %vm10152_vm12, %v9207_v31, %v13889_v21  ;;  %v4542_v18 = vrot.slane %v4540_v9, 5 }
 0x304   : > { %v2728_v10 = vshll.u32 %v2086_v51, 16  ;;  %v1922_v31 = vld [vmem:[#allocation2 + $0x10c] sm:$0xf]  ;;  %v4528_v9 = vrot.slane %v4526_v49, 5 }
 0x305   : > { %1986 = vst.msk [vmem:[#allocation3 + $0x148] sm:$0xf] %vm712_vm2, %v1922_v31  ;;  %v4228_v31 = vld [vmem:[#allocation2 + $0x94] sm:$0xf] }
 0x306   : > { %4035 = vrot.lane.b32.xlu0 %v3858_v32, %s9918_s17  ;;  %v2706_v32 = vrot.slane %v2704_v27, 5  ;;  %v4537_v27 = vor.u32 %v4536_v2, %v4533_v36  ;;  %v4226_v36 = vld [vmem:[#allocation2 + $0x8c] sm:$0x1]  ;;  %v4546_v2 = vrot.slane %v4544_v40, 4  ;;  %v4568_v49 = vshrl.u32 %v4228_v31, 16 }
 0x307   : > { %v4550_v40 = vshll.u32 %v4226_v36, 16 }
 0x308   : > { %v4006_v62 = vpop.permute.xlu0 %4005  ;;  %3648 = vrot.lane.b32.xlu1 %v3499_v39, %s9917_s8  ;;  %v4523_v39 = vor.u32 %v4522_v44, %v12177_v35  ;;  %v2726_v35 = vrot.slane %v2725_v58, 4  ;;  %v4538_v51 = vrot.slane %v4537_v27, 4  ;;  %v2711_v44 = vrot.slane %v2709_v47, 4 }
 0x309   : > { %3650 = vrot.lane.b32.xlu2 %v3502_v13, %s9917_s8  ;;  %v1920_v13 = vld [vmem:[#allocation2 + $0x100] sm:$0xf] }
 0x30a   : > { %v2945_v63 = vpop.permute.xlu1 %2944  ;;  %1984 = vst.msk [vmem:[#allocation3 + $0x138] sm:$0xf] %vm712_vm2, %v1920_v13  ;;  %v4579_v13 = vshrl.u32 %v4230_v37, 16  ;;  %v2715_v27 = vor.u32 %v2714_v38, %v2711_v44 }
 0x30b   : > { %v12435_v53 = vpop.permute.xlu2 %4009  ;;  %3103 = vst.msk [vmem:[#allocation3 + $0x110] sm:$0xf] %vm3068_vm3, %v2945_v63 }
 0x30c   : > { %3779 = vst.msk [vmem:[#allocation3 + $0x110] sm:$0xf] %vm3744_vm5, %v12392_v15  ;;  %v2707_v15 = vsel %vm10120_vm7, %v2702_v4, %v2706_v32  ;;  %v4524_v4 = vrot.slane %v4523_v39, 4  ;;  %v4581_v47 = vrot.slane %v4579_v13, 4  ;;  %v4564_v39 = vshll.u32 %v4228_v31, 16 }
 0x30d   : > { %4164 = vst.msk [vmem:[#allocation3 + $0x110] sm:$0xf] %vm4129_vm6, %v4006_v62  ;;  %v2730_v62 = vrot.slane %v2728_v10, 5  ;;  %v4543_v10 = vsel %vm10120_vm7, %v4538_v51, %v4542_v18  ;;  %v2716_v44 = vrot.slane %v2715_v27, 4 }
 0x30e   : > { %3652 = vrot.lane.b32.xlu0 %v3506_v46, %s9917_s8  ;;  %v4582_v46 = vshll.u32 %v4230_v37, 16  ;;  %v4231_v37 = vld [vmem:[#allocation2 + $0xa0] sm:$0xf] }
 0x30f   : > { %v2731_v58 = vsel %vm10120_vm7, %v2726_v35, %v2730_v62  ;;  %v4552_v62 = vrot.slane %v4550_v40, 5  ;;  %v4588_v13 = vshll.u32 %v4231_v37, 16  ;;  %v4592_v27 = vshrl.u32 %v4231_v37, 16 }
 0x310   : > { %v2949_v63 = vpop.permute.xlu0 %2948  ;;  %2974 = vrot.lane.b32.xlu1 %v2707_v15, %s9916_s24  ;;  %v4584_v25 = vrot.slane %v4582_v46, 5  ;;  %v4229_v46 = vld [vmem:[#allocation2 + $0x98] sm:$0x1] }
 0x311   : > { %4033 = vrot.lane.b32.xlu2 %v3857_v3, %s9918_s17  ;;  %3105 = vst.msk [vmem:[#allocation3 + $0x120] sm:$0xf] %vm3068_vm3, %v2949_v63  ;;  %v4547_v3 = vor.u32 %v4546_v2, %v4542_v18  ;;  %v4227_v63 = vld [vmem:[#allocation2 + $0x90] sm:$0xf]  ;;  %v4529_v2 = vsel %vm10120_vm7, %v4524_v4, %v4528_v9  ;;  %v3210_v18 = vld [vmem:[#allocation2 + $0x14c] sm:$0x1] }
 0x312   : > { %v4008_v32 = vpop.permute.xlu1 %4007  ;;  %v4555_v15 = vshrl.u32 %v4227_v63, 16  ;;  %v4558_v36 = vshll.u32 %v4227_v63, 16  ;;  %v4585_v38 = vor.u32 %v4584_v25, %v4581_v47  ;;  %v12470_v63 = vrot.slane %v4564_v39, 5 }
 0x313   : > { %v2953_v20 = vpop.permute.xlu2 %2952  ;;  %4165 = vst.msk [vmem:[#allocation3 + $0x118] sm:$0xf] %vm4129_vm6, %v4008_v32  ;;  %v4548_v35 = vrot.slane %v4547_v3, 4  ;;  %v4234_v32 = vld [vmem:[#allocation2 + $0xac] sm:$0xf]  ;;  %v13908_v9 = vrot.slane %v12421_v60, 5  ;;  %v2721_v60 = vsel %vm10120_vm7, %v2716_v44, %v12433_v29 }
 0x314   : > { %3107 = vst.msk [vmem:[#allocation3 + $0x130] sm:$0xf] %vm3068_vm3, %v2953_v20  ;;  %v4560_v21 = vrot.slane %v4558_v36, 5  ;;  %v3508_v3 = vrot.slane %v3210_v18, 5  ;;  %v4574_v47 = vshll.u32 %v4229_v46, 16  ;;  %v4612_v25 = vshll.u32 %v4234_v32, 16 }
 0x315   : > { %v4553_v4 = vsel %vm10120_vm7, %v4548_v35, %v4552_v62  ;;  %v3507_v40 = vrot.slane %v13908_v9, 4  ;;  %v4616_v39 = vshrl.u32 %v4234_v32, 16  ;;  %v4606_v36 = vshll.u32 %v4233_v26, 16  ;;  %v4239_v46 = vld [vmem:[#allocation2 + $0xc0] sm:$0xf] }
 0x316   : > { %2978 = vrot.lane.b32.xlu0 %v2731_v58, %s9916_s24  ;;  %v4570_v58 = vrot.slane %v4568_v49, 4  ;;  %v12480_v49 = vrot.slane %v4588_v13, 5  ;;  %v4586_v35 = vrot.slane %v4585_v38, 4  ;;  %v4235_v13 = vld [vmem:[#allocation2 + $0xb0] sm:$0x1]  ;;  %v4576_v29 = vrot.slane %v4574_v47, 5 }
 0x317   : > { %v3509_v37 = vsel %vm10152_vm12, %v3507_v40, %v3508_v3  ;;  %v12492_v44 = vrot.slane %v4612_v25, 5  ;;  %v4618_v38 = vrot.slane %v4616_v39, 4  ;;  %v4651_v3 = vshrl.u32 %v4239_v46, 16  ;;  %v4236_v47 = vld [vmem:[#allocation2 + $0xb4] sm:$0xf] }
 0x318   : > { %v12462_v20 = vpop.permute.xlu0 %4011  ;;  %5096 = vrot.lane.b32.xlu1 %v4529_v2, %s9919_s23  ;;  %v1921_v2 = vld [vmem:[#allocation2 + $0x108] sm:$0xf]  ;;  %v4571_v62 = vor.u32 %v4570_v58, %v12470_v63  ;;  %v4608_v58 = vrot.slane %v4606_v36, 5  ;;  %v1925_v25 = vld [vmem:[#allocation2 + $0x120] sm:$0xf] }
 0x319   : > { %5098 = vrot.lane.b32.xlu2 %v4543_v10, %s9919_s23  ;;  %v4557_v10 = vrot.slane %v4555_v15, 4  ;;  %v4603_v15 = vshrl.u32 %v4233_v26, 16  ;;  %1985 = vst.msk [vmem:[#allocation3 + $0x140] sm:$0xf] %vm712_vm2, %v1921_v2  ;;  %v1923_v26 = vld [vmem:[#allocation2 + $0x114] sm:$0xf]  ;;  %v4619_v39 = vor.u32 %v4618_v38, %v12492_v44 }
 0x31a   : > { %v3625_v31 = vpop.permute.xlu1 %3624  ;;  %1987 = vst.msk [vmem:[#allocation3 + $0x150] sm:$0xf] %vm712_vm2, %v1923_v26  ;;  %v4572_v9 = vrot.slane %v4571_v62, 4  ;;  %v4654_v2 = vshll.u32 %v4239_v46, 16  ;;  %v4627_v46 = vshrl.u32 %v4236_v47, 16  ;;  %v4630_v38 = vshll.u32 %v4236_v47, 16 }
 0x31b   : > { %v12468_v51 = vpop.permute.xlu2 %4015  ;;  %3781 = vst.msk [vmem:[#allocation3 + $0x120] sm:$0xf] %vm3744_vm5, %v3625_v31  ;;  %v4561_v18 = vor.u32 %v4560_v21, %v4557_v10  ;;  %v4594_v21 = vrot.slane %v4592_v27, 4  ;;  %v4605_v31 = vrot.slane %v4603_v15, 4  ;;  %v4232_v10 = vld [vmem:[#allocation2 + $0xa4] sm:$0x1]  ;;  %v4591_v27 = vsel %vm10120_vm7, %v4586_v35, %v12480_v49 }
 0x31c   : > { %4166 = vst.msk [vmem:[#allocation3 + $0x120] sm:$0xf] %vm4129_vm6, %v12435_v53  ;;  %v4622_v15 = vshll.u32 %v4235_v13, 16  ;;  %v4656_v26 = vrot.slane %v4654_v2, 5 }
 0x31d   : > { %v4562_v40 = vrot.slane %v4561_v18, 4  ;;  %v4609_v36 = vor.u32 %v4608_v58, %v4605_v31  ;;  %v4595_v62 = vor.u32 %v4594_v21, %v12480_v49  ;;  %v4598_v18 = vshll.u32 %v4232_v10, 16  ;;  %1989 = vst.msk [vmem:[#allocation3 + $0x160] sm:$0xf] %vm712_vm2, %v1925_v25  ;;  %v4243_v49 = vld [vmem:[#allocation2 + $0xe8] sm:$0xf] }
 0x31e   : > { %5100 = vrot.lane.b32.xlu0 %v4553_v4, %s9919_s23  ;;  %v4624_v21 = vrot.slane %v4622_v15, 5  ;;  %v4240_v31 = vld [vmem:[#allocation2 + $0xc4] sm:$0xf]  ;;  %v4684_v2 = vshll.u32 %v4243_v49, 16 }
 0x31f   : > { %v4567_v13 = vsel %vm10120_vm7, %v4562_v40, %v12470_v63  ;;  %v4610_v10 = vrot.slane %v4609_v36, 4  ;;  %v4242_v15 = vld [vmem:[#allocation2 + $0xe4] sm:$0xf] }
 0x320   : > { %v3629_v53 = vpop.permute.xlu0 %3628  ;;  %3654 = vrot.lane.b32.xlu1 %v3509_v37, %s9917_s8  ;;  %s9921_s8 = smov 96  }
 0x321   : > { %2976 = vrot.lane.b32.xlu2 %v2721_v60, %s9916_s24  ;;  %3783 = vst.msk [vmem:[#allocation3 + $0x130] sm:$0xf] %vm3744_vm5, %v3629_v53  ;;  %v4237_v60 = vld [vmem:[#allocation2 + $0xb8] sm:$0xf]  ;;  %v4577_v53 = vsel %vm10120_vm7, %v4572_v9, %v4576_v29  ;;  %v4620_v29 = vrot.slane %v4619_v39, 4  ;;  %v4600_v9 = vrot.slane %v4598_v18, 5 }
 0x322   : > { %v2951_v4 = vpop.permute.xlu1 %2950  ;;  %v4636_v37 = vshll.u32 %v4237_v60, 16  ;;  %v4640_v35 = vshrl.u32 %v4237_v60, 16  ;;  %v4238_v60 = vld [vmem:[#allocation2 + $0xbc] sm:$0x1]  ;;  %v4688_v39 = vshrl.u32 %v4243_v49, 16  ;;  %v12533_v49 = vrot.slane %v4684_v2, 5 }
 0x323   : > { %v12494_v32 = vpop.permute.xlu2 %3632  ;;  %3106 = vst.msk [vmem:[#allocation3 + $0x128] sm:$0xf] %vm3068_vm3, %v2951_v4  ;;  %v4596_v4 = vrot.slane %v4595_v62, 4  ;;  %v4625_v36 = vsel %vm10120_vm7, %v4620_v29, %v4624_v21  ;;  %v4660_v62 = vshll.u32 %v4240_v31, 16  ;;  %s9920_s24 = smov 80  }
 0x324   : > { %3782 = vst.msk [vmem:[#allocation3 + $0x128] sm:$0xf] %vm3744_vm5, %v12418_v48  ;;  %v12518_v63 = vrot.slane %v4636_v37, 5  ;;  %v4642_v40 = vrot.slane %v4640_v35, 4  ;;  %v4646_v37 = vshll.u32 %v4238_v60, 16  ;;  %v4615_v35 = vsel %vm10120_vm7, %v4610_v10, %v12492_v44 }
 0x325   : > { %4167 = vst.msk [vmem:[#allocation3 + $0x128] sm:$0xf] %vm4129_vm6, %v12462_v20  ;;  %v4653_v20 = vrot.slane %v4651_v3, 4  ;;  %v4629_v3 = vrot.slane %v4627_v46, 4  ;;  %v4601_v18 = vsel %vm10120_vm7, %v4596_v4, %v4600_v9  ;;  %v4690_v29 = vrot.slane %v4688_v39, 4 }
 0x326   : > { %5106 = vrot.lane.b32.xlu0 %v4591_v27, %s9919_s23  ;;  %v4632_v27 = vrot.slane %v4630_v38, 5  ;;  %v4643_v46 = vor.u32 %v4642_v40, %v12518_v63  ;;  %v4662_v21 = vrot.slane %v4660_v62, 5  ;;  %v4648_v44 = vrot.slane %v4646_v37, 5  ;;  %v4248_v10 = vld [vmem:[#allocation2 + $0xfc] sm:$0xf] }
 0x327   : > { %v4657_v47 = vor.u32 %v4656_v26, %v4653_v20  ;;  %v4678_v20 = vshll.u32 %v4242_v15, 16  ;;  %v4246_v4 = vld [vmem:[#allocation2 + $0xf4] sm:$0xf]  ;;  %v4691_v39 = vor.u32 %v4690_v29, %v12533_v49  ;;  %v4726_v62 = vshll.u32 %v4248_v10, 16 }
 0x328   : > { %v2955_v48 = vpop.permute.xlu0 %2954  ;;  %5102 = vrot.lane.b32.xlu1 %v4567_v13, %s9919_s23  ;;  %v4675_v13 = vshrl.u32 %v4242_v15, 16  ;;  %v4633_v38 = vor.u32 %v4632_v27, %v4629_v3  ;;  %v4644_v60 = vrot.slane %v4643_v46, 4  ;;  %v4245_v3 = vld [vmem:[#allocation2 + $0xf0] sm:$0xf]  ;;  %v4241_v15 = vld [vmem:[#allocation2 + $0xc8] sm:$0x1] }
 0x329   : > { %5104 = vrot.lane.b32.xlu2 %v4577_v53, %s9919_s23  ;;  %3108 = vst.msk [vmem:[#allocation3 + $0x138] sm:$0xf] %vm3068_vm3, %v2955_v48  ;;  %v4664_v53 = vshrl.u32 %v4240_v31, 16  ;;  %v4244_v48 = vld [vmem:[#allocation2 + $0xec] sm:$0x1]  ;;  %v4680_v40 = vrot.slane %v4678_v20, 5 }
 0x32a   : > { %v3631_v25 = vpop.permute.xlu1 %3630  ;;  %v4634_v27 = vrot.slane %v4633_v38, 4  ;;  %v4712_v37 = vshrl.u32 %v4246_v4, 16  ;;  %v4702_v46 = vshll.u32 %v4245_v3, 16 }
 0x32b   : > { %v2959_v58 = vpop.permute.xlu2 %2958  ;;  %3784 = vst.msk [vmem:[#allocation3 + $0x138] sm:$0xf] %vm3744_vm5, %v3631_v25  ;;  %v4677_v25 = vrot.slane %v4675_v13, 4  ;;  %v4649_v13 = vsel %vm10120_vm7, %v4644_v60, %v4648_v44  ;;  %v4247_v60 = vld [vmem:[#allocation2 + $0xf8] sm:$0x1] }
 0x32c   : > { %3110 = vst.msk [vmem:[#allocation3 + $0x148] sm:$0xf] %vm3068_vm3, %v2959_v58  ;;  %v4694_v58 = vshll.u32 %v4244_v48, 16  ;;  %v1924_v48 = vld [vmem:[#allocation2 + $0x118] sm:$0xf]  ;;  %v4639_v29 = vsel %vm10120_vm7, %v4634_v27, %v12518_v63 }
 0x32d   : > { %4169 = vst.msk [vmem:[#allocation3 + $0x138] sm:$0xf] %vm4129_vm6, %v12468_v51  ;;  %v4658_v51 = vrot.slane %v4657_v47, 4  ;;  %v4666_v47 = vrot.slane %v4664_v53, 4  ;;  %v1926_v53 = vld [vmem:[#allocation2 + $0x124] sm:$0xf] }
 0x32e   : > { %5112 = vrot.lane.b32.xlu0 %v4625_v36, %s9919_s23  ;;  %v4723_v36 = vshrl.u32 %v4248_v10, 16  ;;  %v4696_v20 = vrot.slane %v4694_v58, 5  ;;  %1988 = vst.msk [vmem:[#allocation3 + $0x158] sm:$0xf] %vm712_vm2, %v1924_v48  ;;  %v4692_v10 = vrot.slane %v4691_v39, 4  ;;  %v4728_v58 = vrot.slane %v4726_v62, 5 }
 0x32f   : > { %v4663_v2 = vsel %vm10120_vm7, %v4658_v51, %v4662_v21  ;;  %v4667_v51 = vor.u32 %v4666_v47, %v4662_v21  ;;  %1990 = vst.msk [vmem:[#allocation3 + $0x168] sm:$0xf] %vm712_vm2, %v1926_v53  ;;  %v4252_v21 = vld [vmem:[#allocation2 + $0x10c] sm:$0xf]  ;;  %v4714_v47 = vrot.slane %v4712_v37, 4  ;;  %v4718_v37 = vshll.u32 %v4247_v60, 16 }
 0x330   : > { %v3635_v26 = vpop.permute.xlu0 %3634  ;;  %5108 = vrot.lane.b32.xlu1 %v4601_v18, %s9919_s23  ;;  %v4708_v18 = vshll.u32 %v4246_v4, 16  ;;  %v4670_v4 = vshll.u32 %v4241_v15, 16  ;;  %v4725_v44 = vrot.slane %v4723_v36, 4  ;;  %v1928_v48 = vld [vmem:[#allocation2 + $0x130] sm:$0xf]  ;;  %v4697_v15 = vsel %vm10120_vm7, %v4692_v10, %v4696_v20 }
 0x331   : > { %5110 = vrot.lane.b32.xlu2 %v4615_v35, %s9919_s23  ;;  %3786 = vst.msk [vmem:[#allocation3 + $0x148] sm:$0xf] %vm3744_vm5, %v3635_v26  ;;  %v4699_v35 = vshrl.u32 %v4245_v3, 16  ;;  %v4681_v26 = vor.u32 %v4680_v40, %v4677_v25  ;;  %v4668_v39 = vrot.slane %v4667_v51, 4  ;;  %v4251_v53 = vld [vmem:[#allocation2 + $0x108] sm:$0xf] }
 0x332   : > { %v4014_v9 = vpop.permute.xlu1 %4013  ;;  %v12555_v40 = vrot.slane %v4708_v18, 5  ;;  %1992 = vst.msk [vmem:[#allocation3 + $0x178] sm:$0xf] %vm712_vm2, %v1928_v48  ;;  %v4672_v36 = vrot.slane %v4670_v4, 5  ;;  %v4729_v18 = vor.u32 %v4728_v58, %v4725_v44  ;;  %v4747_v10 = vshrl.u32 %v4251_v53, 16 }
 0x333   : > { %v12537_v31 = vpop.permute.xlu2 %3638  ;;  %4168 = vst.msk [vmem:[#allocation3 + $0x130] sm:$0xf] %vm4129_vm6, %v4014_v9  ;;  %v4249_v9 = vld [vmem:[#allocation2 + $0x100] sm:$0xf]  ;;  %v4701_v3 = vrot.slane %v4699_v35, 4  ;;  %v4682_v27 = vrot.slane %v4681_v26, 4 }
 0x334   : > { %v4732_v62 = vshll.u32 %v4249_v9, 16  ;;  %v4756_v35 = vshll.u32 %v4252_v21, 16  ;;  %v4715_v26 = vor.u32 %v4714_v47, %v12555_v40  ;;  %v4750_v4 = vshll.u32 %v4251_v53, 16  ;;  %v4254_v53 = vld [vmem:[#allocation2 + $0x114] sm:$0xf] }
 0x335   : > { %v4687_v51 = vsel %vm10120_vm7, %v4682_v27, %v12533_v49  ;;  %v4673_v44 = vsel %vm10120_vm7, %v4668_v39, %v4672_v36  ;;  %v4749_v39 = vrot.slane %v4747_v10, 4  ;;  %v4255_v36 = vld [vmem:[#allocation2 + $0x118] sm:$0xf] }
 0x336   : > { %5118 = vrot.lane.b32.xlu0 %v4663_v2, %s9919_s23  ;;  %v4704_v2 = vrot.slane %v4702_v46, 5  ;;  %v4760_v46 = vshrl.u32 %v4252_v21, 16  ;;  %v4734_v58 = vrot.slane %v4732_v62, 5  ;;  %v12574_v60 = vrot.slane %v4756_v35, 5  ;;  %v4250_v62 = vld [vmem:[#allocation2 + $0x104] sm:$0x1] }
 0x337   : > { %v4716_v47 = vrot.slane %v4715_v26, 4  ;;  %v4742_v10 = vshll.u32 %v4250_v62, 16 }
 0x338   : > { %v4018_v38 = vpop.permute.xlu0 %4017  ;;  %5114 = vrot.lane.b32.xlu1 %v4639_v29, %s9919_s23  ;;  %v4705_v20 = vor.u32 %v4704_v2, %v4701_v3  ;;  %v4253_v29 = vld [vmem:[#allocation2 + $0x110] sm:$0x1]  ;;  %v4762_v21 = vrot.slane %v4760_v46, 4 }
 0x339   : > { %5116 = vrot.lane.b32.xlu2 %v4649_v13, %s9919_s23  ;;  %v4736_v13 = vshrl.u32 %v4249_v9, 16  ;;  %v4720_v9 = vrot.slane %v4718_v37, 5  ;;  %v4766_v2 = vshll.u32 %v4253_v29, 16 }
 0x33a   : > { %v2957_v63 = vpop.permute.xlu1 %2956  ;;  %v4706_v3 = vrot.slane %v4705_v20, 4  ;;  %v4763_v37 = vor.u32 %v4762_v21, %v12574_v60  ;;  %v4780_v20 = vshll.u32 %v4255_v36, 16 }
 0x33b   : > { %v12553_v25 = vpop.permute.xlu2 %4021  ;;  %3109 = vst.msk [vmem:[#allocation3 + $0x140] sm:$0xf] %vm3068_vm3, %v2957_v63  ;;  %v4738_v48 = vrot.slane %v4736_v13, 4  ;;  %v4257_v63 = vld [vmem:[#allocation2 + $0x120] sm:$0xf]  ;;  %v4721_v13 = vsel %vm10120_vm7, %v4716_v47, %v4720_v9 }
 0x33c   : > { %3785 = vst.msk [vmem:[#allocation3 + $0x140] sm:$0xf] %vm3744_vm5, %v12494_v32  ;;  %v4795_v35 = vshrl.u32 %v4257_v63, 16  ;;  %v4798_v46 = vshll.u32 %v4257_v63, 16  ;;  %v4764_v21 = vrot.slane %v4763_v37, 4 }
 0x33d   : > { %4170 = vst.msk [vmem:[#allocation3 + $0x140] sm:$0xf] %vm4129_vm6, %v4018_v38  ;;  %v4730_v38 = vrot.slane %v4729_v18, 4  ;;  %v4739_v26 = vor.u32 %v4738_v48, %v4734_v58  ;;  %v4261_v47 = vld [vmem:[#allocation2 + $0x130] sm:$0xf] }
 0x33e   : > { %5124 = vrot.lane.b32.xlu0 %v4697_v15, %s9919_s23  ;;  %v4752_v15 = vrot.slane %v4750_v4, 5  ;;  %v4771_v4 = vshrl.u32 %v4254_v53, 16  ;;  %v4797_v9 = vrot.slane %v4795_v35, 4  ;;  %v4260_v37 = vld [vmem:[#allocation2 + $0x12c] sm:$0xf] }
 0x33f   : > { %v4735_v18 = vsel %vm10120_vm7, %v4730_v38, %v4734_v58  ;;  %v4711_v38 = vsel %vm10120_vm7, %v4706_v3, %v12555_v40  ;;  %v4800_v58 = vrot.slane %v4798_v46, 5  ;;  %v4740_v63 = vrot.slane %v4739_v26, 4 }
 0x340   : > { %v2961_v32 = vpop.permute.xlu0 %2960  ;;  %5120 = vrot.lane.b32.xlu1 %v4673_v44, %s9919_s23  ;;  %v4753_v29 = vor.u32 %v4752_v15, %v4749_v39  ;;  %v12593_v39 = vrot.slane %v4780_v20, 5  ;;  %v4828_v3 = vshll.u32 %v4261_v47, 16 }
 0x341   : > { %5122 = vrot.lane.b32.xlu2 %v4687_v51, %s9919_s23  ;;  %3111 = vst.msk [vmem:[#allocation3 + $0x150] sm:$0xf] %vm3068_vm3, %v2961_v32  ;;  %v4784_v51 = vshrl.u32 %v4255_v36, 16  ;;  %v4774_v32 = vshll.u32 %v4254_v53, 16  ;;  %v4744_v53 = vrot.slane %v4742_v10, 5  ;;  %v4801_v46 = vor.u32 %v4800_v58, %v4797_v9 }
 0x342   : > { %v4020_v27 = vpop.permute.xlu1 %4019  ;;  %v4754_v62 = vrot.slane %v4753_v29, 4  ;;  %v1927_v10 = vld [vmem:[#allocation2 + $0x12c] sm:$0xf]  ;;  %v12609_v58 = vrot.slane %v4828_v3, 5 }
 0x343   : > { %v2965_v49 = vpop.permute.xlu2 %2964  ;;  %4171 = vst.msk [vmem:[#allocation3 + $0x148] sm:$0xf] %vm4129_vm6, %v4020_v27  ;;  %v4258_v27 = vld [vmem:[#allocation2 + $0x124] sm:$0xf]  ;;  %v4786_v15 = vrot.slane %v4784_v51, 4  ;;  %v4776_v40 = vrot.slane %v4774_v32, 5 }
 0x344   : > { %3113 = vst.msk [vmem:[#allocation3 + $0x160] sm:$0xf] %vm3068_vm3, %v2965_v49  ;;  %v4768_v49 = vrot.slane %v4766_v2, 5  ;;  %v4832_v2 = vshrl.u32 %v4261_v47, 16  ;;  %v4804_v26 = vshll.u32 %v4258_v27, 16  ;;  %v4808_v20 = vshrl.u32 %v4258_v27, 16 }
 0x345   : > { %v4787_v51 = vor.u32 %v4786_v15, %v12593_v39  ;;  %v4759_v32 = vsel %vm10120_vm7, %v4754_v62, %v12574_v60  ;;  %v4819_v47 = vshrl.u32 %v4260_v37, 16  ;;  %1991 = vst.msk [vmem:[#allocation3 + $0x170] sm:$0xf] %vm712_vm2, %v1927_v10  ;;  %v4802_v60 = vrot.slane %v4801_v46, 4  ;;  %v4270_v15 = vld [vmem:[#allocation2 + $0x154] sm:$0xf] }
 0x346   : > { %5130 = vrot.lane.b32.xlu0 %v4735_v18, %s9919_s23  ;;  %v4256_v18 = vld [vmem:[#allocation2 + $0x11c] sm:$0x1]  ;;  %v4769_v35 = vsel %vm10120_vm7, %v4764_v21, %v4768_v49  ;;  %v4822_v21 = vshll.u32 %v4260_v37, 16  ;;  %v4745_v49 = vsel %vm10120_vm7, %v4740_v63, %v4744_v53  ;;  %v4834_v27 = vrot.slane %v4832_v2, 4 }
 0x347   : > { %v4790_v29 = vshll.u32 %v4256_v18, 16  ;;  %v4788_v62 = vrot.slane %v4787_v51, 4  ;;  %v4806_v10 = vrot.slane %v4804_v26, 5  ;;  %v4821_v53 = vrot.slane %v4819_v47, 4 }
 0x348   : > { %v12584_v44 = vpop.permute.xlu0 %4023  ;;  %5126 = vrot.lane.b32.xlu1 %v4711_v38, %s9919_s23  ;;  %v4262_v38 = vld [vmem:[#allocation2 + $0x134] sm:$0x1]  ;;  %v4810_v3 = vrot.slane %v4808_v20, 4  ;;  %v4900_v46 = vshll.u32 %v4270_v15, 16 }
 0x349   : > { %5128 = vrot.lane.b32.xlu2 %v4721_v13, %s9919_s23  ;;  %v4773_v13 = vrot.slane %v4771_v4, 4  ;;  %v1929_v4 = vld [vmem:[#allocation2 + $0x138] sm:$0xf]  ;;  %v4792_v18 = vrot.slane %v4790_v29, 5  ;;  %v4838_v37 = vshll.u32 %v4262_v38, 16 }
 0x34a   : > { %v3637_v36 = vpop.permute.xlu1 %3636  ;;  %1993 = vst.msk [vmem:[#allocation3 + $0x180] sm:$0xf] %vm712_vm2, %v1929_v4  ;;  %v4835_v4 = vor.u32 %v4834_v27, %v12609_v58  ;;  %v4263_v29 = vld [vmem:[#allocation2 + $0x138] sm:$0xf] }
 0x34b   : > { %v12591_v48 = vpop.permute.xlu2 %4027  ;;  %3787 = vst.msk [vmem:[#allocation3 + $0x150] sm:$0xf] %vm3744_vm5, %v3637_v36  ;;  %v4777_v9 = vor.u32 %v4776_v40, %v4773_v13  ;;  %v4824_v13 = vrot.slane %v4822_v21, 5  ;;  %v4259_v40 = vld [vmem:[#allocation2 + $0x128] sm:$0x1]  ;;  %v4793_v20 = vsel %vm10120_vm7, %v4788_v62, %v4792_v18  ;;  %v4840_v38 = vrot.slane %v4838_v37, 5 }
 0x34c   : > { %4172 = vst.msk [vmem:[#allocation3 + $0x150] sm:$0xf] %vm4129_vm6, %v12553_v25  ;;  %v4814_v47 = vshll.u32 %v4259_v40, 16  ;;  %v4904_v21 = vshrl.u32 %v4270_v15, 16  ;;  %v4269_v18 = vld [vmem:[#allocation2 + $0x150] sm:$0xf] }
 0x34d   : > { %v4778_v2 = vrot.slane %v4777_v9, 4  ;;  %v4811_v9 = vor.u32 %v4810_v3, %v4806_v10  ;;  %v1931_v37 = vld [vmem:[#allocation2 + $0x144] sm:$0xf] }
 0x34e   : > { %5136 = vrot.lane.b32.xlu0 %v4769_v35, %s9919_s23  ;;  %v4266_v35 = vld [vmem:[#allocation2 + $0x144] sm:$0xf]  ;;  %1995 = vst.msk [vmem:[#allocation3 + $0x190] sm:$0xf] %vm712_vm2, %v1931_v37 }
 0x34f   : > { %v4867_v51 = vshrl.u32 %v4266_v35, 16  ;;  %v4870_v26 = vshll.u32 %v4266_v35, 16  ;;  %v4836_v35 = vrot.slane %v4835_v4, 4  ;;  %v4812_v3 = vrot.slane %v4811_v9, 4 }
 0x350   : > { %v3641_v25 = vpop.permute.xlu0 %3640  ;;  %5132 = vrot.lane.b32.xlu1 %v4745_v49, %s9919_s23  ;;  %v4825_v49 = vor.u32 %v4824_v13, %v4821_v53  ;;  %v4816_v53 = vrot.slane %v4814_v47, 5  ;;  %v4267_v13 = vld [vmem:[#allocation2 + $0x148] sm:$0xf]  ;;  %v12642_v47 = vrot.slane %v4900_v46, 5  ;;  %v4891_v9 = vshrl.u32 %v4269_v18, 16 }
 0x351   : > { %5134 = vrot.lane.b32.xlu2 %v4759_v32, %s9919_s23  ;;  %3789 = vst.msk [vmem:[#allocation3 + $0x160] sm:$0xf] %vm3744_vm5, %v3641_v25  ;;  %v4264_v32 = vld [vmem:[#allocation2 + $0x13c] sm:$0xf]  ;;  %v4807_v25 = vsel %vm10120_vm7, %v4802_v60, %v4806_v10  ;;  %v4869_v62 = vrot.slane %v4867_v51, 4  ;;  %v4872_v15 = vrot.slane %v4870_v26, 5 }
 0x352   : > { %v2963_v63 = vpop.permute.xlu1 %2962  ;;  %v4852_v27 = vshll.u32 %v4264_v32, 16  ;;  %v4856_v60 = vshrl.u32 %v4264_v32, 16  ;;  %v4265_v32 = vld [vmem:[#allocation2 + $0x140] sm:$0x1]  ;;  %v4880_v46 = vshrl.u32 %v4267_v13, 16 }
 0x353   : > { %v12614_v36 = vpop.permute.xlu2 %3644  ;;  %3112 = vst.msk [vmem:[#allocation3 + $0x158] sm:$0xf] %vm3068_vm3, %v2963_v63 }
 0x354   : > { %3788 = vst.msk [vmem:[#allocation3 + $0x158] sm:$0xf] %vm3744_vm5, %v12537_v31  ;;  %v4783_v31 = vsel %vm10120_vm7, %v4778_v2, %v12593_v39  ;;  %v4826_v39 = vrot.slane %v4825_v49, 4  ;;  %v12635_v2 = vrot.slane %v4852_v27, 5  ;;  %v4858_v4 = vrot.slane %v4856_v60, 4 }
 0x355   : > { %4173 = vst.msk [vmem:[#allocation3 + $0x158] sm:$0xf] %vm4129_vm6, %v12584_v44  ;;  %v4846_v44 = vshll.u32 %v4263_v29, 16  ;;  %v4271_v49 = vld [vmem:[#allocation2 + $0x158] sm:$0x1]  ;;  %v4894_v27 = vshll.u32 %v4269_v18, 16 }
 0x356   : > { %5142 = vrot.lane.b32.xlu0 %v4807_v25, %s9919_s23  ;;  %v4843_v25 = vshrl.u32 %v4263_v29, 16  ;;  %v4841_v29 = vsel %vm10120_vm7, %v4836_v35, %v4840_v38  ;;  %v4831_v60 = vsel %vm10120_vm7, %v4826_v39, %v12609_v58  ;;  %v4862_v38 = vshll.u32 %v4265_v32, 16  ;;  %v4273_v35 = vld [vmem:[#allocation2 + $0x160] sm:$0xf] }
 0x357   : > { %v4848_v26 = vrot.slane %v4846_v44, 5  ;;  %v4910_v18 = vshll.u32 %v4271_v49, 16  ;;  %v4924_v39 = vshll.u32 %v4273_v35, 16 }
 0x358   : > { %v2967_v63 = vpop.permute.xlu0 %2966  ;;  %5138 = vrot.lane.b32.xlu1 %v4783_v31, %s9919_s23  ;;  %v4845_v51 = vrot.slane %v4843_v25, 4  ;;  %v4876_v31 = vshll.u32 %v4267_v13, 16  ;;  %v4859_v25 = vor.u32 %v4858_v4, %v12635_v2  ;;  %v4928_v4 = vshrl.u32 %v4273_v35, 16 }
 0x359   : > { %5140 = vrot.lane.b32.xlu2 %v4793_v20, %s9919_s23  ;;  %3114 = vst.msk [vmem:[#allocation3 + $0x168] sm:$0xf] %vm3068_vm3, %v2967_v63  ;;  %v4873_v20 = vor.u32 %v4872_v15, %v4869_v62  ;;  %v4906_v63 = vrot.slane %v4904_v21, 4  ;;  %v4275_v62 = vld [vmem:[#allocation2 + $0x168] sm:$0xf]  ;;  %v4864_v13 = vrot.slane %v4862_v38, 5 }
 0x35a   : > { %v3643_v40 = vpop.permute.xlu1 %3642  ;;  %v4849_v21 = vor.u32 %v4848_v26, %v4845_v51  ;;  %v4878_v32 = vrot.slane %v4876_v31, 5  ;;  %v4272_v51 = vld [vmem:[#allocation2 + $0x15c] sm:$0xf]  ;;  %v1932_v38 = vld [vmem:[#allocation2 + $0x148] sm:$0xf] }
 0x35b   : > { %v2971_v10 = vpop.permute.xlu2 %2970  ;;  %3790 = vst.msk [vmem:[#allocation3 + $0x168] sm:$0xf] %vm3744_vm5, %v3643_v40  ;;  %v4874_v15 = vrot.slane %v4873_v20, 4  ;;  %v4907_v58 = vor.u32 %v4906_v63, %v12642_v47  ;;  %v4896_v40 = vrot.slane %v4894_v27, 5  ;;  %v4942_v20 = vshll.u32 %v4275_v62, 16 }
 0x35c   : > { %3116 = vst.msk [vmem:[#allocation3 + $0x178] sm:$0xf] %vm3068_vm3, %v2971_v10  ;;  %v4893_v10 = vrot.slane %v4891_v9, 4  ;;  %v4850_v26 = vrot.slane %v4849_v21, 4  ;;  %v4268_v9 = vld [vmem:[#allocation2 + $0x14c] sm:$0x1] }
 0x35d   : > { %4175 = vst.msk [vmem:[#allocation3 + $0x168] sm:$0xf] %vm4129_vm6, %v12591_v48  ;;  %v4817_v48 = vsel %vm10120_vm7, %v4812_v3, %v4816_v53  ;;  %v4860_v53 = vrot.slane %v4859_v25, 4  ;;  %v4939_v3 = vshrl.u32 %v4275_v62, 16  ;;  %v4879_v63 = vsel %vm10120_vm7, %v4874_v15, %v4878_v32  ;;  %v1930_v25 = vld [vmem:[#allocation2 + $0x13c] sm:$0xf] }
 0x35e   : > { %5148 = vrot.lane.b32.xlu0 %v4841_v29, %s9919_s23  ;;  %v4908_v49 = vrot.slane %v4907_v58, 4  ;;  %v4897_v27 = vor.u32 %v4896_v40, %v4893_v10  ;;  %v4915_v31 = vshrl.u32 %v4272_v51, 16  ;;  %v4918_v35 = vshll.u32 %v4272_v51, 16  ;;  %1994 = vst.msk [vmem:[#allocation3 + $0x188] sm:$0xf] %vm712_vm2, %v1930_v25 }
 0x35f   : > { %v12663_v21 = vrot.slane %v4924_v39, 5  ;;  %v4855_v15 = vsel %vm10120_vm7, %v4850_v26, %v12635_v2  ;;  %v4944_v10 = vrot.slane %v4942_v20, 5  ;;  %v4274_v40 = vld [vmem:[#allocation2 + $0x164] sm:$0x1]  ;;  %1996 = vst.msk [vmem:[#allocation3 + $0x198] sm:$0xf] %vm712_vm2, %v1932_v38 }
 0x360   : > { %v3647_v44 = vpop.permute.xlu0 %3646  ;;  %5144 = vrot.lane.b32.xlu1 %v4817_v48, %s9919_s23  ;;  %v4865_v48 = vsel %vm10120_vm7, %v4860_v53, %v4864_v13  ;;  %v4276_v53 = vld [vmem:[#allocation2 + $0x16c] sm:$0xf]  ;;  %v4279_v13 = vld [vmem:[#allocation2 + $0x178] sm:$0xf]  ;;  %v4898_v51 = vrot.slane %v4897_v27, 4  ;;  %v4917_v25 = vrot.slane %v4915_v31, 4 }
 0x361   : > { %5146 = vrot.lane.b32.xlu2 %v4831_v60, %s9919_s23  ;;  %3792 = vst.msk [vmem:[#allocation3 + $0x178] sm:$0xf] %vm3744_vm5, %v3647_v44  ;;  %v4882_v60 = vrot.slane %v4880_v46, 4  ;;  %v4912_v44 = vrot.slane %v4910_v18, 5  ;;  %v4930_v46 = vrot.slane %v4928_v4, 4  ;;  %v4886_v18 = vshll.u32 %v4268_v9, 16 }
 0x362   : > { %v4026_v29 = vpop.permute.xlu1 %4025  ;;  %v4920_v2 = vrot.slane %v4918_v35, 5  ;;  %v4948_v38 = vshll.u32 %v4276_v53, 16  ;;  %v4903_v35 = vsel %vm10120_vm7, %v4898_v51, %v12642_v47 }
 0x363   : > { %v12655_v37 = vpop.permute.xlu2 %3650  ;;  %4174 = vst.msk [vmem:[#allocation3 + $0x160] sm:$0xf] %vm4129_vm6, %v4026_v29  ;;  %v4941_v29 = vrot.slane %v4939_v3, 4  ;;  %v4883_v58 = vor.u32 %v4882_v60, %v4878_v32  ;;  %v4913_v4 = vsel %vm10120_vm7, %v4908_v49, %v4912_v44  ;;  %v4278_v32 = vld [vmem:[#allocation2 + $0x174] sm:$0xf]  ;;  %v4888_v60 = vrot.slane %v4886_v18, 5 }
 0x364   : > { %v4931_v9 = vor.u32 %v4930_v46, %v12663_v21  ;;  %v4952_v49 = vshrl.u32 %v4276_v53, 16  ;;  %v4972_v44 = vshll.u32 %v4279_v13, 16  ;;  %v4963_v27 = vshrl.u32 %v4278_v32, 16 }
 0x365   : > { %v4884_v26 = vrot.slane %v4883_v58, 4  ;;  %v4945_v20 = vor.u32 %v4944_v10, %v4941_v29  ;;  %v4966_v31 = vshll.u32 %v4278_v32, 16  ;;  %v4921_v29 = vor.u32 %v4920_v2, %v4917_v25  ;;  %v4277_v10 = vld [vmem:[#allocation2 + $0x170] sm:$0x1]  ;;  %v4284_v25 = vld [vmem:[#allocation2 + $0x18c] sm:$0xf] }
 0x366   : > { %5154 = vrot.lane.b32.xlu0 %v4879_v63, %s9919_s23  ;;  %v4934_v63 = vshll.u32 %v4274_v40, 16  ;;  %v4932_v58 = vrot.slane %v4931_v9, 4  ;;  %v12690_v40 = vrot.slane %v4972_v44, 5  ;;  %v4954_v47 = vrot.slane %v4952_v49, 4 }
 0x367   : > { %v4946_v46 = vrot.slane %v4945_v20, 4  ;;  %v4968_v51 = vrot.slane %v4966_v31, 5  ;;  %v4922_v32 = vrot.slane %v4921_v29, 4  ;;  %v4281_v20 = vld [vmem:[#allocation2 + $0x180] sm:$0xf]  ;;  %v5011_v49 = vshrl.u32 %v4284_v25, 16 }
 0x368   : > { %v4030_v62 = vpop.permute.xlu0 %4029  ;;  %5150 = vrot.lane.b32.xlu1 %v4855_v15, %s9919_s23  ;;  %v4936_v18 = vrot.slane %v4934_v63, 5  ;;  %v4958_v63 = vshll.u32 %v4277_v10, 16  ;;  %v5014_v44 = vshll.u32 %v4284_v25, 16  ;;  %v4288_v25 = vld [vmem:[#allocation2 + $0x19c] sm:$0xf] }
 0x369   : > { %5152 = vrot.lane.b32.xlu2 %v4865_v48, %s9919_s23  ;;  %v4976_v48 = vshrl.u32 %v4279_v13, 16  ;;  %v4280_v13 = vld [vmem:[#allocation2 + $0x17c] sm:$0x1]  ;;  %v4927_v10 = vsel %vm10120_vm7, %v4922_v32, %v12663_v21  ;;  %v4285_v21 = vld [vmem:[#allocation2 + $0x190] sm:$0xf] }
 0x36a   : > { %v2969_v3 = vpop.permute.xlu1 %2968  ;;  %v4287_v32 = vld [vmem:[#allocation2 + $0x198] sm:$0xf] }
 0x36b   : > { %v12672_v39 = vpop.permute.xlu2 %4033  ;;  %3115 = vst.msk [vmem:[#allocation3 + $0x170] sm:$0xf] %vm3068_vm3, %v2969_v3  ;;  %v4965_v3 = vrot.slane %v4963_v27, 4 }
 0x36c   : > { %3791 = vst.msk [vmem:[#allocation3 + $0x170] sm:$0xf] %vm3744_vm5, %v12614_v36  ;;  %v4889_v36 = vsel %vm10120_vm7, %v4884_v26, %v4888_v60  ;;  %v4282_v60 = vld [vmem:[#allocation2 + $0x184] sm:$0xf] }
 0x36d   : > { %4176 = vst.msk [vmem:[#allocation3 + $0x170] sm:$0xf] %vm4129_vm6, %v4030_v62  ;;  %v4950_v62 = vrot.slane %v4948_v38, 5  ;;  %v4982_v38 = vshll.u32 %v4280_v13, 16  ;;  %v4969_v27 = vor.u32 %v4968_v51, %v4965_v3  ;;  %v5000_v29 = vshrl.u32 %v4282_v60, 16 }
 0x36e   : > { %5160 = vrot.lane.b32.xlu0 %v4913_v4, %s9919_s23  ;;  %v4978_v4 = vrot.slane %v4976_v48, 4  ;;  %v4937_v48 = vsel %vm10120_vm7, %v4932_v58, %v4936_v18  ;;  %v5013_v58 = vrot.slane %v5011_v49, 4  ;;  %v5016_v18 = vrot.slane %v5014_v44, 5  ;;  %v4283_v51 = vld [vmem:[#allocation2 + $0x188] sm:$0x1] }
 0x36f   : > { %v4951_v26 = vsel %vm10120_vm7, %v4946_v46, %v4950_v62  ;;  %v4955_v31 = vor.u32 %v4954_v47, %v4950_v62  ;;  %v4984_v13 = vrot.slane %v4982_v38, 5  ;;  %v4970_v47 = vrot.slane %v4969_v27, 4 }
 0x370   : > { %v2973_v15 = vpop.permute.xlu0 %2972  ;;  %5156 = vrot.lane.b32.xlu1 %v4889_v36, %s9919_s23  ;;  %v4979_v9 = vor.u32 %v4978_v4, %v12690_v40  ;;  %v4990_v36 = vshll.u32 %v4281_v20, 16  ;;  %v4960_v4 = vrot.slane %v4958_v63, 5  ;;  %v5044_v38 = vshll.u32 %v4288_v25, 16 }
 0x371   : > { %5158 = vrot.lane.b32.xlu2 %v4903_v35, %s9919_s23  ;;  %3117 = vst.msk [vmem:[#allocation3 + $0x180] sm:$0xf] %vm3068_vm3, %v2973_v15  ;;  %v4996_v35 = vshll.u32 %v4282_v60, 16  ;;  %v4987_v15 = vshrl.u32 %v4281_v20, 16  ;;  %v4956_v3 = vrot.slane %v4955_v31, 4  ;;  %v5002_v60 = vrot.slane %v5000_v29, 4 }
 0x372   : > { %v4032_v2 = vpop.permute.xlu1 %4031  ;;  %v5048_v49 = vshrl.u32 %v4288_v25, 16  ;;  %v4975_v44 = vsel %vm10120_vm7, %v4970_v47, %v12690_v40  ;;  %v5006_v27 = vshll.u32 %v4283_v51, 16  ;;  %v5020_v31 = vshll.u32 %v4285_v21, 16  ;;  %v4289_v47 = vld [vmem:[#allocation2 + $0x1a0] sm:$0x1] }
 0x373   : > { %v5099_v53 = vpop.permute.xlu2 %5098  ;;  %4177 = vst.msk [vmem:[#allocation3 + $0x178] sm:$0xf] %vm4129_vm6, %v4032_v2  ;;  %v4989_v20 = vrot.slane %v4987_v15, 4  ;;  %v5035_v29 = vshrl.u32 %v4287_v32, 16  ;;  %v5038_v15 = vshll.u32 %v4287_v32, 16 }
 0x374   : > { %5271 = vst.msk [vmem:[#allocation3 + $0xa0] sm:$0xf] %vm5250_vm8, %v5099_v53  ;;  %v4980_v53 = vrot.slane %v4979_v9, 4  ;;  %v5017_v9 = vor.u32 %v5016_v18, %v5013_v58  ;;  %v5046_v58 = vrot.slane %v5044_v38, 5  ;;  %v5050_v40 = vrot.slane %v5048_v49, 4 }
 0x375   : > { %v5022_v51 = vrot.slane %v5020_v31, 5  ;;  %v4286_v32 = vld [vmem:[#allocation2 + $0x194] sm:$0x1]  ;;  %v7574_v38 = vld [vmem:[#allocation2 + $0x16c] sm:$0xf] }
 0x376   : > { %5166 = vrot.lane.b32.xlu0 %v4951_v26, %s9919_s23  ;;  %v4998_v26 = vrot.slane %v4996_v35, 5  ;;  %v4985_v63 = vsel %vm10120_vm7, %v4980_v53, %v4984_v13  ;;  %v5018_v13 = vrot.slane %v5017_v9, 4 }
 0x378   : > { %v12700_v46 = vpop.permute.xlu0 %4035  ;;  %5162 = vrot.lane.b32.xlu1 %v4927_v10, %s9919_s23  ;;  %v5003_v35 = vor.u32 %v5002_v60, %v4998_v26  ;;  %v5024_v10 = vshrl.u32 %v4285_v21, 16  ;;  %v5054_v21 = vshll.u32 %v4289_v47, 16 }
 0x379   : > { %5164 = vrot.lane.b32.xlu2 %v4937_v48, %s9919_s23  ;;  %v4992_v48 = vrot.slane %v4990_v36, 5 }
 0x37a   : > { %v3649_v2 = vpop.permute.xlu1 %3648 }
 0x37b   : > { %v2977_v62 = vpop.permute.xlu2 %2976  ;;  %3793 = vst.msk [vmem:[#allocation3 + $0x180] sm:$0xf] %vm3744_vm5, %v3649_v2  ;;  %v4993_v53 = vor.u32 %v4992_v48, %v4989_v20  ;;  %v5040_v2 = vrot.slane %v5038_v15, 5  ;;  %v5026_v20 = vrot.slane %v5024_v10, 4  ;;  %v5023_v48 = vsel %vm10120_vm7, %v5018_v13, %v5022_v51  ;;  %v7573_v13 = vld [vmem:[#allocation2 + $0x168] sm:$0xe] }
 0x37c   : > { %3119 = vst.msk [vmem:[#allocation3 + $0x190] sm:$0xf] %vm3068_vm3, %v2977_v62  ;;  %v5008_v62 = vrot.slane %v5006_v27, 5  ;;  %v5030_v27 = vshll.u32 %v4286_v32, 16  ;;  %v5322_v32 = vld [vmem:[#allocation2 + $0x28] sm:$0xf] }
 0x37d   : > { %4178 = vst.msk [vmem:[#allocation3 + $0x180] sm:$0xf] %vm4129_vm6, %v12672_v39  ;;  %v4961_v39 = vsel %vm10120_vm7, %v4956_v3, %v4960_v4  ;;  %v5004_v4 = vrot.slane %v5003_v35, 4  ;;  %v5037_v3 = vrot.slane %v5035_v29, 4  ;;  %v4994_v60 = vrot.slane %v4993_v53, 4 }
 0x37e   : > { %5172 = vrot.lane.b32.xlu0 %v4985_v63, %s9919_s23  ;;  %v5056_v35 = vrot.slane %v5054_v21, 5  ;;  %v7871_v29 = vrot.slane %v7574_v38, 5  ;;  %v5032_v53 = vrot.slane %v5030_v27, 5  ;;  %v5315_v38 = vld [vmem:[#allocation2 + $0xc] sm:$0xe]  ;;  %v5523_v27 = vrot.slane %v5322_v32, 5 }
 0x37f   : > { %v5009_v63 = vsel %vm10120_vm7, %v5004_v4, %v5008_v62  ;;  %v5041_v9 = vor.u32 %v5040_v2, %v5037_v3  ;;  %v5319_v62 = vld [vmem:[#allocation2 + $0x1c] sm:$0xf] }
 0x380   : > { %v3653_v36 = vpop.permute.xlu0 %3652  ;;  %5168 = vrot.lane.b32.xlu1 %v4961_v39, %s9919_s23  ;;  %v5316_v39 = vld [vmem:[#allocation2 + $0x10] sm:$0xf]  ;;  %v7873_v4 = vrot.slane %v7871_v29, 4  ;;  %v6375_v32 = vld [vmem:[#allocation2 + $0x1c] sm:$0xf] }
 0x381   : > { %5170 = vrot.lane.b32.xlu2 %v4975_v44, %s9919_s23  ;;  %3795 = vst.msk [vmem:[#allocation3 + $0x190] sm:$0xf] %vm3744_vm5, %v3653_v36  ;;  %v4999_v44 = vsel %vm10120_vm7, %v4994_v60, %v4998_v26  ;;  %v5042_v36 = vrot.slane %v5041_v9, 4  ;;  %v5509_v47 = vrot.slane %v5316_v39, 5 }
 0x382   : > { %4180 = vst.msk [vmem:[#allocation3 + $0x190] sm:$0xf] %vm4129_vm6, %v10717_v19  ;;  %v2975_v25 = vpop.permute.xlu1 %2974  ;;  %v5051_v19 = vor.u32 %v5050_v40, %v5046_v58  ;;  %v7575_v40 = vld [vmem:[#allocation2 + $0x170] sm:$0x1] }
 0x383   : > { %v5105_v18 = vpop.permute.xlu2 %5104  ;;  %3118 = vst.msk [vmem:[#allocation3 + $0x188] sm:$0xf] %vm3068_vm3, %v2975_v25  ;;  %v9272_v25 = vrot.slane %v7573_v13, 9  ;;  %v7874_v3 = vrot.slane %v7575_v40, 5  ;;  %v5511_v9 = vrot.slane %v5509_v47, 4 }
 0x384   : > { %5274 = vst.msk [vmem:[#allocation3 + $0xb8] sm:$0xf] %vm5250_vm8, %v5105_v18  ;;  %v5052_v31 = vrot.slane %v5051_v19, 4  ;;  %v5318_v18 = vld [vmem:[#allocation2 + $0x18] sm:$0xe] }
 0x385   : > { %3794 = vst.msk [vmem:[#allocation3 + $0x188] sm:$0xf] %vm3744_vm5, %v12655_v37  ;;  %v5027_v37 = vor.u32 %v5026_v20, %v5022_v51  ;;  %v5047_v51 = vsel %vm10120_vm7, %v5042_v36, %v5046_v58  ;;  %v9215_v20 = vrot.slane %v5318_v18, 9  ;;  %v7872_v19 = vsel %vm10152_vm12, %v9272_v25, %v7871_v29  ;;  %v5317_v58 = vld [vmem:[#allocation2 + $0x14] sm:$0x1] }
 0x386   : > { %5178 = vrot.lane.b32.xlu0 %v5023_v48, %s9919_s23  ;;  %4179 = vst.msk [vmem:[#allocation3 + $0x188] sm:$0xf] %vm4129_vm6, %v12700_v46  ;;  %v5057_v26 = vsel %vm10120_vm7, %v5052_v31, %v5056_v35  ;;  %v5516_v48 = vrot.slane %v5319_v62, 5  ;;  %v9214_v31 = vrot.slane %v5315_v38, 9  ;;  %v5323_v35 = vld [vmem:[#allocation2 + $0x2c] sm:$0x1] }
 0x387   : > { %v5028_v10 = vrot.slane %v5027_v37, 4  ;;  %8027 = vst.msk [vmem:[#allocation3 + $0x1a4] sm:$0xf] %vm712_vm2, %v7872_v19  ;;  %v5512_v37 = vrot.slane %v5317_v58, 5  ;;  %v5321_v36 = vld [vmem:[#allocation2 + $0x24] sm:$0xe] }
 0x388   : > { %v2979_v49 = vpop.permute.xlu0 %2978  ;;  %5174 = vrot.lane.b32.xlu1 %v4999_v44, %s9919_s23  ;;  %v5517_v44 = vsel %vm10152_vm12, %v9215_v20, %v5516_v48  ;;  %v5526_v39 = vrot.slane %v5323_v35, 5  ;;  %v9216_v13 = vrot.slane %v5321_v36, 9  ;;  %v5518_v40 = vrot.slane %v5516_v48, 4  ;;  %v5325_v62 = vld [vmem:[#allocation2 + $0x34] sm:$0xf] }
 0x389   : > { %5176 = vrot.lane.b32.xlu2 %v5009_v63, %s9919_s23  ;;  %3120 = vst.msk [vmem:[#allocation3 + $0x198] sm:$0xf] %vm3068_vm3, %v2979_v49  ;;  %v5033_v60 = vsel %vm10120_vm7, %v5028_v10, %v5032_v53  ;;  %v7875_v49 = vsel %vm10152_vm12, %v7873_v4, %v7874_v3  ;;  %v5320_v10 = vld [vmem:[#allocation2 + $0x20] sm:$0x1]  ;;  %v5530_v3 = vrot.slane %v5325_v62, 5 }
 0x38a   : > { %v5097_v15 = vpop.permute.xlu1 %5096  ;;  %8028 = vst.msk [vmem:[#allocation3 + $0x1ac] sm:$0xf] %vm712_vm2, %v7875_v49  ;;  %v5519_v18 = vrot.slane %v5320_v10, 5  ;;  %v5328_v25 = vld [vmem:[#allocation2 + $0x40] sm:$0xf]  ;;  %v5524_v4 = vsel %vm10152_vm12, %v9216_v13, %v5523_v27 }
 0x38b   : > { %v5111_v46 = vpop.permute.xlu2 %5110  ;;  %5270 = vst.msk [vmem:[#allocation3 + $0x98] sm:$0xf] %vm5250_vm8, %v5097_v15  ;;  %v5510_v15 = vsel %vm10152_vm12, %v9214_v31, %v5509_v47  ;;  %v5326_v20 = vld [vmem:[#allocation2 + $0x38] sm:$0x1]  ;;  %v5537_v19 = vrot.slane %v5328_v25, 5  ;;  %v6484_v31 = vshrl.u32 %v6375_v32, 16 }
 0x38c   : > { %5277 = vst.msk [vmem:[#allocation3 + $0xd0] sm:$0xf] %vm5250_vm8, %v5111_v46  ;;  %v5513_v46 = vsel %vm10152_vm12, %v5511_v9, %v5512_v37  ;;  %v5532_v9 = vrot.slane %v5530_v3, 4  ;;  %v5533_v38 = vrot.slane %v5326_v20, 5  ;;  %v6374_v49 = vld [vmem:[#allocation2 + $0x18] sm:$0xf] }
 0x38d   : > { %v6471_v35 = vshrl.u32 %v6374_v49, 16  ;;  %v5329_v10 = vld [vmem:[#allocation2 + $0x44] sm:$0x1] }
 0x38e   : > { %5184 = vrot.lane.b32.xlu0 %v5057_v26, %s9919_s23 }
 0x390   : > { %v5101_v2 = vpop.permute.xlu0 %5100  ;;  %5180 = vrot.lane.b32.xlu1 %v5033_v60, %s9919_s23  ;;  %v5520_v60 = vsel %vm10152_vm12, %v5518_v40, %v5519_v18  ;;  %v6376_v40 = vld [vmem:[#allocation2 + $0x20] sm:$0x1]  ;;  %v6473_v18 = vrot.slane %v6471_v35, 4 }
 0x391   : > { %5182 = vrot.lane.b32.xlu2 %v5047_v51, %s9919_s23  ;;  %5272 = vst.msk [vmem:[#allocation3 + $0xa8] sm:$0xf] %vm5250_vm8, %v5101_v2  ;;  %v5327_v51 = vld [vmem:[#allocation2 + $0x3c] sm:$0xe]  ;;  %v6490_v20 = vshll.u32 %v6376_v40, 16  ;;  %s13217_s23 = scalar_lea.vmem [#allocation9], %s9139_s9 }
 0x392   : > { %v3655_v63 = vpop.permute.xlu1 %3654  ;;  %v9218_v48 = vrot.slane %v5327_v51, 9  ;;  %v5990_v40 = vld [vmem:[#allocation2 + $0x1c] sm:$0xf]  ;;  %s9044_s6 = sshll.u32 %s13217_s23, 4  ;;  %s9858_s9 = scalar_lea.hbm %s13888_s5, 1024  ;;  %s9045_s6 = int_to_ptr.vmem [resolvable:$true] %s9044_s6 }
 0x393   : > { %v5117_v21 = vpop.permute.xlu2 %5116  ;;  %3796 = vst.msk [vmem:[#allocation3 + $0x198] sm:$0xf] %vm3744_vm5, %v3655_v63 }
 0x394   : > { %5280 = vst.msk [vmem:[#allocation3 + $0xe8] sm:$0xf] %vm5250_vm8, %v5117_v21  ;;  %v5324_v21 = vld [vmem:[#allocation2 + $0x30] sm:$0xe]  ;;  %v5538_v37 = vsel %vm10152_vm12, %v9218_v48, %v5537_v19  ;;  %v7577_v48 = vld [vmem:[#allocation2 + $0x178] sm:$0xf] }
 0x395   : > { %4181 = vst.msk [vmem:[#allocation3 + $0x198] sm:$0xf] %vm4129_vm6, %v10656_v59  ;;  %v5525_v59 = vrot.slane %v5523_v27, 4  ;;  %v6480_v27 = vshll.u32 %v6375_v32, 16 }
 0x396   : > { %5735 = vrot.lane.b32.xlu0 %v5517_v44, %s9920_s24  ;;  %v9217_v44 = vrot.slane %v5324_v21, 9 }
 0x397   : > { %v5527_v47 = vsel %vm10152_vm12, %v5525_v59, %v5526_v39  ;;  %v5330_v59 = vld [vmem:[#allocation2 + $0x48] sm:$0xe]  ;;  %v12794_v39 = vld [vmem:[#allocation2 + $0x4c] sm:$0xf] }
 0x398   : > { %v5107_v29 = vpop.permute.xlu0 %5106  ;;  %5731 = vrot.lane.b32.xlu1 %v5510_v15, %s9920_s24  ;;  %v5531_v36 = vsel %vm10152_vm12, %v9217_v44, %v5530_v3  ;;  %v5544_v51 = vrot.slane %v12794_v39, 5  ;;  %v5540_v3 = vrot.slane %v5329_v10, 5  ;;  %v6378_v44 = vld [vmem:[#allocation2 + $0x28] sm:$0xf]  ;;  %v7578_v10 = vld [vmem:[#allocation2 + $0x17c] sm:$0x1] }
 0x399   : > { %5733 = vrot.lane.b32.xlu2 %v5513_v46, %s9920_s24  ;;  %5275 = vst.msk [vmem:[#allocation3 + $0xc0] sm:$0xf] %vm5250_vm8, %v5107_v29  ;;  %v5534_v46 = vsel %vm10152_vm12, %v5532_v9, %v5533_v38  ;;  %v6474_v29 = vshll.u32 %v6374_v49, 16  ;;  %v6492_v9 = vrot.slane %v6490_v20, 5  ;;  %v7878_v38 = vrot.slane %v7577_v48, 5 }
 0x39a   : > { %v5103_v26 = vpop.permute.xlu1 %5102  ;;  %v6379_v48 = vld [vmem:[#allocation2 + $0x2c] sm:$0x1] }
 0x39b   : > { %v5123_v53 = vpop.permute.xlu2 %5122  ;;  %5273 = vst.msk [vmem:[#allocation3 + $0xb0] sm:$0xf] %vm5250_vm8, %v5103_v26  ;;  %v6486_v26 = vrot.slane %v6484_v31, 4  ;;  %v6476_v25 = vrot.slane %v6474_v29, 5  ;;  %v6377_v31 = vld [vmem:[#allocation2 + $0x24] sm:$0xf] }
 0x39c   : > { %5283 = vst.msk [vmem:[#allocation3 + $0x100] sm:$0xf] %vm5250_vm8, %v5123_v53  ;;  %v6482_v53 = vrot.slane %v6480_v27, 5  ;;  %v6508_v29 = vshrl.u32 %v6378_v44, 16 }
 0x39e   : > { %5741 = vrot.lane.b32.xlu0 %v5527_v47, %s9920_s24  ;;  %v9219_v47 = vrot.slane %v5330_v59, 9  ;;  %v6498_v59 = vshll.u32 %v6377_v31, 16  ;;  %v6510_v20 = vrot.slane %v6508_v29, 4 }
 0x3a0   : > { %v5113_v2 = vpop.permute.xlu0 %5112  ;;  %5737 = vrot.lane.b32.xlu1 %v5520_v60, %s9920_s24  ;;  %v6487_v60 = vor.u32 %v6486_v26, %v6482_v53  ;;  %v5545_v21 = vsel %vm10152_vm12, %v9219_v47, %v5544_v51  ;;  %v5333_v47 = vld [vmem:[#allocation2 + $0x54] sm:$0xe] }
 0x3a1   : > { %5739 = vrot.lane.b32.xlu2 %v5524_v4, %s9920_s24  ;;  %5278 = vst.msk [vmem:[#allocation3 + $0xd8] sm:$0xf] %vm5250_vm8, %v5113_v2  ;;  %v5539_v4 = vrot.slane %v5537_v19, 4  ;;  %v5989_v2 = vld [vmem:[#allocation2 + $0x18] sm:$0xf] }
 0x3a2   : > { %v5109_v63 = vpop.permute.xlu1 %5108 }
 0x3a3   : > { %v5129_v58 = vpop.permute.xlu2 %5128  ;;  %5276 = vst.msk [vmem:[#allocation3 + $0xc8] sm:$0xf] %vm5250_vm8, %v5109_v63  ;;  %v5541_v19 = vsel %vm10152_vm12, %v5539_v4, %v5540_v3  ;;  %v6488_v63 = vrot.slane %v6487_v60, 4  ;;  %v7881_v3 = vrot.slane %v7578_v10, 5  ;;  %v6381_v10 = vld [vmem:[#allocation2 + $0x34] sm:$0xf] }
 0x3a4   : > { %5286 = vst.msk [vmem:[#allocation3 + $0x118] sm:$0xf] %vm5250_vm8, %v5129_v58  ;;  %v6477_v58 = vor.u32 %v6476_v25, %v6473_v18  ;;  %v7880_v18 = vrot.slane %v7878_v38, 4  ;;  %v12819_v25 = vld [vmem:[#allocation2 + $0x58] sm:$0xf] }
 0x3a5   : > { %v6493_v35 = vsel %vm10120_vm7, %v6488_v63, %v6492_v9  ;;  %v9220_v63 = vrot.slane %v5333_v47, 9  ;;  %v5551_v9 = vrot.slane %v12819_v25, 5 }
 0x3a6   : > { %5747 = vrot.lane.b32.xlu0 %v5538_v37, %s9920_s24  ;;  %v6478_v27 = vrot.slane %v6477_v58, 4  ;;  %v6500_v58 = vrot.slane %v6498_v59, 5 }
 0x3a8   : > { %v5119_v15 = vpop.permute.xlu0 %5118  ;;  %5743 = vrot.lane.b32.xlu1 %v5531_v36, %s9920_s24  ;;  %v6495_v36 = vshrl.u32 %v6377_v31, 16 }
 0x3a9   : > { %5745 = vrot.lane.b32.xlu2 %v5534_v46, %s9920_s24  ;;  %5281 = vst.msk [vmem:[#allocation3 + $0xf0] sm:$0xf] %vm5250_vm8, %v5119_v15  ;;  %v6504_v46 = vshll.u32 %v6378_v44, 16  ;;  %v7576_v15 = vld [vmem:[#allocation2 + $0x174] sm:$0xe] }
 0x3aa   : > { %v5115_v62 = vpop.permute.xlu1 %5114  ;;  %v9273_v26 = vrot.slane %v7576_v15, 9  ;;  %v5991_v44 = vld [vmem:[#allocation2 + $0x24] sm:$0xf] }
 0x3ab   : > { %v5135_v13 = vpop.permute.xlu2 %5134  ;;  %5279 = vst.msk [vmem:[#allocation3 + $0xe0] sm:$0xf] %vm5250_vm8, %v5115_v62  ;;  %v6506_v60 = vrot.slane %v6504_v46, 5 }
 0x3ac   : > { %5289 = vst.msk [vmem:[#allocation3 + $0x130] sm:$0xf] %vm5250_vm8, %v5135_v13  ;;  %v6483_v13 = vsel %vm10120_vm7, %v6478_v27, %v6482_v53  ;;  %v7879_v4 = vsel %vm10152_vm12, %v9273_v26, %v7878_v38  ;;  %v5546_v38 = vrot.slane %v5544_v51, 4  ;;  %v6514_v27 = vshll.u32 %v6379_v48, 16  ;;  %v6380_v26 = vld [vmem:[#allocation2 + $0x30] sm:$0xf] }
 0x3ad   : > { %8029 = vst.msk [vmem:[#allocation3 + $0x1b4] sm:$0xf] %vm712_vm2, %v7879_v4  ;;  %v6519_v47 = vshrl.u32 %v6380_v26, 16  ;;  %v6522_v25 = vshll.u32 %v6380_v26, 16 }
 0x3ae   : > { %6117 = vrot.lane.b32.xlu0 %v5989_v2, %s9921_s8  ;;  %v5332_v2 = vld [vmem:[#allocation2 + $0x50] sm:$0x1]  ;;  %v6516_v51 = vrot.slane %v6514_v27, 5  ;;  %v5336_v27 = vld [vmem:[#allocation2 + $0x60] sm:$0xe] }
 0x3b0   : > { %v5125_v32 = vpop.permute.xlu0 %5124  ;;  %5749 = vrot.lane.b32.xlu1 %v5541_v19, %s9920_s24 }
 0x3b1   : > { %5751 = vrot.lane.b32.xlu2 %v5545_v21, %s9920_s24  ;;  %5284 = vst.msk [vmem:[#allocation3 + $0x108] sm:$0xf] %vm5250_vm8, %v5125_v32  ;;  %v6497_v21 = vrot.slane %v6495_v36, 4  ;;  %v7882_v32 = vsel %vm10152_vm12, %v7880_v18, %v7881_v3  ;;  %v6528_v18 = vshll.u32 %v6381_v10, 16  ;;  %v5992_v3 = vld [vmem:[#allocation2 + $0x28] sm:$0xf] }
 0x3b2   : > { %v5121_v37 = vpop.permute.xlu1 %5120  ;;  %8030 = vst.msk [vmem:[#allocation3 + $0x1bc] sm:$0xf] %vm712_vm2, %v7882_v32  ;;  %v6524_v32 = vrot.slane %v6522_v25, 5 }
 0x3b3   : > { %v5141_v49 = vpop.permute.xlu2 %5140  ;;  %5282 = vst.msk [vmem:[#allocation3 + $0xf8] sm:$0xf] %vm5250_vm8, %v5121_v37  ;;  %v6511_v37 = vor.u32 %v6510_v20, %v6506_v60  ;;  %v6501_v31 = vor.u32 %v6500_v58, %v6497_v21  ;;  %v6530_v21 = vrot.slane %v6528_v18, 5  ;;  %v6521_v58 = vrot.slane %v6519_v47, 4 }
 0x3b4   : > { %5292 = vst.msk [vmem:[#allocation3 + $0x148] sm:$0xf] %vm5250_vm8, %v5141_v49  ;;  %v5547_v49 = vrot.slane %v5332_v2, 5  ;;  %v5335_v2 = vld [vmem:[#allocation2 + $0x5c] sm:$0x1] }
 0x3b5   : > { %v6512_v39 = vrot.slane %v6511_v37, 4  ;;  %v6502_v36 = vrot.slane %v6501_v31, 4  ;;  %v12855_v31 = vld [vmem:[#allocation2 + $0x64] sm:$0xf] }
 0x3b6   : > { %7240 = vrot.lane.b32.xlu0 %v6493_v35, %s9922_s15  ;;  %v5552_v35 = vsel %vm10152_vm12, %v9220_v63, %v5551_v9  ;;  %v5548_v29 = vsel %vm10152_vm12, %v5546_v38, %v5547_v49  ;;  %v5554_v63 = vrot.slane %v5335_v2, 5  ;;  %v6382_v38 = vld [vmem:[#allocation2 + $0x38] sm:$0x1]  ;;  %v5994_v49 = vld [vmem:[#allocation2 + $0x34] sm:$0xf] }
 0x3b8   : > { %v5131_v62 = vpop.permute.xlu0 %5130  ;;  %6119 = vrot.lane.b32.xlu1 %v5990_v40, %s9921_s8  ;;  %v6507_v40 = vsel %vm10120_vm7, %v6502_v36, %v6506_v60  ;;  %v9221_v36 = vrot.slane %v5336_v27, 9 }
 0x3b9   : > { %7238 = vrot.lane.b32.xlu2 %v6483_v13, %s9922_s15  ;;  %5287 = vst.msk [vmem:[#allocation3 + $0x120] sm:$0xf] %vm5250_vm8, %v5131_v62  ;;  %v6517_v13 = vsel %vm10120_vm7, %v6512_v39, %v6516_v51  ;;  %v6532_v62 = vshrl.u32 %v6381_v10, 16  ;;  %v7580_v39 = vld [vmem:[#allocation2 + $0x184] sm:$0xf] }
 0x3ba   : > { %v5127_v19 = vpop.permute.xlu1 %5126  ;;  %v7885_v47 = vrot.slane %v7580_v39, 5 }
 0x3bb   : > { %v5147_v53 = vpop.permute.xlu2 %5146  ;;  %5285 = vst.msk [vmem:[#allocation3 + $0x110] sm:$0xf] %vm5250_vm8, %v5127_v19  ;;  %v6534_v60 = vrot.slane %v6532_v62, 4  ;;  %v5553_v19 = vrot.slane %v5551_v9, 4 }
 0x3bc   : > { %5295 = vst.msk [vmem:[#allocation3 + $0x160] sm:$0xf] %vm5250_vm8, %v5147_v53  ;;  %v6383_v53 = vld [vmem:[#allocation2 + $0x3c] sm:$0xf] }
 0x3bd   : > { %v6546_v37 = vshll.u32 %v6383_v53, 16  ;;  %v5555_v9 = vsel %vm10152_vm12, %v5553_v19, %v5554_v63  ;;  %v7581_v19 = vld [vmem:[#allocation2 + $0x188] sm:$0x1] }
 0x3be   : > { %6121 = vrot.lane.b32.xlu0 %v5991_v44, %s9921_s8  ;;  %v6543_v44 = vshrl.u32 %v6383_v53, 16 }
 0x3bf   : > { %v6548_v26 = vrot.slane %v6546_v37, 5  ;;  %v6386_v37 = vld [vmem:[#allocation2 + $0x48] sm:$0xf] }
 0x3c0   : > { %v5137_v46 = vpop.permute.xlu0 %5136  ;;  %5753 = vrot.lane.b32.xlu1 %v5548_v29, %s9920_s24  ;;  %v6538_v29 = vshll.u32 %v6382_v38, 16  ;;  %v6545_v10 = vrot.slane %v6543_v44, 4  ;;  %v7887_v38 = vrot.slane %v7885_v47, 4 }
 0x3c1   : > { %5755 = vrot.lane.b32.xlu2 %v5552_v35, %s9920_s24  ;;  %5290 = vst.msk [vmem:[#allocation3 + $0x138] sm:$0xf] %vm5250_vm8, %v5137_v46  ;;  %v5993_v35 = vld [vmem:[#allocation2 + $0x30] sm:$0xf]  ;;  %v6535_v46 = vor.u32 %v6534_v60, %v6530_v21 }
 0x3c2   : > { %v5133_v59 = vpop.permute.xlu1 %5132  ;;  %v6540_v62 = vrot.slane %v6538_v29, 5  ;;  %v6549_v2 = vor.u32 %v6548_v26, %v6545_v10  ;;  %v12885_v10 = vld [vmem:[#allocation2 + $0x70] sm:$0xf]  ;;  %v5996_v26 = vld [vmem:[#allocation2 + $0x40] sm:$0xf] }
 0x3c3   : > { %v5153_v15 = vpop.permute.xlu2 %5152  ;;  %5288 = vst.msk [vmem:[#allocation3 + $0x128] sm:$0xf] %vm5250_vm8, %v5133_v59  ;;  %v5558_v59 = vrot.slane %v12855_v31, 5  ;;  %v6536_v18 = vrot.slane %v6535_v46, 4  ;;  %v7888_v31 = vrot.slane %v7581_v19, 5 }
 0x3c4   : > { %5298 = vst.msk [vmem:[#allocation3 + $0x178] sm:$0xf] %vm5250_vm8, %v5153_v15  ;;  %v6525_v15 = vor.u32 %v6524_v32, %v6521_v58  ;;  %v6387_v19 = vld [vmem:[#allocation2 + $0x4c] sm:$0xf] }
 0x3c5   : > { %v7889_v29 = vsel %vm10152_vm12, %v7887_v38, %v7888_v31 }
 0x3c6   : > { %7244 = vrot.lane.b32.xlu0 %v6517_v13, %s9922_s15  ;;  %v6526_v25 = vrot.slane %v6525_v15, 4  ;;  %v6570_v15 = vshll.u32 %v6386_v37, 16  ;;  %8032 = vst.msk [vmem:[#allocation3 + $0x1cc] sm:$0xf] %vm712_vm2, %v7889_v29 }
 0x3c8   : > { %v5143_v4 = vpop.permute.xlu0 %5142  ;;  %6123 = vrot.lane.b32.xlu1 %v5992_v3, %s9921_s8  ;;  %v5559_v3 = vsel %vm10152_vm12, %v9221_v36, %v5558_v59  ;;  %v6531_v58 = vsel %vm10120_vm7, %v6526_v25, %v6530_v21  ;;  %v5339_v36 = vld [vmem:[#allocation2 + $0x6c] sm:$0xe] }
 0x3c9   : > { %7242 = vrot.lane.b32.xlu2 %v6507_v40, %s9922_s15  ;;  %5293 = vst.msk [vmem:[#allocation3 + $0x150] sm:$0xf] %vm5250_vm8, %v5143_v4  ;;  %v6384_v4 = vld [vmem:[#allocation2 + $0x40] sm:$0xf]  ;;  %v9222_v25 = vrot.slane %v5339_v36, 9 }
 0x3ca   : > { %v5139_v48 = vpop.permute.xlu1 %5138  ;;  %v6552_v53 = vshll.u32 %v6384_v4, 16  ;;  %v6556_v32 = vshrl.u32 %v6384_v4, 16  ;;  %v5565_v4 = vrot.slane %v12885_v10, 5 }
 0x3cb   : > { %v5159_v20 = vpop.permute.xlu2 %5158  ;;  %5291 = vst.msk [vmem:[#allocation3 + $0x140] sm:$0xf] %vm5250_vm8, %v5139_v48  ;;  %v7579_v48 = vld [vmem:[#allocation2 + $0x180] sm:$0xe] }
 0x3cc   : > { %5301 = vst.msk [vmem:[#allocation3 + $0x190] sm:$0xf] %vm5250_vm8, %v5159_v20  ;;  %v6541_v20 = vsel %vm10120_vm7, %v6536_v18, %v6540_v62  ;;  %v9274_v63 = vrot.slane %v7579_v48, 9  ;;  %v6558_v21 = vrot.slane %v6556_v32, 4  ;;  %v5338_v18 = vld [vmem:[#allocation2 + $0x68] sm:$0x1] }
 0x3cd   : > { %v5560_v48 = vrot.slane %v5558_v59, 4 }
 0x3ce   : > { %6127 = vrot.lane.b32.xlu0 %v5994_v49, %s9921_s8  ;;  %v6550_v49 = vrot.slane %v6549_v2, 4  ;;  %v7886_v27 = vsel %vm10152_vm12, %v9274_v63, %v7885_v47  ;;  %v6572_v2 = vrot.slane %v6570_v15, 5  ;;  %v5566_v63 = vsel %vm10152_vm12, %v9222_v25, %v5565_v4  ;;  %v6388_v15 = vld [vmem:[#allocation2 + $0x50] sm:$0x1] }
 0x3cf   : > { %8031 = vst.msk [vmem:[#allocation3 + $0x1c4] sm:$0xf] %vm712_vm2, %v7886_v27  ;;  %v6580_v27 = vshrl.u32 %v6387_v19, 16 }
 0x3d0   : > { %v5149_v51 = vpop.permute.xlu0 %5148  ;;  %5757 = vrot.lane.b32.xlu1 %v5555_v9, %s9920_s24  ;;  %v6567_v9 = vshrl.u32 %v6386_v37, 16 }
 0x3d1   : > { %6125 = vrot.lane.b32.xlu2 %v5993_v35, %s9921_s8  ;;  %5296 = vst.msk [vmem:[#allocation3 + $0x168] sm:$0xf] %vm5250_vm8, %v5149_v51  ;;  %v6554_v35 = vrot.slane %v6552_v53, 5  ;;  %v6385_v51 = vld [vmem:[#allocation2 + $0x44] sm:$0x1] }
 0x3d2   : > { %v5145_v40 = vpop.permute.xlu1 %5144  ;;  %v6562_v47 = vshll.u32 %v6385_v51, 16  ;;  %v6389_v51 = vld [vmem:[#allocation2 + $0x54] sm:$0xf] }
 0x3d3   : > { %v5165_v13 = vpop.permute.xlu2 %5164  ;;  %5294 = vst.msk [vmem:[#allocation3 + $0x158] sm:$0xf] %vm5250_vm8, %v5145_v40  ;;  %v6555_v39 = vsel %vm10120_vm7, %v6550_v49, %v6554_v35  ;;  %v5995_v40 = vld [vmem:[#allocation2 + $0x3c] sm:$0xf]  ;;  %v6559_v62 = vor.u32 %v6558_v21, %v6554_v35 }
 0x3d4   : > { %5304 = vst.msk [vmem:[#allocation3 + $0x1a8] sm:$0xf] %vm5250_vm8, %v5165_v13  ;;  %v6564_v32 = vrot.slane %v6562_v47, 5  ;;  %v5341_v47 = vld [vmem:[#allocation2 + $0x74] sm:$0x1] }
 0x3d6   : > { %5759 = vrot.lane.b32.xlu0 %v5559_v3, %s9920_s24  ;;  %v6569_v3 = vrot.slane %v6567_v9, 4 }
 0x3d8   : > { %v5155_v60 = vpop.permute.xlu0 %5154  ;;  %7246 = vrot.lane.b32.xlu1 %v6531_v58, %s9922_s15  ;;  %v6560_v58 = vrot.slane %v6559_v62, 4  ;;  %v6573_v38 = vor.u32 %v6572_v2, %v6569_v3  ;;  %v5997_v62 = vld [vmem:[#allocation2 + $0x48] sm:$0xf]  ;;  %v6586_v3 = vshll.u32 %v6388_v15, 16  ;;  %v6392_v15 = vld [vmem:[#allocation2 + $0x60] sm:$0xf] }
 0x3d9   : > { %7248 = vrot.lane.b32.xlu2 %v6541_v20, %s9922_s15  ;;  %5299 = vst.msk [vmem:[#allocation3 + $0x180] sm:$0xf] %vm5250_vm8, %v5155_v60  ;;  %v5561_v60 = vrot.slane %v5338_v18, 5 }
 0x3da   : > { %v5151_v46 = vpop.permute.xlu1 %5150  ;;  %v6565_v59 = vsel %vm10120_vm7, %v6560_v58, %v6564_v32  ;;  %v6574_v31 = vrot.slane %v6573_v38, 4  ;;  %v5567_v58 = vrot.slane %v5565_v4, 4  ;;  %v5568_v32 = vrot.slane %v5341_v47, 5 }
 0x3db   : > { %v5171_v44 = vpop.permute.xlu2 %5170  ;;  %5297 = vst.msk [vmem:[#allocation3 + $0x170] sm:$0xf] %vm5250_vm8, %v5151_v46  ;;  %v5562_v49 = vsel %vm10152_vm12, %v5560_v48, %v5561_v60  ;;  %v6390_v46 = vld [vmem:[#allocation2 + $0x58] sm:$0xf]  ;;  %v6391_v48 = vld [vmem:[#allocation2 + $0x5c] sm:$0x1] }
 0x3dc   : > { %5307 = vst.msk [vmem:[#allocation3 + $0x1c0] sm:$0xf] %vm5250_vm8, %v5171_v44  ;;  %v6576_v44 = vshll.u32 %v6387_v19, 16  ;;  %v6600_v36 = vshll.u32 %v6390_v46, 16  ;;  %v6604_v10 = vshrl.u32 %v6390_v46, 16 }
 0x3de   : > { %7250 = vrot.lane.b32.xlu0 %v6555_v39, %s9922_s15  ;;  %v6578_v21 = vrot.slane %v6576_v44, 5  ;;  %v6582_v39 = vrot.slane %v6580_v27, 4  ;;  %v6602_v2 = vrot.slane %v6600_v36, 5  ;;  %v5999_v44 = vld [vmem:[#allocation2 + $0x54] sm:$0xf]  ;;  %v5569_v27 = vsel %vm10152_vm12, %v5567_v58, %v5568_v32 }
 0x3df   : > { %v6393_v36 = vld [vmem:[#allocation2 + $0x64] sm:$0xf]  ;;  %v7582_v58 = vld [vmem:[#allocation2 + $0x18c] sm:$0xe] }
 0x3e0   : > { %v5161_v13 = vpop.permute.xlu0 %5160  ;;  %6129 = vrot.lane.b32.xlu1 %v5995_v40, %s9921_s8  ;;  %v6579_v9 = vsel %vm10120_vm7, %v6574_v31, %v6578_v21  ;;  %v6594_v40 = vshll.u32 %v6389_v51, 16  ;;  %v6583_v25 = vor.u32 %v6582_v39, %v6578_v21  ;;  %v6628_v47 = vshrl.u32 %v6393_v36, 16 }
 0x3e1   : > { %6131 = vrot.lane.b32.xlu2 %v5996_v26, %s9921_s8  ;;  %5302 = vst.msk [vmem:[#allocation3 + $0x198] sm:$0xf] %vm5250_vm8, %v5161_v13  ;;  %v5998_v26 = vld [vmem:[#allocation2 + $0x4c] sm:$0xf]  ;;  %v6591_v13 = vshrl.u32 %v6389_v51, 16 }
 0x3e2   : > { %v5157_v53 = vpop.permute.xlu1 %5156  ;;  %v6584_v38 = vrot.slane %v6583_v25, 4  ;;  %v6618_v25 = vshll.u32 %v6392_v15, 16 }
 0x3e3   : > { %v5177_v20 = vpop.permute.xlu2 %5176  ;;  %5300 = vst.msk [vmem:[#allocation3 + $0x188] sm:$0xf] %vm5250_vm8, %v5157_v53  ;;  %v6593_v19 = vrot.slane %v6591_v13, 4  ;;  %v6615_v13 = vshrl.u32 %v6392_v15, 16 }
 0x3e4   : > { %5310 = vst.msk [vmem:[#allocation3 + $0x1d8] sm:$0xf] %vm5250_vm8, %v5177_v20  ;;  %v6606_v20 = vrot.slane %v6604_v10, 4  ;;  %v7583_v10 = vld [vmem:[#allocation2 + $0x190] sm:$0xf] }
 0x3e6   : > { %5763 = vrot.lane.b32.xlu0 %v5566_v63, %s9920_s24  ;;  %v6596_v63 = vrot.slane %v6594_v40, 5  ;;  %v9682_v40 = vld [vmem:[#allocation7 + $0x30] sm:$0xff] }
 0x3e8   : > { %v5167_v37 = vpop.permute.xlu0 %5166  ;;  %7252 = vrot.lane.b32.xlu1 %v6565_v59, %s9922_s15  ;;  %v6610_v59 = vshll.u32 %v6391_v48, 16  ;;  %v6597_v31 = vor.u32 %v6596_v63, %v6593_v19  ;;  %v5342_v48 = vld [vmem:[#allocation2 + $0x78] sm:$0xe] }
 0x3e9   : > { %5761 = vrot.lane.b32.xlu2 %v5562_v49, %s9920_s24  ;;  %5305 = vst.msk [vmem:[#allocation3 + $0x1b0] sm:$0xf] %vm5250_vm8, %v5167_v37  ;;  %v6588_v49 = vrot.slane %v6586_v3, 5  ;;  %v6607_v37 = vor.u32 %v6606_v20, %v6602_v2  ;;  %v7892_v3 = vrot.slane %v7583_v10, 5  ;;  %v9681_v19 = vld [vmem:[#allocation7 + $0x28] sm:$0xff] }
 0x3ea   : > { %v5163_v29 = vpop.permute.xlu1 %5162  ;;  %v6612_v21 = vrot.slane %v6610_v59, 5 }
 0x3eb   : > { %v5183_v35 = vpop.permute.xlu2 %5182  ;;  %5303 = vst.msk [vmem:[#allocation3 + $0x1a0] sm:$0xf] %vm5250_vm8, %v5163_v29  ;;  %v6589_v4 = vsel %vm10120_vm7, %v6584_v38, %v6588_v49  ;;  %v6608_v46 = vrot.slane %v6607_v37, 4  ;;  %v9683_v29 = vld [vmem:[#allocation7 + $0x38] sm:$0xff]  ;;  %v9223_v38 = vrot.slane %v5342_v48, 9  ;;  %v6620_v37 = vrot.slane %v6618_v25, 5 }
 0x3ec   : > { %5313 = vst.msk [vmem:[#allocation3 + $0x1f0] sm:$0xf] %vm5250_vm8, %v5183_v35  ;;  %8564 = vmatpush.bf16.msra.mxu1 %v9683_v29  ;;  %9689 = vmatpush.bf16.msrb.mxu3 %v9683_v29  ;;  %v5385_v29 = vld [vmem:[#allocation2 + $0x13c] sm:$0xf] }
 0x3ee   : > { %7254 = vrot.lane.b32.xlu0 %v6579_v9, %s9922_s15  ;;  %v6598_v9 = vrot.slane %v6597_v31, 4  ;;  %v9275_v31 = vrot.slane %v7582_v58, 9 }
 0x3f0   : > { %v5173_v18 = vpop.permute.xlu0 %5172  ;;  %6133 = vrot.lane.b32.xlu1 %v5997_v62, %s9921_s8  ;;  %v6624_v62 = vshll.u32 %v6393_v36, 16  ;;  %8565 = vmatpush.bf16.msra.mxu1 %v9682_v40 }
 0x3f1   : > { %6135 = vrot.lane.b32.xlu2 %v5998_v26, %s9921_s8  ;;  %5308 = vst.msk [vmem:[#allocation3 + $0x1c8] sm:$0xf] %vm5250_vm8, %v5173_v18  ;;  %v6613_v26 = vsel %vm10120_vm7, %v6608_v46, %v6612_v21  ;;  %v6603_v18 = vsel %vm10120_vm7, %v6598_v9, %v6602_v2  ;;  %9690 = vmatpush.bf16.msrb.mxu3 %v9682_v40  ;;  %v6617_v2 = vrot.slane %v6615_v13, 4  ;;  %v7894_v46 = vrot.slane %v7892_v3, 4  ;;  %v5384_v21 = vld [vmem:[#allocation2 + $0x138] sm:$0xe] }
 0x3f2   : > { %v5169_v60 = vpop.permute.xlu1 %5168  ;;  %v6626_v49 = vrot.slane %v6624_v62, 5  ;;  %v6001_v9 = vld [vmem:[#allocation2 + $0x60] sm:$0xf]  ;;  %v9237_v62 = vrot.slane %v5384_v21, 9 }
 0x3f3   : > { %v5734_v53 = vpop.permute.xlu2 %5733  ;;  %5306 = vst.msk [vmem:[#allocation3 + $0x1b8] sm:$0xf] %vm5250_vm8, %v5169_v60  ;;  %v12932_v60 = vld [vmem:[#allocation2 + $0x7c] sm:$0xf]  ;;  %v6621_v40 = vor.u32 %v6620_v37, %v6617_v2 }
 0x3f4   : > { %5925 = vst.msk [vmem:[#allocation3 + $0x8] sm:$0xf] %vm5923_vm0, %v5734_v53  ;;  %v6000_v53 = vld [vmem:[#allocation2 + $0x58] sm:$0xf]  ;;  %v5572_v59 = vrot.slane %v12932_v60, 5  ;;  %8566 = vmatpush.bf16.msra.mxu1 %v9681_v19 }
 0x3f5   : > { %9691 = vmatpush.bf16.msrb.mxu3 %v9681_v19  ;;  %v6622_v58 = vrot.slane %v6621_v40, 4  ;;  %v6443_v19 = vld [vmem:[#allocation2 + $0x144] sm:$0xf] }
 0x3f6   : > { %6137 = vrot.lane.b32.xlu0 %v5999_v44, %s9921_s8  ;;  %v6630_v44 = vrot.slane %v6628_v47, 4  ;;  %v5573_v13 = vsel %vm10152_vm12, %v9223_v38, %v5572_v59  ;;  %v5670_v47 = vrot.slane %v5385_v29, 5  ;;  %v6396_v29 = vld [vmem:[#allocation2 + $0x70] sm:$0xf] }
 0x3f8   : > { %v5179_v35 = vpop.permute.xlu0 %5178  ;;  %7256 = vrot.lane.b32.xlu1 %v6589_v4, %s9922_s15  ;;  %v7584_v4 = vld [vmem:[#allocation2 + $0x194] sm:$0x1]  ;;  %v6631_v15 = vor.u32 %v6630_v44, %v6626_v49  ;;  %v5671_v2 = vsel %vm10152_vm12, %v9237_v62, %v5670_v47  ;;  %v6648_v62 = vshll.u32 %v6396_v29, 16 }
 0x3f9   : > { %5765 = vrot.lane.b32.xlu2 %v5569_v27, %s9920_s24  ;;  %5311 = vst.msk [vmem:[#allocation3 + $0x1e0] sm:$0xf] %vm5250_vm8, %v5179_v35  ;;  %v6394_v27 = vld [vmem:[#allocation2 + $0x68] sm:$0x1]  ;;  %v6002_v35 = vld [vmem:[#allocation2 + $0x64] sm:$0xf] }
 0x3fa   : > { %v5175_v51 = vpop.permute.xlu1 %5174  ;;  %v6634_v36 = vshll.u32 %v6394_v27, 16  ;;  %v7895_v10 = vrot.slane %v7584_v4, 5  ;;  %v7023_v4 = vshrl.u32 %v6443_v19, 16 }
 0x3fb   : > { %v5740_v39 = vpop.permute.xlu2 %5739  ;;  %5309 = vst.msk [vmem:[#allocation3 + $0x1d0] sm:$0xf] %vm5250_vm8, %v5175_v51  ;;  %v7893_v51 = vsel %vm10152_vm12, %v9275_v31, %v7892_v3  ;;  %v6627_v31 = vsel %vm10120_vm7, %v6622_v58, %v6626_v49  ;;  %v6445_v49 = vld [vmem:[#allocation2 + $0x14c] sm:$0x1] }
 0x3fc   : > { %5928 = vst.msk [vmem:[#allocation3 + $0x20] sm:$0xf] %vm5923_vm0, %v5740_v39  ;;  %v9680_v39 = vld [vmem:[#allocation7 + $0x20] sm:$0xff]  ;;  %v7896_v25 = vsel %vm10152_vm12, %v7894_v46, %v7895_v10  ;;  %v6636_v48 = vrot.slane %v6634_v36, 5  ;;  %v7026_v46 = vshll.u32 %v6443_v19, 16 }
 0x3fd   : > { %8033 = vst.msk [vmem:[#allocation3 + $0x1d4] sm:$0xf] %vm712_vm2, %v7893_v51  ;;  %8567 = vmatpush.bf16.msra.mxu1 %v9680_v39  ;;  %9692 = vmatpush.bf16.msrb.mxu3 %v9680_v39  ;;  %v9677_v39 = vld [vmem:[#allocation7 + $0x8] sm:$0xff] }
 0x3fe   : > { %7260 = vrot.lane.b32.xlu0 %v6613_v26, %s9922_s15  ;;  %8034 = vst.msk [vmem:[#allocation3 + $0x1dc] sm:$0xf] %vm712_vm2, %v7896_v25  ;;  %v7028_v40 = vrot.slane %v7026_v46, 5  ;;  %v6652_v25 = vshrl.u32 %v6396_v29, 16 }
 0x400   : > { %v5185_v20 = vpop.permute.xlu0 %5184  ;;  %6139 = vrot.lane.b32.xlu1 %v6000_v53, %s9921_s8  ;;  %v6632_v53 = vrot.slane %v6631_v15, 4 }
 0x401   : > { %7258 = vrot.lane.b32.xlu2 %v6603_v18, %s9922_s15  ;;  %5314 = vst.msk [vmem:[#allocation3 + $0x1f8] sm:$0xf] %vm5250_vm8, %v5185_v20  ;;  %v9679_v18 = vld [vmem:[#allocation7 + $0x18] sm:$0xff] }
 0x402   : > { %v5181_v63 = vpop.permute.xlu1 %5180  ;;  %8568 = vmatpush.bf16.msra.mxu1 %v9679_v18  ;;  %9693 = vmatpush.bf16.msrb.mxu3 %v9679_v18  ;;  %v6637_v38 = vsel %vm10120_vm7, %v6632_v53, %v6636_v48  ;;  %v6036_v18 = vld [vmem:[#allocation2 + $0x148] sm:$0xf] }
 0x403   : > { %v5746_v32 = vpop.permute.xlu2 %5745  ;;  %5312 = vst.msk [vmem:[#allocation3 + $0x1e8] sm:$0xf] %vm5250_vm8, %v5181_v63  ;;  %v9678_v63 = vld [vmem:[#allocation7 + $0x10] sm:$0xff] }
 0x404   : > { %5931 = vst.msk [vmem:[#allocation3 + $0x38] sm:$0xf] %vm5923_vm0, %v5746_v32  ;;  %v6444_v32 = vld [vmem:[#allocation2 + $0x148] sm:$0xf] }
 0x405   : > { %v7032_v44 = vshll.u32 %v6444_v32, 16  ;;  %v7036_v37 = vshrl.u32 %v6444_v32, 16 }
 0x406   : > { %6143 = vrot.lane.b32.xlu0 %v6002_v35, %s9921_s8  ;;  %v5386_v35 = vld [vmem:[#allocation2 + $0x140] sm:$0x1]  ;;  %8569 = vmatpush.bf16.msra.mxu1 %v9678_v63 }
 0x407   : > { %9694 = vmatpush.bf16.msrb.mxu3 %v9678_v63  ;;  %v5673_v15 = vrot.slane %v5386_v35, 5  ;;  %v7034_v36 = vrot.slane %v7032_v44, 5  ;;  %v7038_v10 = vrot.slane %v7036_v37, 4  ;;  %v6650_v63 = vrot.slane %v6648_v62, 5  ;;  %v6397_v37 = vld [vmem:[#allocation2 + $0x74] sm:$0x1] }
 0x408   : > { %v5736_v26 = vpop.permute.xlu0 %5735  ;;  %5767 = vrot.lane.b32.xlu1 %v5573_v13, %s9920_s24  ;;  %v7025_v13 = vrot.slane %v7023_v4, 4 }
 0x409   : > { %6141 = vrot.lane.b32.xlu2 %v6001_v9, %s9921_s8  ;;  %5926 = vst.msk [vmem:[#allocation3 + $0x10] sm:$0xf] %vm5923_vm0, %v5736_v26  ;;  %v5672_v9 = vrot.slane %v5670_v47, 4  ;;  %v6395_v26 = vld [vmem:[#allocation2 + $0x6c] sm:$0xf]  ;;  %v7039_v53 = vor.u32 %v7038_v10, %v7034_v36  ;;  %v7042_v47 = vshll.u32 %v6445_v49, 16 }
 0x40a   : > { %v5732_v20 = vpop.permute.xlu1 %5731  ;;  %8570 = vmatpush.bf16.msra.mxu1 %v9677_v39  ;;  %v6639_v48 = vshrl.u32 %v6395_v26, 16  ;;  %v6642_v58 = vshll.u32 %v6395_v26, 16  ;;  %v7029_v19 = vor.u32 %v7028_v40, %v7025_v13  ;;  %v7586_v49 = vld [vmem:[#allocation2 + $0x19c] sm:$0xf] }
 0x40b   : > { %v5752_v3 = vpop.permute.xlu2 %5751  ;;  %5924 = vst.msk [vmem:[#allocation3] sm:$0xf] %vm5923_vm0, %v5732_v20  ;;  %9695 = vmatpush.bf16.msrb.mxu3 %v9677_v39  ;;  %v6035_v20 = vld [vmem:[#allocation2 + $0x144] sm:$0xf]  ;;  %v7040_v35 = vrot.slane %v7039_v53, 4  ;;  %v7044_v4 = vrot.slane %v7042_v47, 5 }
 0x40c   : > { %5934 = vst.msk [vmem:[#allocation3 + $0x50] sm:$0xf] %vm5923_vm0, %v5752_v3  ;;  %v9676_v3 = vld [vmem:[#allocation7] sm:$0xff]  ;;  %v6641_v46 = vrot.slane %v6639_v48, 4  ;;  %v6644_v29 = vrot.slane %v6642_v58, 5  ;;  %v7030_v39 = vrot.slane %v7029_v19, 4 }
 0x40d   : > { %v7045_v10 = vsel %vm10120_vm7, %v7040_v35, %v7044_v4  ;;  %v5388_v48 = vld [vmem:[#allocation2 + $0x148] sm:$0xf]  ;;  %v7585_v19 = vld [vmem:[#allocation2 + $0x198] sm:$0xe]  ;;  %v6004_v35 = vld [vmem:[#allocation2 + $0x70] sm:$0xf] }
 0x40e   : > { %5823 = vrot.lane.b32.xlu0 %v5671_v2, %s9920_s24  ;;  %v5674_v2 = vsel %vm10152_vm12, %v5672_v9, %v5673_v15  ;;  %8571 = vmatpush.bf16.msra.mxu1 %v9676_v3  ;;  %v6658_v15 = vshll.u32 %v6397_v37, 16  ;;  %v6645_v26 = vor.u32 %v6644_v29, %v6641_v46  ;;  %v7035_v40 = vsel %vm10120_vm7, %v7030_v39, %v7034_v36  ;;  %v5389_v4 = vld [vmem:[#allocation2 + $0x14c] sm:$0x1]  ;;  %v5387_v39 = vld [vmem:[#allocation2 + $0x144] sm:$0xe] }
 0x40f   : > { %9696 = vmatpush.bf16.msrb.mxu3 %v9676_v3  ;;  %v6447_v3 = vld [vmem:[#allocation2 + $0x154] sm:$0xf]  ;;  %v9276_v37 = vrot.slane %v7585_v19, 9 }
 0x410   : > { %v5742_v27 = vpop.permute.xlu0 %5741  ;;  %7262 = vrot.lane.b32.xlu1 %v6627_v31, %s9922_s15  ;;  %v6660_v62 = vrot.slane %v6658_v15, 5  ;;  %v6646_v47 = vrot.slane %v6645_v26, 4  ;;  %v7056_v58 = vshll.u32 %v6447_v3, 16  ;;  %v6398_v26 = vld [vmem:[#allocation2 + $0x78] sm:$0xf] }
 0x411   : > { %7264 = vrot.lane.b32.xlu2 %v6637_v38, %s9922_s15  ;;  %5929 = vst.msk [vmem:[#allocation3 + $0x28] sm:$0xf] %vm5923_vm0, %v5742_v27  ;;  %v6654_v38 = vrot.slane %v6652_v25, 4  ;;  %v9775_v27 = vld [vmem:[#allocation7 + $0x40] sm:$0xff] }
 0x412   : > { %v5738_v51 = vpop.permute.xlu1 %5737 }
 0x413   : > { %v12963_v21 = vpop.permute.xlu2 %7238  ;;  %5927 = vst.msk [vmem:[#allocation3 + $0x18] sm:$0xf] %vm5923_vm0, %v5738_v51  ;;  %9697 = vmatpush.bf16.msra.mxu3 %v9775_v27  ;;  %v6003_v51 = vld [vmem:[#allocation2 + $0x6c] sm:$0xf]  ;;  %v6655_v9 = vor.u32 %v6654_v38, %v6650_v63  ;;  %v5677_v38 = vrot.slane %v5388_v48, 5 }
 0x416   : > { %6211 = vrot.lane.b32.xlu0 %v6036_v18, %s9921_s8  ;;  %v6656_v18 = vrot.slane %v6655_v9, 4 }
 0x418   : > { %v5748_v32 = vpop.permute.xlu0 %5747  ;;  %5825 = vrot.lane.b32.xlu1 %v5674_v2, %s9920_s24  ;;  %v6661_v36 = vsel %vm10120_vm7, %v6656_v18, %v6660_v62  ;;  %v6446_v2 = vld [vmem:[#allocation2 + $0x150] sm:$0xf]  ;;  %v5680_v18 = vrot.slane %v5389_v4, 5 }
 0x419   : > { %6209 = vrot.lane.b32.xlu2 %v6035_v20, %s9921_s8  ;;  %5932 = vst.msk [vmem:[#allocation3 + $0x40] sm:$0xf] %vm5923_vm0, %v5748_v32  ;;  %v7899_v20 = vrot.slane %v7586_v49, 5  ;;  %v7060_v32 = vshrl.u32 %v6447_v3, 16  ;;  %v7047_v46 = vshrl.u32 %v6446_v2, 16  ;;  %v7050_v15 = vshll.u32 %v6446_v2, 16 }
 0x41a   : > { %v5744_v31 = vpop.permute.xlu1 %5743  ;;  %v6037_v49 = vld [vmem:[#allocation2 + $0x150] sm:$0xf]  ;;  %v9238_v3 = vrot.slane %v5387_v39, 9 }
 0x41b   : > { %v5756_v44 = vpop.permute.xlu2 %5755  ;;  %5930 = vst.msk [vmem:[#allocation3 + $0x30] sm:$0xf] %vm5923_vm0, %v5744_v31  ;;  %v7901_v27 = vrot.slane %v7899_v20, 4  ;;  %v7062_v9 = vrot.slane %v7060_v32, 4  ;;  %v7052_v48 = vrot.slane %v7050_v15, 5 }
 0x41c   : > { %5936 = vst.msk [vmem:[#allocation3 + $0x60] sm:$0xf] %vm5923_vm0, %v5756_v44  ;;  %v7587_v44 = vld [vmem:[#allocation2 + $0x1a0] sm:$0x1] }
 0x41d   : > { %v7902_v29 = vrot.slane %v7587_v44, 5 }
 0x41e   : > { %6145 = vrot.lane.b32.xlu0 %v6003_v51, %s9921_s8  ;;  %v7058_v51 = vrot.slane %v7056_v58, 5  ;;  %v6666_v58 = vshll.u32 %v6398_v26, 16 }
 0x41f   : > { %v7903_v62 = vsel %vm10152_vm12, %v7901_v27, %v7902_v29  ;;  %v6399_v29 = vld [vmem:[#allocation2 + $0x7c] sm:$0xf] }
 0x420   : > { %v6118_v13 = vpop.permute.xlu0 %6117  ;;  %7330 = vrot.lane.b32.xlu1 %v7035_v40, %s9922_s15  ;;  %v5679_v40 = vrot.slane %v5677_v38, 4  ;;  %8036 = vst.msk [vmem:[#allocation3 + $0x1ec] sm:$0xf] %vm712_vm2, %v7903_v62 }
 0x421   : > { %7332 = vrot.lane.b32.xlu2 %v7045_v10, %s9922_s15  ;;  %6310 = vst.msk [vmem:[#allocation3] sm:$0xf] %vm6309_vm10, %v6118_v13 }
 0x422   : > { %7431 = vst.msk [vmem:[#allocation3] sm:$0xf] %vm7430_vm11, %v12963_v21  ;;  %v5750_v53 = vpop.permute.xlu1 %5749  ;;  %v6651_v21 = vsel %vm10120_vm7, %v6646_v47, %v6650_v63  ;;  %v7900_v63 = vsel %vm10152_vm12, %v9276_v37, %v7899_v20  ;;  %v7049_v47 = vrot.slane %v7047_v46, 4  ;;  %v7063_v20 = vor.u32 %v7062_v9, %v7058_v51 }
 0x423   : > { %v7243_v25 = vpop.permute.xlu2 %7242  ;;  %5933 = vst.msk [vmem:[#allocation3 + $0x48] sm:$0xf] %vm5923_vm0, %v5750_v53  ;;  %v6448_v53 = vld [vmem:[#allocation2 + $0x158] sm:$0x1]  ;;  %v5681_v32 = vsel %vm10152_vm12, %v5679_v40, %v5680_v18  ;;  %v6038_v40 = vld [vmem:[#allocation2 + $0x154] sm:$0xf] }
 0x424   : > { %8035 = vst.msk [vmem:[#allocation3 + $0x1e4] sm:$0xf] %vm712_vm2, %v7900_v63  ;;  %v7066_v2 = vshll.u32 %v6448_v53, 16  ;;  %v7064_v44 = vrot.slane %v7063_v20, 4  ;;  %v7053_v37 = vor.u32 %v7052_v48, %v7049_v47  ;;  %v6449_v53 = vld [vmem:[#allocation2 + $0x15c] sm:$0xf] }
 0x426   : > { %7268 = vrot.lane.b32.xlu0 %v6661_v36, %s9922_s15  ;;  %v6663_v36 = vshrl.u32 %v6398_v26, 16  ;;  %v7068_v4 = vrot.slane %v7066_v2, 5  ;;  %v7054_v63 = vrot.slane %v7053_v37, 4  ;;  %v6672_v26 = vshll.u32 %v6399_v29, 16 }
 0x427   : > { %v7074_v2 = vshll.u32 %v6449_v53, 16 }
 0x428   : > { %v7241_v31 = vpop.permute.xlu0 %7240  ;;  %6147 = vrot.lane.b32.xlu1 %v6004_v35, %s9921_s8  ;;  %v6665_v27 = vrot.slane %v6663_v36, 4  ;;  %v6674_v47 = vrot.slane %v6672_v26, 5 }
 0x429   : > { %7266 = vrot.lane.b32.xlu2 %v6651_v21, %s9922_s15  ;;  %v5678_v21 = vsel %vm10152_vm12, %v9238_v3, %v5677_v38  ;;  %v9280_v39 = vld [vmem:[#allocation3] sm:$0xf]  ;;  %v7069_v38 = vsel %vm10120_vm7, %v7064_v44, %v7068_v4  ;;  %v5391_v3 = vld [vmem:[#allocation2 + $0x154] sm:$0xf] }
 0x42a   : > { %v6120_v13 = vpop.permute.xlu1 %6119 }
 0x42b   : > { %v6126_v10 = vpop.permute.xlu2 %6125  ;;  %6311 = vst.msk [vmem:[#allocation3 + $0x8] sm:$0xf] %vm6309_vm10, %v6120_v13 }
 0x42c   : > { %6314 = vst.msk [vmem:[#allocation3 + $0x20] sm:$0xf] %vm6309_vm10, %v6126_v10 }
 0x42d   : > { %7432 = vst.msk [vmem:[#allocation3 + $0x8] sm:$0xf] %vm7430_vm11, %v7241_v31  ;;  %v6668_v31 = vrot.slane %v6666_v58, 5  ;;  %v5684_v58 = vrot.slane %v5391_v3, 5 }
 0x42e   : > { %6213 = vrot.lane.b32.xlu0 %v6037_v49, %s9921_s8  ;;  %v6676_v49 = vshrl.u32 %v6399_v29, 16  ;;  %v7076_v29 = vrot.slane %v7074_v2, 5 }
 0x42f   : > { %v6669_v10 = vor.u32 %v6668_v31, %v6665_v27  ;;  %v6005_v31 = vld [vmem:[#allocation2 + $0x78] sm:$0xf]  ;;  %v5686_v4 = vrot.slane %v5684_v58, 4 }
 0x430   : > { %v6122_v19 = vpop.permute.xlu0 %6121  ;;  %5827 = vrot.lane.b32.xlu1 %v5678_v21, %s9920_s24  ;;  %v6678_v48 = vrot.slane %v6676_v49, 4  ;;  %v5392_v21 = vld [vmem:[#allocation2 + $0x158] sm:$0x1] }
 0x431   : > { %5829 = vrot.lane.b32.xlu2 %v5681_v32, %s9920_s24  ;;  %6312 = vst.msk [vmem:[#allocation3 + $0x10] sm:$0xf] %vm6309_vm10, %v6122_v19  ;;  %v6670_v18 = vrot.slane %v6669_v10, 4  ;;  %v7071_v32 = vshrl.u32 %v6449_v53, 16  ;;  %v6006_v19 = vld [vmem:[#allocation2 + $0x7c] sm:$0xf] }
 0x432   : > { %7433 = vst.msk [vmem:[#allocation3 + $0x10] sm:$0xf] %vm7430_vm11, %v7243_v25  ;;  %v5754_v46 = vpop.permute.xlu1 %5753  ;;  %v7059_v25 = vsel %vm10120_vm7, %v7054_v63, %v7058_v51  ;;  %v6400_v51 = vld [vmem:[#allocation2 + $0x80] sm:$0x1]  ;;  %v6679_v44 = vor.u32 %v6678_v48, %v6674_v47 }
 0x433   : > { %v7249_v35 = vpop.permute.xlu2 %7248  ;;  %5935 = vst.msk [vmem:[#allocation3 + $0x58] sm:$0xf] %vm5923_vm0, %v5754_v46  ;;  %v6675_v36 = vsel %vm10120_vm7, %v6670_v18, %v6674_v47  ;;  %v6682_v37 = vshll.u32 %v6400_v51, 16  ;;  %v7073_v46 = vrot.slane %v7071_v32, 4 }
 0x434   : > { %v9613_v9 = vld [vmem:[#allocation3 + $0x4] sm:$0xf0]  ;;  %v6680_v63 = vrot.slane %v6679_v44, 4  ;;  %v6451_v44 = vld [vmem:[#allocation2 + $0x164] sm:$0x1] }
 0x435   : > { %v9281_v15 = vor.u32 %v9613_v9, %v9280_v39  ;;  %v5687_v9 = vrot.slane %v5392_v21, 5  ;;  %v6684_v10 = vrot.slane %v6682_v37, 5 }
 0x436   : > { %7336 = vrot.lane.b32.xlu0 %v7069_v38, %s9922_s15  ;;  %v5390_v38 = vld [vmem:[#allocation2 + $0x150] sm:$0xe] }
 0x437   : > { %8572 = vmatmul.bf16.vlgmr.msra.gmra.mxu1 %v9281_v15  ;;  %v9239_v18 = vrot.slane %v5390_v38, 9  ;;  %v6685_v47 = vsel %vm10120_vm7, %v6680_v63, %v6684_v10 }
 0x438   : > { %v7245_v13 = vpop.permute.xlu0 %7244  ;;  %6215 = vrot.lane.b32.xlu1 %v6038_v40, %s9921_s8 }
 0x439   : > { %7334 = vrot.lane.b32.xlu2 %v7059_v25, %s9922_s15  ;;  %v6450_v25 = vld [vmem:[#allocation2 + $0x160] sm:$0xf] }
 0x43a   : > { %v6124_v20 = vpop.permute.xlu1 %6123  ;;  %v9288_v26 = vld [vmem:[#allocation3 + $0x10] sm:$0xf]  ;;  %v7080_v3 = vshll.u32 %v6450_v25, 16 }
 0x43b   : > { %v6132_v62 = vpop.permute.xlu2 %6131  ;;  %6313 = vst.msk [vmem:[#allocation3 + $0x18] sm:$0xf] %vm6309_vm10, %v6124_v20  ;;  %v7084_v20 = vshrl.u32 %v6450_v25, 16 }
 0x43c   : > { %6317 = vst.msk [vmem:[#allocation3 + $0x38] sm:$0xf] %vm6309_vm10, %v6132_v62  ;;  %v7077_v62 = vor.u32 %v7076_v29, %v7073_v46  ;;  %v7082_v32 = vrot.slane %v7080_v3, 5  ;;  %v6040_v46 = vld [vmem:[#allocation2 + $0x160] sm:$0xf] }
 0x43d   : > { %7434 = vst.msk [vmem:[#allocation3 + $0x18] sm:$0xf] %vm7430_vm11, %v7245_v13  ;;  %v5688_v13 = vsel %vm10152_vm12, %v5686_v4, %v5687_v9  ;;  %v5344_v29 = vld [vmem:[#allocation2 + $0x80] sm:$0x1]  ;;  %v6039_v9 = vld [vmem:[#allocation2 + $0x15c] sm:$0xf] }
 0x43e   : > { %7270 = vrot.lane.b32.xlu0 %v6675_v36, %s9922_s15  ;;  %v7078_v48 = vrot.slane %v7077_v62, 4  ;;  %v6402_v36 = vld [vmem:[#allocation2 + $0x88] sm:$0xf] }
 0x43f   : > { %v6696_v37 = vshll.u32 %v6402_v36, 16 }
 0x440   : > { %v6128_v27 = vpop.permute.xlu0 %6127  ;;  %6149 = vrot.lane.b32.xlu1 %v6005_v31, %s9921_s8  ;;  %v7083_v21 = vsel %vm10120_vm7, %v7078_v48, %v7082_v32  ;;  %v6007_v48 = vld [vmem:[#allocation2 + $0x84] sm:$0xf] }
 0x441   : > { %6151 = vrot.lane.b32.xlu2 %v6006_v19, %s9921_s8  ;;  %6315 = vst.msk [vmem:[#allocation3 + $0x28] sm:$0xf] %vm6309_vm10, %v6128_v27  ;;  %v7086_v19 = vrot.slane %v7084_v20, 4  ;;  %v6700_v27 = vshrl.u32 %v6402_v36, 16  ;;  %v6698_v63 = vrot.slane %v6696_v37, 5 }
 0x442   : > { %7436 = vst.msk [vmem:[#allocation3 + $0x28] sm:$0xf] %vm7430_vm11, %v7249_v35  ;;  %v5758_v15 = vpop.permute.xlu1 %5757  ;;  %v5685_v35 = vsel %vm10152_vm12, %v9239_v18, %v5684_v58  ;;  %v6401_v58 = vld [vmem:[#allocation2 + $0x84] sm:$0xf]  ;;  %v6453_v37 = vld [vmem:[#allocation2 + $0x16c] sm:$0xf] }
 0x443   : > { %v5762_v39 = vpop.permute.xlu2 %5761  ;;  %5937 = vst.msk [vmem:[#allocation3 + $0x68] sm:$0xf] %vm5923_vm0, %v5758_v15  ;;  %v6687_v31 = vshrl.u32 %v6401_v58, 16  ;;  %v6690_v4 = vshll.u32 %v6401_v58, 16  ;;  %v7087_v38 = vor.u32 %v7086_v19, %v7082_v32  ;;  %v7090_v15 = vshll.u32 %v6451_v44, 16  ;;  %v13058_v58 = vpop.f32.mrf.mxu2 }
 0x444   : > { %5939 = vst.msk [vmem:[#allocation3 + $0x78] sm:$0xf] %vm5923_vm0, %v5762_v39  ;;  %v9615_v49 = vld [vmem:[#allocation3 + $0x14] sm:$0xf0]  ;;  %v6702_v10 = vrot.slane %v6700_v27, 4 }
 0x445   : > { %v9289_v40 = vor.u32 %v9615_v49, %v9288_v26  ;;  %v5574_v26 = vrot.slane %v5572_v59, 4  ;;  %v5575_v49 = vrot.slane %v5344_v29, 5  ;;  %v6692_v18 = vrot.slane %v6690_v4, 5  ;;  %v5394_v4 = vld [vmem:[#allocation2 + $0x160] sm:$0xf] }
 0x446   : > { %5833 = vrot.lane.b32.xlu0 %v5688_v13, %s9920_s24  ;;  %v6403_v13 = vld [vmem:[#allocation2 + $0x8c] sm:$0x1]  ;;  %v7092_v20 = vrot.slane %v7090_v15, 5 }
 0x447   : > { %8577 = vmatmul.bf16.gmra.mxu1 %v9289_v40  ;;  %v6689_v40 = vrot.slane %v6687_v31, 4  ;;  %v6706_v60 = vshll.u32 %v6403_v13, 16  ;;  %v5576_v59 = vsel %vm10152_vm12, %v5574_v26, %v5575_v49  ;;  %v5395_v26 = vld [vmem:[#allocation2 + $0x164] sm:$0x1]  ;;  %v6008_v13 = vld [vmem:[#allocation2 + $0x88] sm:$0xf] }
 0x448   : > { %v5760_v53 = vpop.permute.xlu0 %5759  ;;  %7272 = vrot.lane.b32.xlu1 %v6685_v47, %s9922_s15  ;;  %v7088_v47 = vrot.slane %v7087_v38, 4  ;;  %v5691_v38 = vrot.slane %v5394_v4, 5 }
 0x449   : > { %5831 = vrot.lane.b32.xlu2 %v5685_v35, %s9920_s24  ;;  %5938 = vst.msk [vmem:[#allocation3 + $0x70] sm:$0xf] %vm5923_vm0, %v5760_v53  ;;  %v9617_v3 = vld [vmem:[#allocation3 + $0x24] sm:$0xf0]  ;;  %v6693_v36 = vor.u32 %v6692_v18, %v6689_v40  ;;  %v5393_v40 = vld [vmem:[#allocation2 + $0x15c] sm:$0xe] }
 0x44a   : > { %v7247_v2 = vpop.permute.xlu1 %7246 }
 0x44b   : > { %v6136_v51 = vpop.permute.xlu2 %6135  ;;  %7435 = vst.msk [vmem:[#allocation3 + $0x20] sm:$0xf] %vm7430_vm11, %v7247_v2  ;;  %v7093_v2 = vsel %vm10120_vm7, %v7088_v47, %v7092_v20  ;;  %v6694_v31 = vrot.slane %v6693_v36, 4  ;;  %v6454_v47 = vld [vmem:[#allocation2 + $0x170] sm:$0x1] }
 0x44c   : > { %6319 = vst.msk [vmem:[#allocation3 + $0x48] sm:$0xf] %vm6309_vm10, %v6136_v51  ;;  %v6703_v51 = vor.u32 %v6702_v10, %v6698_v63 }
 0x44e   : > { %7338 = vrot.lane.b32.xlu0 %v7083_v21, %s9922_s15  ;;  %v6704_v19 = vrot.slane %v6703_v51, 4  ;;  %v6708_v21 = vrot.slane %v6706_v60, 5  ;;  %v13070_v51 = vpop.f32.mrf.mxu2 }
 0x450   : > { %v7251_v39 = vpop.permute.xlu0 %7250  ;;  %6217 = vrot.lane.b32.xlu1 %v6039_v9, %s9921_s8  ;;  %v6709_v29 = vsel %vm10120_vm7, %v6704_v19, %v6708_v21  ;;  %v7108_v9 = vshrl.u32 %v6453_v37, 16  ;;  %v7114_v21 = vshll.u32 %v6454_v47, 16 }
 0x451   : > { %6219 = vrot.lane.b32.xlu2 %v6040_v46, %s9921_s8  ;;  %v6452_v46 = vld [vmem:[#allocation2 + $0x168] sm:$0xf] }
 0x452   : > { %v6130_v62 = vpop.permute.xlu1 %6129  ;;  %v9296_v35 = vld [vmem:[#allocation3 + $0x20] sm:$0xf]  ;;  %v7095_v15 = vshrl.u32 %v6452_v46, 16  ;;  %v7098_v10 = vshll.u32 %v6452_v46, 16 }
 0x453   : > { %v5766_v25 = vpop.permute.xlu2 %5765  ;;  %6316 = vst.msk [vmem:[#allocation3 + $0x30] sm:$0xf] %vm6309_vm10, %v6130_v62  ;;  %v9297_v53 = vor.u32 %v9617_v3, %v9296_v35  ;;  %v7110_v62 = vrot.slane %v7108_v9, 4  ;;  %v5693_v3 = vrot.slane %v5691_v38, 4  ;;  %v6405_v9 = vld [vmem:[#allocation2 + $0x94] sm:$0xf] }
 0x454   : > { %5941 = vst.msk [vmem:[#allocation3 + $0x88] sm:$0xf] %vm5923_vm0, %v5766_v25  ;;  %v6699_v25 = vsel %vm10120_vm7, %v6694_v31, %v6698_v63  ;;  %v7097_v20 = vrot.slane %v7095_v15, 4 }
 0x455   : > { %7437 = vst.msk [vmem:[#allocation3 + $0x30] sm:$0xf] %vm7430_vm11, %v7251_v39  ;;  %v7104_v39 = vshll.u32 %v6453_v37, 16 }
 0x456   : > { %6153 = vrot.lane.b32.xlu0 %v6007_v48, %s9921_s8  ;;  %v7100_v48 = vrot.slane %v7098_v10, 5 }
 0x457   : > { %8582 = vmatmul.bf16.gmra.mxu1 %v9297_v53  ;;  %v7106_v18 = vrot.slane %v7104_v39, 5  ;;  %v5694_v53 = vrot.slane %v5395_v26, 5  ;;  %v6404_v26 = vld [vmem:[#allocation2 + $0x90] sm:$0xf] }
 0x458   : > { %v5764_v32 = vpop.permute.xlu0 %5763  ;;  %7340 = vrot.lane.b32.xlu1 %v7093_v2, %s9922_s15  ;;  %v6041_v2 = vld [vmem:[#allocation2 + $0x168] sm:$0xf] }
 0x459   : > { %5769 = vrot.lane.b32.xlu2 %v5576_v59, %s9920_s24  ;;  %5940 = vst.msk [vmem:[#allocation3 + $0x80] sm:$0xf] %vm5923_vm0, %v5764_v32  ;;  %v9240_v32 = vrot.slane %v5393_v40, 9  ;;  %v7111_v19 = vor.u32 %v7110_v62, %v7106_v18  ;;  %v5695_v37 = vsel %vm10152_vm12, %v5693_v3, %v5694_v53  ;;  %v6724_v40 = vshrl.u32 %v6405_v9, 16 }
 0x45a   : > { %v7253_v27 = vpop.permute.xlu1 %7252  ;;  %v6711_v3 = vshrl.u32 %v6404_v26, 16  ;;  %v6714_v53 = vshll.u32 %v6404_v26, 16 }
 0x45b   : > { %v7259_v44 = vpop.permute.xlu2 %7258  ;;  %7438 = vst.msk [vmem:[#allocation3 + $0x38] sm:$0xf] %vm7430_vm11, %v7253_v27  ;;  %v7101_v27 = vor.u32 %v7100_v48, %v7097_v20  ;;  %v5692_v4 = vsel %vm10152_vm12, %v9240_v32, %v5691_v38  ;;  %v7112_v46 = vrot.slane %v7111_v19, 4  ;;  %v6042_v20 = vld [vmem:[#allocation2 + $0x16c] sm:$0xf] }
 0x45c   : > { %v9304_v60 = vld [vmem:[#allocation3 + $0x30] sm:$0xf]  ;;  %v5345_v48 = vld [vmem:[#allocation2 + $0x84] sm:$0xe] }
 0x45d   : > { %v7102_v10 = vrot.slane %v7101_v27, 4  ;;  %v6716_v27 = vrot.slane %v6714_v53, 5 }
 0x45e   : > { %7276 = vrot.lane.b32.xlu0 %v6709_v29, %s9922_s15  ;;  %v7116_v29 = vrot.slane %v7114_v21, 5 }
 0x460   : > { %v7255_v49 = vpop.permute.xlu0 %7254  ;;  %6155 = vrot.lane.b32.xlu1 %v6008_v13, %s9921_s8  ;;  %v7117_v38 = vsel %vm10120_vm7, %v7112_v46, %v7116_v29  ;;  %v6720_v13 = vshll.u32 %v6405_v9, 16  ;;  %v6009_v46 = vld [vmem:[#allocation2 + $0x90] sm:$0xf] }
 0x461   : > { %7274 = vrot.lane.b32.xlu2 %v6699_v25, %s9922_s15  ;;  %v5346_v25 = vld [vmem:[#allocation2 + $0x88] sm:$0xf] }
 0x462   : > { %v6134_v63 = vpop.permute.xlu1 %6133  ;;  %v9619_v59 = vld [vmem:[#allocation3 + $0x34] sm:$0xf0]  ;;  %v5579_v62 = vrot.slane %v5346_v25, 5 }
 0x463   : > { %v6142_v35 = vpop.permute.xlu2 %6141  ;;  %6318 = vst.msk [vmem:[#allocation3 + $0x40] sm:$0xf] %vm6309_vm10, %v6134_v63  ;;  %v9305_v36 = vor.u32 %v9619_v59, %v9304_v60  ;;  %v6722_v63 = vrot.slane %v6720_v13, 5  ;;  %v6726_v60 = vrot.slane %v6724_v40, 4 }
 0x464   : > { %6322 = vst.msk [vmem:[#allocation3 + $0x60] sm:$0xf] %vm6309_vm10, %v6142_v35  ;;  %v5347_v35 = vld [vmem:[#allocation2 + $0x8c] sm:$0x1] }
 0x465   : > { %7439 = vst.msk [vmem:[#allocation3 + $0x40] sm:$0xf] %vm7430_vm11, %v7255_v49  ;;  %v13085_v49 = vpop.f32.mrf.mxu2  ;;  %v5582_v32 = vrot.slane %v5347_v35, 5  ;;  %v6727_v29 = vor.u32 %v6726_v60, %v6722_v63  ;;  %v6455_v60 = vld [vmem:[#allocation2 + $0x174] sm:$0xf] }
 0x466   : > { %6221 = vrot.lane.b32.xlu0 %v6041_v2, %s9921_s8  ;;  %v6406_v2 = vld [vmem:[#allocation2 + $0x98] sm:$0x1] }
 0x467   : > { %8587 = vmatmul.bf16.gmra.mxu1 %v9305_v36  ;;  %v5581_v36 = vrot.slane %v5579_v62, 4  ;;  %v6730_v9 = vshll.u32 %v6406_v2, 16  ;;  %v6728_v13 = vrot.slane %v6727_v29, 4  ;;  %v7122_v2 = vshll.u32 %v6455_v60, 16 }
 0x468   : > { %v6138_v31 = vpop.permute.xlu0 %6137  ;;  %5835 = vrot.lane.b32.xlu1 %v5692_v4, %s9920_s24  ;;  %v9224_v4 = vrot.slane %v5345_v48, 9 }
 0x469   : > { %5837 = vrot.lane.b32.xlu2 %v5695_v37, %s9920_s24  ;;  %6320 = vst.msk [vmem:[#allocation3 + $0x50] sm:$0xf] %vm6309_vm10, %v6138_v31  ;;  %v6732_v40 = vrot.slane %v6730_v9, 5 }
 0x46a   : > { %7441 = vst.msk [vmem:[#allocation3 + $0x50] sm:$0xf] %vm7430_vm11, %v7259_v44  ;;  %v7257_v15 = vpop.permute.xlu1 %7256  ;;  %v7107_v44 = vsel %vm10120_vm7, %v7102_v10, %v7106_v18  ;;  %v6713_v18 = vrot.slane %v6711_v3, 4  ;;  %v5583_v10 = vsel %vm10152_vm12, %v5581_v36, %v5582_v32 }
 0x46b   : > { %v7265_v39 = vpop.permute.xlu2 %7264  ;;  %7440 = vst.msk [vmem:[#allocation3 + $0x48] sm:$0xf] %vm7430_vm11, %v7257_v15 }
 0x46c   : > { %v9312_v21 = vld [vmem:[#allocation3 + $0x40] sm:$0xf]  ;;  %v6717_v25 = vor.u32 %v6716_v27, %v6713_v18 }
 0x46d   : > { %v13097_v15 = vpop.f32.mrf.mxu2 }
 0x46e   : > { %7344 = vrot.lane.b32.xlu0 %v7117_v38, %s9922_s15  ;;  %v5580_v38 = vsel %vm10152_vm12, %v9224_v4, %v5579_v62  ;;  %v6718_v53 = vrot.slane %v6717_v25, 4  ;;  %v6733_v62 = vsel %vm10120_vm7, %v6728_v13, %v6732_v40  ;;  %v5396_v4 = vld [vmem:[#allocation2 + $0x168] sm:$0xe] }
 0x46f   : > { %v9241_v40 = vrot.slane %v5396_v4, 9 }
 0x470   : > { %v7261_v47 = vpop.permute.xlu0 %7260  ;;  %6223 = vrot.lane.b32.xlu1 %v6042_v20, %s9921_s8  ;;  %v6723_v36 = vsel %vm10120_vm7, %v6718_v53, %v6722_v63  ;;  %v6043_v53 = vld [vmem:[#allocation2 + $0x174] sm:$0xf] }
 0x471   : > { %7342 = vrot.lane.b32.xlu2 %v7107_v44, %s9922_s15  ;;  %v6456_v44 = vld [vmem:[#allocation2 + $0x178] sm:$0xf]  ;;  %v9320_v13 = vld [vmem:[#allocation3 + $0x50] sm:$0xf] }
 0x472   : > { %v6140_v19 = vpop.permute.xlu1 %6139  ;;  %v9621_v37 = vld [vmem:[#allocation3 + $0x44] sm:$0xf0]  ;;  %v7128_v20 = vshll.u32 %v6456_v44, 16  ;;  %v7132_v48 = vshrl.u32 %v6456_v44, 16 }
 0x473   : > { %v6210_v59 = vpop.permute.xlu2 %6209  ;;  %6321 = vst.msk [vmem:[#allocation3 + $0x58] sm:$0xf] %vm6309_vm10, %v6140_v19  ;;  %v9313_v31 = vor.u32 %v9621_v37, %v9312_v21  ;;  %v6010_v21 = vld [vmem:[#allocation2 + $0x94] sm:$0xf]  ;;  %v5398_v37 = vld [vmem:[#allocation2 + $0x170] sm:$0x1] }
 0x474   : > { %7442 = vst.msk [vmem:[#allocation3 + $0x58] sm:$0xf] %vm7430_vm11, %v7261_v47  ;;  %v5397_v47 = vld [vmem:[#allocation2 + $0x16c] sm:$0xf]  ;;  %v7130_v18 = vrot.slane %v7128_v20, 5  ;;  %v7134_v27 = vrot.slane %v7132_v48, 4 }
 0x475   : > { %v5698_v32 = vrot.slane %v5397_v47, 5  ;;  %v5701_v25 = vrot.slane %v5398_v37, 5 }
 0x476   : > { %6157 = vrot.lane.b32.xlu0 %v6009_v46, %s9921_s8  ;;  %v6457_v46 = vld [vmem:[#allocation2 + $0x17c] sm:$0x1]  ;;  %v7135_v44 = vor.u32 %v7134_v27, %v7130_v18 }
 0x477   : > { %8592 = vmatmul.bf16.gmra.mxu1 %v9313_v31  ;;  %v13116_v31 = vpop.f32.mrf.mxu2 }
 0x478   : > { %v6144_v26 = vpop.permute.xlu0 %6143  ;;  %5771 = vrot.lane.b32.xlu1 %v5580_v38, %s9920_s24  ;;  %v7124_v38 = vrot.slane %v7122_v2, 5  ;;  %v6408_v2 = vld [vmem:[#allocation2 + $0xa0] sm:$0xf] }
 0x479   : > { %5773 = vrot.lane.b32.xlu2 %v5583_v10, %s9920_s24  ;;  %6323 = vst.msk [vmem:[#allocation3 + $0x68] sm:$0xf] %vm6309_vm10, %v6144_v26  ;;  %v5700_v10 = vrot.slane %v5698_v32, 4 }
 0x47a   : > { %7444 = vst.msk [vmem:[#allocation3 + $0x68] sm:$0xf] %vm7430_vm11, %v7265_v39  ;;  %v5768_v3 = vpop.permute.xlu1 %5767  ;;  %v7119_v39 = vshrl.u32 %v6455_v60, 16  ;;  %v5699_v60 = vsel %vm10152_vm12, %v9241_v40, %v5698_v32  ;;  %v6744_v32 = vshll.u32 %v6408_v2, 16  ;;  %v5350_v40 = vld [vmem:[#allocation2 + $0x98] sm:$0x1] }
 0x47b   : > { %v13107_v35 = vpop.permute.xlu2 %7332  ;;  %5942 = vst.msk [vmem:[#allocation3 + $0x90] sm:$0xf] %vm5923_vm0, %v5768_v3  ;;  %v9623_v29 = vld [vmem:[#allocation3 + $0x54] sm:$0xf0]  ;;  %v7138_v3 = vshll.u32 %v6457_v46, 16 }
 0x47c   : > { %v7121_v26 = vrot.slane %v7119_v39, 4  ;;  %v9321_v47 = vor.u32 %v9623_v29, %v9320_v13  ;;  %v5349_v46 = vld [vmem:[#allocation2 + $0x94] sm:$0xf]  ;;  %v6748_v29 = vshrl.u32 %v6408_v2, 16  ;;  %v6044_v13 = vld [vmem:[#allocation2 + $0x178] sm:$0xf] }
 0x47e   : > { %7280 = vrot.lane.b32.xlu0 %v6733_v62, %s9922_s15  ;;  %v7125_v20 = vor.u32 %v7124_v38, %v7121_v26  ;;  %v7136_v62 = vrot.slane %v7135_v44, 4  ;;  %v5586_v26 = vrot.slane %v5349_v46, 5  ;;  %v5348_v44 = vld [vmem:[#allocation2 + $0x90] sm:$0xe] }
 0x480   : > { %v5824_v19 = vpop.permute.xlu0 %5823  ;;  %6159 = vrot.lane.b32.xlu1 %v6010_v21, %s9921_s8  ;;  %v13129_v21 = vpop.f32.mrf.mxu2  ;;  %v7126_v27 = vrot.slane %v7125_v20, 4  ;;  %v6409_v20 = vld [vmem:[#allocation2 + $0xa4] sm:$0x1] }
 0x481   : > { %7278 = vrot.lane.b32.xlu2 %v6723_v36, %s9922_s15  ;;  %5970 = vst.msk [vmem:[#allocation3 + $0x170] sm:$0xf] %vm5923_vm0, %v5824_v19  ;;  %v7140_v36 = vrot.slane %v7138_v3, 5  ;;  %v6407_v19 = vld [vmem:[#allocation2 + $0x9c] sm:$0xf]  ;;  %v6746_v3 = vrot.slane %v6744_v32, 5 }
 0x482   : > { %6356 = vst.msk [vmem:[#allocation3 + $0x170] sm:$0xf] %vm6309_vm10, %v6210_v59  ;;  %v7263_v9 = vpop.permute.xlu1 %7262  ;;  %v5702_v59 = vsel %vm10152_vm12, %v5700_v10, %v5701_v25  ;;  %v6738_v10 = vshll.u32 %v6407_v19, 16  ;;  %v7131_v25 = vsel %vm10120_vm7, %v7126_v27, %v7130_v18 }
 0x483   : > { %v7267_v63 = vpop.permute.xlu2 %7266  ;;  %7443 = vst.msk [vmem:[#allocation3 + $0x60] sm:$0xf] %vm7430_vm11, %v7263_v9  ;;  %v7141_v4 = vsel %vm10120_vm7, %v7136_v62, %v7140_v36  ;;  %v6735_v9 = vshrl.u32 %v6407_v19, 16  ;;  %v5589_v62 = vrot.slane %v5350_v40, 5  ;;  %v9625_v36 = vld [vmem:[#allocation3 + $0x64] sm:$0xf0] }
 0x484   : > { %v6011_v19 = vld [vmem:[#allocation2 + $0x9c] sm:$0xf] }
 0x486   : > { %6225 = vrot.lane.b32.xlu0 %v6043_v53, %s9921_s8  ;;  %v6750_v53 = vrot.slane %v6748_v29, 4 }
 0x487   : > { %8597 = vmatmul.bf16.gmra.mxu1 %v9321_v47  ;;  %v6737_v47 = vrot.slane %v6735_v9, 4 }
 0x488   : > { %v6212_v48 = vpop.permute.xlu0 %6211  ;;  %5839 = vrot.lane.b32.xlu1 %v5699_v60, %s9920_s24  ;;  %v5588_v60 = vrot.slane %v5586_v26, 4  ;;  %v13148_v2 = vpop.f32.mrf.mxu2  ;;  %v6751_v27 = vor.u32 %v6750_v53, %v6746_v3 }
 0x489   : > { %5841 = vrot.lane.b32.xlu2 %v5702_v59, %s9920_s24  ;;  %v6740_v59 = vrot.slane %v6738_v10, 5 }
 0x48a   : > { %v5826_v37 = vpop.permute.xlu1 %5825  ;;  %v9328_v18 = vld [vmem:[#allocation3 + $0x60] sm:$0xf]  ;;  %v5590_v46 = vsel %vm10152_vm12, %v5588_v60, %v5589_v62  ;;  %v6752_v9 = vrot.slane %v6751_v27, 4 }
 0x48b   : > { %v5830_v39 = vpop.permute.xlu2 %5829  ;;  %5971 = vst.msk [vmem:[#allocation3 + $0x178] sm:$0xf] %vm5923_vm0, %v5826_v37  ;;  %v9329_v37 = vor.u32 %v9625_v36, %v9328_v18  ;;  %v6458_v18 = vld [vmem:[#allocation2 + $0x180] sm:$0xf]  ;;  %v5401_v36 = vld [vmem:[#allocation2 + $0x17c] sm:$0x1] }
 0x48c   : > { %5973 = vst.msk [vmem:[#allocation3 + $0x188] sm:$0xf] %vm5923_vm0, %v5830_v39  ;;  %v9225_v39 = vrot.slane %v5348_v44, 9 }
 0x48d   : > { %6357 = vst.msk [vmem:[#allocation3 + $0x178] sm:$0xf] %vm6309_vm10, %v6212_v48 }
 0x48e   : > { %7348 = vrot.lane.b32.xlu0 %v7141_v4, %s9922_s15  ;;  %7478 = vst.msk [vmem:[#allocation3 + $0x178] sm:$0xf] %vm7430_vm11, %v13107_v35  ;;  %v6754_v4 = vshll.u32 %v6409_v20, 16  ;;  %v5587_v29 = vsel %vm10152_vm12, %v9225_v39, %v5586_v26 }
 0x490   : > { %v6146_v38 = vpop.permute.xlu0 %6145  ;;  %6227 = vrot.lane.b32.xlu1 %v6044_v13, %s9921_s8  ;;  %v6756_v10 = vrot.slane %v6754_v4, 5  ;;  %v6459_v13 = vld [vmem:[#allocation2 + $0x184] sm:$0xf]  ;;  %v13163_v60 = vpop.f32.mrf.mxu2  ;;  %v6012_v4 = vld [vmem:[#allocation2 + $0xa0] sm:$0xf] }
 0x491   : > { %7346 = vrot.lane.b32.xlu2 %v7131_v25, %s9922_s15  ;;  %6324 = vst.msk [vmem:[#allocation3 + $0x70] sm:$0xf] %vm6309_vm10, %v6146_v38  ;;  %v7152_v20 = vshll.u32 %v6459_v13, 16 }
 0x492   : > { %7445 = vst.msk [vmem:[#allocation3 + $0x70] sm:$0xf] %vm7430_vm11, %v7267_v63  ;;  %v7331_v48 = vpop.permute.xlu1 %7330  ;;  %v6741_v63 = vor.u32 %v6740_v59, %v6737_v47  ;;  %v5400_v59 = vld [vmem:[#allocation2 + $0x178] sm:$0xf]  ;;  %v6757_v26 = vsel %vm10120_vm7, %v6752_v9, %v6756_v10  ;;  %v5708_v9 = vrot.slane %v5401_v36, 5 }
 0x493   : > { %v13145_v35 = vpop.permute.xlu2 %7334  ;;  %7477 = vst.msk [vmem:[#allocation3 + $0x170] sm:$0xf] %vm7430_vm11, %v7331_v48  ;;  %v7156_v48 = vshrl.u32 %v6459_v13, 16  ;;  %v5705_v39 = vrot.slane %v5400_v59, 5  ;;  %v6460_v10 = vld [vmem:[#allocation2 + $0x188] sm:$0x1] }
 0x494   : > { %v6742_v38 = vrot.slane %v6741_v63, 4  ;;  %v5399_v63 = vld [vmem:[#allocation2 + $0x174] sm:$0xe] }
 0x495   : > { %v9659_v53 = vld [vmem:[#allocation3 + $0x174] sm:$0xf0] }
 0x496   : > { %6161 = vrot.lane.b32.xlu0 %v6011_v19, %s9921_s8  ;;  %v6747_v62 = vsel %vm10120_vm7, %v6742_v38, %v6746_v3  ;;  %v7143_v19 = vshrl.u32 %v6458_v18, 16  ;;  %v5707_v3 = vrot.slane %v5705_v39, 4  ;;  %v9242_v38 = vrot.slane %v5399_v63, 9  ;;  %v6411_v63 = vld [vmem:[#allocation2 + $0xac] sm:$0xf] }
 0x497   : > { %8602 = vmatmul.bf16.gmra.mxu1 %v9329_v37  ;;  %v7146_v37 = vshll.u32 %v6458_v18, 16 }
 0x498   : > { %v7269_v32 = vpop.permute.xlu0 %7268  ;;  %5775 = vrot.lane.b32.xlu1 %v5587_v29, %s9920_s24  ;;  %v7145_v13 = vrot.slane %v7143_v19, 4  ;;  %v5706_v36 = vsel %vm10152_vm12, %v9242_v38, %v5705_v39  ;;  %v13180_v19 = vpop.f32.mrf.mxu2  ;;  %v6768_v39 = vshll.u32 %v6411_v63, 16 }
 0x499   : > { %5777 = vrot.lane.b32.xlu2 %v5590_v46, %s9920_s24  ;;  %v7154_v46 = vrot.slane %v7152_v20, 5  ;;  %v5709_v20 = vsel %vm10152_vm12, %v5707_v3, %v5708_v9  ;;  %v6410_v9 = vld [vmem:[#allocation2 + $0xa8] sm:$0xf] }
 0x49a   : > { %v6148_v40 = vpop.permute.xlu1 %6147  ;;  %v9464_v44 = vld [vmem:[#allocation3 + $0x170] sm:$0xf] }
 0x49b   : > { %v6152_v25 = vpop.permute.xlu2 %6151  ;;  %6325 = vst.msk [vmem:[#allocation3 + $0x78] sm:$0xf] %vm6309_vm10, %v6148_v40  ;;  %v9465_v47 = vor.u32 %v9659_v53, %v9464_v44  ;;  %v7148_v40 = vrot.slane %v7146_v37, 5  ;;  %v9336_v44 = vld [vmem:[#allocation3 + $0x70] sm:$0xf] }
 0x49c   : > { %6327 = vst.msk [vmem:[#allocation3 + $0x88] sm:$0xf] %vm6309_vm10, %v6152_v25 }
 0x49d   : > { %7446 = vst.msk [vmem:[#allocation3 + $0x78] sm:$0xf] %vm7430_vm11, %v7269_v32  ;;  %8687 = vmatmul.bf16.vlgmr.msrb.gmra.mxu3 %v9465_v47  ;;  %v7158_v32 = vrot.slane %v7156_v48, 4  ;;  %v6045_v47 = vld [vmem:[#allocation2 + $0x180] sm:$0xf]  ;;  %v7149_v48 = vor.u32 %v7148_v40, %v7145_v13  ;;  %v6759_v13 = vshrl.u32 %v6410_v9, 16 }
 0x49e   : > { %7284 = vrot.lane.b32.xlu0 %v6757_v26, %s9922_s15  ;;  %v7162_v26 = vshll.u32 %v6460_v10, 16  ;;  %v6762_v40 = vshll.u32 %v6410_v9, 16 }
 0x49f   : > { %v7159_v18 = vor.u32 %v7158_v32, %v7154_v46  ;;  %v7150_v32 = vrot.slane %v7149_v48, 4 }
 0x4a0   : > { %v6214_v27 = vpop.permute.xlu0 %6213  ;;  %6163 = vrot.lane.b32.xlu1 %v6012_v4, %s9921_s8 }
 0x4a1   : > { %7282 = vrot.lane.b32.xlu2 %v6747_v62, %s9922_s15  ;;  %v7160_v37 = vrot.slane %v7159_v18, 4  ;;  %v7155_v38 = vsel %vm10120_vm7, %v7150_v32, %v7154_v46  ;;  %v13195_v18 = vld [vmem:[%s13887_s4] ss:$0 sm:$0xff]  ;;  %v6412_v46 = vld [vmem:[#allocation2 + $0xb0] sm:$0x1]  ;;  %v6764_v32 = vrot.slane %v6762_v40, 5 }
 0x4a2   : > { %v5828_v25 = vpop.permute.xlu1 %5827 }
 0x4a3   : > { %v5832_v29 = vpop.permute.xlu2 %5831  ;;  %5972 = vst.msk [vmem:[#allocation3 + $0x180] sm:$0xf] %vm5923_vm0, %v5828_v25  ;;  %v6772_v25 = vshrl.u32 %v6411_v63, 16 }
 0x4a4   : > { %5974 = vst.msk [vmem:[#allocation3 + $0x190] sm:$0xf] %vm5923_vm0, %v5832_v29  ;;  %v9627_v53 = vld [vmem:[#allocation3 + $0x74] sm:$0xf0]  ;;  %v5352_v29 = vld [vmem:[#allocation2 + $0xa0] sm:$0xf] }
 0x4a5   : > { %6358 = vst.msk [vmem:[#allocation3 + $0x180] sm:$0xf] %vm6309_vm10, %v6214_v27  ;;  %v9337_v59 = vor.u32 %v9627_v53, %v9336_v44  ;;  %v7164_v27 = vrot.slane %v7162_v26, 5  ;;  %v5593_v3 = vrot.slane %v5352_v29, 5  ;;  %v6046_v53 = vld [vmem:[#allocation2 + $0x184] sm:$0xf] }
 0x4a6   : > { %6229 = vrot.lane.b32.xlu0 %v6045_v47, %s9921_s8  ;;  %7479 = vst.msk [vmem:[#allocation3 + $0x180] sm:$0xf] %vm7430_vm11, %v13145_v35  ;;  %v5353_v47 = vld [vmem:[#allocation2 + $0xa4] sm:$0x1]  ;;  %v6770_v26 = vrot.slane %v6768_v39, 5 }
 0x4a7   : > { %8607 = vmatmul.bf16.gmra.mxu1 %v9337_v59  ;;  %v7165_v10 = vsel %vm10120_vm7, %v7160_v37, %v7164_v27  ;;  %v5351_v59 = vld [vmem:[#allocation2 + $0x9c] sm:$0xe]  ;;  %v5596_v27 = vrot.slane %v5353_v47, 5 }
 0x4a8   : > { %v7337_v62 = vpop.permute.xlu0 %7336  ;;  %5843 = vrot.lane.b32.xlu1 %v5706_v36, %s9920_s24  ;;  %v13197_v36 = vpop.f32.mrf.mxu2  ;;  %v9226_v63 = vrot.slane %v5351_v59, 9 }
 0x4a9   : > { %5845 = vrot.lane.b32.xlu2 %v5709_v20, %s9920_s24  ;;  %v6774_v20 = vrot.slane %v6772_v25, 4  ;;  %13909 = vst [vmem:[#allocation14_spill] sm:$0xff] %v13197_v36  ;;  %v6778_v36 = vshll.u32 %v6412_v46, 16 }
 0x4aa   : > { %v6216_v35 = vpop.permute.xlu1 %6215 }
 0x4ab   : > { %v6220_v4 = vpop.permute.xlu2 %6219  ;;  %6359 = vst.msk [vmem:[#allocation3 + $0x188] sm:$0xf] %vm6309_vm10, %v6216_v35  ;;  %v6761_v35 = vrot.slane %v6759_v13, 4  ;;  %v6780_v46 = vrot.slane %v6778_v36, 5 }
 0x4ac   : > { %7480 = vst.msk [vmem:[#allocation3 + $0x188] sm:$0xf] %vm7430_vm11, %v7337_v62  ;;  %v5595_v62 = vrot.slane %v5593_v3, 4 }
 0x4ad   : > { %v9472_v9 = vld [vmem:[#allocation3 + $0x180] sm:$0xf]  ;;  %v6765_v40 = vor.u32 %v6764_v32, %v6761_v35 }
 0x4ae   : > { %7352 = vrot.lane.b32.xlu0 %v7165_v10, %s9922_s15  ;;  %v5597_v13 = vsel %vm10152_vm12, %v5595_v62, %v5596_v27 }
 0x4af   : > { %v6766_v27 = vrot.slane %v6765_v40, 4  ;;  %v6014_v40 = vld [vmem:[#allocation2 + $0xac] sm:$0xf] }
 0x4b0   : > { %v7271_v44 = vpop.permute.xlu0 %7270  ;;  %6231 = vrot.lane.b32.xlu1 %v6046_v53, %s9921_s8  ;;  %v6775_v53 = vor.u32 %v6774_v20, %v6770_v26  ;;  %v13221_v32 = vpop.f32.mrf.mxu2 }
 0x4b1   : > { %7350 = vrot.lane.b32.xlu2 %v7155_v38, %s9922_s15  ;;  %v6013_v38 = vld [vmem:[#allocation2 + $0xa8] sm:$0xf] }
 0x4b2   : > { %v6150_v37 = vpop.permute.xlu1 %6149  ;;  %v6776_v20 = vrot.slane %v6775_v53, 4  ;;  %v5404_v53 = vld [vmem:[#allocation2 + $0x188] sm:$0x1] }
 0x4b3   : > { %v5770_v48 = vpop.permute.xlu2 %5769  ;;  %6326 = vst.msk [vmem:[#allocation3 + $0x80] sm:$0xf] %vm6309_vm10, %v6150_v37  ;;  %v9661_v10 = vld [vmem:[#allocation3 + $0x184] sm:$0xf0]  ;;  %v6462_v37 = vld [vmem:[#allocation2 + $0x190] sm:$0xf] }
 0x4b4   : > { %5943 = vst.msk [vmem:[#allocation3 + $0x98] sm:$0xf] %vm5923_vm0, %v5770_v48  ;;  %v8573_v29 = vpop.f32.mrf.mxu1  ;;  %v9473_v25 = vor.u32 %v9661_v10, %v9472_v9  ;;  %v7180_v9 = vshrl.u32 %v6462_v37, 16 }
 0x4b5   : > { %7447 = vst.msk [vmem:[#allocation3 + $0x80] sm:$0xf] %vm7430_vm11, %v7271_v44  ;;  %v8574_v39 = vadd.f32 %v13195_v18, %v8573_v29  ;;  %v5594_v44 = vsel %vm10152_vm12, %v9226_v63, %v5593_v3  ;;  %v5403_v3 = vld [vmem:[#allocation2 + $0x184] sm:$0xf]  ;;  %v6461_v63 = vld [vmem:[#allocation2 + $0x18c] sm:$0xf] }
 0x4b6   : > { %6165 = vrot.lane.b32.xlu0 %v6013_v38, %s9921_s8  ;;  %8692 = vmatmul.bf16.gmra.mxu3 %v9473_v25  ;;  %v7176_v29 = vshll.u32 %v6462_v37, 16  ;;  %v5712_v10 = vrot.slane %v5403_v3, 5  ;;  %v7167_v38 = vshrl.u32 %v6461_v63, 16  ;;  %v6771_v25 = vsel %vm10120_vm7, %v6766_v27, %v6770_v26 }
 0x4b7   : > { %v8743_v47 = vadd.f32 %v11217_v7, %v8574_v39 }
 0x4b8   : > { %v5834_v59 = vpop.permute.xlu0 %5833  ;;  %5779 = vrot.lane.b32.xlu1 %v5594_v44, %s9920_s24  ;;  %v5402_v44 = vld [vmem:[#allocation2 + $0x180] sm:$0xe]  ;;  %v5714_v37 = vrot.slane %v5712_v10, 4  ;;  %v7169_v3 = vrot.slane %v7167_v38, 4  ;;  %v13238_v38 = vpop.f32.mrf.mxu2 }
 0x4b9   : > { %5781 = vrot.lane.b32.xlu2 %v5597_v13, %s9920_s24  ;;  %v8902_v48 = vmax.f32 %v8743_v47, 0.0  ;;  %5975 = vst.msk [vmem:[#allocation3 + $0x198] sm:$0xf] %vm5923_vm0, %v5834_v59  ;;  %v7170_v47 = vshll.u32 %v6461_v63, 16 }
 0x4ba   : > { %6361 = vst.msk [vmem:[#allocation3 + $0x198] sm:$0xf] %vm6309_vm10, %v6220_v4  ;;  %v7273_v62 = vpop.permute.xlu1 %7272  ;;  %v6781_v4 = vsel %vm10120_vm7, %v6776_v20, %v6780_v46  ;;  %v7182_v20 = vrot.slane %v7180_v9, 4 }
 0x4bb   : > { %v13213_v7 = vpop.permute.xlu2 %7274  ;;  %8966 = vst [vmem:[%s13217_s23] sm:$0xff] %v8902_v48  ;;  %v7178_v48 = vrot.slane %v7176_v29, 5  ;;  %v7172_v63 = vrot.slane %v7170_v47, 5 }
 0x4bc   : > { %7448 = vst.msk [vmem:[#allocation3 + $0x88] sm:$0xf] %vm7430_vm11, %v7273_v62  ;;  %v8575_v35 = vpop.f32.mrf.mxu1  ;;  %v5715_v62 = vrot.slane %v5404_v53, 5  ;;  %v9344_v27 = vld [vmem:[#allocation3 + $0x80] sm:$0xf] }
 0x4bd   : > { %v8576_v36 = vadd.f32 %v13195_v18, %v8575_v35  ;;  %v7183_v9 = vor.u32 %v7182_v20, %v7178_v48 }
 0x4be   : > { %7288 = vrot.lane.b32.xlu0 %v6781_v4, %s9922_s15  ;;  %v5716_v47 = vsel %vm10152_vm12, %v5714_v37, %v5715_v62  ;;  %v6414_v37 = vld [vmem:[#allocation2 + $0xb8] sm:$0xf] }
 0x4bf   : > { %v8745_v39 = vadd.f32 %v11277_v23, %v8576_v36  ;;  %v6463_v23 = vld [vmem:[#allocation2 + $0x194] sm:$0x1] }
 0x4c0   : > { %v7339_v13 = vpop.permute.xlu0 %7338  ;;  %6167 = vrot.lane.b32.xlu1 %v6014_v40, %s9921_s8  ;;  %v7186_v40 = vshll.u32 %v6463_v23, 16 }
 0x4c1   : > { %7286 = vrot.lane.b32.xlu2 %v6771_v25, %s9922_s15  ;;  %v8903_v59 = vmax.f32 %v8745_v39, 0.0  ;;  %v9243_v39 = vrot.slane %v5402_v44, 9  ;;  %v6047_v25 = vld [vmem:[#allocation2 + $0x18c] sm:$0xf] }
 0x4c2   : > { %v6218_v26 = vpop.permute.xlu1 %6217  ;;  %v7188_v23 = vrot.slane %v7186_v40, 5 }
 0x4c3   : > { %v5838_v46 = vpop.permute.xlu2 %5837  ;;  %8967 = vst [vmem:[%s13217_s23 + $0x8] sm:$0xff] %v8903_v59  ;;  %v9629_v35 = vld [vmem:[#allocation3 + $0x84] sm:$0xf0]  ;;  %v7173_v59 = vor.u32 %v7172_v63, %v7169_v3  ;;  %v5713_v20 = vsel %vm10152_vm12, %v9243_v39, %v5712_v10 }
 0x4c4   : > { %5977 = vst.msk [vmem:[#allocation3 + $0x1a8] sm:$0xf] %vm5923_vm0, %v5838_v46  ;;  %v8578_v4 = vpop.f32.mrf.mxu1  ;;  %v9345_v36 = vor.u32 %v9629_v35, %v9344_v27  ;;  %v6413_v27 = vld [vmem:[#allocation2 + $0xb4] sm:$0xf] }
 0x4c5   : > { %6360 = vst.msk [vmem:[#allocation3 + $0x190] sm:$0xf] %vm6309_vm10, %v6218_v26  ;;  %v8579_v29 = vadd.f32 %v13195_v18, %v8578_v4  ;;  %v7174_v3 = vrot.slane %v7173_v59, 4  ;;  %v5355_v26 = vld [vmem:[#allocation2 + $0xac] sm:$0xf]  ;;  %v6792_v4 = vshll.u32 %v6414_v37, 16  ;;  %v13262_v59 = vpop.f32.mrf.mxu2 }
 0x4c6   : > { %6233 = vrot.lane.b32.xlu0 %v6047_v25, %s9921_s8  ;;  %7481 = vst.msk [vmem:[#allocation3 + $0x190] sm:$0xf] %vm7430_vm11, %v7339_v13  ;;  %8612 = vmatmul.bf16.gmra.mxu1 %v9345_v36  ;;  %v7184_v13 = vrot.slane %v7183_v9, 4  ;;  %v6796_v36 = vshrl.u32 %v6414_v37, 16  ;;  %v6783_v39 = vshrl.u32 %v6413_v27, 16  ;;  %v6786_v40 = vshll.u32 %v6413_v27, 16 }
 0x4c7   : > { %v8748_v53 = vadd.f32 %v11314_v56, %v8579_v29  ;;  %v7179_v29 = vsel %vm10120_vm7, %v7174_v3, %v7178_v48  ;;  %v5356_v9 = vld [vmem:[#allocation2 + $0xb0] sm:$0x1] }
 0x4c8   : > { %v6154_v44 = vpop.permute.xlu0 %6153  ;;  %5847 = vrot.lane.b32.xlu1 %v5713_v20, %s9920_s24  ;;  %v7189_v35 = vsel %vm10120_vm7, %v7184_v13, %v7188_v23  ;;  %v5354_v20 = vld [vmem:[#allocation2 + $0xa8] sm:$0xe]  ;;  %v6798_v13 = vrot.slane %v6796_v36, 4  ;;  %v5603_v37 = vrot.slane %v5356_v9, 5  ;;  %v6785_v48 = vrot.slane %v6783_v39, 4 }
 0x4c9   : > { %5849 = vrot.lane.b32.xlu2 %v5716_v47, %s9920_s24  ;;  %v8904_v46 = vmax.f32 %v8748_v53, 0.0  ;;  %6328 = vst.msk [vmem:[#allocation3 + $0x90] sm:$0xf] %vm6309_vm10, %v6154_v44  ;;  %v6048_v47 = vld [vmem:[#allocation2 + $0x190] sm:$0xf] }
 0x4ca   : > { %7449 = vst.msk [vmem:[#allocation3 + $0x90] sm:$0xf] %vm7430_vm11, %v13213_v7  ;;  %v7341_v62 = vpop.permute.xlu1 %7340  ;;  %v5600_v7 = vrot.slane %v5355_v26, 5 }
 0x4cb   : > { %v13250_v56 = vpop.permute.xlu2 %7342  ;;  %8968 = vst [vmem:[%s13217_s23 + $0x10] sm:$0xff] %v8904_v46  ;;  %v6794_v46 = vrot.slane %v6792_v4, 5 }
 0x4cc   : > { %7482 = vst.msk [vmem:[#allocation3 + $0x198] sm:$0xf] %vm7430_vm11, %v7341_v62  ;;  %v8580_v10 = vpop.f32.mrf.mxu1  ;;  %v6415_v62 = vld [vmem:[#allocation2 + $0xbc] sm:$0x1] }
 0x4cd   : > { %v8581_v63 = vadd.f32 %v13195_v18, %v8580_v10  ;;  %v9480_v26 = vld [vmem:[#allocation3 + $0x190] sm:$0xf]  ;;  %v6788_v10 = vrot.slane %v6786_v40, 5  ;;  %v6799_v36 = vor.u32 %v6798_v13, %v6794_v46 }
 0x4ce   : > { %7356 = vrot.lane.b32.xlu0 %v7189_v35, %s9922_s15 }
 0x4cf   : > { %v8750_v25 = vadd.f32 %v11371_v0, %v8581_v63  ;;  %v5602_v0 = vrot.slane %v5600_v7, 4  ;;  %v6789_v40 = vor.u32 %v6788_v10, %v6785_v48 }
 0x4d0   : > { %v7277_v53 = vpop.permute.xlu0 %7276  ;;  %6235 = vrot.lane.b32.xlu1 %v6048_v47, %s9921_s8  ;;  %v6802_v47 = vshll.u32 %v6415_v62, 16 }
 0x4d1   : > { %7354 = vrot.lane.b32.xlu2 %v7179_v29, %s9922_s15  ;;  %v8905_v44 = vmax.f32 %v8750_v25, 0.0  ;;  %v9227_v25 = vrot.slane %v5354_v20, 9  ;;  %v6015_v29 = vld [vmem:[#allocation2 + $0xb4] sm:$0xf]  ;;  %v5604_v9 = vsel %vm10152_vm12, %v5602_v0, %v5603_v37  ;;  %v6790_v0 = vrot.slane %v6789_v40, 4 }
 0x4d2   : > { %v6156_v3 = vpop.permute.xlu1 %6155  ;;  %v6804_v62 = vrot.slane %v6802_v47, 5  ;;  %v6464_v37 = vld [vmem:[#allocation2 + $0x198] sm:$0xf] }
 0x4d3   : > { %v5774_v23 = vpop.permute.xlu2 %5773  ;;  %8969 = vst [vmem:[%s13217_s23 + $0x18] sm:$0xff] %v8905_v44  ;;  %v9663_v27 = vld [vmem:[#allocation3 + $0x194] sm:$0xf0]  ;;  %v5601_v20 = vsel %vm10152_vm12, %v9227_v25, %v5600_v7  ;;  %v9352_v25 = vld [vmem:[#allocation3 + $0x90] sm:$0xf]  ;;  %v7194_v47 = vshll.u32 %v6464_v37, 16 }
 0x4d4   : > { %5945 = vst.msk [vmem:[#allocation3 + $0xa8] sm:$0xf] %vm5923_vm0, %v5774_v23  ;;  %v8583_v35 = vpop.f32.mrf.mxu1  ;;  %v9481_v63 = vor.u32 %v9663_v27, %v9480_v26  ;;  %v6800_v23 = vrot.slane %v6799_v36, 4  ;;  %v13280_v26 = vpop.f32.mrf.mxu2  ;;  %v5406_v27 = vld [vmem:[#allocation2 + $0x190] sm:$0xf]  ;;  %v7191_v36 = vshrl.u32 %v6464_v37, 16 }
 0x4d5   : > { %6329 = vst.msk [vmem:[#allocation3 + $0x98] sm:$0xf] %vm6309_vm10, %v6156_v3  ;;  %v8584_v4 = vadd.f32 %v13195_v18, %v8583_v35  ;;  %v6465_v3 = vld [vmem:[#allocation2 + $0x19c] sm:$0xf]  ;;  %v5719_v40 = vrot.slane %v5406_v27, 5 }
 0x4d6   : > { %6169 = vrot.lane.b32.xlu0 %v6015_v29, %s9921_s8  ;;  %7450 = vst.msk [vmem:[#allocation3 + $0x98] sm:$0xf] %vm7430_vm11, %v7277_v53  ;;  %8697 = vmatmul.bf16.gmra.mxu3 %v9481_v63  ;;  %v7200_v10 = vshll.u32 %v6465_v3, 16  ;;  %v7204_v7 = vshrl.u32 %v6465_v3, 16  ;;  %v6805_v35 = vsel %vm10120_vm7, %v6800_v23, %v6804_v62  ;;  %v7193_v37 = vrot.slane %v7191_v36, 4 }
 0x4d7   : > { %v8753_v39 = vadd.f32 %v11426_v57, %v8584_v4 }
 0x4d8   : > { %v6222_v44 = vpop.permute.xlu0 %6221  ;;  %5783 = vrot.lane.b32.xlu1 %v5601_v20, %s9920_s24  ;;  %v6016_v20 = vld [vmem:[#allocation2 + $0xb8] sm:$0xf]  ;;  %v13296_v62 = vrot.slane %v7200_v10, 5  ;;  %v7206_v3 = vrot.slane %v7204_v7, 4 }
 0x4d9   : > { %5785 = vrot.lane.b32.xlu2 %v5604_v9, %s9920_s24  ;;  %v8906_v13 = vmax.f32 %v8753_v39, 0.0  ;;  %v6795_v9 = vsel %vm10120_vm7, %v6790_v0, %v6794_v46  ;;  %v5721_v0 = vrot.slane %v5719_v40, 4 }
 0x4da   : > { %v5836_v57 = vpop.permute.xlu1 %5835  ;;  %v7207_v7 = vor.u32 %v7206_v3, %v13296_v62 }
 0x4db   : > { %v13278_v53 = vpop.permute.xlu2 %7278  ;;  %8970 = vst [vmem:[%s13217_s23 + $0x20] sm:$0xff] %v8906_v13  ;;  %v5407_v13 = vld [vmem:[#allocation2 + $0x194] sm:$0x1] }
 0x4dc   : > { %5976 = vst.msk [vmem:[#allocation3 + $0x1a0] sm:$0xf] %vm5923_vm0, %v5836_v57  ;;  %v8585_v48 = vpop.f32.mrf.mxu1  ;;  %v5722_v27 = vrot.slane %v5407_v13, 5  ;;  %v7208_v3 = vrot.slane %v7207_v7, 4 }
 0x4dd   : > { %6362 = vst.msk [vmem:[#allocation3 + $0x1a0] sm:$0xf] %vm6309_vm10, %v6222_v44  ;;  %v8586_v63 = vadd.f32 %v13195_v18, %v8585_v48  ;;  %v9631_v29 = vld [vmem:[#allocation3 + $0x94] sm:$0xf0]  ;;  %v7196_v48 = vrot.slane %v7194_v47, 5 }
 0x4de   : > { %7292 = vrot.lane.b32.xlu0 %v6805_v35, %s9922_s15  ;;  %7483 = vst.msk [vmem:[#allocation3 + $0x1a0] sm:$0xf] %vm7430_vm11, %v13250_v56  ;;  %v9353_v4 = vor.u32 %v9631_v29, %v9352_v25  ;;  %v5405_v56 = vld [vmem:[#allocation2 + $0x18c] sm:$0xe]  ;;  %v835_v25 = vld [vmem:[#allocation2 + $0x1a4] sm:$0x1]  ;;  %v13300_v29 = vpop.f32.mrf.mxu2 }
 0x4df   : > { %v8755_v39 = vadd.f32 %v11484_v43, %v8586_v63  ;;  %v6466_v43 = vld [vmem:[#allocation2 + $0x1a0] sm:$0x1]  ;;  %v9244_v63 = vrot.slane %v5405_v56, 9  ;;  %v836_v47 = vsel %vm10136_vm9, 0, %v835_v25 }
 0x4e0   : > { %v7345_v44 = vpop.permute.xlu0 %7344  ;;  %8617 = vmatmul.bf16.gmra.mxu1 %v9353_v4  ;;  %6171 = vrot.lane.b32.xlu1 %v6016_v20, %s9921_s8  ;;  %v6049_v4 = vld [vmem:[#allocation2 + $0x198] sm:$0xf]  ;;  %v7210_v36 = vshll.u32 %v6466_v43, 16  ;;  %v5723_v20 = vsel %vm10152_vm12, %v5721_v0, %v5722_v27  ;;  %837 = vst [vmem:[#allocation2 + $0x1a4] sm:$0x1] %v836_v47 }
 0x4e1   : > { %7290 = vrot.lane.b32.xlu2 %v6795_v9, %s9922_s15  ;;  %v8907_v23 = vmax.f32 %v8755_v39, 0.0  ;;  %v7197_v39 = vor.u32 %v7196_v48, %v7193_v37  ;;  %v945_v0 = vld [vmem:[#allocation2 + $0x1ac] sm:$0x1] }
 0x4e2   : > { %v6224_v46 = vpop.permute.xlu1 %6223 }
 0x4e3   : > { %v5842_v57 = vpop.permute.xlu2 %5841  ;;  %8971 = vst [vmem:[%s13217_s23 + $0x28] sm:$0xff] %v8907_v23  ;;  %v5720_v23 = vsel %vm10152_vm12, %v9244_v63, %v5719_v40  ;;  %v7198_v37 = vrot.slane %v7197_v39, 4  ;;  %v946_v63 = vsel %vm10101_vm4, 0, %v945_v0 }
 0x4e4   : > { %5979 = vst.msk [vmem:[#allocation3 + $0x1b8] sm:$0xf] %vm5923_vm0, %v5842_v57  ;;  %v8588_v35 = vpop.f32.mrf.mxu1  ;;  %v7212_v57 = vrot.slane %v7210_v36, 5 }
 0x4e5   : > { %6363 = vst.msk [vmem:[#allocation3 + $0x1a8] sm:$0xf] %vm6309_vm10, %v6224_v46  ;;  %v8589_v10 = vadd.f32 %v13195_v18, %v8588_v35  ;;  %v6416_v46 = vld [vmem:[#allocation2 + $0xc0] sm:$0xf]  ;;  %v7203_v24 = vsel %vm10120_vm7, %v7198_v37, %v13296_v62  ;;  %v5357_v62 = vld [vmem:[#allocation2 + $0xb4] sm:$0xe] }
 0x4e6   : > { %6237 = vrot.lane.b32.xlu0 %v6049_v4, %s9921_s8  ;;  %7484 = vst.msk [vmem:[#allocation3 + $0x1a8] sm:$0xf] %vm7430_vm11, %v7345_v44  ;;  %v6417_v44 = vld [vmem:[#allocation2 + $0xc4] sm:$0xf]  ;;  %v7213_v25 = vsel %vm10120_vm7, %v7208_v3, %v7212_v57  ;;  %v13334_v47 = vpop.f32.mrf.mxu2 }
 0x4e7   : > { %v8758_v9 = vadd.f32 %v11536_v11, %v8589_v10  ;;  %v13318_v11 = vld [vmem:[#allocation2 + $0xb8] sm:$0xf]  ;;  %v6816_v35 = vshll.u32 %v6417_v44, 16  ;;  %v6820_v40 = vshrl.u32 %v6417_v44, 16  ;;  %v9488_v10 = vld [vmem:[#allocation3 + $0x1a0] sm:$0xf] }
 0x4e8   : > { %v6158_v13 = vpop.permute.xlu0 %6157  ;;  %5851 = vrot.lane.b32.xlu1 %v5720_v23, %s9920_s24  ;;  %947 = vst [vmem:[#allocation2 + $0x1ac] sm:$0x1] %v946_v63 }
 0x4e9   : > { %5853 = vrot.lane.b32.xlu2 %v5723_v20, %s9920_s24  ;;  %v8908_v56 = vmax.f32 %v8758_v9, 0.0  ;;  %v5607_v9 = vrot.slane %v13318_v11, 5  ;;  %v6807_v20 = vshrl.u32 %v6416_v46, 16  ;;  %v6818_v57 = vrot.slane %v6816_v35, 5 }
 0x4ea   : > { %v5772_v48 = vpop.permute.xlu1 %5771  ;;  %v6822_v44 = vrot.slane %v6820_v40, 4 }
 0x4eb   : > { %v13316_v43 = vpop.permute.xlu2 %7346  ;;  %8972 = vst [vmem:[%s13217_s23 + $0x30] sm:$0xff] %v8908_v56  ;;  %v5359_v56 = vld [vmem:[#allocation2 + $0xbc] sm:$0x1] }
 0x4ec   : > { %5944 = vst.msk [vmem:[#allocation3 + $0xa0] sm:$0xf] %vm5923_vm0, %v5772_v48  ;;  %v8590_v27 = vpop.f32.mrf.mxu1  ;;  %v5609_v48 = vrot.slane %v5607_v9, 4  ;;  %v5610_v0 = vrot.slane %v5359_v56, 5  ;;  %v6823_v35 = vor.u32 %v6822_v44, %v6818_v57 }
 0x4ed   : > { %6330 = vst.msk [vmem:[#allocation3 + $0xa0] sm:$0xf] %vm6309_vm10, %v6158_v13  ;;  %v8591_v4 = vadd.f32 %v13195_v18, %v8590_v27  ;;  %v9665_v7 = vld [vmem:[#allocation3 + $0x1a4] sm:$0xf0]  ;;  %v6810_v13 = vshll.u32 %v6416_v46, 16  ;;  %v6809_v46 = vrot.slane %v6807_v20, 4 }
 0x4ee   : > { %7360 = vrot.lane.b32.xlu0 %v7213_v25, %s9922_s15  ;;  %7451 = vst.msk [vmem:[#allocation3 + $0xa0] sm:$0xf] %vm7430_vm11, %v13278_v53  ;;  %v9489_v36 = vor.u32 %v9665_v7, %v9488_v10  ;;  %v6050_v53 = vld [vmem:[#allocation2 + $0x19c] sm:$0xf]  ;;  %v9228_v25 = vrot.slane %v5357_v62, 9  ;;  %v13354_v56 = vpop.f32.mrf.mxu2 }
 0x4ef   : > { %v8760_v39 = vadd.f32 %v11586_v45, %v8591_v4  ;;  %v6418_v45 = vld [vmem:[#allocation2 + $0xc8] sm:$0x1]  ;;  %v6812_v27 = vrot.slane %v6810_v13, 5  ;;  %v781_v4 = vld [vmem:[#allocation2 + $0xcc] sm:$0x1] }
 0x4f0   : > { %v7281_v23 = vpop.permute.xlu0 %7280  ;;  %8702 = vmatmul.bf16.gmra.mxu3 %v9489_v36  ;;  %6239 = vrot.lane.b32.xlu1 %v6050_v53, %s9921_s8  ;;  %v6017_v10 = vld [vmem:[#allocation2 + $0xc0] sm:$0xf]  ;;  %v6826_v40 = vshll.u32 %v6418_v45, 16  ;;  %v782_v36 = vsel %vm10136_vm9, 0, %v781_v4  ;;  %v5608_v53 = vsel %vm10152_vm12, %v9228_v25, %v5607_v9 }
 0x4f1   : > { %7358 = vrot.lane.b32.xlu2 %v7203_v24, %s9922_s15  ;;  %v8909_v3 = vmax.f32 %v8760_v39, 0.0  ;;  %v5611_v39 = vsel %vm10152_vm12, %v5609_v48, %v5610_v0  ;;  %v6813_v20 = vor.u32 %v6812_v27, %v6809_v46  ;;  %783 = vst [vmem:[#allocation2 + $0xcc] sm:$0x1] %v782_v36  ;;  %v7224_v48 = vshll.u32 %v6468_v55, 16 }
 0x4f2   : > { %v6160_v11 = vpop.permute.xlu1 %6159  ;;  %v6828_v62 = vrot.slane %v6826_v40, 5  ;;  %v7228_v0 = vshrl.u32 %v6468_v55, 16  ;;  %v6469_v55 = vld [vmem:[#allocation2 + $0x1ac] sm:$0x1] }
 0x4f3   : > { %v5778_v37 = vpop.permute.xlu2 %5777  ;;  %8973 = vst [vmem:[%s13217_s23 + $0x38] sm:$0xff] %v8909_v3  ;;  %v6814_v45 = vrot.slane %v6813_v20, 4 }
 0x4f4   : > { %5947 = vst.msk [vmem:[#allocation3 + $0xb8] sm:$0xf] %vm5923_vm0, %v5778_v37  ;;  %v8593_v63 = vpop.f32.mrf.mxu1 }
 0x4f5   : > { %6331 = vst.msk [vmem:[#allocation3 + $0xa8] sm:$0xf] %vm6309_vm10, %v6160_v11  ;;  %v8594_v7 = vadd.f32 %v13195_v18, %v8593_v63  ;;  %v5409_v11 = vld [vmem:[#allocation2 + $0x19c] sm:$0xf]  ;;  %v9360_v4 = vld [vmem:[#allocation3 + $0xa0] sm:$0xf]  ;;  %v6819_v36 = vsel %vm10120_vm7, %v6814_v45, %v6818_v57 }
 0x4f6   : > { %6173 = vrot.lane.b32.xlu0 %v6017_v10, %s9921_s8  ;;  %7452 = vst.msk [vmem:[#allocation3 + $0xa8] sm:$0xf] %vm7430_vm11, %v7281_v23  ;;  %v6824_v23 = vrot.slane %v6823_v35, 4  ;;  %v5726_v35 = vrot.slane %v5409_v11, 5  ;;  %v6051_v57 = vld [vmem:[#allocation2 + $0x1a4] sm:$0xf] }
 0x4f7   : > { %v8763_v24 = vadd.f32 %v11626_v1, %v8594_v7  ;;  %v6467_v1 = vld [vmem:[#allocation2 + $0x1a4] sm:$0xf] }
 0x4f8   : > { %v6226_v13 = vpop.permute.xlu0 %6225  ;;  %5787 = vrot.lane.b32.xlu1 %v5608_v53, %s9920_s24  ;;  %v7215_v46 = vshrl.u32 %v6467_v1, 16  ;;  %v7218_v27 = vshll.u32 %v6467_v1, 16  ;;  %v6829_v63 = vsel %vm10120_vm7, %v6824_v23, %v6828_v62  ;;  %v5410_v53 = vld [vmem:[#allocation2 + $0x1a0] sm:$0x1]  ;;  %v13375_v1 = vpop.f32.mrf.mxu2  ;;  %v5728_v45 = vrot.slane %v5726_v35, 4 }
 0x4f9   : > { %5789 = vrot.lane.b32.xlu2 %v5611_v39, %s9920_s24  ;;  %v8910_v3 = vmax.f32 %v8763_v24, 0.0  ;;  %v13371_v24 = vrot.slane %v7224_v48, 5  ;;  %v7230_v39 = vrot.slane %v7228_v0, 4  ;;  %v5729_v11 = vrot.slane %v5410_v53, 5 }
 0x4fa   : > { %v5840_v37 = vpop.permute.xlu1 %5839  ;;  %v7217_v23 = vrot.slane %v7215_v46, 4  ;;  %v7234_v0 = vshll.u32 %v6469_v55, 16  ;;  %v6419_v55 = vld [vmem:[#allocation2 + $0xcc] sm:$0xf] }
 0x4fb   : > { %v13357_v44 = vpop.permute.xlu2 %7282  ;;  %8974 = vst [vmem:[%s13217_s23 + $0x40] sm:$0xff] %v8910_v3  ;;  %v7231_v48 = vor.u32 %v7230_v39, %v13371_v24  ;;  %v6420_v39 = vld [vmem:[#allocation2 + $0xd0] sm:$0xf] }
 0x4fc   : > { %5978 = vst.msk [vmem:[#allocation3 + $0x1b0] sm:$0xf] %vm5923_vm0, %v5840_v37  ;;  %v8595_v9 = vpop.f32.mrf.mxu1 }
 0x4fd   : > { %6364 = vst.msk [vmem:[#allocation3 + $0x1b0] sm:$0xf] %vm6309_vm10, %v6226_v13  ;;  %v8596_v25 = vadd.f32 %v13195_v18, %v8595_v9  ;;  %v9633_v10 = vld [vmem:[#allocation3 + $0xa4] sm:$0xf0]  ;;  %v6018_v13 = vld [vmem:[#allocation2 + $0xc4] sm:$0xf] }
 0x4fe   : > { %7296 = vrot.lane.b32.xlu0 %v6829_v63, %s9922_s15  ;;  %7485 = vst.msk [vmem:[#allocation3 + $0x1b0] sm:$0xf] %vm7430_vm11, %v13316_v43  ;;  %v9361_v7 = vor.u32 %v9633_v10, %v9360_v4  ;;  %v5408_v43 = vld [vmem:[#allocation2 + $0x198] sm:$0xe]  ;;  %v5730_v4 = vsel %vm10152_vm12, %v5728_v45, %v5729_v11  ;;  %v7232_v10 = vrot.slane %v7231_v48, 4 }
 0x4ff   : > { %v8765_v40 = vadd.f32 %v11681_v16, %v8596_v25  ;;  %v7220_v16 = vrot.slane %v7218_v27, 5  ;;  %v9245_v63 = vrot.slane %v5408_v43, 9  ;;  %v6840_v43 = vshll.u32 %v6420_v39, 16 }
 0x500   : > { %v7349_v20 = vpop.permute.xlu0 %7348  ;;  %8622 = vmatmul.bf16.gmra.mxu1 %v9361_v7  ;;  %6175 = vrot.lane.b32.xlu1 %v6018_v13, %s9921_s8  ;;  %v7236_v7 = vrot.slane %v7234_v0, 5 }
 0x501   : > { %7294 = vrot.lane.b32.xlu2 %v6819_v36, %s9922_s15  ;;  %v8911_v3 = vmax.f32 %v8765_v40, 0.0  ;;  %v7221_v27 = vor.u32 %v7220_v16, %v7217_v23  ;;  %v5727_v36 = vsel %vm10152_vm12, %v9245_v63, %v5726_v35  ;;  %v6844_v23 = vshrl.u32 %v6420_v39, 16  ;;  %v6052_v63 = vld [vmem:[#allocation2 + $0x1a8] sm:$0xf] }
 0x502   : > { %v6228_v37 = vpop.permute.xlu1 %6227  ;;  %v6831_v35 = vshrl.u32 %v6419_v55, 16 }
 0x503   : > { %v5846_v62 = vpop.permute.xlu2 %5845  ;;  %8975 = vst [vmem:[%s13217_s23 + $0x48] sm:$0xff] %v8911_v3  ;;  %v7222_v53 = vrot.slane %v7221_v27, 4 }
 0x504   : > { %5981 = vst.msk [vmem:[#allocation3 + $0x1c8] sm:$0xf] %vm5923_vm0, %v5846_v62  ;;  %v8598_v9 = vpop.f32.mrf.mxu1  ;;  %v5361_v62 = vld [vmem:[#allocation2 + $0xc4] sm:$0xf] }
 0x505   : > { %6365 = vst.msk [vmem:[#allocation3 + $0x1b8] sm:$0xf] %vm6309_vm10, %v6228_v37  ;;  %v8599_v46 = vadd.f32 %v13195_v18, %v8598_v9  ;;  %v13397_v37 = vpop.f32.mrf.mxu2  ;;  %v9496_v11 = vld [vmem:[#allocation3 + $0x1b0] sm:$0xf]  ;;  %v7227_v0 = vsel %vm10120_vm7, %v7222_v53, %v13371_v24  ;;  %v5614_v27 = vrot.slane %v5361_v62, 5 }
 0x506   : > { %6241 = vrot.lane.b32.xlu0 %v6051_v57, %s9921_s8  ;;  %7486 = vst.msk [vmem:[#allocation3 + $0x1b8] sm:$0xf] %vm7430_vm11, %v7349_v20  ;;  %v6834_v57 = vshll.u32 %v6419_v55, 16  ;;  %v6421_v24 = vld [vmem:[#allocation2 + $0xd4] sm:$0x1] }
 0x507   : > { %v8768_v25 = vadd.f32 %v11732_v17, %v8599_v46  ;;  %v7237_v17 = vsel %vm10120_vm7, %v7232_v10, %v7236_v7  ;;  %v5362_v7 = vld [vmem:[#allocation2 + $0xc8] sm:$0x1]  ;;  %v6019_v53 = vld [vmem:[#allocation2 + $0xcc] sm:$0xf]  ;;  %v5616_v55 = vrot.slane %v5614_v27, 4 }
 0x508   : > { %v6162_v40 = vpop.permute.xlu0 %6161  ;;  %5855 = vrot.lane.b32.xlu1 %v5727_v36, %s9920_s24  ;;  %v5360_v36 = vld [vmem:[#allocation2 + $0xc0] sm:$0xe]  ;;  %v6836_v39 = vrot.slane %v6834_v57, 5 }
 0x509   : > { %5857 = vrot.lane.b32.xlu2 %v5730_v4, %s9920_s24  ;;  %v8912_v13 = vmax.f32 %v8768_v25, 0.0  ;;  %v13408_v25 = vrot.slane %v6840_v43, 5  ;;  %v6846_v4 = vrot.slane %v6844_v23, 4  ;;  %v6850_v43 = vshll.u32 %v6421_v24, 16 }
 0x50a   : > { %v5776_v3 = vpop.permute.xlu1 %5775 }
 0x50b   : > { %v13391_v20 = vpop.permute.xlu2 %7350  ;;  %8976 = vst [vmem:[%s13217_s23 + $0x50] sm:$0xff] %v8912_v13 }
 0x50c   : > { %5946 = vst.msk [vmem:[#allocation3 + $0xb0] sm:$0xf] %vm5923_vm0, %v5776_v3  ;;  %v8600_v16 = vpop.f32.mrf.mxu1  ;;  %v6847_v3 = vor.u32 %v6846_v4, %v13408_v25 }
 0x50d   : > { %6332 = vst.msk [vmem:[#allocation3 + $0xb0] sm:$0xf] %vm6309_vm10, %v6162_v40  ;;  %v8601_v45 = vadd.f32 %v13195_v18, %v8600_v16  ;;  %v9667_v48 = vld [vmem:[#allocation3 + $0x1b4] sm:$0xf0]  ;;  %v9229_v16 = vrot.slane %v5360_v36, 9 }
 0x50e   : > { %7364 = vrot.lane.b32.xlu0 %v7237_v17, %s9922_s15  ;;  %7453 = vst.msk [vmem:[#allocation3 + $0xb0] sm:$0xf] %vm7430_vm11, %v13357_v44  ;;  %v9497_v9 = vor.u32 %v9667_v48, %v9496_v11  ;;  %v6833_v44 = vrot.slane %v6831_v35, 4  ;;  %v5617_v17 = vrot.slane %v5362_v7, 5  ;;  %v13419_v35 = vpop.f32.mrf.mxu2  ;;  %v6848_v48 = vrot.slane %v6847_v3, 4 }
 0x50f   : > { %v8770_v46 = vadd.f32 %v11778_v52, %v8601_v45  ;;  %v6020_v3 = vld [vmem:[#allocation2 + $0xd0] sm:$0xf] }
 0x510   : > { %v7285_v10 = vpop.permute.xlu0 %7284  ;;  %8707 = vmatmul.bf16.gmra.mxu3 %v9497_v9  ;;  %6243 = vrot.lane.b32.xlu1 %v6052_v63, %s9921_s8  ;;  %v6837_v45 = vor.u32 %v6836_v39, %v6833_v44  ;;  %v5618_v11 = vsel %vm10152_vm12, %v5616_v55, %v5617_v17  ;;  %v5615_v63 = vsel %vm10152_vm12, %v9229_v16, %v5614_v27 }
 0x511   : > { %7362 = vrot.lane.b32.xlu2 %v7227_v0, %s9922_s15  ;;  %v8913_v40 = vmax.f32 %v8770_v46, 0.0  ;;  %v6852_v0 = vrot.slane %v6850_v43, 5 }
 0x512   : > { %v6164_v52 = vpop.permute.xlu1 %6163  ;;  %v6838_v4 = vrot.slane %v6837_v45, 4 }
 0x513   : > { %v5782_v13 = vpop.permute.xlu2 %5781  ;;  %8977 = vst [vmem:[%s13217_s23 + $0x58] sm:$0xff] %v8913_v40  ;;  %v5364_v40 = vld [vmem:[#allocation2 + $0xe8] sm:$0xf] }
 0x514   : > { %5949 = vst.msk [vmem:[#allocation3 + $0xc8] sm:$0xf] %vm5923_vm0, %v5782_v13  ;;  %v8603_v23 = vpop.f32.mrf.mxu1  ;;  %v6422_v13 = vld [vmem:[#allocation2 + $0xf0] sm:$0xf]  ;;  %v6843_v55 = vsel %vm10120_vm7, %v6838_v4, %v13408_v25 }
 0x515   : > { %6333 = vst.msk [vmem:[#allocation3 + $0xb8] sm:$0xf] %vm6309_vm10, %v6164_v52  ;;  %v8604_v62 = vadd.f32 %v13195_v18, %v8603_v23  ;;  %v5621_v23 = vrot.slane %v5364_v40, 5  ;;  %v6855_v16 = vshrl.u32 %v6422_v13, 16 }
 0x516   : > { %6177 = vrot.lane.b32.xlu0 %v6019_v53, %s9921_s8  ;;  %7454 = vst.msk [vmem:[#allocation3 + $0xb8] sm:$0xf] %vm7430_vm11, %v7285_v10  ;;  %v6423_v10 = vld [vmem:[#allocation2 + $0xf4] sm:$0xf]  ;;  %v9368_v53 = vld [vmem:[#allocation3 + $0xb0] sm:$0xf] }
 0x517   : > { %v8773_v57 = vadd.f32 %v11833_v50, %v8604_v62  ;;  %v6853_v50 = vsel %vm10120_vm7, %v6848_v48, %v6852_v0  ;;  %v6864_v44 = vshll.u32 %v6423_v10, 16  ;;  %v6868_v39 = vshrl.u32 %v6423_v10, 16  ;;  %v5363_v0 = vld [vmem:[#allocation2 + $0xe4] sm:$0xe] }
 0x518   : > { %v6230_v9 = vpop.permute.xlu0 %6229  ;;  %5791 = vrot.lane.b32.xlu1 %v5615_v63, %s9920_s24  ;;  %v6858_v62 = vshll.u32 %v6422_v13, 16  ;;  %v5623_v10 = vrot.slane %v5621_v23, 4 }
 0x519   : > { %5793 = vrot.lane.b32.xlu2 %v5618_v11, %s9920_s24  ;;  %v8914_v46 = vmax.f32 %v8773_v57, 0.0  ;;  %v5365_v57 = vld [vmem:[#allocation2 + $0xec] sm:$0x1]  ;;  %v8857_v11 = vpop.f32.mrf.mxu2 }
 0x51a   : > { %v5844_v24 = vpop.permute.xlu1 %5843  ;;  %v6860_v40 = vrot.slane %v6858_v62, 5 }
 0x51b   : > { %v13428_v7 = vpop.permute.xlu2 %7286  ;;  %8978 = vst [vmem:[%s13217_s23 + $0x60] sm:$0xff] %v8914_v46  ;;  %v6424_v46 = vld [vmem:[#allocation2 + $0xf8] sm:$0x1] }
 0x51c   : > { %5980 = vst.msk [vmem:[#allocation3 + $0x1c0] sm:$0xf] %vm5923_vm0, %v5844_v24  ;;  %v8605_v36 = vpop.f32.mrf.mxu1  ;;  %v6857_v24 = vrot.slane %v6855_v16, 4 }
 0x51d   : > { %6366 = vst.msk [vmem:[#allocation3 + $0x1c0] sm:$0xf] %vm6309_vm10, %v6230_v9  ;;  %v8606_v27 = vadd.f32 %v13195_v18, %v8605_v36  ;;  %v9635_v52 = vld [vmem:[#allocation3 + $0xb4] sm:$0xf0]  ;;  %v6870_v9 = vrot.slane %v6868_v39, 4 }
 0x51e   : > { %7300 = vrot.lane.b32.xlu0 %v6853_v50, %s9922_s15  ;;  %7487 = vst.msk [vmem:[#allocation3 + $0x1c0] sm:$0xf] %vm7430_vm11, %v13391_v20  ;;  %v9369_v17 = vor.u32 %v9635_v52, %v9368_v53  ;;  %v13445_v20 = vrot.slane %v6864_v44, 5  ;;  %v5624_v50 = vrot.slane %v5365_v57, 5  ;;  %v6021_v53 = vld [vmem:[#allocation2 + $0xf0] sm:$0xf] }
 0x51f   : > { %v8775_v43 = vadd.f32 %v11868_v34, %v8606_v27  ;;  %v9230_v27 = vrot.slane %v5363_v0, 9  ;;  %v6874_v52 = vshll.u32 %v6424_v46, 16  ;;  %v5367_v46 = vld [vmem:[#allocation2 + $0xf4] sm:$0xf] }
 0x520   : > { %v7353_v45 = vpop.permute.xlu0 %7352  ;;  %8627 = vmatmul.bf16.gmra.mxu1 %v9369_v17  ;;  %6179 = vrot.lane.b32.xlu1 %v6020_v3, %s9921_s8  ;;  %v8688_v48 = vpop.f32.mrf.mxu3  ;;  %v6871_v39 = vor.u32 %v6870_v9, %v13445_v20  ;;  %v5625_v3 = vsel %vm10152_vm12, %v5623_v10, %v5624_v50 }
 0x521   : > { %7298 = vrot.lane.b32.xlu2 %v6843_v55, %s9922_s15  ;;  %v8915_v25 = vmax.f32 %v8775_v43, 0.0  ;;  %v8689_v34 = vadd.f32 %v13195_v18, %v8688_v48  ;;  %v6861_v43 = vor.u32 %v6860_v40, %v6857_v24  ;;  %v5622_v62 = vsel %vm10152_vm12, %v9230_v27, %v5621_v23  ;;  %v6426_v48 = vld [vmem:[#allocation2 + $0x100] sm:$0xf]  ;;  %v8859_v9 = vpop.f32.mrf.mxu2  ;;  %v6425_v24 = vld [vmem:[#allocation2 + $0xfc] sm:$0xf] }
 0x522   : > { %v6232_v4 = vpop.permute.xlu1 %6231  ;;  %v6888_v10 = vshll.u32 %v6426_v48, 16  ;;  %v6892_v50 = vshrl.u32 %v6426_v48, 16 }
 0x523   : > { %v5850_v63 = vpop.permute.xlu2 %5849  ;;  %8979 = vst [vmem:[%s13217_s23 + $0x68] sm:$0xff] %v8915_v25  ;;  %v8858_v36 = vadd.f32 %v8857_v11, %v8689_v34  ;;  %v6872_v25 = vrot.slane %v6871_v39, 4  ;;  %v5628_v39 = vrot.slane %v5367_v46, 5  ;;  %v6023_v46 = vld [vmem:[#allocation2 + $0xfc] sm:$0xf] }
 0x524   : > { %5983 = vst.msk [vmem:[#allocation3 + $0x1d8] sm:$0xf] %vm5923_vm0, %v5850_v63  ;;  %v8608_v13 = vpop.f32.mrf.mxu1  ;;  %v6862_v63 = vrot.slane %v6861_v43, 4 }
 0x525   : > { %6367 = vst.msk [vmem:[#allocation3 + $0x1c8] sm:$0xf] %vm6309_vm10, %v6232_v4  ;;  %v8609_v44 = vadd.f32 %v13195_v18, %v8608_v13  ;;  %v8948_v55 = vmax.f32 %v8858_v36, 0.0  ;;  %v9504_v13 = vld [vmem:[#allocation3 + $0x1c0] sm:$0xf]  ;;  %v5630_v48 = vrot.slane %v5628_v39, 4 }
 0x526   : > { %6181 = vrot.lane.b32.xlu0 %v6021_v53, %s9921_s8  ;;  %7488 = vst.msk [vmem:[#allocation3 + $0x1c8] sm:$0xf] %vm7430_vm11, %v7353_v45  ;;  %v6876_v45 = vrot.slane %v6874_v52, 5 }
 0x527   : > { %v8778_v17 = vadd.f32 %v11913_v5, %v8609_v44  ;;  %9012 = vst [vmem:[%s13217_s23 + $0x170] sm:$0xff] %v8948_v55  ;;  %v6867_v55 = vsel %vm10120_vm7, %v6862_v63, %v13445_v20 }
 0x528   : > { %v6166_v16 = vpop.permute.xlu0 %6165  ;;  %5795 = vrot.lane.b32.xlu1 %v5622_v62, %s9920_s24  ;;  %v8690_v11 = vpop.f32.mrf.mxu3  ;;  %v6877_v40 = vsel %vm10120_vm7, %v6872_v25, %v6876_v45  ;;  %v5368_v62 = vld [vmem:[#allocation2 + $0xf8] sm:$0x1]  ;;  %v6427_v45 = vld [vmem:[#allocation2 + $0x104] sm:$0x1] }
 0x529   : > { %5797 = vrot.lane.b32.xlu2 %v5625_v3, %s9920_s24  ;;  %v8916_v57 = vmax.f32 %v8778_v17, 0.0  ;;  %v8691_v5 = vadd.f32 %v13195_v18, %v8690_v11  ;;  %v13474_v18 = vld [vmem:[%s13887_s4] ss:$0 sm:$0xff]  ;;  %v6879_v17 = vshrl.u32 %v6425_v24, 16  ;;  %v6882_v3 = vshll.u32 %v6425_v24, 16 }
 0x52a   : > { %v5780_v34 = vpop.permute.xlu1 %5779  ;;  %v6890_v11 = vrot.slane %v6888_v10, 5 }
 0x52b   : > { %v13464_v0 = vpop.permute.xlu2 %7354  ;;  %8980 = vst [vmem:[%s13217_s23 + $0x70] sm:$0xff] %v8916_v57  ;;  %v8860_v4 = vadd.f32 %v8859_v9, %v8691_v5  ;;  %v5631_v5 = vrot.slane %v5368_v62, 5  ;;  %v6881_v9 = vrot.slane %v6879_v17, 4 }
 0x52c   : > { %5948 = vst.msk [vmem:[#allocation3 + $0xc0] sm:$0xf] %vm5923_vm0, %v5780_v34  ;;  %v8610_v23 = vpop.f32.mrf.mxu1  ;;  %v6884_v34 = vrot.slane %v6882_v3, 5 }
 0x52d   : > { %6334 = vst.msk [vmem:[#allocation3 + $0xc0] sm:$0xf] %vm6309_vm10, %v6166_v16  ;;  %v8611_v36 = vadd.f32 %v13474_v18, %v8610_v23  ;;  %v9669_v27 = vld [vmem:[#allocation3 + $0x1c4] sm:$0xf0]  ;;  %v8949_v53 = vmax.f32 %v8860_v4, 0.0  ;;  %v6898_v23 = vshll.u32 %v6427_v45, 16  ;;  %v5632_v10 = vsel %vm10152_vm12, %v5630_v48, %v5631_v5 }
 0x52e   : > { %7304 = vrot.lane.b32.xlu0 %v6877_v40, %s9922_s15  ;;  %7455 = vst.msk [vmem:[#allocation3 + $0xc0] sm:$0xf] %vm7430_vm11, %v13428_v7  ;;  %v9505_v44 = vor.u32 %v9669_v27, %v9504_v13  ;;  %v6022_v16 = vld [vmem:[#allocation2 + $0xf4] sm:$0xf]  ;;  %v5366_v7 = vld [vmem:[#allocation2 + $0xf0] sm:$0xe] }
 0x52f   : > { %v8780_v52 = vadd.f32 %v11959_v30, %v8611_v36  ;;  %9013 = vst [vmem:[%s13217_s23 + $0x178] sm:$0xff] %v8949_v53  ;;  %v6894_v30 = vrot.slane %v6892_v50, 4  ;;  %v9231_v63 = vrot.slane %v5366_v7, 9  ;;  %v6885_v50 = vor.u32 %v6884_v34, %v6881_v9  ;;  %v8862_v36 = vpop.f32.mrf.mxu2  ;;  %v6429_v53 = vld [vmem:[#allocation2 + $0x10c] sm:$0xf] }
 0x530   : > { %v7289_v43 = vpop.permute.xlu0 %7288  ;;  %8712 = vmatmul.bf16.gmra.mxu3 %v9505_v44  ;;  %6183 = vrot.lane.b32.xlu1 %v6022_v16, %s9921_s8  ;;  %v6900_v27 = vrot.slane %v6898_v23, 5  ;;  %v6912_v16 = vshll.u32 %v6429_v53, 16  ;;  %v6916_v62 = vshrl.u32 %v6429_v53, 16  ;;  %v5371_v9 = vld [vmem:[#allocation2 + $0x104] sm:$0x1] }
 0x531   : > { %7302 = vrot.lane.b32.xlu2 %v6867_v55, %s9922_s15  ;;  %v8917_v57 = vmax.f32 %v8780_v52, 0.0  ;;  %v6895_v4 = vor.u32 %v6894_v30, %v6890_v11  ;;  %v5629_v40 = vsel %vm10152_vm12, %v9231_v63, %v5628_v39  ;;  %v6886_v3 = vrot.slane %v6885_v50, 4  ;;  %v5369_v23 = vld [vmem:[#allocation2 + $0xfc] sm:$0xe] }
 0x532   : > { %v6168_v20 = vpop.permute.xlu1 %6167 }
 0x533   : > { %v5786_v25 = vpop.permute.xlu2 %5785  ;;  %8981 = vst [vmem:[%s13217_s23 + $0x78] sm:$0xff] %v8917_v57  ;;  %v6896_v13 = vrot.slane %v6895_v4, 4  ;;  %v6428_v57 = vld [vmem:[#allocation2 + $0x108] sm:$0xf]  ;;  %v6891_v5 = vsel %vm10120_vm7, %v6886_v3, %v6890_v11  ;;  %v6024_v4 = vld [vmem:[#allocation2 + $0x100] sm:$0xf] }
 0x534   : > { %5951 = vst.msk [vmem:[#allocation3 + $0xd8] sm:$0xf] %vm5923_vm0, %v5786_v25  ;;  %v6903_v34 = vshrl.u32 %v6428_v57, 16  ;;  %v6906_v63 = vshll.u32 %v6428_v57, 16 }
 0x535   : > { %6335 = vst.msk [vmem:[#allocation3 + $0xc8] sm:$0xf] %vm6309_vm10, %v6168_v20  ;;  %v6901_v7 = vsel %vm10120_vm7, %v6896_v13, %v6900_v27  ;;  %v9376_v30 = vld [vmem:[#allocation3 + $0xc0] sm:$0xf] }
 0x536   : > { %6185 = vrot.lane.b32.xlu0 %v6023_v46, %s9921_s8  ;;  %7456 = vst.msk [vmem:[#allocation3 + $0xc8] sm:$0xf] %vm7430_vm11, %v7289_v43  ;;  %v5370_v43 = vld [vmem:[#allocation2 + $0x100] sm:$0xf] }
 0x537   : > { %v5635_v20 = vrot.slane %v5370_v43, 5  ;;  %v9232_v43 = vrot.slane %v5369_v23, 9 }
 0x538   : > { %v6234_v24 = vpop.permute.xlu0 %6233  ;;  %5799 = vrot.lane.b32.xlu1 %v5629_v40, %s9920_s24  ;;  %v5638_v40 = vrot.slane %v5371_v9, 5 }
 0x539   : > { %5801 = vrot.lane.b32.xlu2 %v5632_v10, %s9920_s24  ;;  %v8693_v44 = vpop.f32.mrf.mxu3  ;;  %v6914_v10 = vrot.slane %v6912_v16, 5  ;;  %v5637_v53 = vrot.slane %v5635_v20, 4  ;;  %v5636_v9 = vsel %vm10152_vm12, %v9232_v43, %v5635_v20 }
 0x53a   : > { %v8694_v55 = vadd.f32 %v13474_v18, %v8693_v44  ;;  %v5848_v17 = vpop.permute.xlu1 %5847  ;;  %v6905_v44 = vrot.slane %v6903_v34, 4 }
 0x53b   : > { %v13498_v52 = vpop.permute.xlu2 %7290  ;;  %5982 = vst.msk [vmem:[#allocation3 + $0x1d0] sm:$0xf] %vm5923_vm0, %v5848_v17  ;;  %v8864_v17 = vpop.f32.mrf.mxu2 }
 0x53c   : > { %v8863_v39 = vadd.f32 %v8862_v36, %v8694_v55  ;;  %6368 = vst.msk [vmem:[#allocation3 + $0x1d0] sm:$0xf] %vm6309_vm10, %v6234_v24  ;;  %v6430_v36 = vld [vmem:[#allocation2 + $0x110] sm:$0x1]  ;;  %v6908_v55 = vrot.slane %v6906_v63, 5 }
 0x53d   : > { %v9637_v25 = vld [vmem:[#allocation3 + $0xc4] sm:$0xf0]  ;;  %7489 = vst.msk [vmem:[#allocation3 + $0x1d0] sm:$0xf] %vm7430_vm11, %v13464_v0  ;;  %v6918_v0 = vrot.slane %v6916_v62, 4 }
 0x53e   : > { %7308 = vrot.lane.b32.xlu0 %v6901_v7, %s9922_s15  ;;  %v9377_v45 = vor.u32 %v9637_v25, %v9376_v30  ;;  %v8950_v48 = vmax.f32 %v8863_v39, 0.0  ;;  %v6025_v62 = vld [vmem:[#allocation2 + $0x108] sm:$0xf]  ;;  %v6922_v39 = vshll.u32 %v6430_v36, 16  ;;  %v5639_v25 = vsel %vm10152_vm12, %v5637_v53, %v5638_v40 }
 0x53f   : > { %v6919_v57 = vor.u32 %v6918_v0, %v6914_v10 }
 0x540   : > { %v7357_v46 = vpop.permute.xlu0 %7356  ;;  %8632 = vmatmul.bf16.gmra.mxu1 %v9377_v45  ;;  %9014 = vst [vmem:[%s13217_s23 + $0x180] sm:$0xff] %v8950_v48  ;;  %6187 = vrot.lane.b32.xlu1 %v6024_v4, %s9921_s8  ;;  %v6909_v45 = vor.u32 %v6908_v55, %v6905_v44  ;;  %v6924_v63 = vrot.slane %v6922_v39, 5  ;;  %v5374_v39 = vld [vmem:[#allocation2 + $0x110] sm:$0x1] }
 0x541   : > { %7306 = vrot.lane.b32.xlu2 %v6891_v5, %s9922_s15  ;;  %v8695_v50 = vpop.f32.mrf.mxu3  ;;  %v6920_v34 = vrot.slane %v6919_v57, 4  ;;  %v6026_v57 = vld [vmem:[#allocation2 + $0x10c] sm:$0xf] }
 0x542   : > { %v8696_v11 = vadd.f32 %v13474_v18, %v8695_v50  ;;  %v6236_v13 = vpop.permute.xlu1 %6235  ;;  %v6910_v0 = vrot.slane %v6909_v45, 4  ;;  %v5373_v50 = vld [vmem:[#allocation2 + $0x10c] sm:$0xf] }
 0x543   : > { %v5854_v24 = vpop.permute.xlu2 %5853  ;;  %v8613_v27 = vpop.f32.mrf.mxu1  ;;  %6369 = vst.msk [vmem:[#allocation3 + $0x1d8] sm:$0xf] %vm6309_vm10, %v6236_v13 }
 0x544   : > { %5985 = vst.msk [vmem:[#allocation3 + $0x1e8] sm:$0xf] %vm5923_vm0, %v5854_v24  ;;  %v8614_v3 = vadd.f32 %v13474_v18, %v8613_v27  ;;  %v8865_v16 = vadd.f32 %v8864_v17, %v8696_v11  ;;  %v6431_v24 = vld [vmem:[#allocation2 + $0x114] sm:$0xf]  ;;  %v9512_v36 = vld [vmem:[#allocation3 + $0x1d0] sm:$0xf]  ;;  %v6925_v11 = vsel %vm10120_vm7, %v6920_v34, %v6924_v63  ;;  %v6915_v55 = vsel %vm10120_vm7, %v6910_v0, %v6914_v10 }
 0x545   : > { %7490 = vst.msk [vmem:[#allocation3 + $0x1d8] sm:$0xf] %vm7430_vm11, %v7357_v46  ;;  %v5642_v17 = vrot.slane %v5373_v50, 5  ;;  %v6930_v43 = vshll.u32 %v6431_v24, 16  ;;  %v6027_v63 = vld [vmem:[#allocation2 + $0x114] sm:$0xf] }
 0x546   : > { %6189 = vrot.lane.b32.xlu0 %v6025_v62, %s9921_s8  ;;  %v8783_v7 = vadd.f32 %v12006_v41, %v8614_v3  ;;  %v8951_v30 = vmax.f32 %v8865_v16, 0.0  ;;  %v6432_v41 = vld [vmem:[#allocation2 + $0x118] sm:$0xf]  ;;  %v6927_v3 = vshrl.u32 %v6431_v24, 16 }
 0x547   : > { %v6936_v27 = vshll.u32 %v6432_v41, 16  ;;  %v6940_v53 = vshrl.u32 %v6432_v41, 16  ;;  %v5644_v45 = vrot.slane %v5642_v17, 4 }
 0x548   : > { %v8918_v48 = vmax.f32 %v8783_v7, 0.0  ;;  %v6170_v5 = vpop.permute.xlu0 %6169  ;;  %9015 = vst [vmem:[%s13217_s23 + $0x188] sm:$0xff] %v8951_v30  ;;  %5803 = vrot.lane.b32.xlu1 %v5636_v9, %s9920_s24  ;;  %v5372_v7 = vld [vmem:[#allocation2 + $0x108] sm:$0xe]  ;;  %v6932_v9 = vrot.slane %v6930_v43, 5 }
 0x549   : > { %5805 = vrot.lane.b32.xlu2 %v5639_v25, %s9920_s24  ;;  %v6942_v30 = vrot.slane %v6940_v53, 4  ;;  %v6433_v25 = vld [vmem:[#allocation2 + $0x11c] sm:$0x1]  ;;  %v9233_v34 = vrot.slane %v5372_v7, 9  ;;  %v5376_v53 = vld [vmem:[#allocation2 + $0x118] sm:$0xf] }
 0x54a   : > { %8982 = vst [vmem:[%s13217_s23 + $0x80] sm:$0xff] %v8918_v48  ;;  %v5784_v4 = vpop.permute.xlu1 %5783  ;;  %v5645_v48 = vrot.slane %v5374_v39, 5 }
 0x54b   : > { %v13528_v46 = vpop.permute.xlu2 %7358  ;;  %v8615_v23 = vpop.f32.mrf.mxu1  ;;  %5950 = vst.msk [vmem:[#allocation3 + $0xd0] sm:$0xf] %vm5923_vm0, %v5784_v4  ;;  %v6946_v4 = vshll.u32 %v6433_v25, 16  ;;  %v5643_v24 = vsel %vm10152_vm12, %v9233_v34, %v5642_v17 }
 0x54c   : > { %v8616_v40 = vadd.f32 %v13474_v18, %v8615_v23  ;;  %v9671_v20 = vld [vmem:[#allocation3 + $0x1d4] sm:$0xf0]  ;;  %6336 = vst.msk [vmem:[#allocation3 + $0xd0] sm:$0xf] %vm6309_vm10, %v6170_v5  ;;  %v6929_v5 = vrot.slane %v6927_v3, 4  ;;  %v5646_v23 = vsel %vm10152_vm12, %v5644_v45, %v5645_v48 }
 0x54d   : > { %v9513_v13 = vor.u32 %v9671_v20, %v9512_v36  ;;  %7457 = vst.msk [vmem:[#allocation3 + $0xd0] sm:$0xf] %vm7430_vm11, %v13498_v52  ;;  %v6938_v52 = vrot.slane %v6936_v27, 5  ;;  %v6948_v36 = vrot.slane %v6946_v4, 5  ;;  %v6028_v48 = vld [vmem:[#allocation2 + $0x118] sm:$0xf] }
 0x54e   : > { %7312 = vrot.lane.b32.xlu0 %v6925_v11, %s9922_s15  ;;  %v8785_v44 = vadd.f32 %v12041_v54, %v8616_v40  ;;  %v6933_v0 = vor.u32 %v6932_v9, %v6929_v5  ;;  %v6435_v11 = vld [vmem:[#allocation2 + $0x124] sm:$0xf]  ;;  %v5377_v5 = vld [vmem:[#allocation2 + $0x11c] sm:$0x1]  ;;  %v6436_v4 = vld [vmem:[#allocation2 + $0x128] sm:$0x1] }
 0x54f   : > { %8717 = vmatmul.bf16.gmra.mxu3 %v9513_v13  ;;  %v6943_v41 = vor.u32 %v6942_v30, %v6938_v52  ;;  %v5649_v30 = vrot.slane %v5376_v53, 5 }
 0x550   : > { %v8919_v16 = vmax.f32 %v8785_v44, 0.0  ;;  %v7293_v62 = vpop.permute.xlu0 %7292  ;;  %6191 = vrot.lane.b32.xlu1 %v6026_v57, %s9921_s8  ;;  %v6934_v27 = vrot.slane %v6933_v0, 4  ;;  %v6434_v44 = vld [vmem:[#allocation2 + $0x120] sm:$0xf]  ;;  %v6964_v57 = vshrl.u32 %v6435_v11, 16  ;;  %v5652_v0 = vrot.slane %v5377_v5, 5 }
 0x551   : > { %7310 = vrot.lane.b32.xlu2 %v6915_v55, %s9922_s15  ;;  %v6944_v40 = vrot.slane %v6943_v41, 4  ;;  %v6954_v25 = vshll.u32 %v6434_v44, 16 }
 0x552   : > { %8983 = vst [vmem:[%s13217_s23 + $0x88] sm:$0xff] %v8919_v16  ;;  %v6172_v10 = vpop.permute.xlu1 %6171  ;;  %v6939_v7 = vsel %vm10120_vm7, %v6934_v27, %v6938_v52  ;;  %v6966_v34 = vrot.slane %v6964_v57, 4 }
 0x553   : > { %v5790_v54 = vpop.permute.xlu2 %5789  ;;  %6337 = vst.msk [vmem:[#allocation3 + $0xd8] sm:$0xf] %vm6309_vm10, %v6172_v10  ;;  %v6949_v43 = vsel %vm10120_vm7, %v6944_v40, %v6948_v36  ;;  %v6029_v40 = vld [vmem:[#allocation2 + $0x120] sm:$0xf] }
 0x554   : > { %5953 = vst.msk [vmem:[#allocation3 + $0xe8] sm:$0xf] %vm5923_vm0, %v5790_v54  ;;  %v9384_v55 = vld [vmem:[#allocation3 + $0xd0] sm:$0xf]  ;;  %v6951_v54 = vshrl.u32 %v6434_v44, 16 }
 0x555   : > { %7458 = vst.msk [vmem:[#allocation3 + $0xd8] sm:$0xf] %vm7430_vm11, %v7293_v62  ;;  %v6960_v62 = vshll.u32 %v6435_v11, 16 }
 0x556   : > { %6193 = vrot.lane.b32.xlu0 %v6027_v63, %s9921_s8 }
 0x557   : > { %v6962_v9 = vrot.slane %v6960_v62, 5  ;;  %v6438_v62 = vld [vmem:[#allocation2 + $0x130] sm:$0xf] }
 0x558   : > { %v6238_v50 = vpop.permute.xlu0 %6237  ;;  %5807 = vrot.lane.b32.xlu1 %v5643_v24, %s9920_s24 }
 0x559   : > { %5809 = vrot.lane.b32.xlu2 %v5646_v23, %s9920_s24  ;;  %v5651_v23 = vrot.slane %v5649_v30, 4  ;;  %v6967_v11 = vor.u32 %v6966_v34, %v6962_v9 }
 0x55a   : > { %v5852_v13 = vpop.permute.xlu1 %5851 }
 0x55b   : > { %v13554_v20 = vpop.permute.xlu2 %7294  ;;  %5984 = vst.msk [vmem:[#allocation3 + $0x1e0] sm:$0xf] %vm5923_vm0, %v5852_v13  ;;  %v6970_v13 = vshll.u32 %v6436_v4, 16  ;;  %v5653_v53 = vsel %vm10152_vm12, %v5651_v23, %v5652_v0  ;;  %v6030_v23 = vld [vmem:[#allocation2 + $0x124] sm:$0xf] }
 0x55c   : > { %v9639_v3 = vld [vmem:[#allocation3 + $0xd4] sm:$0xf0]  ;;  %6370 = vst.msk [vmem:[#allocation3 + $0x1e0] sm:$0xf] %vm6309_vm10, %v6238_v50  ;;  %v6956_v50 = vrot.slane %v6954_v25, 5 }
 0x55d   : > { %v8618_v17 = vpop.f32.mrf.mxu1  ;;  %v9385_v16 = vor.u32 %v9639_v3, %v9384_v55  ;;  %7491 = vst.msk [vmem:[#allocation3 + $0x1e0] sm:$0xf] %vm7430_vm11, %v13528_v46  ;;  %v5375_v46 = vld [vmem:[#allocation2 + $0x114] sm:$0xe]  ;;  %v5379_v25 = vld [vmem:[#allocation2 + $0x124] sm:$0xf] }
 0x55e   : > { %7316 = vrot.lane.b32.xlu0 %v6949_v43, %s9922_s15  ;;  %v8619_v39 = vadd.f32 %v13474_v18, %v8618_v17  ;;  %v9234_v24 = vrot.slane %v5375_v46, 9  ;;  %v6968_v17 = vrot.slane %v6967_v11, 4  ;;  %v5380_v0 = vld [vmem:[#allocation2 + $0x128] sm:$0x1] }
 0x55f   : > { %8637 = vmatmul.bf16.gmra.mxu1 %v9385_v16  ;;  %v6972_v16 = vrot.slane %v6970_v13, 5  ;;  %v5659_v11 = vrot.slane %v5380_v0, 5 }
 0x560   : > { %v8788_v10 = vadd.f32 %v12071_v28, %v8619_v39  ;;  %v7361_v45 = vpop.permute.xlu0 %7360  ;;  %6195 = vrot.lane.b32.xlu1 %v6028_v48, %s9921_s8  ;;  %v6953_v28 = vrot.slane %v6951_v54, 4  ;;  %v5650_v43 = vsel %vm10152_vm12, %v9234_v24, %v5649_v30 }
 0x561   : > { %7314 = vrot.lane.b32.xlu2 %v6939_v7, %s9922_s15  ;;  %v6973_v48 = vsel %vm10120_vm7, %v6968_v17, %v6972_v16 }
 0x562   : > { %v8920_v63 = vmax.f32 %v8788_v10, 0.0  ;;  %v6240_v52 = vpop.permute.xlu1 %6239  ;;  %v6957_v44 = vor.u32 %v6956_v50, %v6953_v28  ;;  %v6984_v10 = vshll.u32 %v6438_v62, 16  ;;  %v5378_v28 = vld [vmem:[#allocation2 + $0x120] sm:$0xe] }
 0x563   : > { %v5858_v41 = vpop.permute.xlu2 %5857  ;;  %6371 = vst.msk [vmem:[#allocation3 + $0x1e8] sm:$0xf] %vm6309_vm10, %v6240_v52 }
 0x564   : > { %5987 = vst.msk [vmem:[#allocation3 + $0x1f8] sm:$0xf] %vm5923_vm0, %v5858_v41  ;;  %v6958_v54 = vrot.slane %v6957_v44, 4  ;;  %v9520_v30 = vld [vmem:[#allocation3 + $0x1e0] sm:$0xf]  ;;  %v6986_v50 = vrot.slane %v6984_v10, 5 }
 0x565   : > { %8984 = vst [vmem:[%s13217_s23 + $0x90] sm:$0xff] %v8920_v63  ;;  %v8620_v36 = vpop.f32.mrf.mxu1  ;;  %v5656_v63 = vrot.slane %v5379_v25, 5  ;;  %v6031_v44 = vld [vmem:[#allocation2 + $0x12c] sm:$0xf]  ;;  %v6441_v25 = vld [vmem:[#allocation2 + $0x13c] sm:$0xf] }
 0x566   : > { %6197 = vrot.lane.b32.xlu0 %v6029_v40, %s9921_s8  ;;  %7492 = vst.msk [vmem:[#allocation3 + $0x1e8] sm:$0xf] %vm7430_vm11, %v7361_v45  ;;  %v8621_v27 = vadd.f32 %v13474_v18, %v8620_v36  ;;  %v6437_v45 = vld [vmem:[#allocation2 + $0x12c] sm:$0xf]  ;;  %v6963_v34 = vsel %vm10120_vm7, %v6958_v54, %v6962_v9  ;;  %v6439_v36 = vld [vmem:[#allocation2 + $0x134] sm:$0x1] }
 0x567   : > { %v6975_v41 = vshrl.u32 %v6437_v45, 16  ;;  %v6978_v4 = vshll.u32 %v6437_v45, 16  ;;  %v5658_v9 = vrot.slane %v5656_v63, 4  ;;  %v5382_v45 = vld [vmem:[#allocation2 + $0x130] sm:$0xf] }
 0x568   : > { %v8790_v55 = vadd.f32 %v12112_v12, %v8621_v27  ;;  %v6174_v3 = vpop.permute.xlu0 %6173  ;;  %5811 = vrot.lane.b32.xlu1 %v5650_v43, %s9920_s24  ;;  %v6988_v12 = vshrl.u32 %v6438_v62, 16  ;;  %v5663_v0 = vrot.slane %v5382_v45, 5 }
 0x569   : > { %5813 = vrot.lane.b32.xlu2 %v5653_v53, %s9920_s24  ;;  %v6977_v13 = vrot.slane %v6975_v41, 4  ;;  %v6980_v27 = vrot.slane %v6978_v4, 5  ;;  %v9235_v53 = vrot.slane %v5378_v28, 9  ;;  %v5660_v43 = vsel %vm10152_vm12, %v5658_v9, %v5659_v11  ;;  %v5383_v9 = vld [vmem:[#allocation2 + $0x134] sm:$0x1] }
 0x56a   : > { %v8921_v57 = vmax.f32 %v8790_v55, 0.0  ;;  %v5788_v7 = vpop.permute.xlu1 %5787  ;;  %v6990_v24 = vrot.slane %v6988_v12, 4  ;;  %v7008_v41 = vshll.u32 %v6441_v25, 16  ;;  %v7012_v4 = vshrl.u32 %v6441_v25, 16 }
 0x56b   : > { %v13582_v39 = vpop.permute.xlu2 %7362  ;;  %5952 = vst.msk [vmem:[#allocation3 + $0xe0] sm:$0xf] %vm5923_vm0, %v5788_v7  ;;  %v6981_v17 = vor.u32 %v6980_v27, %v6977_v13  ;;  %v5657_v62 = vsel %vm10152_vm12, %v9235_v53, %v5656_v63 }
 0x56c   : > { %8985 = vst [vmem:[%s13217_s23 + $0x98] sm:$0xff] %v8921_v57  ;;  %v6991_v55 = vor.u32 %v6990_v24, %v6986_v50  ;;  %v7010_v11 = vrot.slane %v7008_v41, 5  ;;  %v7014_v13 = vrot.slane %v7012_v4, 4 }
 0x56d   : > { %v9673_v5 = vld [vmem:[#allocation3 + $0x1e4] sm:$0xf0]  ;;  %6338 = vst.msk [vmem:[#allocation3 + $0xe0] sm:$0xf] %vm6309_vm10, %v6174_v3  ;;  %v6994_v3 = vshll.u32 %v6439_v36, 16  ;;  %v6982_v12 = vrot.slane %v6981_v17, 4 }
 0x56e   : > { %7320 = vrot.lane.b32.xlu0 %v6973_v48, %s9922_s15  ;;  %v9521_v46 = vor.u32 %v9673_v5, %v9520_v30  ;;  %7459 = vst.msk [vmem:[#allocation3 + $0xe0] sm:$0xf] %vm7430_vm11, %v13554_v20  ;;  %v6992_v57 = vrot.slane %v6991_v55, 4  ;;  %v6440_v48 = vld [vmem:[#allocation2 + $0x138] sm:$0xf]  ;;  %v5665_v55 = vrot.slane %v5663_v0, 4 }
 0x56f   : > { %v6996_v7 = vrot.slane %v6994_v3, 5  ;;  %v6999_v28 = vshrl.u32 %v6440_v48, 16  ;;  %v7002_v24 = vshll.u32 %v6440_v48, 16  ;;  %v5666_v3 = vrot.slane %v5383_v9, 5 }
 0x570   : > { %v7297_v52 = vpop.permute.xlu0 %7296  ;;  %8722 = vmatmul.bf16.gmra.mxu3 %v9521_v46  ;;  %6199 = vrot.lane.b32.xlu1 %v6030_v23, %s9921_s8  ;;  %v6987_v23 = vsel %vm10120_vm7, %v6982_v12, %v6986_v50 }
 0x571   : > { %7318 = vrot.lane.b32.xlu2 %v6963_v34, %s9922_s15  ;;  %v6997_v46 = vsel %vm10120_vm7, %v6992_v57, %v6996_v7  ;;  %v7015_v57 = vor.u32 %v7014_v13, %v7010_v11  ;;  %v9482_v13 = vld [vmem:[#allocation3 + $0x198] sm:$0xf0] }
 0x572   : > { %v6176_v20 = vpop.permute.xlu1 %6175 }
 0x573   : > { %v5794_v40 = vpop.permute.xlu2 %5793  ;;  %6339 = vst.msk [vmem:[#allocation3 + $0xe8] sm:$0xf] %vm6309_vm10, %v6176_v20  ;;  %v6032_v20 = vld [vmem:[#allocation2 + $0x130] sm:$0xf] }
 0x574   : > { %5955 = vst.msk [vmem:[#allocation3 + $0xf8] sm:$0xf] %vm5923_vm0, %v5794_v40 }
 0x575   : > { %7460 = vst.msk [vmem:[#allocation3 + $0xe8] sm:$0xf] %vm7430_vm11, %v7297_v52  ;;  %v9392_v30 = vld [vmem:[#allocation3 + $0xe0] sm:$0xf] }
 0x576   : > { %6201 = vrot.lane.b32.xlu0 %v6031_v44, %s9921_s8  ;;  %v6442_v44 = vld [vmem:[#allocation2 + $0x140] sm:$0x1] }
 0x577   : > { %v7018_v7 = vshll.u32 %v6442_v44, 16 }
 0x578   : > { %v6242_v16 = vpop.permute.xlu0 %6241  ;;  %5815 = vrot.lane.b32.xlu1 %v5657_v62, %s9920_s24 }
 0x579   : > { %5817 = vrot.lane.b32.xlu2 %v5660_v43, %s9920_s24  ;;  %v7004_v43 = vrot.slane %v7002_v24, 5 }
 0x57a   : > { %v5856_v10 = vpop.permute.xlu1 %5855 }
 0x57b   : > { %v13606_v54 = vpop.permute.xlu2 %7298  ;;  %5986 = vst.msk [vmem:[#allocation3 + $0x1f0] sm:$0xf] %vm5923_vm0, %v5856_v10  ;;  %v5667_v10 = vsel %vm10152_vm12, %v5665_v55, %v5666_v3 }
 0x57c   : > { %v9641_v5 = vld [vmem:[#allocation3 + $0xe4] sm:$0xf0]  ;;  %6372 = vst.msk [vmem:[#allocation3 + $0x1f0] sm:$0xf] %vm6309_vm10, %v6242_v16 }
 0x57d   : > { %v8623_v34 = vpop.f32.mrf.mxu1  ;;  %v9393_v63 = vor.u32 %v9641_v5, %v9392_v30  ;;  %7493 = vst.msk [vmem:[#allocation3 + $0x1f0] sm:$0xf] %vm7430_vm11, %v13582_v39  ;;  %v5381_v39 = vld [vmem:[#allocation2 + $0x12c] sm:$0xe]  ;;  %v6033_v16 = vld [vmem:[#allocation2 + $0x138] sm:$0xf] }
 0x57e   : > { %7324 = vrot.lane.b32.xlu0 %v6997_v46, %s9922_s15  ;;  %v8624_v52 = vadd.f32 %v13474_v18, %v8623_v34  ;;  %v9236_v17 = vrot.slane %v5381_v39, 9  ;;  %v7016_v5 = vrot.slane %v7015_v57, 4  ;;  %v7020_v46 = vrot.slane %v7018_v7, 5  ;;  %v13660_v7 = vpop.f32.mrf.mxu3 }
 0x57f   : > { %8642 = vmatmul.bf16.gmra.mxu1 %v9393_v63 }
 0x580   : > { %v8793_v40 = vadd.f32 %v12142_v33, %v8624_v52  ;;  %v7365_v36 = vpop.permute.xlu0 %7364  ;;  %6203 = vrot.lane.b32.xlu1 %v6032_v20, %s9921_s8  ;;  %v7001_v33 = vrot.slane %v6999_v28, 4  ;;  %v5664_v30 = vsel %vm10152_vm12, %v9236_v17, %v5663_v0 }
 0x581   : > { %7322 = vrot.lane.b32.xlu2 %v6987_v23, %s9922_s15  ;;  %v7021_v23 = vsel %vm10120_vm7, %v7016_v5, %v7020_v46 }
 0x582   : > { %v8922_v27 = vmax.f32 %v8793_v40, 0.0  ;;  %v6244_v50 = vpop.permute.xlu1 %6243  ;;  %v7005_v12 = vor.u32 %v7004_v43, %v7001_v33  ;;  %v6034_v40 = vld [vmem:[#allocation2 + $0x13c] sm:$0xf] }
 0x583   : > { %v5798_v53 = vpop.permute.xlu2 %5797  ;;  %6373 = vst.msk [vmem:[#allocation3 + $0x1f8] sm:$0xf] %vm6309_vm10, %v6244_v50 }
 0x584   : > { %5957 = vst.msk [vmem:[#allocation3 + $0x108] sm:$0xf] %vm5923_vm0, %v5798_v53  ;;  %v9528_v4 = vld [vmem:[#allocation3 + $0x1f0] sm:$0xf]  ;;  %v7006_v52 = vrot.slane %v7005_v12, 4 }
 0x585   : > { %8986 = vst [vmem:[%s13217_s23 + $0xa0] sm:$0xff] %v8922_v27  ;;  %v8625_v62 = vpop.f32.mrf.mxu1 }
 0x586   : > { %6205 = vrot.lane.b32.xlu0 %v6033_v16, %s9921_s8  ;;  %7494 = vst.msk [vmem:[#allocation3 + $0x1f8] sm:$0xf] %vm7430_vm11, %v7365_v36  ;;  %v8626_v25 = vadd.f32 %v13474_v18, %v8625_v62  ;;  %v7011_v28 = vsel %vm10120_vm7, %v7006_v52, %v7010_v11  ;;  %v9662_v11 = vld [vmem:[#allocation3 + $0x194] sm:$0xf] }
 0x587   : > { %v9485_v55 = vor.u32 %v9662_v11, %v9482_v13 }
 0x588   : > { %v8795_v45 = vadd.f32 %v12173_v8, %v8626_v25  ;;  %v6178_v48 = vpop.permute.xlu0 %6177  ;;  %5819 = vrot.lane.b32.xlu1 %v5664_v30, %s9920_s24  ;;  %v9490_v30 = vld [vmem:[#allocation3 + $0x1a8] sm:$0xf0] }
 0x589   : > { %5821 = vrot.lane.b32.xlu2 %v5667_v10, %s9920_s24  ;;  %s9046_s24 = sshll.u32 %s9043_s11, 4  ;;  %s9047_s24 = int_to_ptr.hbm [resolvable:$true] %s9046_s24 }
 0x58a   : > { %v8923_v34 = vmax.f32 %v8795_v45, 0.0  ;;  %v5792_v41 = vpop.permute.xlu1 %5791  ;;  %s9852_s22 = sshra.s32 %s9047_s24, 4  ;;  %s9853_s22 = int_to_ptr.hbm [resolvable:$true] %s9852_s22 }
 0x58b   : > { %v7303_v63 = vpop.permute.xlu2 %7302  ;;  %5954 = vst.msk [vmem:[#allocation3 + $0xf0] sm:$0xf] %vm5923_vm0, %v5792_v41  ;;  %p9859_p11 = scmp.lt.s32.totalorder %s9853_s22, %s13888_s5 }
 0x58c   : > { %8987 = vst [vmem:[%s13217_s23 + $0xa8] sm:$0xff] %v8923_v34 }
 0x58d   : > { %v9675_v8 = vld [vmem:[#allocation3 + $0x1f4] sm:$0xf0]  ;;  %6340 = vst.msk [vmem:[#allocation3 + $0xf0] sm:$0xf] %vm6309_vm10, %v6178_v48  ;;  %v9664_v48 = vld [vmem:[#allocation3 + $0x1a4] sm:$0xf] }
 0x58e   : > { %7328 = vrot.lane.b32.xlu0 %v7021_v23, %s9922_s15  ;;  %v9529_v0 = vor.u32 %v9675_v8, %v9528_v4  ;;  %7461 = vst.msk [vmem:[#allocation3 + $0xf0] sm:$0xf] %vm7430_vm11, %v13606_v54 }
 0x590   : > { %v7301_v24 = vpop.permute.xlu0 %7300  ;;  %8727 = vmatmul.bf16.gmra.mxu3 %v9529_v0  ;;  %6207 = vrot.lane.b32.xlu1 %v6034_v40, %s9921_s8  ;;  %v9498_v40 = vld [vmem:[#allocation3 + $0x1b8] sm:$0xf0]  ;;  %s9031_s8 = scalar_lea.sflag [#allocation6], %s10050_s28 }
 0x591   : > { %7326 = vrot.lane.b32.xlu2 %v7011_v28, %s9922_s15  ;;  %s9854_s15 = scalar_lea.hbm %s9853_s22, 512 }
 0x592   : > { %v6180_v20 = vpop.permute.xlu1 %6179  ;;  %p9855_p1 = scmp.ne.s32.totalorder %s9853_s22, %s9854_s15  ;;  %p9860_p9 = scmp.lt.s32.totalorder %s9858_s9, %s9854_s15 }
 0x593   : > { %v5802_v36 = vpop.permute.xlu2 %5801  ;;  %6341 = vst.msk [vmem:[#allocation3 + $0xf8] sm:$0xf] %vm6309_vm10, %v6180_v20 }
 0x594   : > { %5959 = vst.msk [vmem:[#allocation3 + $0x118] sm:$0xf] %vm5923_vm0, %v5802_v36  ;;  %p9856_p4 = pnand %p9855_p1, %p10022_p7  ;;  %p9861_p2 = por %p9860_p9, %p9859_p11 }
 0x595   : > { %7462 = vst.msk [vmem:[#allocation3 + $0xf8] sm:$0xf] %vm7430_vm11, %v7301_v24  ;;  %v9400_v39 = vld [vmem:[#allocation3 + $0xf0] sm:$0xf]  ;;  %v9666_v24 = vld [vmem:[#allocation3 + $0x1b4] sm:$0xf] }
 0x596   : > { %p9857_p8 = pneg %p9856_p4 }
 0x598   : > { %v6182_v9 = vpop.permute.xlu0 %6181  ;;  %p9862_p10 = pnand %p9861_p2, %p9857_p8 }
 0x59a   : > { %v5796_v42 = vpop.permute.xlu1 %5795 }
 0x59b   : > { %v7307_v54 = vpop.permute.xlu2 %7306  ;;  %5956 = vst.msk [vmem:[#allocation3 + $0x100] sm:$0xf] %vm5923_vm0, %v5796_v42  ;;  %v9501_v42 = vor.u32 %v9666_v24, %v9498_v40 }
 0x59c   : > { %v9643_v27 = vld [vmem:[#allocation3 + $0xf4] sm:$0xf0]  ;;  %6342 = vst.msk [vmem:[#allocation3 + $0x100] sm:$0xf] %vm6309_vm10, %v6182_v9 }
 0x59d   : > { %v8628_v53 = vpop.f32.mrf.mxu1  ;;  %v9401_v44 = vor.u32 %v9643_v27, %v9400_v39  ;;  %7463 = vst.msk [vmem:[#allocation3 + $0x100] sm:$0xf] %vm7430_vm11, %v7303_v63  ;;  %v9493_v63 = vor.u32 %v9664_v48, %v9490_v30 }
 0x59e   : > { %v8629_v50 = vadd.f32 %v13474_v18, %v8628_v53 }
 0x59f   : > { %8647 = vmatmul.bf16.gmra.mxu1 %v9401_v44 }
 0x5a0   : > { %v8798_v3 = vadd.f32 %v12211_v61, %v8629_v50  ;;  %v7305_v33 = vpop.permute.xlu0 %7304  ;;  %9595 = vmatmul.msk.bf16.vlgmr.msra.gmra.mxu3 %vm8467_vm1, %v9485_v55 }
 0x5a2   : > { %v8924_v43 = vmax.f32 %v8798_v3, 0.0  ;;  %v6184_v16 = vpop.permute.xlu1 %6183  ;;  %v13910_v3 = vld [vmem:[#allocation13_spill] sm:$0xff] }
 0x5a3   : > { %v5806_v17 = vpop.permute.xlu2 %5805  ;;  %6343 = vst.msk [vmem:[#allocation3 + $0x108] sm:$0xf] %vm6309_vm10, %v6184_v16 }
 0x5a4   : > { %5961 = vst.msk [vmem:[#allocation3 + $0x128] sm:$0xf] %vm5923_vm0, %v5806_v17  ;;  %v9408_v5 = vld [vmem:[#allocation3 + $0x100] sm:$0xf] }
 0x5a5   : > { %8988 = vst [vmem:[%s13217_s23 + $0xb0] sm:$0xff] %v8924_v43  ;;  %v8630_v62 = vpop.f32.mrf.mxu1 }
 0x5a6   : > { %7464 = vst.msk [vmem:[#allocation3 + $0x108] sm:$0xf] %vm7430_vm11, %v7305_v33  ;;  %v8631_v57 = vadd.f32 %v13474_v18, %v8630_v62 }
 0x5a8   : > { %v8800_v61 = vadd.f32 %v12234_v22, %v8631_v57  ;;  %v6186_v25 = vpop.permute.xlu0 %6185  ;;  %v13668_v22 = vpop.f32.mrf.mxu3 }
 0x5aa   : > { %v8925_v10 = vmax.f32 %v8800_v61, 0.0  ;;  %v5800_v45 = vpop.permute.xlu1 %5799  ;;  %v9668_v61 = vld [vmem:[#allocation3 + $0x1c4] sm:$0xf] }
 0x5ab   : > { %v7311_v12 = vpop.permute.xlu2 %7310  ;;  %5958 = vst.msk [vmem:[#allocation3 + $0x110] sm:$0xf] %vm5923_vm0, %v5800_v45 }
 0x5ac   : > { %8989 = vst [vmem:[%s13217_s23 + $0xb8] sm:$0xff] %v8925_v10 }
 0x5ad   : > { %v9645_v46 = vld [vmem:[#allocation3 + $0x104] sm:$0xf0]  ;;  %6344 = vst.msk [vmem:[#allocation3 + $0x110] sm:$0xf] %vm6309_vm10, %v6186_v25  ;;  %v9506_v25 = vld [vmem:[#allocation3 + $0x1c8] sm:$0xf0] }
 0x5ae   : > { %v9409_v34 = vor.u32 %v9645_v46, %v9408_v5  ;;  %7465 = vst.msk [vmem:[#allocation3 + $0x110] sm:$0xf] %vm7430_vm11, %v7307_v54  ;;  %v9509_v48 = vor.u32 %v9668_v61, %v9506_v25 }
 0x5b0   : > { %v7309_v41 = vpop.permute.xlu0 %7308  ;;  %8652 = vmatmul.bf16.gmra.mxu1 %v9409_v34  ;;  %9596 = vmatmul.msk.bf16.gmra.mxu3 %vm8467_vm1, %v9493_v63  ;;  %v13673_v8 = vpop.f32.mrf.mxu3 }
 0x5b2   : > { %v6188_v52 = vpop.permute.xlu1 %6187 }
 0x5b3   : > { %v5810_v4 = vpop.permute.xlu2 %5809  ;;  %6345 = vst.msk [vmem:[#allocation3 + $0x118] sm:$0xf] %vm6309_vm10, %v6188_v52  ;;  %v9670_v52 = vld [vmem:[#allocation3 + $0x1d4] sm:$0xf] }
 0x5b4   : > { %5963 = vst.msk [vmem:[#allocation3 + $0x138] sm:$0xf] %vm5923_vm0, %v5810_v4 }
 0x5b5   : > { %7466 = vst.msk [vmem:[#allocation3 + $0x118] sm:$0xf] %vm7430_vm11, %v7309_v41  ;;  %v9416_v36 = vld [vmem:[#allocation3 + $0x110] sm:$0xf] }
 0x5b8   : > { %v6190_v23 = vpop.permute.xlu0 %6189  ;;  %v13681_v44 = vpop.f32.mrf.mxu3 }
 0x5ba   : > { %v5804_v28 = vpop.permute.xlu1 %5803 }
 0x5bb   : > { %v7315_v0 = vpop.permute.xlu2 %7314  ;;  %5960 = vst.msk [vmem:[#allocation3 + $0x120] sm:$0xf] %vm5923_vm0, %v5804_v28 }
 0x5bc   : > { %v9647_v20 = vld [vmem:[#allocation3 + $0x114] sm:$0xf0]  ;;  %6346 = vst.msk [vmem:[#allocation3 + $0x120] sm:$0xf] %vm6309_vm10, %v6190_v23  ;;  %v9514_v23 = vld [vmem:[#allocation3 + $0x1d8] sm:$0xf0] }
 0x5bd   : > { %v8633_v9 = vpop.f32.mrf.mxu1  ;;  %v9417_v54 = vor.u32 %v9647_v20, %v9416_v36  ;;  %7467 = vst.msk [vmem:[#allocation3 + $0x120] sm:$0xf] %vm7430_vm11, %v7311_v12 }
 0x5be   : > { %v8634_v39 = vadd.f32 %v13474_v18, %v8633_v9  ;;  %v9517_v9 = vor.u32 %v9670_v52, %v9514_v23 }
 0x5c0   : > { %v8803_v11 = vadd.f32 %v12261_v14, %v8634_v39  ;;  %v7313_v13 = vpop.permute.xlu0 %7312  ;;  %8657 = vmatmul.bf16.gmra.mxu1 %v9417_v54  ;;  %9597 = vmatmul.msk.bf16.gmra.mxu3 %vm8467_vm1, %v9501_v42  ;;  %v13689_v62 = vpop.f32.mrf.mxu3 }
 0x5c2   : > { %v8926_v27 = vmax.f32 %v8803_v11, 0.0  ;;  %v6192_v50 = vpop.permute.xlu1 %6191 }
 0x5c3   : > { %v5814_v53 = vpop.permute.xlu2 %5813  ;;  %6347 = vst.msk [vmem:[#allocation3 + $0x128] sm:$0xf] %vm6309_vm10, %v6192_v50 }
 0x5c4   : > { %5965 = vst.msk [vmem:[#allocation3 + $0x148] sm:$0xf] %vm5923_vm0, %v5814_v53  ;;  %v9424_v10 = vld [vmem:[#allocation3 + $0x120] sm:$0xf]  ;;  %v7589_v53 = vld [vmem:[#allocation2 + $0x1a8] sm:$0xf] }
 0x5c5   : > { %8990 = vst [vmem:[%s13217_s23 + $0xc0] sm:$0xff] %v8926_v27  ;;  %v8635_v55 = vpop.f32.mrf.mxu1  ;;  %v7588_v27 = vld [vmem:[#allocation2 + $0x1a4] sm:$0xe] }
 0x5c6   : > { %7468 = vst.msk [vmem:[#allocation3 + $0x128] sm:$0xf] %vm7430_vm11, %v7313_v13  ;;  %v8636_v14 = vadd.f32 %v13474_v18, %v8635_v55  ;;  %v7590_v55 = vld [vmem:[#allocation2 + $0x1ac] sm:$0x1] }
 0x5c8   : > { %v8805_v33 = vadd.f32 %v13910_v3, %v8636_v14  ;;  %v6194_v43 = vpop.permute.xlu0 %6193  ;;  %v13698_v34 = vpop.f32.mrf.mxu3  ;;  %v9277_v14 = vrot.slane %v7588_v27, 9  ;;  %v7906_v3 = vrot.slane %v7589_v53, 5 }
 0x5ca   : > { %v8927_v17 = vmax.f32 %v8805_v33, 0.0  ;;  %v5808_v57 = vpop.permute.xlu1 %5807  ;;  %v7909_v33 = vrot.slane %v7590_v55, 5 }
 0x5cb   : > { %v7319_v16 = vpop.permute.xlu2 %7318  ;;  %5962 = vst.msk [vmem:[#allocation3 + $0x130] sm:$0xf] %vm5923_vm0, %v5808_v57 }
 0x5cc   : > { %8991 = vst [vmem:[%s13217_s23 + $0xc8] sm:$0xff] %v8927_v17  ;;  %v7908_v17 = vrot.slane %v7906_v3, 4 }
 0x5cd   : > { %v9649_v12 = vld [vmem:[#allocation3 + $0x124] sm:$0xf0]  ;;  %6348 = vst.msk [vmem:[#allocation3 + $0x130] sm:$0xf] %vm6309_vm10, %v6194_v43  ;;  %v7907_v43 = vsel %vm10152_vm12, %v9277_v14, %v7906_v3 }
 0x5ce   : > { %v9425_v45 = vor.u32 %v9649_v12, %v9424_v10  ;;  %7469 = vst.msk [vmem:[#allocation3 + $0x130] sm:$0xf] %vm7430_vm11, %v7315_v0  ;;  %v7910_v25 = vsel %vm10152_vm12, %v7908_v17, %v7909_v33  ;;  %v9672_v12 = vld [vmem:[#allocation3 + $0x1e4] sm:$0xf] }
 0x5cf   : > { %8037 = vst.msk [vmem:[#allocation3 + $0x1f4] sm:$0xf] %vm712_vm2, %v7907_v43 }
 0x5d0   : > { %v7317_v30 = vpop.permute.xlu0 %7316  ;;  %8662 = vmatmul.bf16.gmra.mxu1 %v9425_v45  ;;  %9598 = vmatmul.msk.bf16.gmra.mxu3 %vm8467_vm1, %v9509_v48  ;;  %v13702_v40 = vpop.f32.mrf.mxu3  ;;  %8038 = vst.msk [vmem:[#allocation3 + $0x1fc] sm:$0xf] %vm712_vm2, %v7910_v25  ;;  %v9522_v45 = vld [vmem:[#allocation3 + $0x1e8] sm:$0xf0] }
 0x5d2   : > { %v6196_v46 = vpop.permute.xlu1 %6195 }
 0x5d3   : > { %v5818_v5 = vpop.permute.xlu2 %5817  ;;  %6349 = vst.msk [vmem:[#allocation3 + $0x138] sm:$0xf] %vm6309_vm10, %v6196_v46 }
 0x5d4   : > { %5967 = vst.msk [vmem:[#allocation3 + $0x158] sm:$0xf] %vm5923_vm0, %v5818_v5  ;;  %v9525_v5 = vor.u32 %v9672_v12, %v9522_v45 }
 0x5d5   : > { %7470 = vst.msk [vmem:[#allocation3 + $0x138] sm:$0xf] %vm7430_vm11, %v7317_v30  ;;  %v9432_v28 = vld [vmem:[#allocation3 + $0x130] sm:$0xf] }
 0x5d6   : > { %v9674_v52 = vld [vmem:[#allocation3 + $0x1f4] sm:$0xf] }
 0x5d7   : > { %v9530_v23 = vld [vmem:[#allocation3 + $0x1f8] sm:$0xf0] }
 0x5d8   : > { %v6198_v63 = vpop.permute.xlu0 %6197 }
 0x5da   : > { %v5812_v4 = vpop.permute.xlu1 %5811 }
 0x5db   : > { %v7323_v41 = vpop.permute.xlu2 %7322  ;;  %5964 = vst.msk [vmem:[#allocation3 + $0x140] sm:$0xf] %vm5923_vm0, %v5812_v4 }
 0x5dc   : > { %v8638_v0 = vpop.f32.mrf.mxu1  ;;  %v9651_v24 = vld [vmem:[#allocation3 + $0x134] sm:$0xf0]  ;;  %6350 = vst.msk [vmem:[#allocation3 + $0x140] sm:$0xf] %vm6309_vm10, %v6198_v63 }
 0x5dd   : > { %v8639_v36 = vadd.f32 %v13474_v18, %v8638_v0  ;;  %v9433_v20 = vor.u32 %v9651_v24, %v9432_v28  ;;  %7471 = vst.msk [vmem:[#allocation3 + $0x140] sm:$0xf] %vm7430_vm11, %v7319_v16  ;;  %v13716_v16 = vpop.f32.mrf.mxu3 }
 0x5df   : > { %v8808_v54 = vadd.f32 %v13058_v58, %v8639_v36 }
 0x5e0   : > { %v7321_v39 = vpop.permute.xlu0 %7320  ;;  %8667 = vmatmul.bf16.gmra.mxu1 %v9433_v20  ;;  %9599 = vmatmul.msk.bf16.gmra.mxu3 %vm8467_vm1, %v9517_v9  ;;  %v9533_v20 = vor.u32 %v9674_v52, %v9530_v23 }
 0x5e1   : > { %v8928_v42 = vmax.f32 %v8808_v54, 0.0  ;;  %v13739_v54 = vld [vmem:[%s13887_s4] ss:$0 sm:$0xff] }
 0x5e2   : > { %v6200_v13 = vpop.permute.xlu1 %6199  ;;  %v8699_v12 = vadd.f32 %v13739_v54, %v13660_v7 }
 0x5e3   : > { %v5822_v11 = vpop.permute.xlu2 %5821  ;;  %8992 = vst [vmem:[%s13217_s23 + $0xd0] sm:$0xff] %v8928_v42 }
 0x5e4   : > { %5969 = vst.msk [vmem:[#allocation3 + $0x168] sm:$0xf] %vm5923_vm0, %v5822_v11  ;;  %v8640_v50 = vpop.f32.mrf.mxu1  ;;  %v9440_v48 = vld [vmem:[#allocation3 + $0x140] sm:$0xf] }
 0x5e5   : > { %6351 = vst.msk [vmem:[#allocation3 + $0x148] sm:$0xf] %vm6309_vm10, %v6200_v13  ;;  %v8641_v58 = vadd.f32 %v13474_v18, %v8640_v50  ;;  %v13727_v46 = vpop.f32.mrf.mxu3 }
 0x5e6   : > { %7472 = vst.msk [vmem:[#allocation3 + $0x148] sm:$0xf] %vm7430_vm11, %v7321_v39 }
 0x5e7   : > { %v8810_v57 = vadd.f32 %v13070_v51, %v8641_v58 }
 0x5e8   : > { %v6202_v61 = vpop.permute.xlu0 %6201 }
 0x5e9   : > { %v8929_v10 = vmax.f32 %v8810_v57, 0.0 }
 0x5ea   : > { %v5816_v18 = vpop.permute.xlu1 %5815 }
 0x5eb   : > { %8993 = vst [vmem:[%s13217_s23 + $0xd8] sm:$0xff] %v8929_v10  ;;  %v7327_v9 = vpop.permute.xlu2 %7326 }
 0x5ec   : > { %5966 = vst.msk [vmem:[#allocation3 + $0x150] sm:$0xf] %vm5923_vm0, %v5816_v18 }
 0x5ed   : > { %6352 = vst.msk [vmem:[#allocation3 + $0x150] sm:$0xf] %vm6309_vm10, %v6202_v61  ;;  %v9653_v30 = vld [vmem:[#allocation3 + $0x144] sm:$0xf0]  ;;  %v13732_v4 = vpop.f32.mrf.mxu3 }
 0x5ee   : > { %7473 = vst.msk [vmem:[#allocation3 + $0x150] sm:$0xf] %vm7430_vm11, %v7323_v41  ;;  %v9441_v51 = vor.u32 %v9653_v30, %v9440_v48 }
 0x5f0   : > { %v7325_v6 = vpop.permute.xlu0 %7324  ;;  %8672 = vmatmul.bf16.gmra.mxu1 %v9441_v51  ;;  %9600 = vmatmul.msk.bf16.gmra.mxu3 %vm8467_vm1, %v9525_v5 }
 0x5f2   : > { %v6204_v63 = vpop.permute.xlu1 %6203 }
 0x5f3   : > { %6353 = vst.msk [vmem:[#allocation3 + $0x158] sm:$0xf] %vm6309_vm10, %v6204_v63 }
 0x5f4   : > { %7474 = vst.msk [vmem:[#allocation3 + $0x158] sm:$0xf] %vm7430_vm11, %v7325_v6 }
 0x5f5   : > { %v9448_v24 = vld [vmem:[#allocation3 + $0x150] sm:$0xf]  ;;  %v13745_v13 = vpop.f32.mrf.mxu3 }
 0x5f8   : > { %v6206_v0 = vpop.permute.xlu0 %6205 }
 0x5fa   : > { %v5820_v28 = vpop.permute.xlu1 %5819 }
 0x5fb   : > { %5968 = vst.msk [vmem:[#allocation3 + $0x160] sm:$0xf] %vm5923_vm0, %v5820_v28  ;;  %v9655_v36 = vld [vmem:[#allocation3 + $0x154] sm:$0xf0] }
 0x5fc   : > { %v8643_v41 = vpop.f32.mrf.mxu1  ;;  %6354 = vst.msk [vmem:[#allocation3 + $0x160] sm:$0xf] %vm6309_vm10, %v6206_v0  ;;  %v9449_v42 = vor.u32 %v9655_v36, %v9448_v24 }
 0x5fd   : > { %v8644_v39 = vadd.f32 %v13739_v54, %v8643_v41  ;;  %7475 = vst.msk [vmem:[#allocation3 + $0x160] sm:$0xf] %vm7430_vm11, %v7327_v9  ;;  %v13752_v58 = vpop.f32.mrf.mxu3 }
 0x5ff   : > { %v8813_v11 = vadd.f32 %v13085_v49, %v8644_v39 }
 0x600   : > { %8677 = vmatmul.bf16.gmra.mxu1 %v9449_v42  ;;  %9601 = vmatmul.msk.bf16.gmra.mxu3 %vm8467_vm1, %v9533_v20  ;;  %v7329_v50 = vpop.permute.xlu0 %7328 }
 0x601   : > { %v8930_v27 = vmax.f32 %v8813_v11, 0.0  ;;  %v8706_v11 = vadd.f32 %v13739_v54, %v13681_v44 }
 0x602   : > { %v6208_v53 = vpop.permute.xlu1 %6207 }
 0x603   : > { %8994 = vst [vmem:[%s13217_s23 + $0xe0] sm:$0xff] %v8930_v27 }
 0x604   : > { %6355 = vst.msk [vmem:[#allocation3 + $0x168] sm:$0xf] %vm6309_vm10, %v6208_v53  ;;  %v8645_v55 = vpop.f32.mrf.mxu1  ;;  %v9456_v33 = vld [vmem:[#allocation3 + $0x160] sm:$0xf] }
 0x605   : > { %7476 = vst.msk [vmem:[#allocation3 + $0x168] sm:$0xf] %vm7430_vm11, %v7329_v50  ;;  %v8646_v14 = vadd.f32 %v13739_v54, %v8645_v55 }
 0x607   : > { %v8815_v3 = vadd.f32 %v13097_v15, %v8646_v14 }
 0x609   : > { %v8931_v49 = vmax.f32 %v8815_v3, 0.0  ;;  %v8709_v3 = vadd.f32 %v13739_v54, %v13689_v62 }
 0x60b   : > { %8995 = vst [vmem:[%s13217_s23 + $0xe8] sm:$0xff] %v8931_v49 }
 0x60c   : > { %v9657_v43 = vld [vmem:[#allocation3 + $0x164] sm:$0xf0] }
 0x60d   : > { %v9457_v17 = vor.u32 %v9657_v43, %v9456_v33 }
 0x610   : > { %8682 = vmatmul.bf16.gmra.mxu1 %v9457_v17 }
 0x613   : > { %v13755_v57 = vpop.f32.mrf.mxu3 }
 0x61b   : > { %v13757_v61 = vpop.f32.mrf.mxu3 }
 0x61c   : > { %v8648_v25 = vpop.f32.mrf.mxu1 }
 0x61d   : > { %v8649_v10 = vadd.f32 %v13739_v54, %v8648_v25  ;;  %v13911_v25 = vld [vmem:[#allocation14_spill] sm:$0xff] }
 0x61f   : > { %v8818_v18 = vadd.f32 %v13116_v31, %v8649_v10  ;;  %v8701_v31 = vadd.f32 %v13739_v54, %v13668_v22 }
 0x621   : > { %v8932_v15 = vmax.f32 %v8818_v18, 0.0  ;;  %v8711_v18 = vadd.f32 %v13739_v54, %v13698_v34 }
 0x623   : > { %8996 = vst [vmem:[%s13217_s23 + $0xf0] sm:$0xff] %v8932_v15  ;;  %v8867_v45 = vpop.f32.mrf.mxu3 }
 0x624   : > { %v8868_v48 = vadd.f32 %v8867_v45, %v8699_v12  ;;  %v8650_v30 = vpop.f32.mrf.mxu1 }
 0x625   : > { %v8651_v51 = vadd.f32 %v13739_v54, %v8650_v30 }
 0x626   : > { %v8952_v5 = vmax.f32 %v8868_v48, 0.0 }
 0x627   : > { %v8820_v6 = vadd.f32 %v13129_v21, %v8651_v51  ;;  %v8704_v21 = vadd.f32 %v13739_v54, %v13673_v8  ;;  %v8714_v51 = vadd.f32 %v13739_v54, %v13702_v40 }
 0x628   : > { %9016 = vst [vmem:[%s13217_s23 + $0x190] sm:$0xff] %v8952_v5 }
 0x629   : > { %v8933_v63 = vmax.f32 %v8820_v6, 0.0 }
 0x62b   : > { %8997 = vst [vmem:[%s13217_s23 + $0xf8] sm:$0xff] %v8933_v63  ;;  %v8869_v52 = vpop.f32.mrf.mxu3 }
 0x62c   : > { %v8870_v7 = vadd.f32 %v8869_v52, %v8701_v31 }
 0x62d   : > { %v8653_v23 = vpop.f32.mrf.mxu1 }
 0x62e   : > { %v8953_v0 = vmax.f32 %v8870_v7, 0.0  ;;  %v8654_v28 = vadd.f32 %v13739_v54, %v8653_v23  ;;  %v8716_v23 = vadd.f32 %v13739_v54, %v13716_v16 }
 0x630   : > { %9017 = vst [vmem:[%s13217_s23 + $0x198] sm:$0xff] %v8953_v0  ;;  %v8823_v41 = vadd.f32 %v13148_v2, %v8654_v28 }
 0x632   : > { %v8934_v24 = vmax.f32 %v8823_v41, 0.0 }
 0x633   : > { %v8872_v36 = vpop.f32.mrf.mxu3 }
 0x634   : > { %8998 = vst [vmem:[%s13217_s23 + $0x100] sm:$0xff] %v8934_v24  ;;  %v8873_v22 = vadd.f32 %v8872_v36, %v8704_v21  ;;  %v8719_v36 = vadd.f32 %v13739_v54, %v13727_v46 }
 0x635   : > { %v8655_v20 = vpop.f32.mrf.mxu1 }
 0x636   : > { %v8954_v9 = vmax.f32 %v8873_v22, 0.0  ;;  %v8656_v39 = vadd.f32 %v13739_v54, %v8655_v20 }
 0x638   : > { %9018 = vst [vmem:[%s13217_s23 + $0x1a0] sm:$0xff] %v8954_v9  ;;  %v8825_v42 = vadd.f32 %v13163_v60, %v8656_v39 }
 0x63a   : > { %v8935_v2 = vmax.f32 %v8825_v42, 0.0 }
 0x63b   : > { %v8874_v27 = vpop.f32.mrf.mxu3 }
 0x63c   : > { %8999 = vst [vmem:[%s13217_s23 + $0x108] sm:$0xff] %v8935_v2  ;;  %v8875_v8 = vadd.f32 %v8874_v27, %v8706_v11  ;;  %v8721_v11 = vadd.f32 %v13739_v54, %v13732_v4 }
 0x63d   : > { %v8658_v53 = vpop.f32.mrf.mxu1 }
 0x63e   : > { %v8955_v50 = vmax.f32 %v8875_v8, 0.0  ;;  %v8659_v55 = vadd.f32 %v13739_v54, %v8658_v53 }
 0x640   : > { %9019 = vst [vmem:[%s13217_s23 + $0x1a8] sm:$0xff] %v8955_v50  ;;  %v8828_v14 = vadd.f32 %v13180_v19, %v8659_v55  ;;  %v8724_v55 = vadd.f32 %v13739_v54, %v13745_v13 }
 0x642   : > { %v8936_v60 = vmax.f32 %v8828_v14, 0.0 }
 0x643   : > { %v8877_v49 = vpop.f32.mrf.mxu3 }
 0x644   : > { %9000 = vst [vmem:[%s13217_s23 + $0x110] sm:$0xff] %v8936_v60  ;;  %v8878_v44 = vadd.f32 %v8877_v49, %v8709_v3 }
 0x645   : > { %v8660_v33 = vpop.f32.mrf.mxu1 }
 0x646   : > { %v8956_v43 = vmax.f32 %v8878_v44, 0.0  ;;  %v8661_v17 = vadd.f32 %v13739_v54, %v8660_v33  ;;  %v8726_v33 = vadd.f32 %v13739_v54, %v13752_v58 }
 0x648   : > { %9020 = vst [vmem:[%s13217_s23 + $0x1b0] sm:$0xff] %v8956_v43  ;;  %v8830_v10 = vadd.f32 %v13911_v25, %v8661_v17 }
 0x64a   : > { %v8937_v19 = vmax.f32 %v8830_v10, 0.0 }
 0x64b   : > { %v8879_v15 = vpop.f32.mrf.mxu3 }
 0x64c   : > { %9001 = vst [vmem:[%s13217_s23 + $0x118] sm:$0xff] %v8937_v19  ;;  %v8880_v62 = vadd.f32 %v8879_v15, %v8711_v18  ;;  %v8729_v19 = vadd.f32 %v13739_v54, %v13755_v57 }
 0x64d   : > { %v8663_v12 = vpop.f32.mrf.mxu1 }
 0x64e   : > { %v8957_v45 = vmax.f32 %v8880_v62, 0.0  ;;  %v8664_v48 = vadd.f32 %v13739_v54, %v8663_v12 }
 0x650   : > { %9021 = vst [vmem:[%s13217_s23 + $0x1b8] sm:$0xff] %v8957_v45  ;;  %v8833_v30 = vadd.f32 %v13221_v32, %v8664_v48 }
 0x652   : > { %v8938_v5 = vmax.f32 %v8833_v30, 0.0 }
 0x653   : > { %v8882_v6 = vpop.f32.mrf.mxu3 }
 0x654   : > { %9002 = vst [vmem:[%s13217_s23 + $0x120] sm:$0xff] %v8938_v5  ;;  %v8883_v34 = vadd.f32 %v8882_v6, %v8714_v51 }
 0x655   : > { %v8665_v63 = vpop.f32.mrf.mxu1 }
 0x656   : > { %v8958_v31 = vmax.f32 %v8883_v34, 0.0  ;;  %v8666_v52 = vadd.f32 %v13739_v54, %v8665_v63 }
 0x658   : > { %9022 = vst [vmem:[%s13217_s23 + $0x1c0] sm:$0xff] %v8958_v31  ;;  %v8835_v7 = vadd.f32 %v13238_v38, %v8666_v52 }
 0x65a   : > { %v8939_v32 = vmax.f32 %v8835_v7, 0.0 }
 0x65b   : > { %v8884_v0 = vpop.f32.mrf.mxu3 }
 0x65c   : > { %9003 = vst [vmem:[%s13217_s23 + $0x128] sm:$0xff] %v8939_v32  ;;  %v8885_v40 = vadd.f32 %v8884_v0, %v8716_v23 }
 0x65d   : > { %v8668_v28 = vpop.f32.mrf.mxu1 }
 0x65e   : > { %v8959_v41 = vmax.f32 %v8885_v40, 0.0  ;;  %v8669_v21 = vadd.f32 %v13739_v54, %v8668_v28 }
 0x660   : > { %9023 = vst [vmem:[%s13217_s23 + $0x1c8] sm:$0xff] %v8959_v41  ;;  %v8838_v24 = vadd.f32 %v13262_v59, %v8669_v21 }
 0x662   : > { %v8940_v38 = vmax.f32 %v8838_v24, 0.0 }
 0x663   : > { %v8887_v22 = vpop.f32.mrf.mxu3 }
 0x664   : > { %9004 = vst [vmem:[%s13217_s23 + $0x130] sm:$0xff] %v8940_v38  ;;  %v8888_v16 = vadd.f32 %v8887_v22, %v8719_v36 }
 0x665   : > { %v8670_v20 = vpop.f32.mrf.mxu1 }
 0x666   : > { %v8960_v9 = vmax.f32 %v8888_v16, 0.0  ;;  %v8671_v39 = vadd.f32 %v13739_v54, %v8670_v20 }
 0x668   : > { %9024 = vst [vmem:[%s13217_s23 + $0x1d0] sm:$0xff] %v8960_v9  ;;  %v8840_v42 = vadd.f32 %v13280_v26, %v8671_v39 }
 0x66a   : > { %v8941_v59 = vmax.f32 %v8840_v42, 0.0 }
 0x66b   : > { %v8889_v2 = vpop.f32.mrf.mxu3 }
 0x66c   : > { %9005 = vst [vmem:[%s13217_s23 + $0x138] sm:$0xff] %v8941_v59  ;;  %v8890_v46 = vadd.f32 %v8889_v2, %v8721_v11 }
 0x66d   : > { %v8673_v27 = vpop.f32.mrf.mxu1 }
 0x66e   : > { %v8961_v8 = vmax.f32 %v8890_v46, 0.0  ;;  %v8674_v53 = vadd.f32 %v13739_v54, %v8673_v27 }
 0x670   : > { %9025 = vst [vmem:[%s13217_s23 + $0x1d8] sm:$0xff] %v8961_v8  ;;  %v8843_v50 = vadd.f32 %v13300_v29, %v8674_v53 }
 0x672   : > { %v8942_v26 = vmax.f32 %v8843_v50, 0.0 }
 0x673   : > { %v8892_v14 = vpop.f32.mrf.mxu3 }
 0x674   : > { %9006 = vst [vmem:[%s13217_s23 + $0x140] sm:$0xff] %v8942_v26  ;;  %v8893_v4 = vadd.f32 %v8892_v14, %v8724_v55 }
 0x675   : > { %v8675_v3 = vpop.f32.mrf.mxu1 }
 0x676   : > { %v8962_v60 = vmax.f32 %v8893_v4, 0.0  ;;  %v8676_v49 = vadd.f32 %v13739_v54, %v8675_v3 }
 0x678   : > { %9026 = vst [vmem:[%s13217_s23 + $0x1e0] sm:$0xff] %v8962_v60  ;;  %v8845_v44 = vadd.f32 %v13334_v47, %v8676_v49 }
 0x67a   : > { %v8943_v29 = vmax.f32 %v8845_v44, 0.0 }
 0x67b   : > { %v8894_v43 = vpop.f32.mrf.mxu3 }
 0x67c   : > { %9007 = vst [vmem:[%s13217_s23 + $0x148] sm:$0xff] %v8943_v29  ;;  %v8895_v13 = vadd.f32 %v8894_v43, %v8726_v33 }
 0x67d   : > { %v8678_v17 = vpop.f32.mrf.mxu1 }
 0x67e   : > { %v8963_v25 = vmax.f32 %v8895_v13, 0.0  ;;  %v8679_v10 = vadd.f32 %v13739_v54, %v8678_v17 }
 0x680   : > { %9027 = vst [vmem:[%s13217_s23 + $0x1e8] sm:$0xff] %v8963_v25  ;;  %v8848_v18 = vadd.f32 %v13354_v56, %v8679_v10  ;;  %v8731_v56 = vadd.f32 %v13739_v54, %v13757_v61 }
 0x682   : > { %v8944_v47 = vmax.f32 %v8848_v18, 0.0 }
 0x683   : > { %v8897_v15 = vpop.f32.mrf.mxu3 }
 0x684   : > { %9008 = vst [vmem:[%s13217_s23 + $0x150] sm:$0xff] %v8944_v47  ;;  %v8898_v58 = vadd.f32 %v8897_v15, %v8729_v19 }
 0x685   : > { %v8680_v62 = vpop.f32.mrf.mxu1 }
 0x686   : > { %v8964_v12 = vmax.f32 %v8898_v58, 0.0  ;;  %v8681_v45 = vadd.f32 %v13739_v54, %v8680_v62 }
 0x688   : > { %9028 = vst [vmem:[%s13217_s23 + $0x1f0] sm:$0xff] %v8964_v12  ;;  %v8850_v48 = vadd.f32 %v13375_v1, %v8681_v45 }
 0x68a   : > { %v8945_v30 = vmax.f32 %v8850_v48, 0.0 }
 0x68b   : > { %v8899_v57 = vpop.f32.mrf.mxu3 }
 0x68c   : > { %9009 = vst [vmem:[%s13217_s23 + $0x158] sm:$0xff] %v8945_v30  ;;  %v8900_v51 = vadd.f32 %v8899_v57, %v8731_v56 }
 0x68d   : > { %v8683_v5 = vpop.f32.mrf.mxu1 }
 0x68e   : > { %v8965_v6 = vmax.f32 %v8900_v51, 0.0  ;;  %v8684_v34 = vadd.f32 %v13739_v54, %v8683_v5 }
 0x690   : > { %9029 = vst [vmem:[%s13217_s23 + $0x1f8] sm:$0xff] %v8965_v6  ;;  %v8853_v63 = vadd.f32 %v13397_v37, %v8684_v34 }
 0x692   : > { %v8946_v31 = vmax.f32 %v8853_v63, 0.0 }
 0x694   : > { %9010 = vst [vmem:[%s13217_s23 + $0x160] sm:$0xff] %v8946_v31 }
 0x695   : > { %v8685_v1 = vpop.f32.mrf.mxu1 }
 0x696   : > { %v8686_v61 = vadd.f32 %v13739_v54, %v8685_v1 }
 0x698   : > { %v8855_v52 = vadd.f32 %v13419_v35, %v8686_v61 }
 0x69a   : > { %v8947_v7 = vmax.f32 %v8855_v52, 0.0 }
 0x69c   : > { %9011 = vst [vmem:[%s13217_s23 + $0x168] sm:$0xff] %v8947_v7 }
 0x69d   : > { %9865 = shalt.err (!%p9862_p10)
}
 0x69e   : > { %s9923_s28 = smov 128   ;;  %s9924_s23 = smov 8  }
 0x69f   : > { %9704 = dma.vmem_to_hbm [thread:$0]  (%p10022_p7), %s9045_s6, 8192, %s9047_s24, %s9031_s8, %s9923_s28, %s9923_s28, %s9924_s23  }
 0x6a0 PF: > { %s9061_s10 = sand.u32 1, %s9896_s18   ;;  %p13912_p12 = scmp.ge.s32.totalorder %s9908_s21, 2 }
 0x6a1   : > { %s9062_s29 = scalar_lea.sflag [#allocation6], %s9061_s10 }
 0x6a2   : > { %p9715_p13 = pnand %p13912_p12, %p9990_p6 }
 0x6a4   : > { %p9716_p0 = pneg %p9715_p13 }
 0x6a6   : > { %9891 = dma.done.wait (%p9716_p0), %s9062_s29, 8192  }
 0x6a7   : > { %9893 = vsyncadd (%p9716_p0), %s9062_s29, 4294959104  ;;  %p19_p3 = scmp.ge.s32.totalorder %s10008_s7, 4   ;;  %s13913_s18 = smov %s9900_s19 }
 0x6a8   : > { %s13914_s19 = smov %s9904_s20  ;;  %s13915_s20 = smov %s10018_s12 }
 0x6a9   : > { %s13916_s21 = smov %s10008_s7  ;;  %21 = sbr.rel (!%p19_p3) target bundleno = 6 (0x6), region = 92 }
 0x6ae   :  { %9068 = vsyncpa [#allocation5], 1 }
 0x6af   :  { %9070 = vsyncpa [#allocation5 + $0x1], 1 }
 0x6b0   :  { %9071 = vsyncpa [#allocation8], 1 }
 0x6b1   :  { %9072 = vsyncpa [#allocation6], 1 }
 0x6b2   :  { %9074 = vsyncpa [#allocation6 + $0x1], 1 }

</bundles_post_ra>
